<compile_context>
chip_gen: v5e
topology: v5e:2x2
jax: 0.10.0
libtpu: 0.0.40
codegen_flags: <defaults>
</compile_context>

<pallas_src>
import functools

import jax
import jax.numpy as jnp
from jax import lax
from jax.experimental import pallas as pl
from jax.experimental.pallas import tpu as pltpu


def _round_up(x, m):
    return (x + m - 1) // m * m


# ----------------------------------------------------------------------------
# Fused Pallas kernel: all GRU layers (wavefronted) + avg/max pooling + Linear.
# ----------------------------------------------------------------------------
def make_fused_kernel(layers):
    def kernel(*refs):
        # in_refs : x, (wih, whh, bi, bhh_n) * layers, w_fc, b_fc
        # out_refs: y (Bp, Op)
        # scratch : gi (T, Bp, 3*Hp)  -- hoisted layer-0 input projection
        x_ref = refs[0]
        layer_refs = []
        idx = 1
        for _ in range(layers):
            layer_refs.append(tuple(refs[idx:idx + 4]))
            idx += 4
        w_fc_ref, b_fc_ref = refs[idx], refs[idx + 1]
        out_ref = refs[idx + 2]
        gi_ref = refs[idx + 3]

        T, Bp, din0 = x_ref.shape
        Hp = layer_refs[0][1].shape[0]            # whh: (Hp, 3*Hp)
        inv_T = jnp.float32(1.0 / T)

        # Hoisted layer-0 input projection for the whole sequence: one big bf16
        # MXU pass, fully off the serial recurrence chain. r/z biases (bih+bhh)
        # are pre-folded into bi.
        wih0_ref, _, bi0_ref, _ = layer_refs[0]
        x_all = x_ref[...].reshape(T * Bp, din0).astype(jnp.bfloat16)
        gi_ref[...] = (
            jnp.dot(x_all, wih0_ref[...], preferred_element_type=jnp.float32)
            + bi0_ref[...]
        ).reshape(T, Bp, 3 * Hp)

        def fast_sigmoid(v):
            # Single EUP op per vreg (tanh) instead of exp + reciprocal.
            return 0.5 * jnp.tanh(0.5 * v) + 0.5

        def cell(l, gi, h):
            # gi: (Bp, 3*Hp) f32 input projection (r/z biases already included)
            # h : (Bp, Hp)   f32 previous hidden state of layer l
            _, whh_ref, _, bhhn_ref = layer_refs[l]
            gh = jnp.dot(h.astype(jnp.bfloat16), whh_ref[...],
                         preferred_element_type=jnp.float32)
            rz = fast_sigmoid(gi[:, :2 * Hp] + gh[:, :2 * Hp])   # lane-aligned slices
            r, z = rz[:, :Hp], rz[:, Hp:]
            n = jnp.tanh(gi[:, 2 * Hp:] + r * (gh[:, 2 * Hp:] + bhhn_ref[...]))
            return (1.0 - z) * n + z * h

        # Wavefront over (layer, time): wave w runs layer l at time t = w - l.
        # Layer l's input at time t is h[l-1] carried from the previous wave.
        h = [jnp.zeros((Bp, Hp), jnp.float32) for _ in range(layers)]
        s = jnp.zeros((Bp, Hp), jnp.float32)               # running sum  (avg pool)
        m = jnp.full((Bp, Hp), -jnp.inf, jnp.float32)      # running max  (max pool)

        for w in range(T + layers - 1):                    # static python loop
            new_h = list(h)
            for l in range(layers):
                t = w - l
                if 0 <= t < T:                             # static boundary condition
                    if l == 0:
                        gi = gi_ref[t]
                    else:
                        wih_ref, _, bi_ref, _ = layer_refs[l]
                        gi = jnp.dot(h[l - 1].astype(jnp.bfloat16), wih_ref[...],
                                     preferred_element_type=jnp.float32) + bi_ref[...]
                    h_new = cell(l, gi, h[l])
                    new_h[l] = h_new
                    if l == layers - 1:
                        s = s + h_new
                        m = jnp.maximum(m, h_new)
            h = new_h

        # Fused head: [avg, max] concatenated on a 128-lane-aligned boundary,
        # single 2*Hp-deep contraction.
        feat = jnp.concatenate([s * inv_T, m], axis=-1)    # (Bp, 2*Hp) f32
        y = jnp.dot(feat.astype(jnp.bfloat16), w_fc_ref[...],
                    preferred_element_type=jnp.float32) + b_fc_ref[...]
        out_ref[...] = y

    return kernel


# ----------------------------------------------------------------------------
# Wrappers
# ----------------------------------------------------------------------------
def run_fused(x_p, kparams, layers):
    T, Bp, _ = x_p.shape
    Hp = kparams["gru"][0]["whh"].shape[0]
    Op = kparams["w_fc"].shape[1]

    args = [x_p]
    for l in range(layers):
        p = kparams["gru"][l]
        args += [p["wih"], p["whh"], p["bi"], p["bhh_n"]]
    args += [kparams["w_fc"], kparams["b_fc"]]

    return pl.pallas_call(
        make_fused_kernel(layers),
        out_shape=jax.ShapeDtypeStruct((Bp, Op), jnp.float32),
        in_specs=[pl.BlockSpec(memory_space=pltpu.MemorySpace.VMEM) for _ in args],
        out_specs=pl.BlockSpec(memory_space=pltpu.MemorySpace.VMEM),
        scratch_shapes=[
            pltpu.VMEM((T, Bp, 3 * Hp), jnp.float32),   # hoisted layer-0 projection
        ],
    )(*args)


@functools.partial(jax.jit, static_argnames=("layers", "outputs"))
def gru_max_avg_forward(x, kparams, *, layers, outputs):
    """x: (B, input_size, T) -- same layout the PyTorch module consumes."""
    B, C, T = x.shape
    din_p = kparams["gru"][0]["wih"].shape[0]
    Bp = _round_up(max(B, 1), 8)
    # torch.swapaxes(x, 1, 2) -> (B, T, C); kernel wants time-major (T, Bp, Din_p).
    seq = jnp.transpose(x, (2, 0, 1)).astype(jnp.float32)   # (T, B, C)
    x_p = jnp.zeros((T, Bp, din_p), jnp.float32).at[:, :B, :C].set(seq)
    y_p = run_fused(x_p, kparams, layers)
    return y_p[:B, :outputs]


# ----------------------------------------------------------------------------
# Deterministic parameter init (PyTorch-like uniform(-1/sqrt(H), 1/sqrt(H))).
# Returns raw torch-layout params for the reference and padded kernel params
# (matmul weights in bf16, biases in f32).
# ----------------------------------------------------------------------------
def init_params(key, input_size, hidden_size, layers, outputs):
    H = hidden_size
    Hp = _round_up(H, 128)
    Op = _round_up(outputs, 128)
    bound = 1.0 / float(H) ** 0.5

    raw = {"gru": []}
    kern = {"gru": []}
    for l in range(layers):
        din = input_size if l == 0 else H
        # Layer-0 Din kept 128-padded: the hoisted projection is off the serial
        # chain, so the only cost is a few KiB of dead lanes at these sizes.
        din_p = _round_up(din, 128) if l == 0 else Hp
        key, k1, k2, k3, k4 = jax.random.split(key, 5)
        wih = jax.random.uniform(k1, (3 * H, din), jnp.float32, -bound, bound)
        whh = jax.random.uniform(k2, (3 * H, H), jnp.float32, -bound, bound)
        bih = jax.random.uniform(k3, (3 * H,), jnp.float32, -bound, bound)
        bhh = jax.random.uniform(k4, (3 * H,), jnp.float32, -bound, bound)
        raw["gru"].append(dict(wih=wih, whh=whh, bih=bih, bhh=bhh))

        # Lane-aligned, transposed, per-gate zero-padded kernel forms.
        wih_p = jnp.zeros((din_p, 3 * Hp), jnp.float32)
        whh_p = jnp.zeros((Hp, 3 * Hp), jnp.float32)
        for g in range(3):
            wih_p = wih_p.at[:din, g * Hp:g * Hp + H].set(wih[g * H:(g + 1) * H, :].T)
            whh_p = whh_p.at[:H, g * Hp:g * Hp + H].set(whh[g * H:(g + 1) * H, :].T)
        bi_p = jnp.zeros((1, 3 * Hp), jnp.float32)
        bi_p = bi_p.at[0, 0:H].set(bih[0:H] + bhh[0:H])                    # r (folded)
        bi_p = bi_p.at[0, Hp:Hp + H].set(bih[H:2 * H] + bhh[H:2 * H])      # z (folded)
        bi_p = bi_p.at[0, 2 * Hp:2 * Hp + H].set(bih[2 * H:3 * H])         # n (input)
        bhhn_p = jnp.zeros((1, Hp), jnp.float32).at[0, :H].set(bhh[2 * H:3 * H])
        kern["gru"].append(dict(wih=wih_p.astype(jnp.bfloat16),
                                whh=whh_p.astype(jnp.bfloat16),
                                bi=bi_p, bhh_n=bhhn_p))

    key, k1, k2 = jax.random.split(key, 3)
    fbound = 1.0 / float(2 * H) ** 0.5
    fc_w = jax.random.uniform(k1, (outputs, 2 * H), jnp.float32, -fbound, fbound)
    fc_b = jax.random.uniform(k2, (outputs,), jnp.float32, -fbound, fbound)
    raw["fc_w"], raw["fc_b"] = fc_w, fc_b

    # Fused head weight: rows [0,H) = avg half, rows [Hp, Hp+H) = max half.
    w_fc_p = jnp.zeros((2 * Hp, Op), jnp.float32)
    w_fc_p = w_fc_p.at[:H, :outputs].set(fc_w[:, :H].T)
    w_fc_p = w_fc_p.at[Hp:Hp + H, :outputs].set(fc_w[:, H:2 * H].T)
    kern["w_fc"] = w_fc_p.astype(jnp.bfloat16)
    kern["b_fc"] = jnp.zeros((1, Op), jnp.float32).at[0, :outputs].set(fc_b)
    return raw, kern


# ----------------------------------------------------------------------------
# Pure-JAX reference (mirrors torch GRU semantics) for correctness checking.
# matmul_dtype=float32  -> full-precision reference.
# matmul_dtype=bfloat16 -> same operand precision as the kernel (tight check).
# ----------------------------------------------------------------------------
def reference_forward(x, raw, layers, hidden_size, matmul_dtype=jnp.float32):
    H = hidden_size

    def mdot(a, b):
        if matmul_dtype == jnp.float32:
            return jnp.dot(a, b, precision=jax.lax.Precision.HIGHEST)
        return jnp.dot(a.astype(matmul_dtype), b.astype(matmul_dtype),
                       preferred_element_type=jnp.float32)

    seq = jnp.swapaxes(x, 1, 2).astype(jnp.float32)  # (B, T, C)
    for l in range(layers):
        p = raw["gru"][l]
        wih, whh, bih, bhh = p["wih"], p["whh"], p["bih"], p["bhh"]

        def cell(h, x_t):
            gi = mdot(x_t, wih.T) + bih
            gh = mdot(h, whh.T) + bhh
            i_r, i_z, i_n = gi[:, :H], gi[:, H:2 * H], gi[:, 2 * H:]
            h_r, h_z, h_n = gh[:, :H], gh[:, H:2 * H], gh[:, 2 * H:]
            r = jax.nn.sigmoid(i_r + h_r)
            z = jax.nn.sigmoid(i_z + h_z)
            n = jnp.tanh(i_n + r * h_n)
            h_new = (1.0 - z) * n + z * h
            return h_new, h_new

        h0 = jnp.zeros((x.shape[0], H), jnp.float32)
        _, outs = lax.scan(cell, h0, jnp.swapaxes(seq, 0, 1))  # (T, B, H)
        seq = jnp.swapaxes(outs, 0, 1)                         # (B, T, H)

    avg = jnp.mean(seq, axis=1)
    mx = jnp.max(seq, axis=1)
    feat = jnp.concatenate([avg, mx], axis=-1)
    return mdot(feat, raw["fc_w"].T) + raw["fc_b"]


# ----------------------------------------------------------------------------
if __name__ == "__main__":
    INPUT_SIZE = 4     # channels of x
    HIDDEN_SIZE = 32
    LAYERS = 2
    OUTPUTS = 8
    BATCH = 2
    SEQ = 16

    key = jax.random.PRNGKey(0)
    key, kx = jax.random.split(key)
    # x layout: (B, input_size, T) -- matches what the torch module receives.
    x = jax.random.normal(kx, (BATCH, INPUT_SIZE, SEQ), jnp.float32)

    raw_params, kern_params = init_params(key, INPUT_SIZE, HIDDEN_SIZE, LAYERS, OUTPUTS)

    y = gru_max_avg_forward(x, kern_params, layers=LAYERS, outputs=OUTPUTS)
    y = jax.block_until_ready(y)
    assert y.shape == (BATCH, OUTPUTS), y.shape

    # Tight check against a reference with matching (bf16-operand) matmul precision.
    y_ref_q = reference_forward(x, raw_params, LAYERS, HIDDEN_SIZE,
                                matmul_dtype=jnp.bfloat16)
    err_q = float(jnp.max(jnp.abs(y - y_ref_q)))
    assert err_q < 5e-3, f"mismatch vs matched-precision reference: max abs err {err_q}"

    # Looser sanity check against the full-f32 reference (bf16 MXU operand drift).
    y_ref_f = reference_forward(x, raw_params, LAYERS, HIDDEN_SIZE,
                                matmul_dtype=jnp.float32)
    err_f = float(jnp.max(jnp.abs(y - y_ref_f)))
    assert err_f < 1.5e-1, f"mismatch vs f32 reference: max abs err {err_f}"

    print("KERNEL_OK")
</pallas_src>

<mosaic_0001>
module attributes {stable_mosaic.version = 11 : i64} {
  func.func @kernel(%arg0: memref<16x8x128xf32, #tpu.memory_space<vmem>>, %arg1: memref<128x384xbf16, #tpu.memory_space<vmem>>, %arg2: memref<128x384xbf16, #tpu.memory_space<vmem>>, %arg3: memref<1x384xf32, #tpu.memory_space<vmem>>, %arg4: memref<1x128xf32, #tpu.memory_space<vmem>>, %arg5: memref<128x384xbf16, #tpu.memory_space<vmem>>, %arg6: memref<128x384xbf16, #tpu.memory_space<vmem>>, %arg7: memref<1x384xf32, #tpu.memory_space<vmem>>, %arg8: memref<1x128xf32, #tpu.memory_space<vmem>>, %arg9: memref<256x128xbf16, #tpu.memory_space<vmem>>, %arg10: memref<1x128xf32, #tpu.memory_space<vmem>>, %arg11: memref<8x128xf32, #tpu.memory_space<vmem>>, %arg12: memref<16x8x384xf32, #tpu.memory_space<vmem>>) attributes {dimension_semantics = [], scalar_prefetch = 0 : i64, scratch_operands = 1 : i64, tpu.core_type = #tpu.core_type<tc>} {
    %c0 = arith.constant 0 : index
    %c0_0 = arith.constant 0 : index
    %c0_1 = arith.constant 0 : index
    %0 = vector.load %arg0[%c0, %c0_0, %c0_1] : memref<16x8x128xf32, #tpu.memory_space<vmem>>, vector<16x8x128xf32>
    %1 = vector.shape_cast %0 : vector<16x8x128xf32> to vector<128x128xf32>
    %2 = arith.truncf %1 : vector<128x128xf32> to vector<128x128xbf16>
    %c0_2 = arith.constant 0 : index
    %c0_3 = arith.constant 0 : index
    %3 = vector.load %arg1[%c0_2, %c0_3] : memref<128x384xbf16, #tpu.memory_space<vmem>>, vector<128x384xbf16>
    %cst = arith.constant dense<0.000000e+00> : vector<128x384xf32>
    %4 = tpu.matmul %2, %3, %cst {dimension_numbers = #tpu.dot_dimension_numbers<[1], [0], [0], [1], [0, 0, 1, 1], [], []>} : vector<128x128xbf16>, vector<128x384xbf16>, vector<128x384xf32> -> vector<128x384xf32>
    %c0_4 = arith.constant 0 : index
    %c0_5 = arith.constant 0 : index
    %5 = vector.load %arg3[%c0_4, %c0_5] : memref<1x384xf32, #tpu.memory_space<vmem>>, vector<1x384xf32>
    %6 = vector.broadcast %5 : vector<1x384xf32> to vector<128x384xf32>
    %7 = arith.addf %4, %6 : vector<128x384xf32>
    %8 = vector.shape_cast %7 : vector<128x384xf32> to vector<16x8x384xf32>
    %c0_6 = arith.constant 0 : index
    %c0_7 = arith.constant 0 : index
    %c0_8 = arith.constant 0 : index
    %9 = vector.load %arg12[%c0_6, %c0_7, %c0_8] : memref<16x8x384xf32, #tpu.memory_space<vmem>>, vector<16x8x384xf32>
    tpu.vector_store %arg12[%c0_6, %c0_7, %c0_8], %8 {strides = array<i32>} : memref<16x8x384xf32, #tpu.memory_space<vmem>>, vector<16x8x384xf32>,
    %cst_9 = arith.constant 0.000000e+00 : f32
    %10 = vector.broadcast %cst_9 : f32 to vector<8x128xf32>
    %cst_10 = arith.constant 0.000000e+00 : f32
    %11 = vector.broadcast %cst_10 : f32 to vector<8x128xf32>
    %cst_11 = arith.constant 0.000000e+00 : f32
    %12 = vector.broadcast %cst_11 : f32 to vector<8x128xf32>
    %cst_12 = arith.constant 0xFF800000 : f32
    %13 = vector.broadcast %cst_12 : f32 to vector<8x128xf32>
    %c0_13 = arith.constant 0 : index
    %c0_14 = arith.constant 0 : index
    %c0_15 = arith.constant 0 : index
    %14 = vector.load %arg12[%c0_13, %c0_14, %c0_15] : memref<16x8x384xf32, #tpu.memory_space<vmem>>, vector<1x8x384xf32>
    %15 = vector.shape_cast %14 : vector<1x8x384xf32> to vector<8x384xf32>
    %16 = arith.truncf %10 : vector<8x128xf32> to vector<8x128xbf16>
    %c0_16 = arith.constant 0 : index
    %c0_17 = arith.constant 0 : index
    %17 = vector.load %arg2[%c0_16, %c0_17] : memref<128x384xbf16, #tpu.memory_space<vmem>>, vector<128x384xbf16>
    %cst_18 = arith.constant dense<0.000000e+00> : vector<8x384xf32>
    %18 = tpu.matmul %16, %17, %cst_18 {dimension_numbers = #tpu.dot_dimension_numbers<[1], [0], [0], [1], [0, 0, 1, 1], [], []>} : vector<8x128xbf16>, vector<128x384xbf16>, vector<8x384xf32> -> vector<8x384xf32>
    %19 = vector.extract_strided_slice %15 {offsets = [0, 0], sizes = [8, 256], strides = [1, 1]} : vector<8x384xf32> to vector<8x256xf32>
    %20 = vector.extract_strided_slice %18 {offsets = [0, 0], sizes = [8, 256], strides = [1, 1]} : vector<8x384xf32> to vector<8x256xf32>
    %21 = arith.addf %19, %20 : vector<8x256xf32>
    %cst_19 = arith.constant 5.000000e-01 : f32
    %22 = vector.broadcast %cst_19 : f32 to vector<8x256xf32>
    %23 = arith.mulf %22, %21 : vector<8x256xf32>
    %24 = math.tanh %23 : vector<8x256xf32>
    %cst_20 = arith.constant 5.000000e-01 : f32
    %25 = vector.broadcast %cst_20 : f32 to vector<8x256xf32>
    %26 = arith.mulf %25, %24 : vector<8x256xf32>
    %cst_21 = arith.constant 5.000000e-01 : f32
    %27 = vector.broadcast %cst_21 : f32 to vector<8x256xf32>
    %28 = arith.addf %26, %27 : vector<8x256xf32>
    %29 = vector.extract_strided_slice %28 {offsets = [0, 0], sizes = [8, 128], strides = [1, 1]} : vector<8x256xf32> to vector<8x128xf32>
    %30 = vector.extract_strided_slice %28 {offsets = [0, 128], sizes = [8, 128], strides = [1, 1]} : vector<8x256xf32> to vector<8x128xf32>
    %31 = vector.extract_strided_slice %15 {offsets = [0, 256], sizes = [8, 128], strides = [1, 1]} : vector<8x384xf32> to vector<8x128xf32>
    %32 = vector.extract_strided_slice %18 {offsets = [0, 256], sizes = [8, 128], strides = [1, 1]} : vector<8x384xf32> to vector<8x128xf32>
    %c0_22 = arith.constant 0 : index
    %c0_23 = arith.constant 0 : index
    %33 = vector.load %arg4[%c0_22, %c0_23] : memref<1x128xf32, #tpu.memory_space<vmem>>, vector<1x128xf32>
    %34 = vector.broadcast %33 : vector<1x128xf32> to vector<8x128xf32>
    %35 = arith.addf %32, %34 : vector<8x128xf32>
    %36 = arith.mulf %29, %35 : vector<8x128xf32>
    %37 = arith.addf %31, %36 : vector<8x128xf32>
    %38 = math.tanh %37 : vector<8x128xf32>
    %cst_24 = arith.constant 1.000000e+00 : f32
    %39 = vector.broadcast %cst_24 : f32 to vector<8x128xf32>
    %40 = arith.subf %39, %30 : vector<8x128xf32>
    %41 = arith.mulf %40, %38 : vector<8x128xf32>
    %42 = arith.mulf %30, %10 : vector<8x128xf32>
    %43 = arith.addf %41, %42 : vector<8x128xf32>
    %c1 = arith.constant 1 : index
    %c0_25 = arith.constant 0 : index
    %c0_26 = arith.constant 0 : index
    %44 = vector.load %arg12[%c1, %c0_25, %c0_26] : memref<16x8x384xf32, #tpu.memory_space<vmem>>, vector<1x8x384xf32>
    %45 = vector.shape_cast %44 : vector<1x8x384xf32> to vector<8x384xf32>
    %46 = arith.truncf %43 : vector<8x128xf32> to vector<8x128xbf16>
    %c0_27 = arith.constant 0 : index
    %c0_28 = arith.constant 0 : index
    %47 = vector.load %arg2[%c0_27, %c0_28] : memref<128x384xbf16, #tpu.memory_space<vmem>>, vector<128x384xbf16>
    %cst_29 = arith.constant dense<0.000000e+00> : vector<8x384xf32>
    %48 = tpu.matmul %46, %47, %cst_29 {dimension_numbers = #tpu.dot_dimension_numbers<[1], [0], [0], [1], [0, 0, 1, 1], [], []>} : vector<8x128xbf16>, vector<128x384xbf16>, vector<8x384xf32> -> vector<8x384xf32>
    %49 = vector.extract_strided_slice %45 {offsets = [0, 0], sizes = [8, 256], strides = [1, 1]} : vector<8x384xf32> to vector<8x256xf32>
    %50 = vector.extract_strided_slice %48 {offsets = [0, 0], sizes = [8, 256], strides = [1, 1]} : vector<8x384xf32> to vector<8x256xf32>
    %51 = arith.addf %49, %50 : vector<8x256xf32>
    %cst_30 = arith.constant 5.000000e-01 : f32
    %52 = vector.broadcast %cst_30 : f32 to vector<8x256xf32>
    %53 = arith.mulf %52, %51 : vector<8x256xf32>
    %54 = math.tanh %53 : vector<8x256xf32>
    %cst_31 = arith.constant 5.000000e-01 : f32
    %55 = vector.broadcast %cst_31 : f32 to vector<8x256xf32>
    %56 = arith.mulf %55, %54 : vector<8x256xf32>
    %cst_32 = arith.constant 5.000000e-01 : f32
    %57 = vector.broadcast %cst_32 : f32 to vector<8x256xf32>
    %58 = arith.addf %56, %57 : vector<8x256xf32>
    %59 = vector.extract_strided_slice %58 {offsets = [0, 0], sizes = [8, 128], strides = [1, 1]} : vector<8x256xf32> to vector<8x128xf32>
    %60 = vector.extract_strided_slice %58 {offsets = [0, 128], sizes = [8, 128], strides = [1, 1]} : vector<8x256xf32> to vector<8x128xf32>
    %61 = vector.extract_strided_slice %45 {offsets = [0, 256], sizes = [8, 128], strides = [1, 1]} : vector<8x384xf32> to vector<8x128xf32>
    %62 = vector.extract_strided_slice %48 {offsets = [0, 256], sizes = [8, 128], strides = [1, 1]} : vector<8x384xf32> to vector<8x128xf32>
    %c0_33 = arith.constant 0 : index
    %c0_34 = arith.constant 0 : index
    %63 = vector.load %arg4[%c0_33, %c0_34] : memref<1x128xf32, #tpu.memory_space<vmem>>, vector<1x128xf32>
    %64 = vector.broadcast %63 : vector<1x128xf32> to vector<8x128xf32>
    %65 = arith.addf %62, %64 : vector<8x128xf32>
    %66 = arith.mulf %59, %65 : vector<8x128xf32>
    %67 = arith.addf %61, %66 : vector<8x128xf32>
    %68 = math.tanh %67 : vector<8x128xf32>
    %cst_35 = arith.constant 1.000000e+00 : f32
    %69 = vector.broadcast %cst_35 : f32 to vector<8x128xf32>
    %70 = arith.subf %69, %60 : vector<8x128xf32>
    %71 = arith.mulf %70, %68 : vector<8x128xf32>
    %72 = arith.mulf %60, %43 : vector<8x128xf32>
    %73 = arith.addf %71, %72 : vector<8x128xf32>
    %74 = arith.truncf %43 : vector<8x128xf32> to vector<8x128xbf16>
    %c0_36 = arith.constant 0 : index
    %c0_37 = arith.constant 0 : index
    %75 = vector.load %arg5[%c0_36, %c0_37] : memref<128x384xbf16, #tpu.memory_space<vmem>>, vector<128x384xbf16>
    %cst_38 = arith.constant dense<0.000000e+00> : vector<8x384xf32>
    %76 = tpu.matmul %74, %75, %cst_38 {dimension_numbers = #tpu.dot_dimension_numbers<[1], [0], [0], [1], [0, 0, 1, 1], [], []>} : vector<8x128xbf16>, vector<128x384xbf16>, vector<8x384xf32> -> vector<8x384xf32>
    %c0_39 = arith.constant 0 : index
    %c0_40 = arith.constant 0 : index
    %77 = vector.load %arg7[%c0_39, %c0_40] : memref<1x384xf32, #tpu.memory_space<vmem>>, vector<1x384xf32>
    %78 = vector.broadcast %77 : vector<1x384xf32> to vector<8x384xf32>
    %79 = arith.addf %76, %78 : vector<8x384xf32>
    %80 = arith.truncf %11 : vector<8x128xf32> to vector<8x128xbf16>
    %c0_41 = arith.constant 0 : index
    %c0_42 = arith.constant 0 : index
    %81 = vector.load %arg6[%c0_41, %c0_42] : memref<128x384xbf16, #tpu.memory_space<vmem>>, vector<128x384xbf16>
    %cst_43 = arith.constant dense<0.000000e+00> : vector<8x384xf32>
    %82 = tpu.matmul %80, %81, %cst_43 {dimension_numbers = #tpu.dot_dimension_numbers<[1], [0], [0], [1], [0, 0, 1, 1], [], []>} : vector<8x128xbf16>, vector<128x384xbf16>, vector<8x384xf32> -> vector<8x384xf32>
    %83 = vector.extract_strided_slice %79 {offsets = [0, 0], sizes = [8, 256], strides = [1, 1]} : vector<8x384xf32> to vector<8x256xf32>
    %84 = vector.extract_strided_slice %82 {offsets = [0, 0], sizes = [8, 256], strides = [1, 1]} : vector<8x384xf32> to vector<8x256xf32>
    %85 = arith.addf %83, %84 : vector<8x256xf32>
    %cst_44 = arith.constant 5.000000e-01 : f32
    %86 = vector.broadcast %cst_44 : f32 to vector<8x256xf32>
    %87 = arith.mulf %86, %85 : vector<8x256xf32>
    %88 = math.tanh %87 : vector<8x256xf32>
    %cst_45 = arith.constant 5.000000e-01 : f32
    %89 = vector.broadcast %cst_45 : f32 to vector<8x256xf32>
    %90 = arith.mulf %89, %88 : vector<8x256xf32>
    %cst_46 = arith.constant 5.000000e-01 : f32
    %91 = vector.broadcast %cst_46 : f32 to vector<8x256xf32>
    %92 = arith.addf %90, %91 : vector<8x256xf32>
    %93 = vector.extract_strided_slice %92 {offsets = [0, 0], sizes = [8, 128], strides = [1, 1]} : vector<8x256xf32> to vector<8x128xf32>
    %94 = vector.extract_strided_slice %92 {offsets = [0, 128], sizes = [8, 128], strides = [1, 1]} : vector<8x256xf32> to vector<8x128xf32>
    %95 = vector.extract_strided_slice %79 {offsets = [0, 256], sizes = [8, 128], strides = [1, 1]} : vector<8x384xf32> to vector<8x128xf32>
    %96 = vector.extract_strided_slice %82 {offsets = [0, 256], sizes = [8, 128], strides = [1, 1]} : vector<8x384xf32> to vector<8x128xf32>
    %c0_47 = arith.constant 0 : index
    %c0_48 = arith.constant 0 : index
    %97 = vector.load %arg8[%c0_47, %c0_48] : memref<1x128xf32, #tpu.memory_space<vmem>>, vector<1x128xf32>
    %98 = vector.broadcast %97 : vector<1x128xf32> to vector<8x128xf32>
    %99 = arith.addf %96, %98 : vector<8x128xf32>
    %100 = arith.mulf %93, %99 : vector<8x128xf32>
    %101 = arith.addf %95, %100 : vector<8x128xf32>
    %102 = math.tanh %101 : vector<8x128xf32>
    %cst_49 = arith.constant 1.000000e+00 : f32
    %103 = vector.broadcast %cst_49 : f32 to vector<8x128xf32>
    %104 = arith.subf %103, %94 : vector<8x128xf32>
    %105 = arith.mulf %104, %102 : vector<8x128xf32>
    %106 = arith.mulf %94, %11 : vector<8x128xf32>
    %107 = arith.addf %105, %106 : vector<8x128xf32>
    %108 = arith.addf %12, %107 : vector<8x128xf32>
    %109 = arith.maximumf %13, %107 : vector<8x128xf32>
    %c2 = arith.constant 2 : index
    %c0_50 = arith.constant 0 : index
    %c0_51 = arith.constant 0 : index
    %110 = vector.load %arg12[%c2, %c0_50, %c0_51] : memref<16x8x384xf32, #tpu.memory_space<vmem>>, vector<1x8x384xf32>
    %111 = vector.shape_cast %110 : vector<1x8x384xf32> to vector<8x384xf32>
    %112 = arith.truncf %73 : vector<8x128xf32> to vector<8x128xbf16>
    %c0_52 = arith.constant 0 : index
    %c0_53 = arith.constant 0 : index
    %113 = vector.load %arg2[%c0_52, %c0_53] : memref<128x384xbf16, #tpu.memory_space<vmem>>, vector<128x384xbf16>
    %cst_54 = arith.constant dense<0.000000e+00> : vector<8x384xf32>
    %114 = tpu.matmul %112, %113, %cst_54 {dimension_numbers = #tpu.dot_dimension_numbers<[1], [0], [0], [1], [0, 0, 1, 1], [], []>} : vector<8x128xbf16>, vector<128x384xbf16>, vector<8x384xf32> -> vector<8x384xf32>
    %115 = vector.extract_strided_slice %111 {offsets = [0, 0], sizes = [8, 256], strides = [1, 1]} : vector<8x384xf32> to vector<8x256xf32>
    %116 = vector.extract_strided_slice %114 {offsets = [0, 0], sizes = [8, 256], strides = [1, 1]} : vector<8x384xf32> to vector<8x256xf32>
    %117 = arith.addf %115, %116 : vector<8x256xf32>
    %cst_55 = arith.constant 5.000000e-01 : f32
    %118 = vector.broadcast %cst_55 : f32 to vector<8x256xf32>
    %119 = arith.mulf %118, %117 : vector<8x256xf32>
    %120 = math.tanh %119 : vector<8x256xf32>
    %cst_56 = arith.constant 5.000000e-01 : f32
    %121 = vector.broadcast %cst_56 : f32 to vector<8x256xf32>
    %122 = arith.mulf %121, %120 : vector<8x256xf32>
    %cst_57 = arith.constant 5.000000e-01 : f32
    %123 = vector.broadcast %cst_57 : f32 to vector<8x256xf32>
    %124 = arith.addf %122, %123 : vector<8x256xf32>
    %125 = vector.extract_strided_slice %124 {offsets = [0, 0], sizes = [8, 128], strides = [1, 1]} : vector<8x256xf32> to vector<8x128xf32>
    %126 = vector.extract_strided_slice %124 {offsets = [0, 128], sizes = [8, 128], strides = [1, 1]} : vector<8x256xf32> to vector<8x128xf32>
    %127 = vector.extract_strided_slice %111 {offsets = [0, 256], sizes = [8, 128], strides = [1, 1]} : vector<8x384xf32> to vector<8x128xf32>
    %128 = vector.extract_strided_slice %114 {offsets = [0, 256], sizes = [8, 128], strides = [1, 1]} : vector<8x384xf32> to vector<8x128xf32>
    %c0_58 = arith.constant 0 : index
    %c0_59 = arith.constant 0 : index
    %129 = vector.load %arg4[%c0_58, %c0_59] : memref<1x128xf32, #tpu.memory_space<vmem>>, vector<1x128xf32>
    %130 = vector.broadcast %129 : vector<1x128xf32> to vector<8x128xf32>
    %131 = arith.addf %128, %130 : vector<8x128xf32>
    %132 = arith.mulf %125, %131 : vector<8x128xf32>
    %133 = arith.addf %127, %132 : vector<8x128xf32>
    %134 = math.tanh %133 : vector<8x128xf32>
    %cst_60 = arith.constant 1.000000e+00 : f32
    %135 = vector.broadcast %cst_60 : f32 to vector<8x128xf32>
    %136 = arith.subf %135, %126 : vector<8x128xf32>
    %137 = arith.mulf %136, %134 : vector<8x128xf32>
    %138 = arith.mulf %126, %73 : vector<8x128xf32>
    %139 = arith.addf %137, %138 : vector<8x128xf32>
    %140 = arith.truncf %73 : vector<8x128xf32> to vector<8x128xbf16>
    %c0_61 = arith.constant 0 : index
    %c0_62 = arith.constant 0 : index
    %141 = vector.load %arg5[%c0_61, %c0_62] : memref<128x384xbf16, #tpu.memory_space<vmem>>, vector<128x384xbf16>
    %cst_63 = arith.constant dense<0.000000e+00> : vector<8x384xf32>
    %142 = tpu.matmul %140, %141, %cst_63 {dimension_numbers = #tpu.dot_dimension_numbers<[1], [0], [0], [1], [0, 0, 1, 1], [], []>} : vector<8x128xbf16>, vector<128x384xbf16>, vector<8x384xf32> -> vector<8x384xf32>
    %c0_64 = arith.constant 0 : index
    %c0_65 = arith.constant 0 : index
    %143 = vector.load %arg7[%c0_64, %c0_65] : memref<1x384xf32, #tpu.memory_space<vmem>>, vector<1x384xf32>
    %144 = vector.broadcast %143 : vector<1x384xf32> to vector<8x384xf32>
    %145 = arith.addf %142, %144 : vector<8x384xf32>
    %146 = arith.truncf %107 : vector<8x128xf32> to vector<8x128xbf16>
    %c0_66 = arith.constant 0 : index
    %c0_67 = arith.constant 0 : index
    %147 = vector.load %arg6[%c0_66, %c0_67] : memref<128x384xbf16, #tpu.memory_space<vmem>>, vector<128x384xbf16>
    %cst_68 = arith.constant dense<0.000000e+00> : vector<8x384xf32>
    %148 = tpu.matmul %146, %147, %cst_68 {dimension_numbers = #tpu.dot_dimension_numbers<[1], [0], [0], [1], [0, 0, 1, 1], [], []>} : vector<8x128xbf16>, vector<128x384xbf16>, vector<8x384xf32> -> vector<8x384xf32>
    %149 = vector.extract_strided_slice %145 {offsets = [0, 0], sizes = [8, 256], strides = [1, 1]} : vector<8x384xf32> to vector<8x256xf32>
    %150 = vector.extract_strided_slice %148 {offsets = [0, 0], sizes = [8, 256], strides = [1, 1]} : vector<8x384xf32> to vector<8x256xf32>
    %151 = arith.addf %149, %150 : vector<8x256xf32>
    %cst_69 = arith.constant 5.000000e-01 : f32
    %152 = vector.broadcast %cst_69 : f32 to vector<8x256xf32>
    %153 = arith.mulf %152, %151 : vector<8x256xf32>
    %154 = math.tanh %153 : vector<8x256xf32>
    %cst_70 = arith.constant 5.000000e-01 : f32
    %155 = vector.broadcast %cst_70 : f32 to vector<8x256xf32>
    %156 = arith.mulf %155, %154 : vector<8x256xf32>
    %cst_71 = arith.constant 5.000000e-01 : f32
    %157 = vector.broadcast %cst_71 : f32 to vector<8x256xf32>
    %158 = arith.addf %156, %157 : vector<8x256xf32>
    %159 = vector.extract_strided_slice %158 {offsets = [0, 0], sizes = [8, 128], strides = [1, 1]} : vector<8x256xf32> to vector<8x128xf32>
    %160 = vector.extract_strided_slice %158 {offsets = [0, 128], sizes = [8, 128], strides = [1, 1]} : vector<8x256xf32> to vector<8x128xf32>
    %161 = vector.extract_strided_slice %145 {offsets = [0, 256], sizes = [8, 128], strides = [1, 1]} : vector<8x384xf32> to vector<8x128xf32>
    %162 = vector.extract_strided_slice %148 {offsets = [0, 256], sizes = [8, 128], strides = [1, 1]} : vector<8x384xf32> to vector<8x128xf32>
    %c0_72 = arith.constant 0 : index
    %c0_73 = arith.constant 0 : index
    %163 = vector.load %arg8[%c0_72, %c0_73] : memref<1x128xf32, #tpu.memory_space<vmem>>, vector<1x128xf32>
    %164 = vector.broadcast %163 : vector<1x128xf32> to vector<8x128xf32>
    %165 = arith.addf %162, %164 : vector<8x128xf32>
    %166 = arith.mulf %159, %165 : vector<8x128xf32>
    %167 = arith.addf %161, %166 : vector<8x128xf32>
    %168 = math.tanh %167 : vector<8x128xf32>
    %cst_74 = arith.constant 1.000000e+00 : f32
    %169 = vector.broadcast %cst_74 : f32 to vector<8x128xf32>
    %170 = arith.subf %169, %160 : vector<8x128xf32>
    %171 = arith.mulf %170, %168 : vector<8x128xf32>
    %172 = arith.mulf %160, %107 : vector<8x128xf32>
    %173 = arith.addf %171, %172 : vector<8x128xf32>
    %174 = arith.addf %108, %173 : vector<8x128xf32>
    %175 = arith.maximumf %109, %173 : vector<8x128xf32>
    %c3 = arith.constant 3 : index
    %c0_75 = arith.constant 0 : index
    %c0_76 = arith.constant 0 : index
    %176 = vector.load %arg12[%c3, %c0_75, %c0_76] : memref<16x8x384xf32, #tpu.memory_space<vmem>>, vector<1x8x384xf32>
    %177 = vector.shape_cast %176 : vector<1x8x384xf32> to vector<8x384xf32>
    %178 = arith.truncf %139 : vector<8x128xf32> to vector<8x128xbf16>
    %c0_77 = arith.constant 0 : index
    %c0_78 = arith.constant 0 : index
    %179 = vector.load %arg2[%c0_77, %c0_78] : memref<128x384xbf16, #tpu.memory_space<vmem>>, vector<128x384xbf16>
    %cst_79 = arith.constant dense<0.000000e+00> : vector<8x384xf32>
    %180 = tpu.matmul %178, %179, %cst_79 {dimension_numbers = #tpu.dot_dimension_numbers<[1], [0], [0], [1], [0, 0, 1, 1], [], []>} : vector<8x128xbf16>, vector<128x384xbf16>, vector<8x384xf32> -> vector<8x384xf32>
    %181 = vector.extract_strided_slice %177 {offsets = [0, 0], sizes = [8, 256], strides = [1, 1]} : vector<8x384xf32> to vector<8x256xf32>
    %182 = vector.extract_strided_slice %180 {offsets = [0, 0], sizes = [8, 256], strides = [1, 1]} : vector<8x384xf32> to vector<8x256xf32>
    %183 = arith.addf %181, %182 : vector<8x256xf32>
    %cst_80 = arith.constant 5.000000e-01 : f32
    %184 = vector.broadcast %cst_80 : f32 to vector<8x256xf32>
    %185 = arith.mulf %184, %183 : vector<8x256xf32>
    %186 = math.tanh %185 : vector<8x256xf32>
    %cst_81 = arith.constant 5.000000e-01 : f32
    %187 = vector.broadcast %cst_81 : f32 to vector<8x256xf32>
    %188 = arith.mulf %187, %186 : vector<8x256xf32>
    %cst_82 = arith.constant 5.000000e-01 : f32
    %189 = vector.broadcast %cst_82 : f32 to vector<8x256xf32>
    %190 = arith.addf %188, %189 : vector<8x256xf32>
    %191 = vector.extract_strided_slice %190 {offsets = [0, 0], sizes = [8, 128], strides = [1, 1]} : vector<8x256xf32> to vector<8x128xf32>
    %192 = vector.extract_strided_slice %190 {offsets = [0, 128], sizes = [8, 128], strides = [1, 1]} : vector<8x256xf32> to vector<8x128xf32>
    %193 = vector.extract_strided_slice %177 {offsets = [0, 256], sizes = [8, 128], strides = [1, 1]} : vector<8x384xf32> to vector<8x128xf32>
    %194 = vector.extract_strided_slice %180 {offsets = [0, 256], sizes = [8, 128], strides = [1, 1]} : vector<8x384xf32> to vector<8x128xf32>
    %c0_83 = arith.constant 0 : index
    %c0_84 = arith.constant 0 : index
    %195 = vector.load %arg4[%c0_83, %c0_84] : memref<1x128xf32, #tpu.memory_space<vmem>>, vector<1x128xf32>
    %196 = vector.broadcast %195 : vector<1x128xf32> to vector<8x128xf32>
    %197 = arith.addf %194, %196 : vector<8x128xf32>
    %198 = arith.mulf %191, %197 : vector<8x128xf32>
    %199 = arith.addf %193, %198 : vector<8x128xf32>
    %200 = math.tanh %199 : vector<8x128xf32>
    %cst_85 = arith.constant 1.000000e+00 : f32
    %201 = vector.broadcast %cst_85 : f32 to vector<8x128xf32>
    %202 = arith.subf %201, %192 : vector<8x128xf32>
    %203 = arith.mulf %202, %200 : vector<8x128xf32>
    %204 = arith.mulf %192, %139 : vector<8x128xf32>
    %205 = arith.addf %203, %204 : vector<8x128xf32>
    %206 = arith.truncf %139 : vector<8x128xf32> to vector<8x128xbf16>
    %c0_86 = arith.constant 0 : index
    %c0_87 = arith.constant 0 : index
    %207 = vector.load %arg5[%c0_86, %c0_87] : memref<128x384xbf16, #tpu.memory_space<vmem>>, vector<128x384xbf16>
    %cst_88 = arith.constant dense<0.000000e+00> : vector<8x384xf32>
    %208 = tpu.matmul %206, %207, %cst_88 {dimension_numbers = #tpu.dot_dimension_numbers<[1], [0], [0], [1], [0, 0, 1, 1], [], []>} : vector<8x128xbf16>, vector<128x384xbf16>, vector<8x384xf32> -> vector<8x384xf32>
    %c0_89 = arith.constant 0 : index
    %c0_90 = arith.constant 0 : index
    %209 = vector.load %arg7[%c0_89, %c0_90] : memref<1x384xf32, #tpu.memory_space<vmem>>, vector<1x384xf32>
    %210 = vector.broadcast %209 : vector<1x384xf32> to vector<8x384xf32>
    %211 = arith.addf %208, %210 : vector<8x384xf32>
    %212 = arith.truncf %173 : vector<8x128xf32> to vector<8x128xbf16>
    %c0_91 = arith.constant 0 : index
    %c0_92 = arith.constant 0 : index
    %213 = vector.load %arg6[%c0_91, %c0_92] : memref<128x384xbf16, #tpu.memory_space<vmem>>, vector<128x384xbf16>
    %cst_93 = arith.constant dense<0.000000e+00> : vector<8x384xf32>
    %214 = tpu.matmul %212, %213, %cst_93 {dimension_numbers = #tpu.dot_dimension_numbers<[1], [0], [0], [1], [0, 0, 1, 1], [], []>} : vector<8x128xbf16>, vector<128x384xbf16>, vector<8x384xf32> -> vector<8x384xf32>
    %215 = vector.extract_strided_slice %211 {offsets = [0, 0], sizes = [8, 256], strides = [1, 1]} : vector<8x384xf32> to vector<8x256xf32>
    %216 = vector.extract_strided_slice %214 {offsets = [0, 0], sizes = [8, 256], strides = [1, 1]} : vector<8x384xf32> to vector<8x256xf32>
    %217 = arith.addf %215, %216 : vector<8x256xf32>
    %cst_94 = arith.constant 5.000000e-01 : f32
    %218 = vector.broadcast %cst_94 : f32 to vector<8x256xf32>
    %219 = arith.mulf %218, %217 : vector<8x256xf32>
    %220 = math.tanh %219 : vector<8x256xf32>
    %cst_95 = arith.constant 5.000000e-01 : f32
    %221 = vector.broadcast %cst_95 : f32 to vector<8x256xf32>
    %222 = arith.mulf %221, %220 : vector<8x256xf32>
    %cst_96 = arith.constant 5.000000e-01 : f32
    %223 = vector.broadcast %cst_96 : f32 to vector<8x256xf32>
    %224 = arith.addf %222, %223 : vector<8x256xf32>
    %225 = vector.extract_strided_slice %224 {offsets = [0, 0], sizes = [8, 128], strides = [1, 1]} : vector<8x256xf32> to vector<8x128xf32>
    %226 = vector.extract_strided_slice %224 {offsets = [0, 128], sizes = [8, 128], strides = [1, 1]} : vector<8x256xf32> to vector<8x128xf32>
    %227 = vector.extract_strided_slice %211 {offsets = [0, 256], sizes = [8, 128], strides = [1, 1]} : vector<8x384xf32> to vector<8x128xf32>
    %228 = vector.extract_strided_slice %214 {offsets = [0, 256], sizes = [8, 128], strides = [1, 1]} : vector<8x384xf32> to vector<8x128xf32>
    %c0_97 = arith.constant 0 : index
    %c0_98 = arith.constant 0 : index
    %229 = vector.load %arg8[%c0_97, %c0_98] : memref<1x128xf32, #tpu.memory_space<vmem>>, vector<1x128xf32>
    %230 = vector.broadcast %229 : vector<1x128xf32> to vector<8x128xf32>
    %231 = arith.addf %228, %230 : vector<8x128xf32>
    %232 = arith.mulf %225, %231 : vector<8x128xf32>
    %233 = arith.addf %227, %232 : vector<8x128xf32>
    %234 = math.tanh %233 : vector<8x128xf32>
    %cst_99 = arith.constant 1.000000e+00 : f32
    %235 = vector.broadcast %cst_99 : f32 to vector<8x128xf32>
    %236 = arith.subf %235, %226 : vector<8x128xf32>
    %237 = arith.mulf %236, %234 : vector<8x128xf32>
    %238 = arith.mulf %226, %173 : vector<8x128xf32>
    %239 = arith.addf %237, %238 : vector<8x128xf32>
    %240 = arith.addf %174, %239 : vector<8x128xf32>
    %241 = arith.maximumf %175, %239 : vector<8x128xf32>
    %c4 = arith.constant 4 : index
    %c0_100 = arith.constant 0 : index
    %c0_101 = arith.constant 0 : index
    %242 = vector.load %arg12[%c4, %c0_100, %c0_101] : memref<16x8x384xf32, #tpu.memory_space<vmem>>, vector<1x8x384xf32>
    %243 = vector.shape_cast %242 : vector<1x8x384xf32> to vector<8x384xf32>
    %244 = arith.truncf %205 : vector<8x128xf32> to vector<8x128xbf16>
    %c0_102 = arith.constant 0 : index
    %c0_103 = arith.constant 0 : index
    %245 = vector.load %arg2[%c0_102, %c0_103] : memref<128x384xbf16, #tpu.memory_space<vmem>>, vector<128x384xbf16>
    %cst_104 = arith.constant dense<0.000000e+00> : vector<8x384xf32>
    %246 = tpu.matmul %244, %245, %cst_104 {dimension_numbers = #tpu.dot_dimension_numbers<[1], [0], [0], [1], [0, 0, 1, 1], [], []>} : vector<8x128xbf16>, vector<128x384xbf16>, vector<8x384xf32> -> vector<8x384xf32>
    %247 = vector.extract_strided_slice %243 {offsets = [0, 0], sizes = [8, 256], strides = [1, 1]} : vector<8x384xf32> to vector<8x256xf32>
    %248 = vector.extract_strided_slice %246 {offsets = [0, 0], sizes = [8, 256], strides = [1, 1]} : vector<8x384xf32> to vector<8x256xf32>
    %249 = arith.addf %247, %248 : vector<8x256xf32>
    %cst_105 = arith.constant 5.000000e-01 : f32
    %250 = vector.broadcast %cst_105 : f32 to vector<8x256xf32>
    %251 = arith.mulf %250, %249 : vector<8x256xf32>
    %252 = math.tanh %251 : vector<8x256xf32>
    %cst_106 = arith.constant 5.000000e-01 : f32
    %253 = vector.broadcast %cst_106 : f32 to vector<8x256xf32>
    %254 = arith.mulf %253, %252 : vector<8x256xf32>
    %cst_107 = arith.constant 5.000000e-01 : f32
    %255 = vector.broadcast %cst_107 : f32 to vector<8x256xf32>
    %256 = arith.addf %254, %255 : vector<8x256xf32>
    %257 = vector.extract_strided_slice %256 {offsets = [0, 0], sizes = [8, 128], strides = [1, 1]} : vector<8x256xf32> to vector<8x128xf32>
    %258 = vector.extract_strided_slice %256 {offsets = [0, 128], sizes = [8, 128], strides = [1, 1]} : vector<8x256xf32> to vector<8x128xf32>
    %259 = vector.extract_strided_slice %243 {offsets = [0, 256], sizes = [8, 128], strides = [1, 1]} : vector<8x384xf32> to vector<8x128xf32>
    %260 = vector.extract_strided_slice %246 {offsets = [0, 256], sizes = [8, 128], strides = [1, 1]} : vector<8x384xf32> to vector<8x128xf32>
    %c0_108 = arith.constant 0 : index
    %c0_109 = arith.constant 0 : index
    %261 = vector.load %arg4[%c0_108, %c0_109] : memref<1x128xf32, #tpu.memory_space<vmem>>, vector<1x128xf32>
    %262 = vector.broadcast %261 : vector<1x128xf32> to vector<8x128xf32>
    %263 = arith.addf %260, %262 : vector<8x128xf32>
    %264 = arith.mulf %257, %263 : vector<8x128xf32>
    %265 = arith.addf %259, %264 : vector<8x128xf32>
    %266 = math.tanh %265 : vector<8x128xf32>
    %cst_110 = arith.constant 1.000000e+00 : f32
    %267 = vector.broadcast %cst_110 : f32 to vector<8x128xf32>
    %268 = arith.subf %267, %258 : vector<8x128xf32>
    %269 = arith.mulf %268, %266 : vector<8x128xf32>
    %270 = arith.mulf %258, %205 : vector<8x128xf32>
    %271 = arith.addf %269, %270 : vector<8x128xf32>
    %272 = arith.truncf %205 : vector<8x128xf32> to vector<8x128xbf16>
    %c0_111 = arith.constant 0 : index
    %c0_112 = arith.constant 0 : index
    %273 = vector.load %arg5[%c0_111, %c0_112] : memref<128x384xbf16, #tpu.memory_space<vmem>>, vector<128x384xbf16>
    %cst_113 = arith.constant dense<0.000000e+00> : vector<8x384xf32>
    %274 = tpu.matmul %272, %273, %cst_113 {dimension_numbers = #tpu.dot_dimension_numbers<[1], [0], [0], [1], [0, 0, 1, 1], [], []>} : vector<8x128xbf16>, vector<128x384xbf16>, vector<8x384xf32> -> vector<8x384xf32>
    %c0_114 = arith.constant 0 : index
    %c0_115 = arith.constant 0 : index
    %275 = vector.load %arg7[%c0_114, %c0_115] : memref<1x384xf32, #tpu.memory_space<vmem>>, vector<1x384xf32>
    %276 = vector.broadcast %275 : vector<1x384xf32> to vector<8x384xf32>
    %277 = arith.addf %274, %276 : vector<8x384xf32>
    %278 = arith.truncf %239 : vector<8x128xf32> to vector<8x128xbf16>
    %c0_116 = arith.constant 0 : index
    %c0_117 = arith.constant 0 : index
    %279 = vector.load %arg6[%c0_116, %c0_117] : memref<128x384xbf16, #tpu.memory_space<vmem>>, vector<128x384xbf16>
    %cst_118 = arith.constant dense<0.000000e+00> : vector<8x384xf32>
    %280 = tpu.matmul %278, %279, %cst_118 {dimension_numbers = #tpu.dot_dimension_numbers<[1], [0], [0], [1], [0, 0, 1, 1], [], []>} : vector<8x128xbf16>, vector<128x384xbf16>, vector<8x384xf32> -> vector<8x384xf32>
    %281 = vector.extract_strided_slice %277 {offsets = [0, 0], sizes = [8, 256], strides = [1, 1]} : vector<8x384xf32> to vector<8x256xf32>
    %282 = vector.extract_strided_slice %280 {offsets = [0, 0], sizes = [8, 256], strides = [1, 1]} : vector<8x384xf32> to vector<8x256xf32>
    %283 = arith.addf %281, %282 : vector<8x256xf32>
    %cst_119 = arith.constant 5.000000e-01 : f32
    %284 = vector.broadcast %cst_119 : f32 to vector<8x256xf32>
    %285 = arith.mulf %284, %283 : vector<8x256xf32>
    %286 = math.tanh %285 : vector<8x256xf32>
    %cst_120 = arith.constant 5.000000e-01 : f32
    %287 = vector.broadcast %cst_120 : f32 to vector<8x256xf32>
    %288 = arith.mulf %287, %286 : vector<8x256xf32>
    %cst_121 = arith.constant 5.000000e-01 : f32
    %289 = vector.broadcast %cst_121 : f32 to vector<8x256xf32>
    %290 = arith.addf %288, %289 : vector<8x256xf32>
    %291 = vector.extract_strided_slice %290 {offsets = [0, 0], sizes = [8, 128], strides = [1, 1]} : vector<8x256xf32> to vector<8x128xf32>
    %292 = vector.extract_strided_slice %290 {offsets = [0, 128], sizes = [8, 128], strides = [1, 1]} : vector<8x256xf32> to vector<8x128xf32>
    %293 = vector.extract_strided_slice %277 {offsets = [0, 256], sizes = [8, 128], strides = [1, 1]} : vector<8x384xf32> to vector<8x128xf32>
    %294 = vector.extract_strided_slice %280 {offsets = [0, 256], sizes = [8, 128], strides = [1, 1]} : vector<8x384xf32> to vector<8x128xf32>
    %c0_122 = arith.constant 0 : index
    %c0_123 = arith.constant 0 : index
    %295 = vector.load %arg8[%c0_122, %c0_123] : memref<1x128xf32, #tpu.memory_space<vmem>>, vector<1x128xf32>
    %296 = vector.broadcast %295 : vector<1x128xf32> to vector<8x128xf32>
    %297 = arith.addf %294, %296 : vector<8x128xf32>
    %298 = arith.mulf %291, %297 : vector<8x128xf32>
    %299 = arith.addf %293, %298 : vector<8x128xf32>
    %300 = math.tanh %299 : vector<8x128xf32>
    %cst_124 = arith.constant 1.000000e+00 : f32
    %301 = vector.broadcast %cst_124 : f32 to vector<8x128xf32>
    %302 = arith.subf %301, %292 : vector<8x128xf32>
    %303 = arith.mulf %302, %300 : vector<8x128xf32>
    %304 = arith.mulf %292, %239 : vector<8x128xf32>
    %305 = arith.addf %303, %304 : vector<8x128xf32>
    %306 = arith.addf %240, %305 : vector<8x128xf32>
    %307 = arith.maximumf %241, %305 : vector<8x128xf32>
    %c5 = arith.constant 5 : index
    %c0_125 = arith.constant 0 : index
    %c0_126 = arith.constant 0 : index
    %308 = vector.load %arg12[%c5, %c0_125, %c0_126] : memref<16x8x384xf32, #tpu.memory_space<vmem>>, vector<1x8x384xf32>
    %309 = vector.shape_cast %308 : vector<1x8x384xf32> to vector<8x384xf32>
    %310 = arith.truncf %271 : vector<8x128xf32> to vector<8x128xbf16>
    %c0_127 = arith.constant 0 : index
    %c0_128 = arith.constant 0 : index
    %311 = vector.load %arg2[%c0_127, %c0_128] : memref<128x384xbf16, #tpu.memory_space<vmem>>, vector<128x384xbf16>
    %cst_129 = arith.constant dense<0.000000e+00> : vector<8x384xf32>
    %312 = tpu.matmul %310, %311, %cst_129 {dimension_numbers = #tpu.dot_dimension_numbers<[1], [0], [0], [1], [0, 0, 1, 1], [], []>} : vector<8x128xbf16>, vector<128x384xbf16>, vector<8x384xf32> -> vector<8x384xf32>
    %313 = vector.extract_strided_slice %309 {offsets = [0, 0], sizes = [8, 256], strides = [1, 1]} : vector<8x384xf32> to vector<8x256xf32>
    %314 = vector.extract_strided_slice %312 {offsets = [0, 0], sizes = [8, 256], strides = [1, 1]} : vector<8x384xf32> to vector<8x256xf32>
    %315 = arith.addf %313, %314 : vector<8x256xf32>
    %cst_130 = arith.constant 5.000000e-01 : f32
    %316 = vector.broadcast %cst_130 : f32 to vector<8x256xf32>
    %317 = arith.mulf %316, %315 : vector<8x256xf32>
    %318 = math.tanh %317 : vector<8x256xf32>
    %cst_131 = arith.constant 5.000000e-01 : f32
    %319 = vector.broadcast %cst_131 : f32 to vector<8x256xf32>
    %320 = arith.mulf %319, %318 : vector<8x256xf32>
    %cst_132 = arith.constant 5.000000e-01 : f32
    %321 = vector.broadcast %cst_132 : f32 to vector<8x256xf32>
    %322 = arith.addf %320, %321 : vector<8x256xf32>
    %323 = vector.extract_strided_slice %322 {offsets = [0, 0], sizes = [8, 128], strides = [1, 1]} : vector<8x256xf32> to vector<8x128xf32>
    %324 = vector.extract_strided_slice %322 {offsets = [0, 128], sizes = [8, 128], strides = [1, 1]} : vector<8x256xf32> to vector<8x128xf32>
    %325 = vector.extract_strided_slice %309 {offsets = [0, 256], sizes = [8, 128], strides = [1, 1]} : vector<8x384xf32> to vector<8x128xf32>
    %326 = vector.extract_strided_slice %312 {offsets = [0, 256], sizes = [8, 128], strides = [1, 1]} : vector<8x384xf32> to vector<8x128xf32>
    %c0_133 = arith.constant 0 : index
    %c0_134 = arith.constant 0 : index
    %327 = vector.load %arg4[%c0_133, %c0_134] : memref<1x128xf32, #tpu.memory_space<vmem>>, vector<1x128xf32>
    %328 = vector.broadcast %327 : vector<1x128xf32> to vector<8x128xf32>
    %329 = arith.addf %326, %328 : vector<8x128xf32>
    %330 = arith.mulf %323, %329 : vector<8x128xf32>
    %331 = arith.addf %325, %330 : vector<8x128xf32>
    %332 = math.tanh %331 : vector<8x128xf32>
    %cst_135 = arith.constant 1.000000e+00 : f32
    %333 = vector.broadcast %cst_135 : f32 to vector<8x128xf32>
    %334 = arith.subf %333, %324 : vector<8x128xf32>
    %335 = arith.mulf %334, %332 : vector<8x128xf32>
    %336 = arith.mulf %324, %271 : vector<8x128xf32>
    %337 = arith.addf %335, %336 : vector<8x128xf32>
    %338 = arith.truncf %271 : vector<8x128xf32> to vector<8x128xbf16>
    %c0_136 = arith.constant 0 : index
    %c0_137 = arith.constant 0 : index
    %339 = vector.load %arg5[%c0_136, %c0_137] : memref<128x384xbf16, #tpu.memory_space<vmem>>, vector<128x384xbf16>
    %cst_138 = arith.constant dense<0.000000e+00> : vector<8x384xf32>
    %340 = tpu.matmul %338, %339, %cst_138 {dimension_numbers = #tpu.dot_dimension_numbers<[1], [0], [0], [1], [0, 0, 1, 1], [], []>} : vector<8x128xbf16>, vector<128x384xbf16>, vector<8x384xf32> -> vector<8x384xf32>
    %c0_139 = arith.constant 0 : index
    %c0_140 = arith.constant 0 : index
    %341 = vector.load %arg7[%c0_139, %c0_140] : memref<1x384xf32, #tpu.memory_space<vmem>>, vector<1x384xf32>
    %342 = vector.broadcast %341 : vector<1x384xf32> to vector<8x384xf32>
    %343 = arith.addf %340, %342 : vector<8x384xf32>
    %344 = arith.truncf %305 : vector<8x128xf32> to vector<8x128xbf16>
    %c0_141 = arith.constant 0 : index
    %c0_142 = arith.constant 0 : index
    %345 = vector.load %arg6[%c0_141, %c0_142] : memref<128x384xbf16, #tpu.memory_space<vmem>>, vector<128x384xbf16>
    %cst_143 = arith.constant dense<0.000000e+00> : vector<8x384xf32>
    %346 = tpu.matmul %344, %345, %cst_143 {dimension_numbers = #tpu.dot_dimension_numbers<[1], [0], [0], [1], [0, 0, 1, 1], [], []>} : vector<8x128xbf16>, vector<128x384xbf16>, vector<8x384xf32> -> vector<8x384xf32>
    %347 = vector.extract_strided_slice %343 {offsets = [0, 0], sizes = [8, 256], strides = [1, 1]} : vector<8x384xf32> to vector<8x256xf32>
    %348 = vector.extract_strided_slice %346 {offsets = [0, 0], sizes = [8, 256], strides = [1, 1]} : vector<8x384xf32> to vector<8x256xf32>
    %349 = arith.addf %347, %348 : vector<8x256xf32>
    %cst_144 = arith.constant 5.000000e-01 : f32
    %350 = vector.broadcast %cst_144 : f32 to vector<8x256xf32>
    %351 = arith.mulf %350, %349 : vector<8x256xf32>
    %352 = math.tanh %351 : vector<8x256xf32>
    %cst_145 = arith.constant 5.000000e-01 : f32
    %353 = vector.broadcast %cst_145 : f32 to vector<8x256xf32>
    %354 = arith.mulf %353, %352 : vector<8x256xf32>
    %cst_146 = arith.constant 5.000000e-01 : f32
    %355 = vector.broadcast %cst_146 : f32 to vector<8x256xf32>
    %356 = arith.addf %354, %355 : vector<8x256xf32>
    %357 = vector.extract_strided_slice %356 {offsets = [0, 0], sizes = [8, 128], strides = [1, 1]} : vector<8x256xf32> to vector<8x128xf32>
    %358 = vector.extract_strided_slice %356 {offsets = [0, 128], sizes = [8, 128], strides = [1, 1]} : vector<8x256xf32> to vector<8x128xf32>
    %359 = vector.extract_strided_slice %343 {offsets = [0, 256], sizes = [8, 128], strides = [1, 1]} : vector<8x384xf32> to vector<8x128xf32>
    %360 = vector.extract_strided_slice %346 {offsets = [0, 256], sizes = [8, 128], strides = [1, 1]} : vector<8x384xf32> to vector<8x128xf32>
    %c0_147 = arith.constant 0 : index
    %c0_148 = arith.constant 0 : index
    %361 = vector.load %arg8[%c0_147, %c0_148] : memref<1x128xf32, #tpu.memory_space<vmem>>, vector<1x128xf32>
    %362 = vector.broadcast %361 : vector<1x128xf32> to vector<8x128xf32>
    %363 = arith.addf %360, %362 : vector<8x128xf32>
    %364 = arith.mulf %357, %363 : vector<8x128xf32>
    %365 = arith.addf %359, %364 : vector<8x128xf32>
    %366 = math.tanh %365 : vector<8x128xf32>
    %cst_149 = arith.constant 1.000000e+00 : f32
    %367 = vector.broadcast %cst_149 : f32 to vector<8x128xf32>
    %368 = arith.subf %367, %358 : vector<8x128xf32>
    %369 = arith.mulf %368, %366 : vector<8x128xf32>
    %370 = arith.mulf %358, %305 : vector<8x128xf32>
    %371 = arith.addf %369, %370 : vector<8x128xf32>
    %372 = arith.addf %306, %371 : vector<8x128xf32>
    %373 = arith.maximumf %307, %371 : vector<8x128xf32>
    %c6 = arith.constant 6 : index
    %c0_150 = arith.constant 0 : index
    %c0_151 = arith.constant 0 : index
    %374 = vector.load %arg12[%c6, %c0_150, %c0_151] : memref<16x8x384xf32, #tpu.memory_space<vmem>>, vector<1x8x384xf32>
    %375 = vector.shape_cast %374 : vector<1x8x384xf32> to vector<8x384xf32>
    %376 = arith.truncf %337 : vector<8x128xf32> to vector<8x128xbf16>
    %c0_152 = arith.constant 0 : index
    %c0_153 = arith.constant 0 : index
    %377 = vector.load %arg2[%c0_152, %c0_153] : memref<128x384xbf16, #tpu.memory_space<vmem>>, vector<128x384xbf16>
    %cst_154 = arith.constant dense<0.000000e+00> : vector<8x384xf32>
    %378 = tpu.matmul %376, %377, %cst_154 {dimension_numbers = #tpu.dot_dimension_numbers<[1], [0], [0], [1], [0, 0, 1, 1], [], []>} : vector<8x128xbf16>, vector<128x384xbf16>, vector<8x384xf32> -> vector<8x384xf32>
    %379 = vector.extract_strided_slice %375 {offsets = [0, 0], sizes = [8, 256], strides = [1, 1]} : vector<8x384xf32> to vector<8x256xf32>
    %380 = vector.extract_strided_slice %378 {offsets = [0, 0], sizes = [8, 256], strides = [1, 1]} : vector<8x384xf32> to vector<8x256xf32>
    %381 = arith.addf %379, %380 : vector<8x256xf32>
    %cst_155 = arith.constant 5.000000e-01 : f32
    %382 = vector.broadcast %cst_155 : f32 to vector<8x256xf32>
    %383 = arith.mulf %382, %381 : vector<8x256xf32>
    %384 = math.tanh %383 : vector<8x256xf32>
    %cst_156 = arith.constant 5.000000e-01 : f32
    %385 = vector.broadcast %cst_156 : f32 to vector<8x256xf32>
    %386 = arith.mulf %385, %384 : vector<8x256xf32>
    %cst_157 = arith.constant 5.000000e-01 : f32
    %387 = vector.broadcast %cst_157 : f32 to vector<8x256xf32>
    %388 = arith.addf %386, %387 : vector<8x256xf32>
    %389 = vector.extract_strided_slice %388 {offsets = [0, 0], sizes = [8, 128], strides = [1, 1]} : vector<8x256xf32> to vector<8x128xf32>
    %390 = vector.extract_strided_slice %388 {offsets = [0, 128], sizes = [8, 128], strides = [1, 1]} : vector<8x256xf32> to vector<8x128xf32>
    %391 = vector.extract_strided_slice %375 {offsets = [0, 256], sizes = [8, 128], strides = [1, 1]} : vector<8x384xf32> to vector<8x128xf32>
    %392 = vector.extract_strided_slice %378 {offsets = [0, 256], sizes = [8, 128], strides = [1, 1]} : vector<8x384xf32> to vector<8x128xf32>
    %c0_158 = arith.constant 0 : index
    %c0_159 = arith.constant 0 : index
    %393 = vector.load %arg4[%c0_158, %c0_159] : memref<1x128xf32, #tpu.memory_space<vmem>>, vector<1x128xf32>
    %394 = vector.broadcast %393 : vector<1x128xf32> to vector<8x128xf32>
    %395 = arith.addf %392, %394 : vector<8x128xf32>
    %396 = arith.mulf %389, %395 : vector<8x128xf32>
    %397 = arith.addf %391, %396 : vector<8x128xf32>
    %398 = math.tanh %397 : vector<8x128xf32>
    %cst_160 = arith.constant 1.000000e+00 : f32
    %399 = vector.broadcast %cst_160 : f32 to vector<8x128xf32>
    %400 = arith.subf %399, %390 : vector<8x128xf32>
    %401 = arith.mulf %400, %398 : vector<8x128xf32>
    %402 = arith.mulf %390, %337 : vector<8x128xf32>
    %403 = arith.addf %401, %402 : vector<8x128xf32>
    %404 = arith.truncf %337 : vector<8x128xf32> to vector<8x128xbf16>
    %c0_161 = arith.constant 0 : index
    %c0_162 = arith.constant 0 : index
    %405 = vector.load %arg5[%c0_161, %c0_162] : memref<128x384xbf16, #tpu.memory_space<vmem>>, vector<128x384xbf16>
    %cst_163 = arith.constant dense<0.000000e+00> : vector<8x384xf32>
    %406 = tpu.matmul %404, %405, %cst_163 {dimension_numbers = #tpu.dot_dimension_numbers<[1], [0], [0], [1], [0, 0, 1, 1], [], []>} : vector<8x128xbf16>, vector<128x384xbf16>, vector<8x384xf32> -> vector<8x384xf32>
    %c0_164 = arith.constant 0 : index
    %c0_165 = arith.constant 0 : index
    %407 = vector.load %arg7[%c0_164, %c0_165] : memref<1x384xf32, #tpu.memory_space<vmem>>, vector<1x384xf32>
    %408 = vector.broadcast %407 : vector<1x384xf32> to vector<8x384xf32>
    %409 = arith.addf %406, %408 : vector<8x384xf32>
    %410 = arith.truncf %371 : vector<8x128xf32> to vector<8x128xbf16>
    %c0_166 = arith.constant 0 : index
    %c0_167 = arith.constant 0 : index
    %411 = vector.load %arg6[%c0_166, %c0_167] : memref<128x384xbf16, #tpu.memory_space<vmem>>, vector<128x384xbf16>
    %cst_168 = arith.constant dense<0.000000e+00> : vector<8x384xf32>
    %412 = tpu.matmul %410, %411, %cst_168 {dimension_numbers = #tpu.dot_dimension_numbers<[1], [0], [0], [1], [0, 0, 1, 1], [], []>} : vector<8x128xbf16>, vector<128x384xbf16>, vector<8x384xf32> -> vector<8x384xf32>
    %413 = vector.extract_strided_slice %409 {offsets = [0, 0], sizes = [8, 256], strides = [1, 1]} : vector<8x384xf32> to vector<8x256xf32>
    %414 = vector.extract_strided_slice %412 {offsets = [0, 0], sizes = [8, 256], strides = [1, 1]} : vector<8x384xf32> to vector<8x256xf32>
    %415 = arith.addf %413, %414 : vector<8x256xf32>
    %cst_169 = arith.constant 5.000000e-01 : f32
    %416 = vector.broadcast %cst_169 : f32 to vector<8x256xf32>
    %417 = arith.mulf %416, %415 : vector<8x256xf32>
    %418 = math.tanh %417 : vector<8x256xf32>
    %cst_170 = arith.constant 5.000000e-01 : f32
    %419 = vector.broadcast %cst_170 : f32 to vector<8x256xf32>
    %420 = arith.mulf %419, %418 : vector<8x256xf32>
    %cst_171 = arith.constant 5.000000e-01 : f32
    %421 = vector.broadcast %cst_171 : f32 to vector<8x256xf32>
    %422 = arith.addf %420, %421 : vector<8x256xf32>
    %423 = vector.extract_strided_slice %422 {offsets = [0, 0], sizes = [8, 128], strides = [1, 1]} : vector<8x256xf32> to vector<8x128xf32>
    %424 = vector.extract_strided_slice %422 {offsets = [0, 128], sizes = [8, 128], strides = [1, 1]} : vector<8x256xf32> to vector<8x128xf32>
    %425 = vector.extract_strided_slice %409 {offsets = [0, 256], sizes = [8, 128], strides = [1, 1]} : vector<8x384xf32> to vector<8x128xf32>
    %426 = vector.extract_strided_slice %412 {offsets = [0, 256], sizes = [8, 128], strides = [1, 1]} : vector<8x384xf32> to vector<8x128xf32>
    %c0_172 = arith.constant 0 : index
    %c0_173 = arith.constant 0 : index
    %427 = vector.load %arg8[%c0_172, %c0_173] : memref<1x128xf32, #tpu.memory_space<vmem>>, vector<1x128xf32>
    %428 = vector.broadcast %427 : vector<1x128xf32> to vector<8x128xf32>
    %429 = arith.addf %426, %428 : vector<8x128xf32>
    %430 = arith.mulf %423, %429 : vector<8x128xf32>
    %431 = arith.addf %425, %430 : vector<8x128xf32>
    %432 = math.tanh %431 : vector<8x128xf32>
    %cst_174 = arith.constant 1.000000e+00 : f32
    %433 = vector.broadcast %cst_174 : f32 to vector<8x128xf32>
    %434 = arith.subf %433, %424 : vector<8x128xf32>
    %435 = arith.mulf %434, %432 : vector<8x128xf32>
    %436 = arith.mulf %424, %371 : vector<8x128xf32>
    %437 = arith.addf %435, %436 : vector<8x128xf32>
    %438 = arith.addf %372, %437 : vector<8x128xf32>
    %439 = arith.maximumf %373, %437 : vector<8x128xf32>
    %c7 = arith.constant 7 : index
    %c0_175 = arith.constant 0 : index
    %c0_176 = arith.constant 0 : index
    %440 = vector.load %arg12[%c7, %c0_175, %c0_176] : memref<16x8x384xf32, #tpu.memory_space<vmem>>, vector<1x8x384xf32>
    %441 = vector.shape_cast %440 : vector<1x8x384xf32> to vector<8x384xf32>
    %442 = arith.truncf %403 : vector<8x128xf32> to vector<8x128xbf16>
    %c0_177 = arith.constant 0 : index
    %c0_178 = arith.constant 0 : index
    %443 = vector.load %arg2[%c0_177, %c0_178] : memref<128x384xbf16, #tpu.memory_space<vmem>>, vector<128x384xbf16>
    %cst_179 = arith.constant dense<0.000000e+00> : vector<8x384xf32>
    %444 = tpu.matmul %442, %443, %cst_179 {dimension_numbers = #tpu.dot_dimension_numbers<[1], [0], [0], [1], [0, 0, 1, 1], [], []>} : vector<8x128xbf16>, vector<128x384xbf16>, vector<8x384xf32> -> vector<8x384xf32>
    %445 = vector.extract_strided_slice %441 {offsets = [0, 0], sizes = [8, 256], strides = [1, 1]} : vector<8x384xf32> to vector<8x256xf32>
    %446 = vector.extract_strided_slice %444 {offsets = [0, 0], sizes = [8, 256], strides = [1, 1]} : vector<8x384xf32> to vector<8x256xf32>
    %447 = arith.addf %445, %446 : vector<8x256xf32>
    %cst_180 = arith.constant 5.000000e-01 : f32
    %448 = vector.broadcast %cst_180 : f32 to vector<8x256xf32>
    %449 = arith.mulf %448, %447 : vector<8x256xf32>
    %450 = math.tanh %449 : vector<8x256xf32>
    %cst_181 = arith.constant 5.000000e-01 : f32
    %451 = vector.broadcast %cst_181 : f32 to vector<8x256xf32>
    %452 = arith.mulf %451, %450 : vector<8x256xf32>
    %cst_182 = arith.constant 5.000000e-01 : f32
    %453 = vector.broadcast %cst_182 : f32 to vector<8x256xf32>
    %454 = arith.addf %452, %453 : vector<8x256xf32>
    %455 = vector.extract_strided_slice %454 {offsets = [0, 0], sizes = [8, 128], strides = [1, 1]} : vector<8x256xf32> to vector<8x128xf32>
    %456 = vector.extract_strided_slice %454 {offsets = [0, 128], sizes = [8, 128], strides = [1, 1]} : vector<8x256xf32> to vector<8x128xf32>
    %457 = vector.extract_strided_slice %441 {offsets = [0, 256], sizes = [8, 128], strides = [1, 1]} : vector<8x384xf32> to vector<8x128xf32>
    %458 = vector.extract_strided_slice %444 {offsets = [0, 256], sizes = [8, 128], strides = [1, 1]} : vector<8x384xf32> to vector<8x128xf32>
    %c0_183 = arith.constant 0 : index
    %c0_184 = arith.constant 0 : index
    %459 = vector.load %arg4[%c0_183, %c0_184] : memref<1x128xf32, #tpu.memory_space<vmem>>, vector<1x128xf32>
    %460 = vector.broadcast %459 : vector<1x128xf32> to vector<8x128xf32>
    %461 = arith.addf %458, %460 : vector<8x128xf32>
    %462 = arith.mulf %455, %461 : vector<8x128xf32>
    %463 = arith.addf %457, %462 : vector<8x128xf32>
    %464 = math.tanh %463 : vector<8x128xf32>
    %cst_185 = arith.constant 1.000000e+00 : f32
    %465 = vector.broadcast %cst_185 : f32 to vector<8x128xf32>
    %466 = arith.subf %465, %456 : vector<8x128xf32>
    %467 = arith.mulf %466, %464 : vector<8x128xf32>
    %468 = arith.mulf %456, %403 : vector<8x128xf32>
    %469 = arith.addf %467, %468 : vector<8x128xf32>
    %470 = arith.truncf %403 : vector<8x128xf32> to vector<8x128xbf16>
    %c0_186 = arith.constant 0 : index
    %c0_187 = arith.constant 0 : index
    %471 = vector.load %arg5[%c0_186, %c0_187] : memref<128x384xbf16, #tpu.memory_space<vmem>>, vector<128x384xbf16>
    %cst_188 = arith.constant dense<0.000000e+00> : vector<8x384xf32>
    %472 = tpu.matmul %470, %471, %cst_188 {dimension_numbers = #tpu.dot_dimension_numbers<[1], [0], [0], [1], [0, 0, 1, 1], [], []>} : vector<8x128xbf16>, vector<128x384xbf16>, vector<8x384xf32> -> vector<8x384xf32>
    %c0_189 = arith.constant 0 : index
    %c0_190 = arith.constant 0 : index
    %473 = vector.load %arg7[%c0_189, %c0_190] : memref<1x384xf32, #tpu.memory_space<vmem>>, vector<1x384xf32>
    %474 = vector.broadcast %473 : vector<1x384xf32> to vector<8x384xf32>
    %475 = arith.addf %472, %474 : vector<8x384xf32>
    %476 = arith.truncf %437 : vector<8x128xf32> to vector<8x128xbf16>
    %c0_191 = arith.constant 0 : index
    %c0_192 = arith.constant 0 : index
    %477 = vector.load %arg6[%c0_191, %c0_192] : memref<128x384xbf16, #tpu.memory_space<vmem>>, vector<128x384xbf16>
    %cst_193 = arith.constant dense<0.000000e+00> : vector<8x384xf32>
    %478 = tpu.matmul %476, %477, %cst_193 {dimension_numbers = #tpu.dot_dimension_numbers<[1], [0], [0], [1], [0, 0, 1, 1], [], []>} : vector<8x128xbf16>, vector<128x384xbf16>, vector<8x384xf32> -> vector<8x384xf32>
    %479 = vector.extract_strided_slice %475 {offsets = [0, 0], sizes = [8, 256], strides = [1, 1]} : vector<8x384xf32> to vector<8x256xf32>
    %480 = vector.extract_strided_slice %478 {offsets = [0, 0], sizes = [8, 256], strides = [1, 1]} : vector<8x384xf32> to vector<8x256xf32>
    %481 = arith.addf %479, %480 : vector<8x256xf32>
    %cst_194 = arith.constant 5.000000e-01 : f32
    %482 = vector.broadcast %cst_194 : f32 to vector<8x256xf32>
    %483 = arith.mulf %482, %481 : vector<8x256xf32>
    %484 = math.tanh %483 : vector<8x256xf32>
    %cst_195 = arith.constant 5.000000e-01 : f32
    %485 = vector.broadcast %cst_195 : f32 to vector<8x256xf32>
    %486 = arith.mulf %485, %484 : vector<8x256xf32>
    %cst_196 = arith.constant 5.000000e-01 : f32
    %487 = vector.broadcast %cst_196 : f32 to vector<8x256xf32>
    %488 = arith.addf %486, %487 : vector<8x256xf32>
    %489 = vector.extract_strided_slice %488 {offsets = [0, 0], sizes = [8, 128], strides = [1, 1]} : vector<8x256xf32> to vector<8x128xf32>
    %490 = vector.extract_strided_slice %488 {offsets = [0, 128], sizes = [8, 128], strides = [1, 1]} : vector<8x256xf32> to vector<8x128xf32>
    %491 = vector.extract_strided_slice %475 {offsets = [0, 256], sizes = [8, 128], strides = [1, 1]} : vector<8x384xf32> to vector<8x128xf32>
    %492 = vector.extract_strided_slice %478 {offsets = [0, 256], sizes = [8, 128], strides = [1, 1]} : vector<8x384xf32> to vector<8x128xf32>
    %c0_197 = arith.constant 0 : index
    %c0_198 = arith.constant 0 : index
    %493 = vector.load %arg8[%c0_197, %c0_198] : memref<1x128xf32, #tpu.memory_space<vmem>>, vector<1x128xf32>
    %494 = vector.broadcast %493 : vector<1x128xf32> to vector<8x128xf32>
    %495 = arith.addf %492, %494 : vector<8x128xf32>
    %496 = arith.mulf %489, %495 : vector<8x128xf32>
    %497 = arith.addf %491, %496 : vector<8x128xf32>
    %498 = math.tanh %497 : vector<8x128xf32>
    %cst_199 = arith.constant 1.000000e+00 : f32
    %499 = vector.broadcast %cst_199 : f32 to vector<8x128xf32>
    %500 = arith.subf %499, %490 : vector<8x128xf32>
    %501 = arith.mulf %500, %498 : vector<8x128xf32>
    %502 = arith.mulf %490, %437 : vector<8x128xf32>
    %503 = arith.addf %501, %502 : vector<8x128xf32>
    %504 = arith.addf %438, %503 : vector<8x128xf32>
    %505 = arith.maximumf %439, %503 : vector<8x128xf32>
    %c8 = arith.constant 8 : index
    %c0_200 = arith.constant 0 : index
    %c0_201 = arith.constant 0 : index
    %506 = vector.load %arg12[%c8, %c0_200, %c0_201] : memref<16x8x384xf32, #tpu.memory_space<vmem>>, vector<1x8x384xf32>
    %507 = vector.shape_cast %506 : vector<1x8x384xf32> to vector<8x384xf32>
    %508 = arith.truncf %469 : vector<8x128xf32> to vector<8x128xbf16>
    %c0_202 = arith.constant 0 : index
    %c0_203 = arith.constant 0 : index
    %509 = vector.load %arg2[%c0_202, %c0_203] : memref<128x384xbf16, #tpu.memory_space<vmem>>, vector<128x384xbf16>
    %cst_204 = arith.constant dense<0.000000e+00> : vector<8x384xf32>
    %510 = tpu.matmul %508, %509, %cst_204 {dimension_numbers = #tpu.dot_dimension_numbers<[1], [0], [0], [1], [0, 0, 1, 1], [], []>} : vector<8x128xbf16>, vector<128x384xbf16>, vector<8x384xf32> -> vector<8x384xf32>
    %511 = vector.extract_strided_slice %507 {offsets = [0, 0], sizes = [8, 256], strides = [1, 1]} : vector<8x384xf32> to vector<8x256xf32>
    %512 = vector.extract_strided_slice %510 {offsets = [0, 0], sizes = [8, 256], strides = [1, 1]} : vector<8x384xf32> to vector<8x256xf32>
    %513 = arith.addf %511, %512 : vector<8x256xf32>
    %cst_205 = arith.constant 5.000000e-01 : f32
    %514 = vector.broadcast %cst_205 : f32 to vector<8x256xf32>
    %515 = arith.mulf %514, %513 : vector<8x256xf32>
    %516 = math.tanh %515 : vector<8x256xf32>
    %cst_206 = arith.constant 5.000000e-01 : f32
    %517 = vector.broadcast %cst_206 : f32 to vector<8x256xf32>
    %518 = arith.mulf %517, %516 : vector<8x256xf32>
    %cst_207 = arith.constant 5.000000e-01 : f32
    %519 = vector.broadcast %cst_207 : f32 to vector<8x256xf32>
    %520 = arith.addf %518, %519 : vector<8x256xf32>
    %521 = vector.extract_strided_slice %520 {offsets = [0, 0], sizes = [8, 128], strides = [1, 1]} : vector<8x256xf32> to vector<8x128xf32>
    %522 = vector.extract_strided_slice %520 {offsets = [0, 128], sizes = [8, 128], strides = [1, 1]} : vector<8x256xf32> to vector<8x128xf32>
    %523 = vector.extract_strided_slice %507 {offsets = [0, 256], sizes = [8, 128], strides = [1, 1]} : vector<8x384xf32> to vector<8x128xf32>
    %524 = vector.extract_strided_slice %510 {offsets = [0, 256], sizes = [8, 128], strides = [1, 1]} : vector<8x384xf32> to vector<8x128xf32>
    %c0_208 = arith.constant 0 : index
    %c0_209 = arith.constant 0 : index
    %525 = vector.load %arg4[%c0_208, %c0_209] : memref<1x128xf32, #tpu.memory_space<vmem>>, vector<1x128xf32>
    %526 = vector.broadcast %525 : vector<1x128xf32> to vector<8x128xf32>
    %527 = arith.addf %524, %526 : vector<8x128xf32>
    %528 = arith.mulf %521, %527 : vector<8x128xf32>
    %529 = arith.addf %523, %528 : vector<8x128xf32>
    %530 = math.tanh %529 : vector<8x128xf32>
    %cst_210 = arith.constant 1.000000e+00 : f32
    %531 = vector.broadcast %cst_210 : f32 to vector<8x128xf32>
    %532 = arith.subf %531, %522 : vector<8x128xf32>
    %533 = arith.mulf %532, %530 : vector<8x128xf32>
    %534 = arith.mulf %522, %469 : vector<8x128xf32>
    %535 = arith.addf %533, %534 : vector<8x128xf32>
    %536 = arith.truncf %469 : vector<8x128xf32> to vector<8x128xbf16>
    %c0_211 = arith.constant 0 : index
    %c0_212 = arith.constant 0 : index
    %537 = vector.load %arg5[%c0_211, %c0_212] : memref<128x384xbf16, #tpu.memory_space<vmem>>, vector<128x384xbf16>
    %cst_213 = arith.constant dense<0.000000e+00> : vector<8x384xf32>
    %538 = tpu.matmul %536, %537, %cst_213 {dimension_numbers = #tpu.dot_dimension_numbers<[1], [0], [0], [1], [0, 0, 1, 1], [], []>} : vector<8x128xbf16>, vector<128x384xbf16>, vector<8x384xf32> -> vector<8x384xf32>
    %c0_214 = arith.constant 0 : index
    %c0_215 = arith.constant 0 : index
    %539 = vector.load %arg7[%c0_214, %c0_215] : memref<1x384xf32, #tpu.memory_space<vmem>>, vector<1x384xf32>
    %540 = vector.broadcast %539 : vector<1x384xf32> to vector<8x384xf32>
    %541 = arith.addf %538, %540 : vector<8x384xf32>
    %542 = arith.truncf %503 : vector<8x128xf32> to vector<8x128xbf16>
    %c0_216 = arith.constant 0 : index
    %c0_217 = arith.constant 0 : index
    %543 = vector.load %arg6[%c0_216, %c0_217] : memref<128x384xbf16, #tpu.memory_space<vmem>>, vector<128x384xbf16>
    %cst_218 = arith.constant dense<0.000000e+00> : vector<8x384xf32>
    %544 = tpu.matmul %542, %543, %cst_218 {dimension_numbers = #tpu.dot_dimension_numbers<[1], [0], [0], [1], [0, 0, 1, 1], [], []>} : vector<8x128xbf16>, vector<128x384xbf16>, vector<8x384xf32> -> vector<8x384xf32>
    %545 = vector.extract_strided_slice %541 {offsets = [0, 0], sizes = [8, 256], strides = [1, 1]} : vector<8x384xf32> to vector<8x256xf32>
    %546 = vector.extract_strided_slice %544 {offsets = [0, 0], sizes = [8, 256], strides = [1, 1]} : vector<8x384xf32> to vector<8x256xf32>
    %547 = arith.addf %545, %546 : vector<8x256xf32>
    %cst_219 = arith.constant 5.000000e-01 : f32
    %548 = vector.broadcast %cst_219 : f32 to vector<8x256xf32>
    %549 = arith.mulf %548, %547 : vector<8x256xf32>
    %550 = math.tanh %549 : vector<8x256xf32>
    %cst_220 = arith.constant 5.000000e-01 : f32
    %551 = vector.broadcast %cst_220 : f32 to vector<8x256xf32>
    %552 = arith.mulf %551, %550 : vector<8x256xf32>
    %cst_221 = arith.constant 5.000000e-01 : f32
    %553 = vector.broadcast %cst_221 : f32 to vector<8x256xf32>
    %554 = arith.addf %552, %553 : vector<8x256xf32>
    %555 = vector.extract_strided_slice %554 {offsets = [0, 0], sizes = [8, 128], strides = [1, 1]} : vector<8x256xf32> to vector<8x128xf32>
    %556 = vector.extract_strided_slice %554 {offsets = [0, 128], sizes = [8, 128], strides = [1, 1]} : vector<8x256xf32> to vector<8x128xf32>
    %557 = vector.extract_strided_slice %541 {offsets = [0, 256], sizes = [8, 128], strides = [1, 1]} : vector<8x384xf32> to vector<8x128xf32>
    %558 = vector.extract_strided_slice %544 {offsets = [0, 256], sizes = [8, 128], strides = [1, 1]} : vector<8x384xf32> to vector<8x128xf32>
    %c0_222 = arith.constant 0 : index
    %c0_223 = arith.constant 0 : index
    %559 = vector.load %arg8[%c0_222, %c0_223] : memref<1x128xf32, #tpu.memory_space<vmem>>, vector<1x128xf32>
    %560 = vector.broadcast %559 : vector<1x128xf32> to vector<8x128xf32>
    %561 = arith.addf %558, %560 : vector<8x128xf32>
    %562 = arith.mulf %555, %561 : vector<8x128xf32>
    %563 = arith.addf %557, %562 : vector<8x128xf32>
    %564 = math.tanh %563 : vector<8x128xf32>
    %cst_224 = arith.constant 1.000000e+00 : f32
    %565 = vector.broadcast %cst_224 : f32 to vector<8x128xf32>
    %566 = arith.subf %565, %556 : vector<8x128xf32>
    %567 = arith.mulf %566, %564 : vector<8x128xf32>
    %568 = arith.mulf %556, %503 : vector<8x128xf32>
    %569 = arith.addf %567, %568 : vector<8x128xf32>
    %570 = arith.addf %504, %569 : vector<8x128xf32>
    %571 = arith.maximumf %505, %569 : vector<8x128xf32>
    %c9 = arith.constant 9 : index
    %c0_225 = arith.constant 0 : index
    %c0_226 = arith.constant 0 : index
    %572 = vector.load %arg12[%c9, %c0_225, %c0_226] : memref<16x8x384xf32, #tpu.memory_space<vmem>>, vector<1x8x384xf32>
    %573 = vector.shape_cast %572 : vector<1x8x384xf32> to vector<8x384xf32>
    %574 = arith.truncf %535 : vector<8x128xf32> to vector<8x128xbf16>
    %c0_227 = arith.constant 0 : index
    %c0_228 = arith.constant 0 : index
    %575 = vector.load %arg2[%c0_227, %c0_228] : memref<128x384xbf16, #tpu.memory_space<vmem>>, vector<128x384xbf16>
    %cst_229 = arith.constant dense<0.000000e+00> : vector<8x384xf32>
    %576 = tpu.matmul %574, %575, %cst_229 {dimension_numbers = #tpu.dot_dimension_numbers<[1], [0], [0], [1], [0, 0, 1, 1], [], []>} : vector<8x128xbf16>, vector<128x384xbf16>, vector<8x384xf32> -> vector<8x384xf32>
    %577 = vector.extract_strided_slice %573 {offsets = [0, 0], sizes = [8, 256], strides = [1, 1]} : vector<8x384xf32> to vector<8x256xf32>
    %578 = vector.extract_strided_slice %576 {offsets = [0, 0], sizes = [8, 256], strides = [1, 1]} : vector<8x384xf32> to vector<8x256xf32>
    %579 = arith.addf %577, %578 : vector<8x256xf32>
    %cst_230 = arith.constant 5.000000e-01 : f32
    %580 = vector.broadcast %cst_230 : f32 to vector<8x256xf32>
    %581 = arith.mulf %580, %579 : vector<8x256xf32>
    %582 = math.tanh %581 : vector<8x256xf32>
    %cst_231 = arith.constant 5.000000e-01 : f32
    %583 = vector.broadcast %cst_231 : f32 to vector<8x256xf32>
    %584 = arith.mulf %583, %582 : vector<8x256xf32>
    %cst_232 = arith.constant 5.000000e-01 : f32
    %585 = vector.broadcast %cst_232 : f32 to vector<8x256xf32>
    %586 = arith.addf %584, %585 : vector<8x256xf32>
    %587 = vector.extract_strided_slice %586 {offsets = [0, 0], sizes = [8, 128], strides = [1, 1]} : vector<8x256xf32> to vector<8x128xf32>
    %588 = vector.extract_strided_slice %586 {offsets = [0, 128], sizes = [8, 128], strides = [1, 1]} : vector<8x256xf32> to vector<8x128xf32>
    %589 = vector.extract_strided_slice %573 {offsets = [0, 256], sizes = [8, 128], strides = [1, 1]} : vector<8x384xf32> to vector<8x128xf32>
    %590 = vector.extract_strided_slice %576 {offsets = [0, 256], sizes = [8, 128], strides = [1, 1]} : vector<8x384xf32> to vector<8x128xf32>
    %c0_233 = arith.constant 0 : index
    %c0_234 = arith.constant 0 : index
    %591 = vector.load %arg4[%c0_233, %c0_234] : memref<1x128xf32, #tpu.memory_space<vmem>>, vector<1x128xf32>
    %592 = vector.broadcast %591 : vector<1x128xf32> to vector<8x128xf32>
    %593 = arith.addf %590, %592 : vector<8x128xf32>
    %594 = arith.mulf %587, %593 : vector<8x128xf32>
    %595 = arith.addf %589, %594 : vector<8x128xf32>
    %596 = math.tanh %595 : vector<8x128xf32>
    %cst_235 = arith.constant 1.000000e+00 : f32
    %597 = vector.broadcast %cst_235 : f32 to vector<8x128xf32>
    %598 = arith.subf %597, %588 : vector<8x128xf32>
    %599 = arith.mulf %598, %596 : vector<8x128xf32>
    %600 = arith.mulf %588, %535 : vector<8x128xf32>
    %601 = arith.addf %599, %600 : vector<8x128xf32>
    %602 = arith.truncf %535 : vector<8x128xf32> to vector<8x128xbf16>
    %c0_236 = arith.constant 0 : index
    %c0_237 = arith.constant 0 : index
    %603 = vector.load %arg5[%c0_236, %c0_237] : memref<128x384xbf16, #tpu.memory_space<vmem>>, vector<128x384xbf16>
    %cst_238 = arith.constant dense<0.000000e+00> : vector<8x384xf32>
    %604 = tpu.matmul %602, %603, %cst_238 {dimension_numbers = #tpu.dot_dimension_numbers<[1], [0], [0], [1], [0, 0, 1, 1], [], []>} : vector<8x128xbf16>, vector<128x384xbf16>, vector<8x384xf32> -> vector<8x384xf32>
    %c0_239 = arith.constant 0 : index
    %c0_240 = arith.constant 0 : index
    %605 = vector.load %arg7[%c0_239, %c0_240] : memref<1x384xf32, #tpu.memory_space<vmem>>, vector<1x384xf32>
    %606 = vector.broadcast %605 : vector<1x384xf32> to vector<8x384xf32>
    %607 = arith.addf %604, %606 : vector<8x384xf32>
    %608 = arith.truncf %569 : vector<8x128xf32> to vector<8x128xbf16>
    %c0_241 = arith.constant 0 : index
    %c0_242 = arith.constant 0 : index
    %609 = vector.load %arg6[%c0_241, %c0_242] : memref<128x384xbf16, #tpu.memory_space<vmem>>, vector<128x384xbf16>
    %cst_243 = arith.constant dense<0.000000e+00> : vector<8x384xf32>
    %610 = tpu.matmul %608, %609, %cst_243 {dimension_numbers = #tpu.dot_dimension_numbers<[1], [0], [0], [1], [0, 0, 1, 1], [], []>} : vector<8x128xbf16>, vector<128x384xbf16>, vector<8x384xf32> -> vector<8x384xf32>
    %611 = vector.extract_strided_slice %607 {offsets = [0, 0], sizes = [8, 256], strides = [1, 1]} : vector<8x384xf32> to vector<8x256xf32>
    %612 = vector.extract_strided_slice %610 {offsets = [0, 0], sizes = [8, 256], strides = [1, 1]} : vector<8x384xf32> to vector<8x256xf32>
    %613 = arith.addf %611, %612 : vector<8x256xf32>
    %cst_244 = arith.constant 5.000000e-01 : f32
    %614 = vector.broadcast %cst_244 : f32 to vector<8x256xf32>
    %615 = arith.mulf %614, %613 : vector<8x256xf32>
    %616 = math.tanh %615 : vector<8x256xf32>
    %cst_245 = arith.constant 5.000000e-01 : f32
    %617 = vector.broadcast %cst_245 : f32 to vector<8x256xf32>
    %618 = arith.mulf %617, %616 : vector<8x256xf32>
    %cst_246 = arith.constant 5.000000e-01 : f32
    %619 = vector.broadcast %cst_246 : f32 to vector<8x256xf32>
    %620 = arith.addf %618, %619 : vector<8x256xf32>
    %621 = vector.extract_strided_slice %620 {offsets = [0, 0], sizes = [8, 128], strides = [1, 1]} : vector<8x256xf32> to vector<8x128xf32>
    %622 = vector.extract_strided_slice %620 {offsets = [0, 128], sizes = [8, 128], strides = [1, 1]} : vector<8x256xf32> to vector<8x128xf32>
    %623 = vector.extract_strided_slice %607 {offsets = [0, 256], sizes = [8, 128], strides = [1, 1]} : vector<8x384xf32> to vector<8x128xf32>
    %624 = vector.extract_strided_slice %610 {offsets = [0, 256], sizes = [8, 128], strides = [1, 1]} : vector<8x384xf32> to vector<8x128xf32>
    %c0_247 = arith.constant 0 : index
    %c0_248 = arith.constant 0 : index
    %625 = vector.load %arg8[%c0_247, %c0_248] : memref<1x128xf32, #tpu.memory_space<vmem>>, vector<1x128xf32>
    %626 = vector.broadcast %625 : vector<1x128xf32> to vector<8x128xf32>
    %627 = arith.addf %624, %626 : vector<8x128xf32>
    %628 = arith.mulf %621, %627 : vector<8x128xf32>
    %629 = arith.addf %623, %628 : vector<8x128xf32>
    %630 = math.tanh %629 : vector<8x128xf32>
    %cst_249 = arith.constant 1.000000e+00 : f32
    %631 = vector.broadcast %cst_249 : f32 to vector<8x128xf32>
    %632 = arith.subf %631, %622 : vector<8x128xf32>
    %633 = arith.mulf %632, %630 : vector<8x128xf32>
    %634 = arith.mulf %622, %569 : vector<8x128xf32>
    %635 = arith.addf %633, %634 : vector<8x128xf32>
    %636 = arith.addf %570, %635 : vector<8x128xf32>
    %637 = arith.maximumf %571, %635 : vector<8x128xf32>
    %c10 = arith.constant 10 : index
    %c0_250 = arith.constant 0 : index
    %c0_251 = arith.constant 0 : index
    %638 = vector.load %arg12[%c10, %c0_250, %c0_251] : memref<16x8x384xf32, #tpu.memory_space<vmem>>, vector<1x8x384xf32>
    %639 = vector.shape_cast %638 : vector<1x8x384xf32> to vector<8x384xf32>
    %640 = arith.truncf %601 : vector<8x128xf32> to vector<8x128xbf16>
    %c0_252 = arith.constant 0 : index
    %c0_253 = arith.constant 0 : index
    %641 = vector.load %arg2[%c0_252, %c0_253] : memref<128x384xbf16, #tpu.memory_space<vmem>>, vector<128x384xbf16>
    %cst_254 = arith.constant dense<0.000000e+00> : vector<8x384xf32>
    %642 = tpu.matmul %640, %641, %cst_254 {dimension_numbers = #tpu.dot_dimension_numbers<[1], [0], [0], [1], [0, 0, 1, 1], [], []>} : vector<8x128xbf16>, vector<128x384xbf16>, vector<8x384xf32> -> vector<8x384xf32>
    %643 = vector.extract_strided_slice %639 {offsets = [0, 0], sizes = [8, 256], strides = [1, 1]} : vector<8x384xf32> to vector<8x256xf32>
    %644 = vector.extract_strided_slice %642 {offsets = [0, 0], sizes = [8, 256], strides = [1, 1]} : vector<8x384xf32> to vector<8x256xf32>
    %645 = arith.addf %643, %644 : vector<8x256xf32>
    %cst_255 = arith.constant 5.000000e-01 : f32
    %646 = vector.broadcast %cst_255 : f32 to vector<8x256xf32>
    %647 = arith.mulf %646, %645 : vector<8x256xf32>
    %648 = math.tanh %647 : vector<8x256xf32>
    %cst_256 = arith.constant 5.000000e-01 : f32
    %649 = vector.broadcast %cst_256 : f32 to vector<8x256xf32>
    %650 = arith.mulf %649, %648 : vector<8x256xf32>
    %cst_257 = arith.constant 5.000000e-01 : f32
    %651 = vector.broadcast %cst_257 : f32 to vector<8x256xf32>
    %652 = arith.addf %650, %651 : vector<8x256xf32>
    %653 = vector.extract_strided_slice %652 {offsets = [0, 0], sizes = [8, 128], strides = [1, 1]} : vector<8x256xf32> to vector<8x128xf32>
    %654 = vector.extract_strided_slice %652 {offsets = [0, 128], sizes = [8, 128], strides = [1, 1]} : vector<8x256xf32> to vector<8x128xf32>
    %655 = vector.extract_strided_slice %639 {offsets = [0, 256], sizes = [8, 128], strides = [1, 1]} : vector<8x384xf32> to vector<8x128xf32>
    %656 = vector.extract_strided_slice %642 {offsets = [0, 256], sizes = [8, 128], strides = [1, 1]} : vector<8x384xf32> to vector<8x128xf32>
    %c0_258 = arith.constant 0 : index
    %c0_259 = arith.constant 0 : index
    %657 = vector.load %arg4[%c0_258, %c0_259] : memref<1x128xf32, #tpu.memory_space<vmem>>, vector<1x128xf32>
    %658 = vector.broadcast %657 : vector<1x128xf32> to vector<8x128xf32>
    %659 = arith.addf %656, %658 : vector<8x128xf32>
    %660 = arith.mulf %653, %659 : vector<8x128xf32>
    %661 = arith.addf %655, %660 : vector<8x128xf32>
    %662 = math.tanh %661 : vector<8x128xf32>
    %cst_260 = arith.constant 1.000000e+00 : f32
    %663 = vector.broadcast %cst_260 : f32 to vector<8x128xf32>
    %664 = arith.subf %663, %654 : vector<8x128xf32>
    %665 = arith.mulf %664, %662 : vector<8x128xf32>
    %666 = arith.mulf %654, %601 : vector<8x128xf32>
    %667 = arith.addf %665, %666 : vector<8x128xf32>
    %668 = arith.truncf %601 : vector<8x128xf32> to vector<8x128xbf16>
    %c0_261 = arith.constant 0 : index
    %c0_262 = arith.constant 0 : index
    %669 = vector.load %arg5[%c0_261, %c0_262] : memref<128x384xbf16, #tpu.memory_space<vmem>>, vector<128x384xbf16>
    %cst_263 = arith.constant dense<0.000000e+00> : vector<8x384xf32>
    %670 = tpu.matmul %668, %669, %cst_263 {dimension_numbers = #tpu.dot_dimension_numbers<[1], [0], [0], [1], [0, 0, 1, 1], [], []>} : vector<8x128xbf16>, vector<128x384xbf16>, vector<8x384xf32> -> vector<8x384xf32>
    %c0_264 = arith.constant 0 : index
    %c0_265 = arith.constant 0 : index
    %671 = vector.load %arg7[%c0_264, %c0_265] : memref<1x384xf32, #tpu.memory_space<vmem>>, vector<1x384xf32>
    %672 = vector.broadcast %671 : vector<1x384xf32> to vector<8x384xf32>
    %673 = arith.addf %670, %672 : vector<8x384xf32>
    %674 = arith.truncf %635 : vector<8x128xf32> to vector<8x128xbf16>
    %c0_266 = arith.constant 0 : index
    %c0_267 = arith.constant 0 : index
    %675 = vector.load %arg6[%c0_266, %c0_267] : memref<128x384xbf16, #tpu.memory_space<vmem>>, vector<128x384xbf16>
    %cst_268 = arith.constant dense<0.000000e+00> : vector<8x384xf32>
    %676 = tpu.matmul %674, %675, %cst_268 {dimension_numbers = #tpu.dot_dimension_numbers<[1], [0], [0], [1], [0, 0, 1, 1], [], []>} : vector<8x128xbf16>, vector<128x384xbf16>, vector<8x384xf32> -> vector<8x384xf32>
    %677 = vector.extract_strided_slice %673 {offsets = [0, 0], sizes = [8, 256], strides = [1, 1]} : vector<8x384xf32> to vector<8x256xf32>
    %678 = vector.extract_strided_slice %676 {offsets = [0, 0], sizes = [8, 256], strides = [1, 1]} : vector<8x384xf32> to vector<8x256xf32>
    %679 = arith.addf %677, %678 : vector<8x256xf32>
    %cst_269 = arith.constant 5.000000e-01 : f32
    %680 = vector.broadcast %cst_269 : f32 to vector<8x256xf32>
    %681 = arith.mulf %680, %679 : vector<8x256xf32>
    %682 = math.tanh %681 : vector<8x256xf32>
    %cst_270 = arith.constant 5.000000e-01 : f32
    %683 = vector.broadcast %cst_270 : f32 to vector<8x256xf32>
    %684 = arith.mulf %683, %682 : vector<8x256xf32>
    %cst_271 = arith.constant 5.000000e-01 : f32
    %685 = vector.broadcast %cst_271 : f32 to vector<8x256xf32>
    %686 = arith.addf %684, %685 : vector<8x256xf32>
    %687 = vector.extract_strided_slice %686 {offsets = [0, 0], sizes = [8, 128], strides = [1, 1]} : vector<8x256xf32> to vector<8x128xf32>
    %688 = vector.extract_strided_slice %686 {offsets = [0, 128], sizes = [8, 128], strides = [1, 1]} : vector<8x256xf32> to vector<8x128xf32>
    %689 = vector.extract_strided_slice %673 {offsets = [0, 256], sizes = [8, 128], strides = [1, 1]} : vector<8x384xf32> to vector<8x128xf32>
    %690 = vector.extract_strided_slice %676 {offsets = [0, 256], sizes = [8, 128], strides = [1, 1]} : vector<8x384xf32> to vector<8x128xf32>
    %c0_272 = arith.constant 0 : index
    %c0_273 = arith.constant 0 : index
    %691 = vector.load %arg8[%c0_272, %c0_273] : memref<1x128xf32, #tpu.memory_space<vmem>>, vector<1x128xf32>
    %692 = vector.broadcast %691 : vector<1x128xf32> to vector<8x128xf32>
    %693 = arith.addf %690, %692 : vector<8x128xf32>
    %694 = arith.mulf %687, %693 : vector<8x128xf32>
    %695 = arith.addf %689, %694 : vector<8x128xf32>
    %696 = math.tanh %695 : vector<8x128xf32>
    %cst_274 = arith.constant 1.000000e+00 : f32
    %697 = vector.broadcast %cst_274 : f32 to vector<8x128xf32>
    %698 = arith.subf %697, %688 : vector<8x128xf32>
    %699 = arith.mulf %698, %696 : vector<8x128xf32>
    %700 = arith.mulf %688, %635 : vector<8x128xf32>
    %701 = arith.addf %699, %700 : vector<8x128xf32>
    %702 = arith.addf %636, %701 : vector<8x128xf32>
    %703 = arith.maximumf %637, %701 : vector<8x128xf32>
    %c11 = arith.constant 11 : index
    %c0_275 = arith.constant 0 : index
    %c0_276 = arith.constant 0 : index
    %704 = vector.load %arg12[%c11, %c0_275, %c0_276] : memref<16x8x384xf32, #tpu.memory_space<vmem>>, vector<1x8x384xf32>
    %705 = vector.shape_cast %704 : vector<1x8x384xf32> to vector<8x384xf32>
    %706 = arith.truncf %667 : vector<8x128xf32> to vector<8x128xbf16>
    %c0_277 = arith.constant 0 : index
    %c0_278 = arith.constant 0 : index
    %707 = vector.load %arg2[%c0_277, %c0_278] : memref<128x384xbf16, #tpu.memory_space<vmem>>, vector<128x384xbf16>
    %cst_279 = arith.constant dense<0.000000e+00> : vector<8x384xf32>
    %708 = tpu.matmul %706, %707, %cst_279 {dimension_numbers = #tpu.dot_dimension_numbers<[1], [0], [0], [1], [0, 0, 1, 1], [], []>} : vector<8x128xbf16>, vector<128x384xbf16>, vector<8x384xf32> -> vector<8x384xf32>
    %709 = vector.extract_strided_slice %705 {offsets = [0, 0], sizes = [8, 256], strides = [1, 1]} : vector<8x384xf32> to vector<8x256xf32>
    %710 = vector.extract_strided_slice %708 {offsets = [0, 0], sizes = [8, 256], strides = [1, 1]} : vector<8x384xf32> to vector<8x256xf32>
    %711 = arith.addf %709, %710 : vector<8x256xf32>
    %cst_280 = arith.constant 5.000000e-01 : f32
    %712 = vector.broadcast %cst_280 : f32 to vector<8x256xf32>
    %713 = arith.mulf %712, %711 : vector<8x256xf32>
    %714 = math.tanh %713 : vector<8x256xf32>
    %cst_281 = arith.constant 5.000000e-01 : f32
    %715 = vector.broadcast %cst_281 : f32 to vector<8x256xf32>
    %716 = arith.mulf %715, %714 : vector<8x256xf32>
    %cst_282 = arith.constant 5.000000e-01 : f32
    %717 = vector.broadcast %cst_282 : f32 to vector<8x256xf32>
    %718 = arith.addf %716, %717 : vector<8x256xf32>
    %719 = vector.extract_strided_slice %718 {offsets = [0, 0], sizes = [8, 128], strides = [1, 1]} : vector<8x256xf32> to vector<8x128xf32>
    %720 = vector.extract_strided_slice %718 {offsets = [0, 128], sizes = [8, 128], strides = [1, 1]} : vector<8x256xf32> to vector<8x128xf32>
    %721 = vector.extract_strided_slice %705 {offsets = [0, 256], sizes = [8, 128], strides = [1, 1]} : vector<8x384xf32> to vector<8x128xf32>
    %722 = vector.extract_strided_slice %708 {offsets = [0, 256], sizes = [8, 128], strides = [1, 1]} : vector<8x384xf32> to vector<8x128xf32>
    %c0_283 = arith.constant 0 : index
    %c0_284 = arith.constant 0 : index
    %723 = vector.load %arg4[%c0_283, %c0_284] : memref<1x128xf32, #tpu.memory_space<vmem>>, vector<1x128xf32>
    %724 = vector.broadcast %723 : vector<1x128xf32> to vector<8x128xf32>
    %725 = arith.addf %722, %724 : vector<8x128xf32>
    %726 = arith.mulf %719, %725 : vector<8x128xf32>
    %727 = arith.addf %721, %726 : vector<8x128xf32>
    %728 = math.tanh %727 : vector<8x128xf32>
    %cst_285 = arith.constant 1.000000e+00 : f32
    %729 = vector.broadcast %cst_285 : f32 to vector<8x128xf32>
    %730 = arith.subf %729, %720 : vector<8x128xf32>
    %731 = arith.mulf %730, %728 : vector<8x128xf32>
    %732 = arith.mulf %720, %667 : vector<8x128xf32>
    %733 = arith.addf %731, %732 : vector<8x128xf32>
    %734 = arith.truncf %667 : vector<8x128xf32> to vector<8x128xbf16>
    %c0_286 = arith.constant 0 : index
    %c0_287 = arith.constant 0 : index
    %735 = vector.load %arg5[%c0_286, %c0_287] : memref<128x384xbf16, #tpu.memory_space<vmem>>, vector<128x384xbf16>
    %cst_288 = arith.constant dense<0.000000e+00> : vector<8x384xf32>
    %736 = tpu.matmul %734, %735, %cst_288 {dimension_numbers = #tpu.dot_dimension_numbers<[1], [0], [0], [1], [0, 0, 1, 1], [], []>} : vector<8x128xbf16>, vector<128x384xbf16>, vector<8x384xf32> -> vector<8x384xf32>
    %c0_289 = arith.constant 0 : index
    %c0_290 = arith.constant 0 : index
    %737 = vector.load %arg7[%c0_289, %c0_290] : memref<1x384xf32, #tpu.memory_space<vmem>>, vector<1x384xf32>
    %738 = vector.broadcast %737 : vector<1x384xf32> to vector<8x384xf32>
    %739 = arith.addf %736, %738 : vector<8x384xf32>
    %740 = arith.truncf %701 : vector<8x128xf32> to vector<8x128xbf16>
    %c0_291 = arith.constant 0 : index
    %c0_292 = arith.constant 0 : index
    %741 = vector.load %arg6[%c0_291, %c0_292] : memref<128x384xbf16, #tpu.memory_space<vmem>>, vector<128x384xbf16>
    %cst_293 = arith.constant dense<0.000000e+00> : vector<8x384xf32>
    %742 = tpu.matmul %740, %741, %cst_293 {dimension_numbers = #tpu.dot_dimension_numbers<[1], [0], [0], [1], [0, 0, 1, 1], [], []>} : vector<8x128xbf16>, vector<128x384xbf16>, vector<8x384xf32> -> vector<8x384xf32>
    %743 = vector.extract_strided_slice %739 {offsets = [0, 0], sizes = [8, 256], strides = [1, 1]} : vector<8x384xf32> to vector<8x256xf32>
    %744 = vector.extract_strided_slice %742 {offsets = [0, 0], sizes = [8, 256], strides = [1, 1]} : vector<8x384xf32> to vector<8x256xf32>
    %745 = arith.addf %743, %744 : vector<8x256xf32>
    %cst_294 = arith.constant 5.000000e-01 : f32
    %746 = vector.broadcast %cst_294 : f32 to vector<8x256xf32>
    %747 = arith.mulf %746, %745 : vector<8x256xf32>
    %748 = math.tanh %747 : vector<8x256xf32>
    %cst_295 = arith.constant 5.000000e-01 : f32
    %749 = vector.broadcast %cst_295 : f32 to vector<8x256xf32>
    %750 = arith.mulf %749, %748 : vector<8x256xf32>
    %cst_296 = arith.constant 5.000000e-01 : f32
    %751 = vector.broadcast %cst_296 : f32 to vector<8x256xf32>
    %752 = arith.addf %750, %751 : vector<8x256xf32>
    %753 = vector.extract_strided_slice %752 {offsets = [0, 0], sizes = [8, 128], strides = [1, 1]} : vector<8x256xf32> to vector<8x128xf32>
    %754 = vector.extract_strided_slice %752 {offsets = [0, 128], sizes = [8, 128], strides = [1, 1]} : vector<8x256xf32> to vector<8x128xf32>
    %755 = vector.extract_strided_slice %739 {offsets = [0, 256], sizes = [8, 128], strides = [1, 1]} : vector<8x384xf32> to vector<8x128xf32>
    %756 = vector.extract_strided_slice %742 {offsets = [0, 256], sizes = [8, 128], strides = [1, 1]} : vector<8x384xf32> to vector<8x128xf32>
    %c0_297 = arith.constant 0 : index
    %c0_298 = arith.constant 0 : index
    %757 = vector.load %arg8[%c0_297, %c0_298] : memref<1x128xf32, #tpu.memory_space<vmem>>, vector<1x128xf32>
    %758 = vector.broadcast %757 : vector<1x128xf32> to vector<8x128xf32>
    %759 = arith.addf %756, %758 : vector<8x128xf32>
    %760 = arith.mulf %753, %759 : vector<8x128xf32>
    %761 = arith.addf %755, %760 : vector<8x128xf32>
    %762 = math.tanh %761 : vector<8x128xf32>
    %cst_299 = arith.constant 1.000000e+00 : f32
    %763 = vector.broadcast %cst_299 : f32 to vector<8x128xf32>
    %764 = arith.subf %763, %754 : vector<8x128xf32>
    %765 = arith.mulf %764, %762 : vector<8x128xf32>
    %766 = arith.mulf %754, %701 : vector<8x128xf32>
    %767 = arith.addf %765, %766 : vector<8x128xf32>
    %768 = arith.addf %702, %767 : vector<8x128xf32>
    %769 = arith.maximumf %703, %767 : vector<8x128xf32>
    %c12 = arith.constant 12 : index
    %c0_300 = arith.constant 0 : index
    %c0_301 = arith.constant 0 : index
    %770 = vector.load %arg12[%c12, %c0_300, %c0_301] : memref<16x8x384xf32, #tpu.memory_space<vmem>>, vector<1x8x384xf32>
    %771 = vector.shape_cast %770 : vector<1x8x384xf32> to vector<8x384xf32>
    %772 = arith.truncf %733 : vector<8x128xf32> to vector<8x128xbf16>
    %c0_302 = arith.constant 0 : index
    %c0_303 = arith.constant 0 : index
    %773 = vector.load %arg2[%c0_302, %c0_303] : memref<128x384xbf16, #tpu.memory_space<vmem>>, vector<128x384xbf16>
    %cst_304 = arith.constant dense<0.000000e+00> : vector<8x384xf32>
    %774 = tpu.matmul %772, %773, %cst_304 {dimension_numbers = #tpu.dot_dimension_numbers<[1], [0], [0], [1], [0, 0, 1, 1], [], []>} : vector<8x128xbf16>, vector<128x384xbf16>, vector<8x384xf32> -> vector<8x384xf32>
    %775 = vector.extract_strided_slice %771 {offsets = [0, 0], sizes = [8, 256], strides = [1, 1]} : vector<8x384xf32> to vector<8x256xf32>
    %776 = vector.extract_strided_slice %774 {offsets = [0, 0], sizes = [8, 256], strides = [1, 1]} : vector<8x384xf32> to vector<8x256xf32>
    %777 = arith.addf %775, %776 : vector<8x256xf32>
    %cst_305 = arith.constant 5.000000e-01 : f32
    %778 = vector.broadcast %cst_305 : f32 to vector<8x256xf32>
    %779 = arith.mulf %778, %777 : vector<8x256xf32>
    %780 = math.tanh %779 : vector<8x256xf32>
    %cst_306 = arith.constant 5.000000e-01 : f32
    %781 = vector.broadcast %cst_306 : f32 to vector<8x256xf32>
    %782 = arith.mulf %781, %780 : vector<8x256xf32>
    %cst_307 = arith.constant 5.000000e-01 : f32
    %783 = vector.broadcast %cst_307 : f32 to vector<8x256xf32>
    %784 = arith.addf %782, %783 : vector<8x256xf32>
    %785 = vector.extract_strided_slice %784 {offsets = [0, 0], sizes = [8, 128], strides = [1, 1]} : vector<8x256xf32> to vector<8x128xf32>
    %786 = vector.extract_strided_slice %784 {offsets = [0, 128], sizes = [8, 128], strides = [1, 1]} : vector<8x256xf32> to vector<8x128xf32>
    %787 = vector.extract_strided_slice %771 {offsets = [0, 256], sizes = [8, 128], strides = [1, 1]} : vector<8x384xf32> to vector<8x128xf32>
    %788 = vector.extract_strided_slice %774 {offsets = [0, 256], sizes = [8, 128], strides = [1, 1]} : vector<8x384xf32> to vector<8x128xf32>
    %c0_308 = arith.constant 0 : index
    %c0_309 = arith.constant 0 : index
    %789 = vector.load %arg4[%c0_308, %c0_309] : memref<1x128xf32, #tpu.memory_space<vmem>>, vector<1x128xf32>
    %790 = vector.broadcast %789 : vector<1x128xf32> to vector<8x128xf32>
    %791 = arith.addf %788, %790 : vector<8x128xf32>
    %792 = arith.mulf %785, %791 : vector<8x128xf32>
    %793 = arith.addf %787, %792 : vector<8x128xf32>
    %794 = math.tanh %793 : vector<8x128xf32>
    %cst_310 = arith.constant 1.000000e+00 : f32
    %795 = vector.broadcast %cst_310 : f32 to vector<8x128xf32>
    %796 = arith.subf %795, %786 : vector<8x128xf32>
    %797 = arith.mulf %796, %794 : vector<8x128xf32>
    %798 = arith.mulf %786, %733 : vector<8x128xf32>
    %799 = arith.addf %797, %798 : vector<8x128xf32>
    %800 = arith.truncf %733 : vector<8x128xf32> to vector<8x128xbf16>
    %c0_311 = arith.constant 0 : index
    %c0_312 = arith.constant 0 : index
    %801 = vector.load %arg5[%c0_311, %c0_312] : memref<128x384xbf16, #tpu.memory_space<vmem>>, vector<128x384xbf16>
    %cst_313 = arith.constant dense<0.000000e+00> : vector<8x384xf32>
    %802 = tpu.matmul %800, %801, %cst_313 {dimension_numbers = #tpu.dot_dimension_numbers<[1], [0], [0], [1], [0, 0, 1, 1], [], []>} : vector<8x128xbf16>, vector<128x384xbf16>, vector<8x384xf32> -> vector<8x384xf32>
    %c0_314 = arith.constant 0 : index
    %c0_315 = arith.constant 0 : index
    %803 = vector.load %arg7[%c0_314, %c0_315] : memref<1x384xf32, #tpu.memory_space<vmem>>, vector<1x384xf32>
    %804 = vector.broadcast %803 : vector<1x384xf32> to vector<8x384xf32>
    %805 = arith.addf %802, %804 : vector<8x384xf32>
    %806 = arith.truncf %767 : vector<8x128xf32> to vector<8x128xbf16>
    %c0_316 = arith.constant 0 : index
    %c0_317 = arith.constant 0 : index
    %807 = vector.load %arg6[%c0_316, %c0_317] : memref<128x384xbf16, #tpu.memory_space<vmem>>, vector<128x384xbf16>
    %cst_318 = arith.constant dense<0.000000e+00> : vector<8x384xf32>
    %808 = tpu.matmul %806, %807, %cst_318 {dimension_numbers = #tpu.dot_dimension_numbers<[1], [0], [0], [1], [0, 0, 1, 1], [], []>} : vector<8x128xbf16>, vector<128x384xbf16>, vector<8x384xf32> -> vector<8x384xf32>
    %809 = vector.extract_strided_slice %805 {offsets = [0, 0], sizes = [8, 256], strides = [1, 1]} : vector<8x384xf32> to vector<8x256xf32>
    %810 = vector.extract_strided_slice %808 {offsets = [0, 0], sizes = [8, 256], strides = [1, 1]} : vector<8x384xf32> to vector<8x256xf32>
    %811 = arith.addf %809, %810 : vector<8x256xf32>
    %cst_319 = arith.constant 5.000000e-01 : f32
    %812 = vector.broadcast %cst_319 : f32 to vector<8x256xf32>
    %813 = arith.mulf %812, %811 : vector<8x256xf32>
    %814 = math.tanh %813 : vector<8x256xf32>
    %cst_320 = arith.constant 5.000000e-01 : f32
    %815 = vector.broadcast %cst_320 : f32 to vector<8x256xf32>
    %816 = arith.mulf %815, %814 : vector<8x256xf32>
    %cst_321 = arith.constant 5.000000e-01 : f32
    %817 = vector.broadcast %cst_321 : f32 to vector<8x256xf32>
    %818 = arith.addf %816, %817 : vector<8x256xf32>
    %819 = vector.extract_strided_slice %818 {offsets = [0, 0], sizes = [8, 128], strides = [1, 1]} : vector<8x256xf32> to vector<8x128xf32>
    %820 = vector.extract_strided_slice %818 {offsets = [0, 128], sizes = [8, 128], strides = [1, 1]} : vector<8x256xf32> to vector<8x128xf32>
    %821 = vector.extract_strided_slice %805 {offsets = [0, 256], sizes = [8, 128], strides = [1, 1]} : vector<8x384xf32> to vector<8x128xf32>
    %822 = vector.extract_strided_slice %808 {offsets = [0, 256], sizes = [8, 128], strides = [1, 1]} : vector<8x384xf32> to vector<8x128xf32>
    %c0_322 = arith.constant 0 : index
    %c0_323 = arith.constant 0 : index
    %823 = vector.load %arg8[%c0_322, %c0_323] : memref<1x128xf32, #tpu.memory_space<vmem>>, vector<1x128xf32>
    %824 = vector.broadcast %823 : vector<1x128xf32> to vector<8x128xf32>
    %825 = arith.addf %822, %824 : vector<8x128xf32>
    %826 = arith.mulf %819, %825 : vector<8x128xf32>
    %827 = arith.addf %821, %826 : vector<8x128xf32>
    %828 = math.tanh %827 : vector<8x128xf32>
    %cst_324 = arith.constant 1.000000e+00 : f32
    %829 = vector.broadcast %cst_324 : f32 to vector<8x128xf32>
    %830 = arith.subf %829, %820 : vector<8x128xf32>
    %831 = arith.mulf %830, %828 : vector<8x128xf32>
    %832 = arith.mulf %820, %767 : vector<8x128xf32>
    %833 = arith.addf %831, %832 : vector<8x128xf32>
    %834 = arith.addf %768, %833 : vector<8x128xf32>
    %835 = arith.maximumf %769, %833 : vector<8x128xf32>
    %c13 = arith.constant 13 : index
    %c0_325 = arith.constant 0 : index
    %c0_326 = arith.constant 0 : index
    %836 = vector.load %arg12[%c13, %c0_325, %c0_326] : memref<16x8x384xf32, #tpu.memory_space<vmem>>, vector<1x8x384xf32>
    %837 = vector.shape_cast %836 : vector<1x8x384xf32> to vector<8x384xf32>
    %838 = arith.truncf %799 : vector<8x128xf32> to vector<8x128xbf16>
    %c0_327 = arith.constant 0 : index
    %c0_328 = arith.constant 0 : index
    %839 = vector.load %arg2[%c0_327, %c0_328] : memref<128x384xbf16, #tpu.memory_space<vmem>>, vector<128x384xbf16>
    %cst_329 = arith.constant dense<0.000000e+00> : vector<8x384xf32>
    %840 = tpu.matmul %838, %839, %cst_329 {dimension_numbers = #tpu.dot_dimension_numbers<[1], [0], [0], [1], [0, 0, 1, 1], [], []>} : vector<8x128xbf16>, vector<128x384xbf16>, vector<8x384xf32> -> vector<8x384xf32>
    %841 = vector.extract_strided_slice %837 {offsets = [0, 0], sizes = [8, 256], strides = [1, 1]} : vector<8x384xf32> to vector<8x256xf32>
    %842 = vector.extract_strided_slice %840 {offsets = [0, 0], sizes = [8, 256], strides = [1, 1]} : vector<8x384xf32> to vector<8x256xf32>
    %843 = arith.addf %841, %842 : vector<8x256xf32>
    %cst_330 = arith.constant 5.000000e-01 : f32
    %844 = vector.broadcast %cst_330 : f32 to vector<8x256xf32>
    %845 = arith.mulf %844, %843 : vector<8x256xf32>
    %846 = math.tanh %845 : vector<8x256xf32>
    %cst_331 = arith.constant 5.000000e-01 : f32
    %847 = vector.broadcast %cst_331 : f32 to vector<8x256xf32>
    %848 = arith.mulf %847, %846 : vector<8x256xf32>
    %cst_332 = arith.constant 5.000000e-01 : f32
    %849 = vector.broadcast %cst_332 : f32 to vector<8x256xf32>
    %850 = arith.addf %848, %849 : vector<8x256xf32>
    %851 = vector.extract_strided_slice %850 {offsets = [0, 0], sizes = [8, 128], strides = [1, 1]} : vector<8x256xf32> to vector<8x128xf32>
    %852 = vector.extract_strided_slice %850 {offsets = [0, 128], sizes = [8, 128], strides = [1, 1]} : vector<8x256xf32> to vector<8x128xf32>
    %853 = vector.extract_strided_slice %837 {offsets = [0, 256], sizes = [8, 128], strides = [1, 1]} : vector<8x384xf32> to vector<8x128xf32>
    %854 = vector.extract_strided_slice %840 {offsets = [0, 256], sizes = [8, 128], strides = [1, 1]} : vector<8x384xf32> to vector<8x128xf32>
    %c0_333 = arith.constant 0 : index
    %c0_334 = arith.constant 0 : index
    %855 = vector.load %arg4[%c0_333, %c0_334] : memref<1x128xf32, #tpu.memory_space<vmem>>, vector<1x128xf32>
    %856 = vector.broadcast %855 : vector<1x128xf32> to vector<8x128xf32>
    %857 = arith.addf %854, %856 : vector<8x128xf32>
    %858 = arith.mulf %851, %857 : vector<8x128xf32>
    %859 = arith.addf %853, %858 : vector<8x128xf32>
    %860 = math.tanh %859 : vector<8x128xf32>
    %cst_335 = arith.constant 1.000000e+00 : f32
    %861 = vector.broadcast %cst_335 : f32 to vector<8x128xf32>
    %862 = arith.subf %861, %852 : vector<8x128xf32>
    %863 = arith.mulf %862, %860 : vector<8x128xf32>
    %864 = arith.mulf %852, %799 : vector<8x128xf32>
    %865 = arith.addf %863, %864 : vector<8x128xf32>
    %866 = arith.truncf %799 : vector<8x128xf32> to vector<8x128xbf16>
    %c0_336 = arith.constant 0 : index
    %c0_337 = arith.constant 0 : index
    %867 = vector.load %arg5[%c0_336, %c0_337] : memref<128x384xbf16, #tpu.memory_space<vmem>>, vector<128x384xbf16>
    %cst_338 = arith.constant dense<0.000000e+00> : vector<8x384xf32>
    %868 = tpu.matmul %866, %867, %cst_338 {dimension_numbers = #tpu.dot_dimension_numbers<[1], [0], [0], [1], [0, 0, 1, 1], [], []>} : vector<8x128xbf16>, vector<128x384xbf16>, vector<8x384xf32> -> vector<8x384xf32>
    %c0_339 = arith.constant 0 : index
    %c0_340 = arith.constant 0 : index
    %869 = vector.load %arg7[%c0_339, %c0_340] : memref<1x384xf32, #tpu.memory_space<vmem>>, vector<1x384xf32>
    %870 = vector.broadcast %869 : vector<1x384xf32> to vector<8x384xf32>
    %871 = arith.addf %868, %870 : vector<8x384xf32>
    %872 = arith.truncf %833 : vector<8x128xf32> to vector<8x128xbf16>
    %c0_341 = arith.constant 0 : index
    %c0_342 = arith.constant 0 : index
    %873 = vector.load %arg6[%c0_341, %c0_342] : memref<128x384xbf16, #tpu.memory_space<vmem>>, vector<128x384xbf16>
    %cst_343 = arith.constant dense<0.000000e+00> : vector<8x384xf32>
    %874 = tpu.matmul %872, %873, %cst_343 {dimension_numbers = #tpu.dot_dimension_numbers<[1], [0], [0], [1], [0, 0, 1, 1], [], []>} : vector<8x128xbf16>, vector<128x384xbf16>, vector<8x384xf32> -> vector<8x384xf32>
    %875 = vector.extract_strided_slice %871 {offsets = [0, 0], sizes = [8, 256], strides = [1, 1]} : vector<8x384xf32> to vector<8x256xf32>
    %876 = vector.extract_strided_slice %874 {offsets = [0, 0], sizes = [8, 256], strides = [1, 1]} : vector<8x384xf32> to vector<8x256xf32>
    %877 = arith.addf %875, %876 : vector<8x256xf32>
    %cst_344 = arith.constant 5.000000e-01 : f32
    %878 = vector.broadcast %cst_344 : f32 to vector<8x256xf32>
    %879 = arith.mulf %878, %877 : vector<8x256xf32>
    %880 = math.tanh %879 : vector<8x256xf32>
    %cst_345 = arith.constant 5.000000e-01 : f32
    %881 = vector.broadcast %cst_345 : f32 to vector<8x256xf32>
    %882 = arith.mulf %881, %880 : vector<8x256xf32>
    %cst_346 = arith.constant 5.000000e-01 : f32
    %883 = vector.broadcast %cst_346 : f32 to vector<8x256xf32>
    %884 = arith.addf %882, %883 : vector<8x256xf32>
    %885 = vector.extract_strided_slice %884 {offsets = [0, 0], sizes = [8, 128], strides = [1, 1]} : vector<8x256xf32> to vector<8x128xf32>
    %886 = vector.extract_strided_slice %884 {offsets = [0, 128], sizes = [8, 128], strides = [1, 1]} : vector<8x256xf32> to vector<8x128xf32>
    %887 = vector.extract_strided_slice %871 {offsets = [0, 256], sizes = [8, 128], strides = [1, 1]} : vector<8x384xf32> to vector<8x128xf32>
    %888 = vector.extract_strided_slice %874 {offsets = [0, 256], sizes = [8, 128], strides = [1, 1]} : vector<8x384xf32> to vector<8x128xf32>
    %c0_347 = arith.constant 0 : index
    %c0_348 = arith.constant 0 : index
    %889 = vector.load %arg8[%c0_347, %c0_348] : memref<1x128xf32, #tpu.memory_space<vmem>>, vector<1x128xf32>
    %890 = vector.broadcast %889 : vector<1x128xf32> to vector<8x128xf32>
    %891 = arith.addf %888, %890 : vector<8x128xf32>
    %892 = arith.mulf %885, %891 : vector<8x128xf32>
    %893 = arith.addf %887, %892 : vector<8x128xf32>
    %894 = math.tanh %893 : vector<8x128xf32>
    %cst_349 = arith.constant 1.000000e+00 : f32
    %895 = vector.broadcast %cst_349 : f32 to vector<8x128xf32>
    %896 = arith.subf %895, %886 : vector<8x128xf32>
    %897 = arith.mulf %896, %894 : vector<8x128xf32>
    %898 = arith.mulf %886, %833 : vector<8x128xf32>
    %899 = arith.addf %897, %898 : vector<8x128xf32>
    %900 = arith.addf %834, %899 : vector<8x128xf32>
    %901 = arith.maximumf %835, %899 : vector<8x128xf32>
    %c14 = arith.constant 14 : index
    %c0_350 = arith.constant 0 : index
    %c0_351 = arith.constant 0 : index
    %902 = vector.load %arg12[%c14, %c0_350, %c0_351] : memref<16x8x384xf32, #tpu.memory_space<vmem>>, vector<1x8x384xf32>
    %903 = vector.shape_cast %902 : vector<1x8x384xf32> to vector<8x384xf32>
    %904 = arith.truncf %865 : vector<8x128xf32> to vector<8x128xbf16>
    %c0_352 = arith.constant 0 : index
    %c0_353 = arith.constant 0 : index
    %905 = vector.load %arg2[%c0_352, %c0_353] : memref<128x384xbf16, #tpu.memory_space<vmem>>, vector<128x384xbf16>
    %cst_354 = arith.constant dense<0.000000e+00> : vector<8x384xf32>
    %906 = tpu.matmul %904, %905, %cst_354 {dimension_numbers = #tpu.dot_dimension_numbers<[1], [0], [0], [1], [0, 0, 1, 1], [], []>} : vector<8x128xbf16>, vector<128x384xbf16>, vector<8x384xf32> -> vector<8x384xf32>
    %907 = vector.extract_strided_slice %903 {offsets = [0, 0], sizes = [8, 256], strides = [1, 1]} : vector<8x384xf32> to vector<8x256xf32>
    %908 = vector.extract_strided_slice %906 {offsets = [0, 0], sizes = [8, 256], strides = [1, 1]} : vector<8x384xf32> to vector<8x256xf32>
    %909 = arith.addf %907, %908 : vector<8x256xf32>
    %cst_355 = arith.constant 5.000000e-01 : f32
    %910 = vector.broadcast %cst_355 : f32 to vector<8x256xf32>
    %911 = arith.mulf %910, %909 : vector<8x256xf32>
    %912 = math.tanh %911 : vector<8x256xf32>
    %cst_356 = arith.constant 5.000000e-01 : f32
    %913 = vector.broadcast %cst_356 : f32 to vector<8x256xf32>
    %914 = arith.mulf %913, %912 : vector<8x256xf32>
    %cst_357 = arith.constant 5.000000e-01 : f32
    %915 = vector.broadcast %cst_357 : f32 to vector<8x256xf32>
    %916 = arith.addf %914, %915 : vector<8x256xf32>
    %917 = vector.extract_strided_slice %916 {offsets = [0, 0], sizes = [8, 128], strides = [1, 1]} : vector<8x256xf32> to vector<8x128xf32>
    %918 = vector.extract_strided_slice %916 {offsets = [0, 128], sizes = [8, 128], strides = [1, 1]} : vector<8x256xf32> to vector<8x128xf32>
    %919 = vector.extract_strided_slice %903 {offsets = [0, 256], sizes = [8, 128], strides = [1, 1]} : vector<8x384xf32> to vector<8x128xf32>
    %920 = vector.extract_strided_slice %906 {offsets = [0, 256], sizes = [8, 128], strides = [1, 1]} : vector<8x384xf32> to vector<8x128xf32>
    %c0_358 = arith.constant 0 : index
    %c0_359 = arith.constant 0 : index
    %921 = vector.load %arg4[%c0_358, %c0_359] : memref<1x128xf32, #tpu.memory_space<vmem>>, vector<1x128xf32>
    %922 = vector.broadcast %921 : vector<1x128xf32> to vector<8x128xf32>
    %923 = arith.addf %920, %922 : vector<8x128xf32>
    %924 = arith.mulf %917, %923 : vector<8x128xf32>
    %925 = arith.addf %919, %924 : vector<8x128xf32>
    %926 = math.tanh %925 : vector<8x128xf32>
    %cst_360 = arith.constant 1.000000e+00 : f32
    %927 = vector.broadcast %cst_360 : f32 to vector<8x128xf32>
    %928 = arith.subf %927, %918 : vector<8x128xf32>
    %929 = arith.mulf %928, %926 : vector<8x128xf32>
    %930 = arith.mulf %918, %865 : vector<8x128xf32>
    %931 = arith.addf %929, %930 : vector<8x128xf32>
    %932 = arith.truncf %865 : vector<8x128xf32> to vector<8x128xbf16>
    %c0_361 = arith.constant 0 : index
    %c0_362 = arith.constant 0 : index
    %933 = vector.load %arg5[%c0_361, %c0_362] : memref<128x384xbf16, #tpu.memory_space<vmem>>, vector<128x384xbf16>
    %cst_363 = arith.constant dense<0.000000e+00> : vector<8x384xf32>
    %934 = tpu.matmul %932, %933, %cst_363 {dimension_numbers = #tpu.dot_dimension_numbers<[1], [0], [0], [1], [0, 0, 1, 1], [], []>} : vector<8x128xbf16>, vector<128x384xbf16>, vector<8x384xf32> -> vector<8x384xf32>
    %c0_364 = arith.constant 0 : index
    %c0_365 = arith.constant 0 : index
    %935 = vector.load %arg7[%c0_364, %c0_365] : memref<1x384xf32, #tpu.memory_space<vmem>>, vector<1x384xf32>
    %936 = vector.broadcast %935 : vector<1x384xf32> to vector<8x384xf32>
    %937 = arith.addf %934, %936 : vector<8x384xf32>
    %938 = arith.truncf %899 : vector<8x128xf32> to vector<8x128xbf16>
    %c0_366 = arith.constant 0 : index
    %c0_367 = arith.constant 0 : index
    %939 = vector.load %arg6[%c0_366, %c0_367] : memref<128x384xbf16, #tpu.memory_space<vmem>>, vector<128x384xbf16>
    %cst_368 = arith.constant dense<0.000000e+00> : vector<8x384xf32>
    %940 = tpu.matmul %938, %939, %cst_368 {dimension_numbers = #tpu.dot_dimension_numbers<[1], [0], [0], [1], [0, 0, 1, 1], [], []>} : vector<8x128xbf16>, vector<128x384xbf16>, vector<8x384xf32> -> vector<8x384xf32>
    %941 = vector.extract_strided_slice %937 {offsets = [0, 0], sizes = [8, 256], strides = [1, 1]} : vector<8x384xf32> to vector<8x256xf32>
    %942 = vector.extract_strided_slice %940 {offsets = [0, 0], sizes = [8, 256], strides = [1, 1]} : vector<8x384xf32> to vector<8x256xf32>
    %943 = arith.addf %941, %942 : vector<8x256xf32>
    %cst_369 = arith.constant 5.000000e-01 : f32
    %944 = vector.broadcast %cst_369 : f32 to vector<8x256xf32>
    %945 = arith.mulf %944, %943 : vector<8x256xf32>
    %946 = math.tanh %945 : vector<8x256xf32>
    %cst_370 = arith.constant 5.000000e-01 : f32
    %947 = vector.broadcast %cst_370 : f32 to vector<8x256xf32>
    %948 = arith.mulf %947, %946 : vector<8x256xf32>
    %cst_371 = arith.constant 5.000000e-01 : f32
    %949 = vector.broadcast %cst_371 : f32 to vector<8x256xf32>
    %950 = arith.addf %948, %949 : vector<8x256xf32>
    %951 = vector.extract_strided_slice %950 {offsets = [0, 0], sizes = [8, 128], strides = [1, 1]} : vector<8x256xf32> to vector<8x128xf32>
    %952 = vector.extract_strided_slice %950 {offsets = [0, 128], sizes = [8, 128], strides = [1, 1]} : vector<8x256xf32> to vector<8x128xf32>
    %953 = vector.extract_strided_slice %937 {offsets = [0, 256], sizes = [8, 128], strides = [1, 1]} : vector<8x384xf32> to vector<8x128xf32>
    %954 = vector.extract_strided_slice %940 {offsets = [0, 256], sizes = [8, 128], strides = [1, 1]} : vector<8x384xf32> to vector<8x128xf32>
    %c0_372 = arith.constant 0 : index
    %c0_373 = arith.constant 0 : index
    %955 = vector.load %arg8[%c0_372, %c0_373] : memref<1x128xf32, #tpu.memory_space<vmem>>, vector<1x128xf32>
    %956 = vector.broadcast %955 : vector<1x128xf32> to vector<8x128xf32>
    %957 = arith.addf %954, %956 : vector<8x128xf32>
    %958 = arith.mulf %951, %957 : vector<8x128xf32>
    %959 = arith.addf %953, %958 : vector<8x128xf32>
    %960 = math.tanh %959 : vector<8x128xf32>
    %cst_374 = arith.constant 1.000000e+00 : f32
    %961 = vector.broadcast %cst_374 : f32 to vector<8x128xf32>
    %962 = arith.subf %961, %952 : vector<8x128xf32>
    %963 = arith.mulf %962, %960 : vector<8x128xf32>
    %964 = arith.mulf %952, %899 : vector<8x128xf32>
    %965 = arith.addf %963, %964 : vector<8x128xf32>
    %966 = arith.addf %900, %965 : vector<8x128xf32>
    %967 = arith.maximumf %901, %965 : vector<8x128xf32>
    %c15 = arith.constant 15 : index
    %c0_375 = arith.constant 0 : index
    %c0_376 = arith.constant 0 : index
    %968 = vector.load %arg12[%c15, %c0_375, %c0_376] : memref<16x8x384xf32, #tpu.memory_space<vmem>>, vector<1x8x384xf32>
    %969 = vector.shape_cast %968 : vector<1x8x384xf32> to vector<8x384xf32>
    %970 = arith.truncf %931 : vector<8x128xf32> to vector<8x128xbf16>
    %c0_377 = arith.constant 0 : index
    %c0_378 = arith.constant 0 : index
    %971 = vector.load %arg2[%c0_377, %c0_378] : memref<128x384xbf16, #tpu.memory_space<vmem>>, vector<128x384xbf16>
    %cst_379 = arith.constant dense<0.000000e+00> : vector<8x384xf32>
    %972 = tpu.matmul %970, %971, %cst_379 {dimension_numbers = #tpu.dot_dimension_numbers<[1], [0], [0], [1], [0, 0, 1, 1], [], []>} : vector<8x128xbf16>, vector<128x384xbf16>, vector<8x384xf32> -> vector<8x384xf32>
    %973 = vector.extract_strided_slice %969 {offsets = [0, 0], sizes = [8, 256], strides = [1, 1]} : vector<8x384xf32> to vector<8x256xf32>
    %974 = vector.extract_strided_slice %972 {offsets = [0, 0], sizes = [8, 256], strides = [1, 1]} : vector<8x384xf32> to vector<8x256xf32>
    %975 = arith.addf %973, %974 : vector<8x256xf32>
    %cst_380 = arith.constant 5.000000e-01 : f32
    %976 = vector.broadcast %cst_380 : f32 to vector<8x256xf32>
    %977 = arith.mulf %976, %975 : vector<8x256xf32>
    %978 = math.tanh %977 : vector<8x256xf32>
    %cst_381 = arith.constant 5.000000e-01 : f32
    %979 = vector.broadcast %cst_381 : f32 to vector<8x256xf32>
    %980 = arith.mulf %979, %978 : vector<8x256xf32>
    %cst_382 = arith.constant 5.000000e-01 : f32
    %981 = vector.broadcast %cst_382 : f32 to vector<8x256xf32>
    %982 = arith.addf %980, %981 : vector<8x256xf32>
    %983 = vector.extract_strided_slice %982 {offsets = [0, 0], sizes = [8, 128], strides = [1, 1]} : vector<8x256xf32> to vector<8x128xf32>
    %984 = vector.extract_strided_slice %982 {offsets = [0, 128], sizes = [8, 128], strides = [1, 1]} : vector<8x256xf32> to vector<8x128xf32>
    %985 = vector.extract_strided_slice %969 {offsets = [0, 256], sizes = [8, 128], strides = [1, 1]} : vector<8x384xf32> to vector<8x128xf32>
    %986 = vector.extract_strided_slice %972 {offsets = [0, 256], sizes = [8, 128], strides = [1, 1]} : vector<8x384xf32> to vector<8x128xf32>
    %c0_383 = arith.constant 0 : index
    %c0_384 = arith.constant 0 : index
    %987 = vector.load %arg4[%c0_383, %c0_384] : memref<1x128xf32, #tpu.memory_space<vmem>>, vector<1x128xf32>
    %988 = vector.broadcast %987 : vector<1x128xf32> to vector<8x128xf32>
    %989 = arith.addf %986, %988 : vector<8x128xf32>
    %990 = arith.mulf %983, %989 : vector<8x128xf32>
    %991 = arith.addf %985, %990 : vector<8x128xf32>
    %992 = math.tanh %991 : vector<8x128xf32>
    %cst_385 = arith.constant 1.000000e+00 : f32
    %993 = vector.broadcast %cst_385 : f32 to vector<8x128xf32>
    %994 = arith.subf %993, %984 : vector<8x128xf32>
    %995 = arith.mulf %994, %992 : vector<8x128xf32>
    %996 = arith.mulf %984, %931 : vector<8x128xf32>
    %997 = arith.addf %995, %996 : vector<8x128xf32>
    %998 = arith.truncf %931 : vector<8x128xf32> to vector<8x128xbf16>
    %c0_386 = arith.constant 0 : index
    %c0_387 = arith.constant 0 : index
    %999 = vector.load %arg5[%c0_386, %c0_387] : memref<128x384xbf16, #tpu.memory_space<vmem>>, vector<128x384xbf16>
    %cst_388 = arith.constant dense<0.000000e+00> : vector<8x384xf32>
    %1000 = tpu.matmul %998, %999, %cst_388 {dimension_numbers = #tpu.dot_dimension_numbers<[1], [0], [0], [1], [0, 0, 1, 1], [], []>} : vector<8x128xbf16>, vector<128x384xbf16>, vector<8x384xf32> -> vector<8x384xf32>
    %c0_389 = arith.constant 0 : index
    %c0_390 = arith.constant 0 : index
    %1001 = vector.load %arg7[%c0_389, %c0_390] : memref<1x384xf32, #tpu.memory_space<vmem>>, vector<1x384xf32>
    %1002 = vector.broadcast %1001 : vector<1x384xf32> to vector<8x384xf32>
    %1003 = arith.addf %1000, %1002 : vector<8x384xf32>
    %1004 = arith.truncf %965 : vector<8x128xf32> to vector<8x128xbf16>
    %c0_391 = arith.constant 0 : index
    %c0_392 = arith.constant 0 : index
    %1005 = vector.load %arg6[%c0_391, %c0_392] : memref<128x384xbf16, #tpu.memory_space<vmem>>, vector<128x384xbf16>
    %cst_393 = arith.constant dense<0.000000e+00> : vector<8x384xf32>
    %1006 = tpu.matmul %1004, %1005, %cst_393 {dimension_numbers = #tpu.dot_dimension_numbers<[1], [0], [0], [1], [0, 0, 1, 1], [], []>} : vector<8x128xbf16>, vector<128x384xbf16>, vector<8x384xf32> -> vector<8x384xf32>
    %1007 = vector.extract_strided_slice %1003 {offsets = [0, 0], sizes = [8, 256], strides = [1, 1]} : vector<8x384xf32> to vector<8x256xf32>
    %1008 = vector.extract_strided_slice %1006 {offsets = [0, 0], sizes = [8, 256], strides = [1, 1]} : vector<8x384xf32> to vector<8x256xf32>
    %1009 = arith.addf %1007, %1008 : vector<8x256xf32>
    %cst_394 = arith.constant 5.000000e-01 : f32
    %1010 = vector.broadcast %cst_394 : f32 to vector<8x256xf32>
    %1011 = arith.mulf %1010, %1009 : vector<8x256xf32>
    %1012 = math.tanh %1011 : vector<8x256xf32>
    %cst_395 = arith.constant 5.000000e-01 : f32
    %1013 = vector.broadcast %cst_395 : f32 to vector<8x256xf32>
    %1014 = arith.mulf %1013, %1012 : vector<8x256xf32>
    %cst_396 = arith.constant 5.000000e-01 : f32
    %1015 = vector.broadcast %cst_396 : f32 to vector<8x256xf32>
    %1016 = arith.addf %1014, %1015 : vector<8x256xf32>
    %1017 = vector.extract_strided_slice %1016 {offsets = [0, 0], sizes = [8, 128], strides = [1, 1]} : vector<8x256xf32> to vector<8x128xf32>
    %1018 = vector.extract_strided_slice %1016 {offsets = [0, 128], sizes = [8, 128], strides = [1, 1]} : vector<8x256xf32> to vector<8x128xf32>
    %1019 = vector.extract_strided_slice %1003 {offsets = [0, 256], sizes = [8, 128], strides = [1, 1]} : vector<8x384xf32> to vector<8x128xf32>
    %1020 = vector.extract_strided_slice %1006 {offsets = [0, 256], sizes = [8, 128], strides = [1, 1]} : vector<8x384xf32> to vector<8x128xf32>
    %c0_397 = arith.constant 0 : index
    %c0_398 = arith.constant 0 : index
    %1021 = vector.load %arg8[%c0_397, %c0_398] : memref<1x128xf32, #tpu.memory_space<vmem>>, vector<1x128xf32>
    %1022 = vector.broadcast %1021 : vector<1x128xf32> to vector<8x128xf32>
    %1023 = arith.addf %1020, %1022 : vector<8x128xf32>
    %1024 = arith.mulf %1017, %1023 : vector<8x128xf32>
    %1025 = arith.addf %1019, %1024 : vector<8x128xf32>
    %1026 = math.tanh %1025 : vector<8x128xf32>
    %cst_399 = arith.constant 1.000000e+00 : f32
    %1027 = vector.broadcast %cst_399 : f32 to vector<8x128xf32>
    %1028 = arith.subf %1027, %1018 : vector<8x128xf32>
    %1029 = arith.mulf %1028, %1026 : vector<8x128xf32>
    %1030 = arith.mulf %1018, %965 : vector<8x128xf32>
    %1031 = arith.addf %1029, %1030 : vector<8x128xf32>
    %1032 = arith.addf %966, %1031 : vector<8x128xf32>
    %1033 = arith.maximumf %967, %1031 : vector<8x128xf32>
    %1034 = arith.truncf %997 : vector<8x128xf32> to vector<8x128xbf16>
    %c0_400 = arith.constant 0 : index
    %c0_401 = arith.constant 0 : index
    %1035 = vector.load %arg5[%c0_400, %c0_401] : memref<128x384xbf16, #tpu.memory_space<vmem>>, vector<128x384xbf16>
    %cst_402 = arith.constant dense<0.000000e+00> : vector<8x384xf32>
    %1036 = tpu.matmul %1034, %1035, %cst_402 {dimension_numbers = #tpu.dot_dimension_numbers<[1], [0], [0], [1], [0, 0, 1, 1], [], []>} : vector<8x128xbf16>, vector<128x384xbf16>, vector<8x384xf32> -> vector<8x384xf32>
    %c0_403 = arith.constant 0 : index
    %c0_404 = arith.constant 0 : index
    %1037 = vector.load %arg7[%c0_403, %c0_404] : memref<1x384xf32, #tpu.memory_space<vmem>>, vector<1x384xf32>
    %1038 = vector.broadcast %1037 : vector<1x384xf32> to vector<8x384xf32>
    %1039 = arith.addf %1036, %1038 : vector<8x384xf32>
    %1040 = arith.truncf %1031 : vector<8x128xf32> to vector<8x128xbf16>
    %c0_405 = arith.constant 0 : index
    %c0_406 = arith.constant 0 : index
    %1041 = vector.load %arg6[%c0_405, %c0_406] : memref<128x384xbf16, #tpu.memory_space<vmem>>, vector<128x384xbf16>
    %cst_407 = arith.constant dense<0.000000e+00> : vector<8x384xf32>
    %1042 = tpu.matmul %1040, %1041, %cst_407 {dimension_numbers = #tpu.dot_dimension_numbers<[1], [0], [0], [1], [0, 0, 1, 1], [], []>} : vector<8x128xbf16>, vector<128x384xbf16>, vector<8x384xf32> -> vector<8x384xf32>
    %1043 = vector.extract_strided_slice %1039 {offsets = [0, 0], sizes = [8, 256], strides = [1, 1]} : vector<8x384xf32> to vector<8x256xf32>
    %1044 = vector.extract_strided_slice %1042 {offsets = [0, 0], sizes = [8, 256], strides = [1, 1]} : vector<8x384xf32> to vector<8x256xf32>
    %1045 = arith.addf %1043, %1044 : vector<8x256xf32>
    %cst_408 = arith.constant 5.000000e-01 : f32
    %1046 = vector.broadcast %cst_408 : f32 to vector<8x256xf32>
    %1047 = arith.mulf %1046, %1045 : vector<8x256xf32>
    %1048 = math.tanh %1047 : vector<8x256xf32>
    %cst_409 = arith.constant 5.000000e-01 : f32
    %1049 = vector.broadcast %cst_409 : f32 to vector<8x256xf32>
    %1050 = arith.mulf %1049, %1048 : vector<8x256xf32>
    %cst_410 = arith.constant 5.000000e-01 : f32
    %1051 = vector.broadcast %cst_410 : f32 to vector<8x256xf32>
    %1052 = arith.addf %1050, %1051 : vector<8x256xf32>
    %1053 = vector.extract_strided_slice %1052 {offsets = [0, 0], sizes = [8, 128], strides = [1, 1]} : vector<8x256xf32> to vector<8x128xf32>
    %1054 = vector.extract_strided_slice %1052 {offsets = [0, 128], sizes = [8, 128], strides = [1, 1]} : vector<8x256xf32> to vector<8x128xf32>
    %1055 = vector.extract_strided_slice %1039 {offsets = [0, 256], sizes = [8, 128], strides = [1, 1]} : vector<8x384xf32> to vector<8x128xf32>
    %1056 = vector.extract_strided_slice %1042 {offsets = [0, 256], sizes = [8, 128], strides = [1, 1]} : vector<8x384xf32> to vector<8x128xf32>
    %c0_411 = arith.constant 0 : index
    %c0_412 = arith.constant 0 : index
    %1057 = vector.load %arg8[%c0_411, %c0_412] : memref<1x128xf32, #tpu.memory_space<vmem>>, vector<1x128xf32>
    %1058 = vector.broadcast %1057 : vector<1x128xf32> to vector<8x128xf32>
    %1059 = arith.addf %1056, %1058 : vector<8x128xf32>
    %1060 = arith.mulf %1053, %1059 : vector<8x128xf32>
    %1061 = arith.addf %1055, %1060 : vector<8x128xf32>
    %1062 = math.tanh %1061 : vector<8x128xf32>
    %cst_413 = arith.constant 1.000000e+00 : f32
    %1063 = vector.broadcast %cst_413 : f32 to vector<8x128xf32>
    %1064 = arith.subf %1063, %1054 : vector<8x128xf32>
    %1065 = arith.mulf %1064, %1062 : vector<8x128xf32>
    %1066 = arith.mulf %1054, %1031 : vector<8x128xf32>
    %1067 = arith.addf %1065, %1066 : vector<8x128xf32>
    %1068 = arith.addf %1032, %1067 : vector<8x128xf32>
    %1069 = arith.maximumf %1033, %1067 : vector<8x128xf32>
    %cst_414 = arith.constant 6.250000e-02 : f32
    %1070 = vector.broadcast %cst_414 : f32 to vector<8x128xf32>
    %1071 = arith.mulf %1068, %1070 : vector<8x128xf32>
    %1072 = tpu.concatenate %1071, %1069 in 1 : vector<8x128xf32>, vector<8x128xf32> -> vector<8x256xf32>
    %1073 = arith.truncf %1072 : vector<8x256xf32> to vector<8x256xbf16>
    %c0_415 = arith.constant 0 : index
    %c0_416 = arith.constant 0 : index
    %1074 = vector.load %arg9[%c0_415, %c0_416] : memref<256x128xbf16, #tpu.memory_space<vmem>>, vector<256x128xbf16>
    %cst_417 = arith.constant dense<0.000000e+00> : vector<8x128xf32>
    %1075 = tpu.matmul %1073, %1074, %cst_417 {dimension_numbers = #tpu.dot_dimension_numbers<[1], [0], [0], [1], [0, 0, 1, 1], [], []>} : vector<8x256xbf16>, vector<256x128xbf16>, vector<8x128xf32> -> vector<8x128xf32>
    %c0_418 = arith.constant 0 : index
    %c0_419 = arith.constant 0 : index
    %1076 = vector.load %arg10[%c0_418, %c0_419] : memref<1x128xf32, #tpu.memory_space<vmem>>, vector<1x128xf32>
    %1077 = vector.broadcast %1076 : vector<1x128xf32> to vector<8x128xf32>
    %1078 = arith.addf %1075, %1077 : vector<8x128xf32>
    %c0_420 = arith.constant 0 : index
    %c0_421 = arith.constant 0 : index
    %1079 = vector.load %arg11[%c0_420, %c0_421] : memref<8x128xf32, #tpu.memory_space<vmem>>, vector<8x128xf32>
    tpu.vector_store %arg11[%c0_420, %c0_421], %1078 {strides = array<i32>} : memref<8x128xf32, #tpu.memory_space<vmem>>, vector<8x128xf32>,
    return
  }
}

</mosaic_0001>

<bundles_post_ra>
// kernel: gru_max_avg_forward.1
= control target key start
LH: loop header
LB: loop body
LE: loop exit
PB: predicated region body
PF: predicated region fallthrough
CT: control target
= control target key end

     0   :  { %16 = vsyncpa [#allocation4], 0  ;;  %s6695_s0 = inlined_call_operand.vmem [shape: f32[16,8,128], index: 0, kind: input, shape index: {}]   ;;  %s6696_s1 = inlined_call_operand.vmem [shape: bf16[128,384], index: 1, kind: input, shape index: {}]   ;;  %s6697_s2 = inlined_call_operand.hbm [shape: bf16[128,384], index: 2, kind: input, shape index: {}]   ;;  %s6698_s3 = inlined_call_operand.vmem [shape: f32[1,384], index: 3, kind: input, shape index: {}]   ;;  %s6699_s4 = inlined_call_operand.vmem [shape: f32[1,128], index: 4, kind: input, shape index: {}]   ;;  %s6700_s5 = inlined_call_operand.hbm [shape: bf16[128,384], index: 5, kind: input, shape index: {}]   ;;  %s6701_s6 = inlined_call_operand.hbm [shape: bf16[128,384], index: 6, kind: input, shape index: {}]   ;;  %s6702_s7 = inlined_call_operand.vmem [shape: f32[1,384], index: 7, kind: input, shape index: {}]   ;;  %s6703_s8 = inlined_call_operand.vmem [shape: f32[1,128], index: 8, kind: input, shape index: {}]   ;;  %s6704_s9 = inlined_call_operand.hbm [shape: bf16[256,128], index: 9, kind: input, shape index: {}]   ;;  %s6705_s10 = inlined_call_operand.vmem [shape: f32[1,128], index: 10, kind: input, shape index: {}]   ;;  %s6706_s11 = inlined_call_operand.vmem [shape: f32[8,128], index: 11, kind: output, shape index: {}]  }
   0x1   :  { %17 = vsyncpa [#allocation6], 0 }
   0x2   :  { %18 = vsyncpa [#allocation9], 0  ;;  %s44_s19 = sshll.u32 %s6700_s5, 4  ;;  %s4599_s20 = smov [#allocation5]   ;;  %s45_s19 = int_to_ptr.hbm [resolvable:$true] %s44_s19 }
   0x3   :  { %s46_s21 = sshll.u32 %s4599_s20, 4  ;;  %s27_s24 = sshll.u32 %s6697_s2, 4  ;;  %s47_s21 = int_to_ptr.vmem [resolvable:$true] %s46_s21  ;;  %s28_s24 = int_to_ptr.hbm [resolvable:$true] %s27_s24 }
   0x4   :  { %s4600_s25 = smov 192   ;;  %s4601_s26 = smov 12  }
   0x5   :  { %52 = dma.hbm_to_vmem [thread:$0]  %s45_s19, 3072, %s47_s21, [#allocation6], %s4600_s25, %s4600_s25, %s4601_s26  }
   0x6   :  { %s4602_s27 = smov [#allocation3]   ;;  %s57_s12 = sshll.u32 %s6701_s6, 4  ;;  %s58_s12 = int_to_ptr.hbm [resolvable:$true] %s57_s12 }
   0x7   :  { %s29_s28 = sshll.u32 %s4602_s27, 4  ;;  %s74_s14 = sshll.u32 %s6704_s9, 4  ;;  %s30_s28 = int_to_ptr.vmem [resolvable:$true] %s29_s28  ;;  %s75_s14 = int_to_ptr.hbm [resolvable:$true] %s74_s14 }
   0x8   :  { %35 = dma.hbm_to_vmem [thread:$0]  %s28_s24, 3072, %s30_s28, [#allocation4], %s4600_s25, %s4600_s25, %s4601_s26  }
   0x9   :  { %s4603_s15 = smov [#allocation7]   ;;  %s4604_s2 = smov [#allocation8]  }
   0xa   :  { %s59_s16 = sshll.u32 %s4603_s15, 4  ;;  %s76_s17 = sshll.u32 %s4604_s2, 4  ;;  %s60_s16 = int_to_ptr.vmem [resolvable:$true] %s59_s16  ;;  %s77_s17 = int_to_ptr.vmem [resolvable:$true] %s76_s17 }
   0xb   :  { %65 = dma.hbm_to_vmem [thread:$0]  %s58_s12, 3072, %s60_s16, [#allocation6], %s4600_s25, %s4600_s25, %s4601_s26  }
   0xc   :  { %s4605_s18 = smov 64   ;;  %s4606_s19 = smov 4  }
   0xd   :  { %82 = dma.hbm_to_vmem [thread:$0]  %s75_s14, 2048, %s77_s17, [#allocation9], %s4605_s18, %s4605_s18, %s4606_s19  }
   0xe   :  { %4593 = dma.done.wait [#allocation4], 3072  }
   0xf   :  { %4594 = vsyncadd [#allocation4], 4294964224 }
  0x10   :  { %4595 = dma.done.wait [#allocation6], 6144  }
  0x11   :  { %4596 = vsyncadd [#allocation6], 4294961152 }
  0x12   :  { %4597 = dma.done.wait [#allocation9], 2048  }
  0x13   :  { %4598 = vsyncadd [#allocation9], 4294965248  ;;  %v3909_v0 = vld [vmem:[#allocation3 + $0xa8] sm:$0xf]  ;;  %v4221_v1 = vld [vmem:[#allocation3 + $0xb0] sm:$0xf0] }
  0x14   :  { %v3897_v2 = vld [vmem:[#allocation3 + $0x90] sm:$0xf]  ;;  %v4680_v3 = vor.u32 %v4221_v1, %v3909_v0  ;;  %v4218_v4 = vld [vmem:[#allocation3 + $0x98] sm:$0xf0]  ;;  %v3885_v6 = vld [vmem:[#allocation3 + $0x78] sm:$0xf] }
  0x15   :  { %v4683_v5 = vor.u32 %v4218_v4, %v3897_v2  ;;  %v4215_v7 = vld [vmem:[#allocation3 + $0x80] sm:$0xf0]  ;;  %v3813_v8 = vld [vmem:[%s6696_s1 + $0xa8] sm:$0xf]  ;;  %v4197_v9 = vld [vmem:[%s6696_s1 + $0xb0] sm:$0xf0] }
  0x16   :  { %652 = vmatpush.bf16.msra.mxu3 %v4680_v3  ;;  %v4692_v10 = vor.u32 %v4215_v7, %v3885_v6  ;;  %v3814_v11 = vor.u32 %v4197_v9, %v3813_v8  ;;  %v3801_v12 = vld [vmem:[%s6696_s1 + $0x90] sm:$0xf]  ;;  %v4194_v13 = vld [vmem:[%s6696_s1 + $0x98] sm:$0xf0]  ;;  %v3873_v14 = vld [vmem:[#allocation3 + $0x60] sm:$0xf] }
  0x17   :  { %v4212_v15 = vld [vmem:[#allocation3 + $0x68] sm:$0xf0]  ;;  %v3802_v16 = vor.u32 %v4194_v13, %v3801_v12  ;;  %v3789_v17 = vld [vmem:[%s6696_s1 + $0x78] sm:$0xf]  ;;  %v4191_v18 = vld [vmem:[%s6696_s1 + $0x80] sm:$0xf0] }
  0x18   :  { %294 = vmatpush.bf16.msra.mxu0 %v3814_v11  ;;  %v4707_v19 = vor.u32 %v4212_v15, %v3873_v14  ;;  %v3861_v20 = vld [vmem:[#allocation3 + $0x48] sm:$0xf]  ;;  %v4209_v21 = vld [vmem:[#allocation3 + $0x50] sm:$0xf0]  ;;  %v3790_v22 = vor.u32 %v4191_v18, %v3789_v17  ;;  %v3777_v23 = vld [vmem:[%s6696_s1 + $0x60] sm:$0xf] }
  0x19   :  { %v4188_v24 = vld [vmem:[%s6696_s1 + $0x68] sm:$0xf0]  ;;  %v4719_v26 = vor.u32 %v4209_v21, %v3861_v20  ;;  %v3815_v27 = vld [vmem:[%s6696_s1 + $0xb4] sm:$0xf0]  ;;  %v3849_v28 = vld [vmem:[#allocation3 + $0x30] sm:$0xf] }
  0x1a   :  { %653 = vmatpush.bf16.msra.mxu3 %v4683_v5  ;;  %v4196_v25 = vld [vmem:[%s6696_s1 + $0xac] sm:$0xf]  ;;  %v4206_v29 = vld [vmem:[#allocation3 + $0x38] sm:$0xf0]  ;;  %v3778_v31 = vor.u32 %v4188_v24, %v3777_v23  ;;  %v3765_v32 = vld [vmem:[%s6696_s1 + $0x48] sm:$0xf] }
  0x1b   :  { %v3818_v30 = vor.u32 %v4196_v25, %v3815_v27  ;;  %v4185_v33 = vld [vmem:[%s6696_s1 + $0x50] sm:$0xf0]  ;;  %v4734_v35 = vor.u32 %v4206_v29, %v3849_v28  ;;  %v3837_v36 = vld [vmem:[#allocation3 + $0x18] sm:$0xf]  ;;  %v3803_v37 = vld [vmem:[%s6696_s1 + $0x9c] sm:$0xf0] }
  0x1c   :  { %295 = vmatpush.bf16.msra.mxu0 %v3802_v16  ;;  %v4193_v34 = vld [vmem:[%s6696_s1 + $0x94] sm:$0xf]  ;;  %v4203_v38 = vld [vmem:[#allocation3 + $0x20] sm:$0xf0]  ;;  %v3821_v40 = vld [vmem:[%s6696_s1 + $0xb0] sm:$0xf]  ;;  %v3766_v42 = vor.u32 %v4185_v33, %v3765_v32 }
  0x1d   :  { %343 = vmatpush.bf16.msra.mxu1 %v3818_v30  ;;  %v3806_v39 = vor.u32 %v4193_v34, %v3803_v37  ;;  %v4198_v41 = vld [vmem:[%s6696_s1 + $0xb8] sm:$0xf0]  ;;  %v3753_v44 = vld [vmem:[%s6696_s1 + $0x30] sm:$0xf]  ;;  %v4755_v47 = vor.u32 %v4203_v38, %v3837_v36  ;;  %v3825_v48 = vld [vmem:[#allocation3] sm:$0xf] }
  0x1e   :  { %654 = vmatpush.bf16.msra.mxu3 %v4692_v10  ;;  %v3822_v43 = vor.u32 %v4198_v41, %v3821_v40  ;;  %v4182_v45 = vld [vmem:[%s6696_s1 + $0x38] sm:$0xf0]  ;;  %v3791_v49 = vld [vmem:[%s6696_s1 + $0x84] sm:$0xf0]  ;;  %v4200_v50 = vld [vmem:[#allocation3 + $0x8] sm:$0xf0] }
  0x1f   :  { %v4190_v46 = vld [vmem:[%s6696_s1 + $0x7c] sm:$0xf]  ;;  %v3809_v52 = vld [vmem:[%s6696_s1 + $0x98] sm:$0xf]  ;;  %v4195_v53 = vld [vmem:[%s6696_s1 + $0xa0] sm:$0xf0]  ;;  %v3754_v56 = vor.u32 %v4182_v45, %v3753_v44  ;;  %v4776_v61 = vor.u32 %v4200_v50, %v3825_v48 }
  0x20   :  { %296 = vmatpush.bf16.msra.mxu0 %v3790_v22  ;;  %392 = vmatpush.bf16.msra.mxu2 %v3822_v43  ;;  %v3794_v51 = vor.u32 %v4190_v46, %v3791_v49  ;;  %v4220_v54 = vld [vmem:[#allocation3 + $0xac] sm:$0xf]  ;;  %v3911_v55 = vld [vmem:[#allocation3 + $0xb4] sm:$0xf0]  ;;  %v3810_v57 = vor.u32 %v4195_v53, %v3809_v52  ;;  %v4179_v59 = vld [vmem:[%s6696_s1 + $0x20] sm:$0xf0] }
  0x21   :  { %344 = vmatpush.bf16.msra.mxu1 %v3806_v39  ;;  %v3741_v58 = vld [vmem:[%s6696_s1 + $0x18] sm:$0xf]  ;;  %v4187_v60 = vld [vmem:[%s6696_s1 + $0x64] sm:$0xf]  ;;  %v3779_v62 = vld [vmem:[%s6696_s1 + $0x6c] sm:$0xf0]  ;;  %v4781_v63 = vor.u32 %v4220_v54, %v3911_v55 }
  0x22   :  { %655 = vmatpush.bf16.msra.mxu3 %v4707_v19  ;;  %v3782_v0 = vor.u32 %v4187_v60, %v3779_v62  ;;  %v3797_v1 = vld [vmem:[%s6696_s1 + $0x80] sm:$0xf]  ;;  %v4192_v2 = vld [vmem:[%s6696_s1 + $0x88] sm:$0xf0]  ;;  %v4217_v4 = vld [vmem:[#allocation3 + $0x94] sm:$0xf]  ;;  %v3742_v7 = vor.u32 %v4179_v59, %v3741_v58 }
  0x23   :  { %v3899_v6 = vld [vmem:[#allocation3 + $0x9c] sm:$0xf0]  ;;  %v3798_v8 = vor.u32 %v4192_v2, %v3797_v1  ;;  %v4184_v9 = vld [vmem:[%s6696_s1 + $0x4c] sm:$0xf]  ;;  %v3767_v13 = vld [vmem:[%s6696_s1 + $0x54] sm:$0xf0] }
  0x24   :  { %297 = vmatpush.bf16.msra.mxu0 %v3778_v31  ;;  %393 = vmatpush.bf16.msra.mxu2 %v3810_v57  ;;  %v3729_v11 = vld [vmem:[%s6696_s1] sm:$0xf]  ;;  %v4176_v12 = vld [vmem:[%s6696_s1 + $0x8] sm:$0xf0]  ;;  %v4214_v14 = vld [vmem:[#allocation3 + $0x7c] sm:$0xf]  ;;  %v3770_v16 = vor.u32 %v4184_v9, %v3767_v13  ;;  %v4803_v17 = vor.u32 %v4217_v4, %v3899_v6 }
  0x25   :  { %345 = vmatpush.bf16.msra.mxu1 %v3794_v51  ;;  %v3887_v15 = vld [vmem:[#allocation3 + $0x84] sm:$0xf0]  ;;  %v102_v18 = vld [vmem:[%s6695_s0] sm:$0xff]  ;;  %v4189_v21 = vld [vmem:[%s6696_s1 + $0x70] sm:$0xf0]  ;;  %v3730_v22 = vor.u32 %v4176_v12, %v3729_v11  ;;  %v6707_v28 = vmov 0  }
  0x26   :  { %656 = vmatpush.bf16.msra.mxu3 %v4719_v26  ;;  %v3785_v20 = vld [vmem:[%s6696_s1 + $0x68] sm:$0xf]  ;;  %v4181_v25 = vld [vmem:[%s6696_s1 + $0x34] sm:$0xf]  ;;  %v3755_v27 = vld [vmem:[%s6696_s1 + $0x3c] sm:$0xf0]  ;;  %v4825_v30 = vor.u32 %v4214_v14, %v3887_v15 }
  0x27   :  { %v103_v23 = vld [vmem:[%s6695_s0 + $0x8] sm:$0xff]  ;;  %v3786_v24 = vor.u32 %v4189_v21, %v3785_v20  ;;  %v3758_v29 = vor.u32 %v4181_v25, %v3755_v27  ;;  %v4211_v31 = vld [vmem:[#allocation3 + $0x64] sm:$0xf]  ;;  %v3773_v33 = vld [vmem:[%s6696_s1 + $0x50] sm:$0xf] }
  0x28   :  { %298 = vmatpush.bf16.msra.mxu0 %v3766_v42  ;;  %394 = vmatpush.bf16.msra.mxu2 %v3798_v8  ;;  %v118_v32 = vpack.c.bf16 %v103_v23, %v102_v18  ;;  %v4186_v34 = vld [vmem:[%s6696_s1 + $0x58] sm:$0xf0]  ;;  %v3875_v36 = vld [vmem:[#allocation3 + $0x6c] sm:$0xf0]  ;;  %v3743_v39 = vld [vmem:[%s6696_s1 + $0x24] sm:$0xf0] }
  0x29   :  { %346 = vmatpush.bf16.msra.mxu1 %v3782_v0  ;;  %v3774_v37 = vor.u32 %v4186_v34, %v3773_v33  ;;  %v4178_v38 = vld [vmem:[%s6696_s1 + $0x1c] sm:$0xf]  ;;  %v4841_v41 = vor.u32 %v4211_v31, %v3875_v36  ;;  %v4208_v42 = vld [vmem:[#allocation3 + $0x4c] sm:$0xf]  ;;  %v3761_v43 = vld [vmem:[%s6696_s1 + $0x38] sm:$0xf] }
  0x2a   :  { %657 = vmatpush.bf16.msra.mxu3 %v4734_v35  ;;  %v3746_v40 = vor.u32 %v4178_v38, %v3743_v39  ;;  %v4183_v44 = vld [vmem:[%s6696_s1 + $0x40] sm:$0xf0]  ;;  %v3863_v45 = vld [vmem:[#allocation3 + $0x54] sm:$0xf0]  ;;  %v3731_v49 = vld [vmem:[%s6696_s1 + $0xc] sm:$0xf0] }
  0x2b   :  { %v3762_v46 = vor.u32 %v4183_v44, %v3761_v43  ;;  %v4175_v48 = vld [vmem:[%s6696_s1 + $0x4] sm:$0xf]  ;;  %v3917_v50 = vld [vmem:[#allocation3 + $0xb0] sm:$0xf]  ;;  %v4222_v51 = vld [vmem:[#allocation3 + $0xb8] sm:$0xf0]  ;;  %v4857_v53 = vor.u32 %v4208_v42, %v3863_v45 }
  0x2c   :  { %299 = vmatpush.bf16.msra.mxu0 %v3754_v56  ;;  %395 = vmatpush.bf16.msra.mxu2 %v3786_v24  ;;  %v3734_v52 = vor.u32 %v4175_v48, %v3731_v49  ;;  %v3749_v54 = vld [vmem:[%s6696_s1 + $0x20] sm:$0xf]  ;;  %v4180_v55 = vld [vmem:[%s6696_s1 + $0x28] sm:$0xf0]  ;;  %v4205_v56 = vld [vmem:[#allocation3 + $0x34] sm:$0xf]  ;;  %v4865_v58 = vor.u32 %v4222_v51, %v3917_v50 }
  0x2d   :  { %347 = vmatpush.bf16.msra.mxu1 %v3770_v16  ;;  %v3851_v57 = vld [vmem:[#allocation3 + $0x3c] sm:$0xf0]  ;;  %v3750_v59 = vor.u32 %v4180_v55, %v3749_v54  ;;  %v3905_v60 = vld [vmem:[#allocation3 + $0x98] sm:$0xf]  ;;  %v4219_v62 = vld [vmem:[#allocation3 + $0xa0] sm:$0xf0] }
  0x2e   :  { %658 = vmatpush.bf16.msra.mxu3 %v4755_v47  ;;  %v4870_v0 = vor.u32 %v4205_v56, %v3851_v57  ;;  %v3737_v1 = vld [vmem:[%s6696_s1 + $0x8] sm:$0xf]  ;;  %v4177_v2 = vld [vmem:[%s6696_s1 + $0x10] sm:$0xf0]  ;;  %v4202_v4 = vld [vmem:[#allocation3 + $0x1c] sm:$0xf] }
  0x2f   :  { %v3839_v6 = vld [vmem:[#allocation3 + $0x24] sm:$0xf0]  ;;  %v3738_v8 = vor.u32 %v4177_v2, %v3737_v1  ;;  %v3893_v9 = vld [vmem:[#allocation3 + $0x80] sm:$0xf]  ;;  %v4216_v11 = vld [vmem:[#allocation3 + $0x88] sm:$0xf0] }
  0x30   :  { %300 = vmatpush.bf16.msra.mxu0 %v3742_v7  ;;  %396 = vmatpush.bf16.msra.mxu2 %v3774_v37  ;;  %v4878_v7 = vor.u32 %v4219_v62, %v3905_v60  ;;  %v4883_v12 = vor.u32 %v4202_v4, %v3839_v6  ;;  %v4199_v13 = vld [vmem:[#allocation3 + $0x4] sm:$0xf]  ;;  %v3827_v14 = vld [vmem:[#allocation3 + $0xc] sm:$0xf0]  ;;  %v4885_v15 = vor.u32 %v4216_v11, %v3893_v9  ;;  %v3881_v16 = vld [vmem:[#allocation3 + $0x68] sm:$0xf] }
  0x31   :  { %348 = vmatpush.bf16.msra.mxu1 %v3758_v29  ;;  %v4213_v18 = vld [vmem:[#allocation3 + $0x70] sm:$0xf0]  ;;  %v4890_v20 = vor.u32 %v4199_v13, %v3827_v14  ;;  %v4210_v23 = vld [vmem:[#allocation3 + $0x58] sm:$0xf0]  ;;  %v4005_v24 = vld [vmem:[#allocation5 + $0xa8] sm:$0xf] }
  0x32   :  { %659 = vmatpush.bf16.msra.mxu3 %v4776_v61  ;;  %v4892_v21 = vor.u32 %v4213_v18, %v3881_v16  ;;  %v4245_v25 = vld [vmem:[#allocation5 + $0xb0] sm:$0xf0]  ;;  %v105_v31 = vld [vmem:[%s6695_s0 + $0x18] sm:$0xff]  ;;  %v4207_v38 = vld [vmem:[#allocation3 + $0x40] sm:$0xf0] }
  0x33   :  { %v104_v27 = vld [vmem:[%s6695_s0 + $0x10] sm:$0xff]  ;;  %v4901_v29 = vor.u32 %v4245_v25, %v4005_v24  ;;  %v4242_v33 = vld [vmem:[#allocation5 + $0x98] sm:$0xf0]  ;;  %v3857_v37 = vld [vmem:[#allocation3 + $0x38] sm:$0xf] }
  0x34   :  { %301 = vmatpush.bf16.msra.mxu0 %v3730_v22  ;;  %397 = vmatpush.bf16.msra.mxu2 %v3762_v46  ;;  %v3869_v22 = vld [vmem:[#allocation3 + $0x50] sm:$0xf]  ;;  %v119_v36 = vpack.c.bf16 %v105_v31, %v104_v27  ;;  %v4239_v42 = vld [vmem:[#allocation5 + $0x80] sm:$0xf0]  ;;  %v4915_v43 = vor.u32 %v4207_v38, %v3857_v37  ;;  %v3845_v44 = vld [vmem:[#allocation3 + $0x20] sm:$0xf] }
  0x35   :  { %660 = vmatmul.bf16.vlgmr.msra.gmra.mxu3 %v6707_v28  ;;  %349 = vmatpush.bf16.msra.mxu1 %v3746_v40  ;;  %v4906_v34 = vor.u32 %v4210_v23, %v3869_v22  ;;  %v3981_v40 = vld [vmem:[#allocation5 + $0x78] sm:$0xf]  ;;  %v4204_v45 = vld [vmem:[#allocation3 + $0x28] sm:$0xf0]  ;;  %v3969_v49 = vld [vmem:[#allocation5 + $0x60] sm:$0xf] }
  0x36   :  { %665 = vmatpush.bf16.msrb.mxu3 %v4781_v63  ;;  %v4919_v46 = vor.u32 %v4239_v42, %v3981_v40  ;;  %v4923_v48 = vor.u32 %v4204_v45, %v3845_v44  ;;  %v4236_v50 = vld [vmem:[#allocation5 + $0x68] sm:$0xf0]  ;;  %v3833_v51 = vld [vmem:[#allocation3 + $0x8] sm:$0xf]  ;;  %v106_v55 = vld [vmem:[%s6695_s0 + $0x20] sm:$0xff] }
  0x37   :  { %302 = vmatmul.bf16.vlgmr.msra.gmra.mxu0 %v118_v32  ;;  %v4926_v54 = vor.u32 %v4236_v50, %v3969_v49  ;;  %v107_v56 = vld [vmem:[%s6695_s0 + $0x28] sm:$0xff]  ;;  %v108_v60 = vld [vmem:[%s6695_s0 + $0x30] sm:$0xff]  ;;  %v109_v62 = vld [vmem:[%s6695_s0 + $0x38] sm:$0xff] }
  0x38   :  { %731 = vmatpush.bf16.msrb.mxu0 %v4781_v63  ;;  %398 = vmatpush.bf16.msra.mxu2 %v3750_v59  ;;  %6840 = vst [vmem:[#allocation14_spill] sm:$0xff] %v4919_v46  ;;  %v120_v59 = vpack.c.bf16 %v107_v56, %v106_v55  ;;  %v121_v1 = vpack.c.bf16 %v109_v62, %v108_v60  ;;  %v110_v2 = vld [vmem:[%s6695_s0 + $0x40] sm:$0xff]  ;;  %v111_v4 = vld [vmem:[%s6695_s0 + $0x48] sm:$0xff]  ;;  %v4233_v9 = vld [vmem:[#allocation5 + $0x50] sm:$0xf0] }
  0x39   :  { %350 = vmatpush.bf16.msra.mxu1 %v3734_v52  ;;  %v4201_v52 = vld [vmem:[#allocation3 + $0x10] sm:$0xf0]  ;;  %6841 = vst [vmem:[#allocation15_spill] sm:$0xff] %v4926_v54  ;;  %v122_v6 = vpack.c.bf16 %v111_v4, %v110_v2  ;;  %v113_v14 = vld [vmem:[%s6695_s0 + $0x58] sm:$0xff]  ;;  %v114_v23 = vld [vmem:[%s6695_s0 + $0x60] sm:$0xff] }
  0x3a   :  { %666 = vmatpush.bf16.msrb.mxu3 %v4803_v17  ;;  %v4936_v57 = vor.u32 %v4201_v52, %v3833_v51  ;;  %v112_v11 = vld [vmem:[%s6695_s0 + $0x50] sm:$0xff]  ;;  %v115_v24 = vld [vmem:[%s6695_s0 + $0x68] sm:$0xff]  ;;  %v4230_v31 = vld [vmem:[#allocation5 + $0x38] sm:$0xf0] }
  0x3b   :  { %v123_v16 = vpack.c.bf16 %v113_v14, %v112_v11  ;;  %v124_v25 = vpack.c.bf16 %v115_v24, %v114_v23  ;;  %v3945_v27 = vld [vmem:[#allocation5 + $0x30] sm:$0xf]  ;;  %v4241_v37 = vld [vmem:[#allocation5 + $0x94] sm:$0xf]  ;;  %v3995_v40 = vld [vmem:[#allocation5 + $0x9c] sm:$0xf0] }
  0x3c   :  { %732 = vmatpush.bf16.msrb.mxu0 %v4803_v17  ;;  %351 = vmatmul.bf16.vlgmr.msra.gmra.mxu1 %v118_v32  ;;  %v4988_v42 = vor.u32 %v4241_v37, %v3995_v40  ;;  %v4238_v44 = vld [vmem:[#allocation5 + $0x7c] sm:$0xf]  ;;  %v3983_v45 = vld [vmem:[#allocation5 + $0x84] sm:$0xf0]  ;;  %v4994_v49 = vld [vmem:[%s6698_s3] sm:$0x7] }
  0x3d   :  { %744 = vmatpush.bf16.msrb.mxu1 %v4865_v58  ;;  %399 = vmatpush.bf16.msra.mxu2 %v3738_v8  ;;  %v3957_v8 = vld [vmem:[#allocation5 + $0x48] sm:$0xf]  ;;  %v4996_v50 = vor.u32 %v4238_v44, %v3983_v45  ;;  %v3933_v51 = vld [vmem:[#allocation5 + $0x18] sm:$0xf]  ;;  %v4227_v52 = vld [vmem:[#allocation5 + $0x20] sm:$0xf0] }
  0x3e   :  { %667 = vmatpush.bf16.msrb.mxu3 %v4825_v30  ;;  %v4968_v13 = vor.u32 %v4233_v9, %v3957_v8  ;;  %6844 = vst [vmem:[#allocation18_spill] sm:$0xff] %v4988_v42  ;;  %v4998_v55 = vor.u32 %v4227_v52, %v3933_v51  ;;  %v5002_v56 = vperm.slane %v4994_v49, 0  ;;  %v117_v60 = vld [vmem:[%s6695_s0 + $0x78] sm:$0xff]  ;;  %v4235_v62 = vld [vmem:[#allocation5 + $0x64] sm:$0xf] }
  0x3f   :  { %6845 = vst [vmem:[#allocation19_spill] sm:$0xff] %v4996_v50  ;;  %v3971_v2 = vld [vmem:[#allocation5 + $0x6c] sm:$0xf0]  ;;  %v4101_v14 = vld [vmem:[#allocation7 + $0xa8] sm:$0xf] }
  0x40   :  { %733 = vmatpush.bf16.msrb.mxu0 %v4825_v30  ;;  %400 = vmatmul.bf16.vlgmr.msra.gmra.mxu2 %v118_v32  ;;  %v3993_v32 = vld [vmem:[#allocation5 + $0x90] sm:$0xf]  ;;  %6842 = vst [vmem:[#allocation16_spill] sm:$0xff] %v4968_v13  ;;  %v5013_v9 = vor.u32 %v4235_v62, %v3971_v2  ;;  %v4232_v37 = vld [vmem:[#allocation5 + $0x4c] sm:$0xf] }
  0x41   :  { %745 = vmatpush.bf16.msrb.mxu1 %v4878_v7  ;;  %943 = vmatpush.bf16.msrb.mxu2 %v4901_v29  ;;  %v4911_v39 = vor.u32 %v4242_v33, %v3993_v32  ;;  %v4244_v32 = vld [vmem:[#allocation5 + $0xac] sm:$0xf]  ;;  %v4982_v33 = vor.u32 %v4230_v31, %v3945_v27  ;;  %6846 = vst [vmem:[#allocation20_spill] sm:$0xff] %v4998_v55  ;;  %v4013_v4 = vld [vmem:[#allocation5 + $0xb0] sm:$0xf] }
  0x42   :  { %668 = vmatpush.bf16.msrb.mxu3 %v4841_v41  ;;  %6847 = vst [vmem:[#allocation21_spill] sm:$0xff] %v5002_v56  ;;  %v4268_v27 = vld [vmem:[#allocation7 + $0xac] sm:$0xf]  ;;  %v4103_v31 = vld [vmem:[#allocation7 + $0xb4] sm:$0xf0] }
  0x43   :  { %6839 = vst [vmem:[#allocation13_spill] sm:$0xff] %v4911_v39  ;;  %v3959_v40 = vld [vmem:[#allocation5 + $0x54] sm:$0xf0]  ;;  %v4243_v51 = vld [vmem:[#allocation5 + $0xa0] sm:$0xf0] }
  0x44   :  { %734 = vmatpush.bf16.msrb.mxu0 %v4841_v41  ;;  %6843 = vst [vmem:[#allocation17_spill] sm:$0xff] %v4982_v33  ;;  %v5026_v44 = vor.u32 %v4232_v37, %v3959_v40  ;;  %v4001_v45 = vld [vmem:[#allocation5 + $0x98] sm:$0xf]  ;;  %v4266_v62 = vld [vmem:[#allocation7 + $0x98] sm:$0xf0]  ;;  %v5044_v37 = vperm.slane %v4994_v49, 1 }
  0x45   :  { %746 = vmatpush.bf16.msrb.mxu1 %v4885_v15  ;;  %944 = vmatpush.bf16.msrb.mxu2 %v4911_v39  ;;  %6848 = vst [vmem:[#allocation22_spill] sm:$0xff] %v5013_v9  ;;  %v4265_v2 = vld [vmem:[#allocation7 + $0x94] sm:$0xf] }
  0x46   :  { %669 = vmatpush.bf16.msrb.mxu3 %v4857_v53  ;;  %6852 = vst [vmem:[#allocation26_spill] sm:$0xff] %v5026_v44 }
  0x47   :  { %307 = vmatmul.bf16.gmra.mxu0 %v119_v36  ;;  %6857 = vst [vmem:[#allocation31_spill] sm:$0xff] %v5044_v37 }
  0x48   :  { %735 = vmatpush.bf16.msrb.mxu0 %v4857_v53 }
  0x49   :  { %747 = vmatpush.bf16.msrb.mxu1 %v4892_v21  ;;  %945 = vmatpush.bf16.msrb.mxu2 %v4919_v46 }
  0x4a   :  { %670 = vmatpush.bf16.msrb.mxu3 %v4870_v0 }
  0x4c   :  { %736 = vmatpush.bf16.msrb.mxu0 %v4870_v0  ;;  %356 = vmatmul.bf16.gmra.mxu1 %v119_v36 }
  0x4d   :  { %748 = vmatpush.bf16.msrb.mxu1 %v4906_v34  ;;  %946 = vmatpush.bf16.msrb.mxu2 %v4926_v54 }
  0x4e   :  { %671 = vmatpush.bf16.msrb.mxu3 %v4883_v12 }
  0x50   :  { %737 = vmatpush.bf16.msrb.mxu0 %v4883_v12  ;;  %405 = vmatmul.bf16.gmra.mxu2 %v119_v36  ;;  %v4007_v36 = vld [vmem:[#allocation5 + $0xb4] sm:$0xf0] }
  0x51   :  { %749 = vmatpush.bf16.msrb.mxu1 %v4915_v43  ;;  %947 = vmatpush.bf16.msrb.mxu2 %v4968_v13  ;;  %v4984_v38 = vor.u32 %v4244_v32, %v4007_v36  ;;  %v5022_v36 = vor.u32 %v4268_v27, %v4103_v31  ;;  %v4077_v27 = vld [vmem:[#allocation7 + $0x78] sm:$0xf] }
  0x52   :  { %672 = vmatpush.bf16.msrb.mxu3 %v4890_v20 }
  0x53   :  { %6851 = vst [vmem:[#allocation25_spill] sm:$0xff] %v5022_v36 }
  0x54   :  { %738 = vmatpush.bf16.msrb.mxu0 %v4890_v20 }
  0x55   :  { %673 = vmatmul.bf16.vlgmr.msrb.gmra.mxu3 %v6707_v28  ;;  %750 = vmatpush.bf16.msrb.mxu1 %v4923_v48 }
  0x56   :  { %678 = vmatpush.bf16.msra.mxu3 %v4865_v58  ;;  %948 = vmatpush.bf16.msrb.mxu2 %v4982_v33 }
  0x57   :  { %312 = vmatmul.bf16.gmra.mxu0 %v120_v59 }
  0x59   :  { %751 = vmatpush.bf16.msrb.mxu1 %v4936_v57 }
  0x5a   :  { %679 = vmatpush.bf16.msra.mxu3 %v4878_v7  ;;  %949 = vmatpush.bf16.msrb.mxu2 %v4998_v55 }
  0x5c   :  { %361 = vmatmul.bf16.gmra.mxu1 %v120_v59 }
  0x5e   :  { %680 = vmatpush.bf16.msra.mxu3 %v4885_v15 }
  0x60   :  { %410 = vmatmul.bf16.gmra.mxu2 %v120_v59  ;;  %v116_v59 = vld [vmem:[%s6695_s0 + $0x70] sm:$0xff] }
  0x62   :  { %681 = vmatpush.bf16.msra.mxu3 %v4892_v21 }
  0x66   :  { %682 = vmatpush.bf16.msra.mxu3 %v4906_v34 }
  0x67   :  { %317 = vmatmul.bf16.gmra.mxu0 %v121_v1 }
  0x6a   :  { %683 = vmatpush.bf16.msra.mxu3 %v4915_v43 }
  0x6c   :  { %366 = vmatmul.bf16.gmra.mxu1 %v121_v1 }
  0x6e   :  { %684 = vmatpush.bf16.msra.mxu3 %v4923_v48 }
  0x70   :  { %415 = vmatmul.bf16.gmra.mxu2 %v121_v1  ;;  %v125_v1 = vpack.c.bf16 %v117_v60, %v116_v59  ;;  %v5030_v59 = vor.u32 %v4243_v51, %v4001_v45  ;;  %v4089_v60 = vld [vmem:[#allocation7 + $0x90] sm:$0xf]  ;;  %v4263_v51 = vld [vmem:[#allocation7 + $0x80] sm:$0xf0] }
  0x72   :  { %685 = vmatpush.bf16.msra.mxu3 %v4936_v57  ;;  %6853 = vst [vmem:[#allocation27_spill] sm:$0xff] %v5030_v59 }
  0x75   :  { %686 = vmatmul.bf16.vlgmr.msra.gmra.mxu3 %v6707_v28 }
  0x76   :  { %718 = vmatpush.bf16.msrb.mxu3 %v4680_v3 }
  0x77   :  { %322 = vmatmul.bf16.gmra.mxu0 %v122_v6 }
  0x7a   :  { %719 = vmatpush.bf16.msrb.mxu3 %v4683_v5 }
  0x7c   :  { %371 = vmatmul.bf16.gmra.mxu1 %v122_v6 }
  0x7e   :  { %720 = vmatpush.bf16.msrb.mxu3 %v4692_v10 }
  0x80   :  { %420 = vmatmul.bf16.gmra.mxu2 %v122_v6  ;;  %v4246_v6 = vld [vmem:[#allocation5 + $0xb8] sm:$0xf0] }
  0x81   :  { %v5015_v11 = vor.u32 %v4246_v6, %v4013_v4  ;;  %v4091_v4 = vld [vmem:[#allocation7 + $0x9c] sm:$0xf0] }
  0x82   :  { %721 = vmatpush.bf16.msrb.mxu3 %v4707_v19  ;;  %v5036_v6 = vor.u32 %v4265_v2, %v4091_v4  ;;  %v4262_v2 = vld [vmem:[#allocation7 + $0x7c] sm:$0xf]  ;;  %v4079_v4 = vld [vmem:[#allocation7 + $0x84] sm:$0xf0] }
  0x83   :  { %969 = vmatpush.bf16.msra.mxu0 %v5015_v11 }
  0x84   :  { %6855 = vst [vmem:[#allocation29_spill] sm:$0xff] %v5036_v6 }
  0x86   :  { %722 = vmatpush.bf16.msrb.mxu3 %v4719_v26 }
  0x87   :  { %327 = vmatmul.bf16.gmra.mxu0 %v123_v16 }
  0x88   :  { %970 = vmatpush.bf16.msra.mxu0 %v5030_v59 }
  0x8a   :  { %723 = vmatpush.bf16.msrb.mxu3 %v4734_v35 }
  0x8c   :  { %376 = vmatmul.bf16.gmra.mxu1 %v123_v16 }
  0x8e   :  { %724 = vmatpush.bf16.msrb.mxu3 %v4755_v47 }
  0x90   :  { %425 = vmatmul.bf16.gmra.mxu2 %v123_v16  ;;  %v4269_v16 = vld [vmem:[#allocation7 + $0xb0] sm:$0xf0] }
  0x91   :  { %v5017_v24 = vor.u32 %v4269_v16, %v4101_v14  ;;  %v4229_v14 = vld [vmem:[#allocation5 + $0x34] sm:$0xf]  ;;  %v3947_v16 = vld [vmem:[#allocation5 + $0x3c] sm:$0xf0] }
  0x92   :  { %725 = vmatpush.bf16.msrb.mxu3 %v4776_v61 }
  0x93   :  { %6849 = vst [vmem:[#allocation23_spill] sm:$0xff] %v5017_v24  ;;  %1142 = vmatpush.bf16.msra.mxu1 %v5017_v24 }
  0x96   :  { %956 = vmatpush.bf16.msra.mxu3 %v4984_v38 }
  0x97   :  { %332 = vmatmul.bf16.gmra.mxu0 %v124_v25 }
  0x9a   :  { %957 = vmatpush.bf16.msra.mxu3 %v4988_v42 }
  0x9c   :  { %381 = vmatmul.bf16.gmra.mxu1 %v124_v25 }
  0x9e   :  { %958 = vmatpush.bf16.msra.mxu3 %v4996_v50 }
  0xa0   :  { %430 = vmatmul.bf16.gmra.mxu2 %v124_v25  ;;  %v4224_v25 = vld [vmem:[#allocation5 + $0x8] sm:$0xf0] }
  0xa2   :  { %959 = vmatpush.bf16.msra.mxu3 %v5013_v9 }
  0xa6   :  { %960 = vmatpush.bf16.msra.mxu3 %v5026_v44 }
  0xa7   :  { %337 = vmatmul.bf16.gmra.mxu0 %v125_v1 }
  0xac   :  { %386 = vmatmul.bf16.gmra.mxu1 %v125_v1 }
  0xb0   :  { %435 = vmatmul.bf16.gmra.mxu2 %v125_v1  ;;  %v5033_v1 = vor.u32 %v4266_v62, %v4089_v60  ;;  %v5049_v62 = vor.u32 %v4263_v51, %v4077_v27 }
  0xb2   :  { %6854 = vst [vmem:[#allocation28_spill] sm:$0xff] %v5033_v1  ;;  %1143 = vmatpush.bf16.msra.mxu1 %v5033_v1 }
  0xb3   :  { %6859 = vst [vmem:[#allocation33_spill] sm:$0xff] %v5049_v62 }
  0xb4   :  { %v303_v23 = vpop.f32.mrf.mxu0 }
  0xb5   :  { %v304_v52 = vadd.f32 %v303_v23, %v5002_v56  ;;  %v3989_v23 = vld [vmem:[#allocation5 + $0x80] sm:$0xf]  ;;  %v4260_v56 = vld [vmem:[#allocation7 + $0x68] sm:$0xf0] }
  0xb6   :  { %1144 = vmatpush.bf16.msra.mxu1 %v5049_v62 }
  0xb8   :  { %v4974_v18 = vpop.f32.mrf.mxu3 }
  0xb9   :  { %v691_v31 = vadd.f32 %v4974_v18, %v304_v52  ;;  %v352_v60 = vpop.f32.mrf.mxu1  ;;  %v3935_v18 = vld [vmem:[#allocation5 + $0x24] sm:$0xf0] }
  0xba   :  { %v353_v27 = vadd.f32 %v352_v60, %v5044_v37  ;;  %v4256_v37 = vld [vmem:[#allocation7 + $0x4c] sm:$0xf] }
  0xbb   :  { %v693_v28 = vmul.f32 0.5, %v691_v31  ;;  %v4223_v31 = vld [vmem:[#allocation5 + $0x4] sm:$0xf] }
  0xbc   :  { %v5099_v55 = vpop.f32.mrf.mxu0 }
  0xbd   :  { %4299 = vtanh.f32 %v693_v28  ;;  %6875 = vst [vmem:[#allocation49_spill] sm:$0xff] %v5099_v55 }
  0xc0   :  { %v663_v22 = vpop.f32.mrf.mxu3 }
  0xc1   :  { %v3921_v22 = vld [vmem:[#allocation5] sm:$0xf] }
  0xc2   :  { %v5020_v32 = vor.u32 %v4224_v25, %v3921_v22  ;;  %v5040_v22 = vor.u32 %v4229_v14, %v3947_v16  ;;  %v4240_v25 = vld [vmem:[#allocation5 + $0x88] sm:$0xf0]  ;;  %v5052_v14 = vor.u32 %v4262_v2, %v4079_v4  ;;  %v4226_v16 = vld [vmem:[#allocation5 + $0x1c] sm:$0xf]  ;;  %v4259_v4 = vld [vmem:[#allocation7 + $0x64] sm:$0xf] }
  0xc3   :  { %v5046_v45 = vor.u32 %v4240_v25, %v3989_v23  ;;  %v5056_v52 = vor.u32 %v4226_v16, %v3935_v18  ;;  %v3977_v23 = vld [vmem:[#allocation5 + $0x68] sm:$0xf]  ;;  %v4237_v25 = vld [vmem:[#allocation5 + $0x70] sm:$0xf0]  ;;  %v3923_v16 = vld [vmem:[#allocation5 + $0xc] sm:$0xf0] }
  0xc4   :  { %6850 = vst [vmem:[#allocation24_spill] sm:$0xff] %v5020_v32  ;;  %950 = vmatpush.bf16.msrb.mxu2 %v5020_v32  ;;  %961 = vmatpush.bf16.msra.mxu3 %v5040_v22  ;;  %v5059_v51 = vor.u32 %v4237_v25, %v3977_v23  ;;  %v5070_v18 = vor.u32 %v4223_v31, %v3923_v16  ;;  %v3965_v23 = vld [vmem:[#allocation5 + $0x50] sm:$0xf]  ;;  %v401_v32 = vpop.f32.mrf.mxu2 }
  0xc5   :  { %6856 = vst [vmem:[#allocation30_spill] sm:$0xff] %v5040_v22  ;;  %971 = vmatpush.bf16.msra.mxu0 %v5046_v45  ;;  %v4041_v31 = vld [vmem:[#allocation7 + $0x30] sm:$0xf] }
  0xc6   :  { %6858 = vst [vmem:[#allocation32_spill] sm:$0xff] %v5046_v45 }
  0xc7   :  { %6860 = vst [vmem:[#allocation34_spill] sm:$0xff] %v5052_v14 }
  0xc8   :  { %1155 = vmatpush.bf16.msra.mxu2 %v5022_v36  ;;  %6861 = vst [vmem:[#allocation35_spill] sm:$0xff] %v5056_v52  ;;  %962 = vmatpush.bf16.msra.mxu3 %v5056_v52  ;;  %v4228_v52 = vld [vmem:[#allocation5 + $0x28] sm:$0xf0] }
  0xc9   :  { %6862 = vst [vmem:[#allocation36_spill] sm:$0xff] %v5059_v51  ;;  %972 = vmatpush.bf16.msra.mxu0 %v5059_v51 }
  0xca   :  { %6865 = vst [vmem:[#allocation39_spill] sm:$0xff] %v5070_v18 }
  0xcc   :  { %1156 = vmatpush.bf16.msra.mxu2 %v5036_v6  ;;  %v4067_v6 = vld [vmem:[#allocation7 + $0x6c] sm:$0xf0]  ;;  %963 = vmatpush.bf16.msra.mxu3 %v5070_v18  ;;  %v4043_v18 = vld [vmem:[#allocation7 + $0x3c] sm:$0xf0] }
  0xcd   :  { %v5065_v36 = vor.u32 %v4259_v4, %v4067_v6  ;;  %v4257_v6 = vld [vmem:[#allocation7 + $0x50] sm:$0xf0] }
  0xcf   :  { %6864 = vst [vmem:[#allocation38_spill] sm:$0xff] %v5065_v36 }
  0xd0   :  { %1157 = vmatpush.bf16.msra.mxu2 %v5052_v14  ;;  %v4055_v14 = vld [vmem:[#allocation7 + $0x54] sm:$0xf0] }
  0xd1   :  { %v5079_v28 = vor.u32 %v4256_v37, %v4055_v14  ;;  %v3941_v14 = vld [vmem:[#allocation5 + $0x20] sm:$0xf] }
  0xd3   :  { %6868 = vst [vmem:[#allocation42_spill] sm:$0xff] %v5079_v28 }
  0xd4   :  { %1158 = vmatpush.bf16.msra.mxu2 %v5065_v36 }
  0xd8   :  { %v5011_v8 = vpop.f32.mrf.mxu3  ;;  %1159 = vmatpush.bf16.msra.mxu2 %v5079_v28 }
  0xd9   :  { %v692_v60 = vadd.f32 %v5011_v8, %v353_v27  ;;  %v3953_v8 = vld [vmem:[#allocation5 + $0x38] sm:$0xf]  ;;  %v4231_v27 = vld [vmem:[#allocation5 + $0x40] sm:$0xf0] }
  0xdb   :  { %v694_v16 = vmul.f32 0.5, %v692_v60  ;;  %v4029_v60 = vld [vmem:[#allocation7 + $0x18] sm:$0xf] }
  0xdd   :  { %4301 = vtanh.f32 %v694_v16  ;;  %v4250_v16 = vld [vmem:[#allocation7 + $0x1c] sm:$0xf] }
  0xe0   :  { %v676_v40 = vpop.f32.mrf.mxu3 }
  0xe1   :  { %v4065_v40 = vld [vmem:[#allocation7 + $0x60] sm:$0xf] }
  0xe2   :  { %v5062_v2 = vor.u32 %v4260_v56, %v4065_v40  ;;  %v4234_v56 = vld [vmem:[#allocation5 + $0x58] sm:$0xf0]  ;;  %v4053_v40 = vld [vmem:[#allocation7 + $0x48] sm:$0xf] }
  0xe3   :  { %v5073_v25 = vor.u32 %v4234_v56, %v3965_v23  ;;  %v5076_v4 = vor.u32 %v4257_v6, %v4053_v40  ;;  %v5082_v23 = vor.u32 %v4231_v27, %v3953_v8  ;;  %v4254_v56 = vld [vmem:[#allocation7 + $0x38] sm:$0xf0]  ;;  %v4300_v40 = vpop.eup %4299  ;;  %v4253_v6 = vld [vmem:[#allocation7 + $0x34] sm:$0xf]  ;;  %v5091_v8 = vor.u32 %v4228_v52, %v3941_v14  ;;  %v4251_v27 = vld [vmem:[#allocation7 + $0x20] sm:$0xf0]  ;;  %v5106_v52 = vpop.f32.mrf.mxu1 }
  0xe4   :  { %6863 = vst [vmem:[#allocation37_spill] sm:$0xff] %v5062_v2  ;;  %1145 = vmatpush.bf16.msra.mxu1 %v5062_v2  ;;  %v5085_v36 = vor.u32 %v4254_v56, %v4041_v31  ;;  %v5088_v37 = vor.u32 %v4253_v6, %v4043_v18  ;;  %v5094_v31 = vperm.slane %v4994_v49, 2  ;;  %v697_v56 = vmul.f32 0.5, %v4300_v40  ;;  %v5104_v18 = vld [vmem:[%s6699_s4] ss:$0 sm:$0xff] }
  0xe5   :  { %6866 = vst [vmem:[#allocation40_spill] sm:$0xff] %v5073_v25  ;;  %973 = vmatpush.bf16.msra.mxu0 %v5073_v25  ;;  %v5097_v28 = vor.u32 %v4251_v27, %v4029_v60  ;;  %v4031_v6 = vld [vmem:[#allocation7 + $0x24] sm:$0xf0]  ;;  %v4225_v14 = vld [vmem:[#allocation5 + $0x10] sm:$0xf0] }
  0xe6   :  { %6867 = vst [vmem:[#allocation41_spill] sm:$0xff] %v5076_v4  ;;  %1160 = vmatpush.bf16.msra.mxu2 %v5088_v37  ;;  %v5109_v49 = vor.u32 %v4250_v16, %v4031_v6  ;;  %v3929_v40 = vld [vmem:[#allocation5 + $0x8] sm:$0xf]  ;;  %v4248_v27 = vld [vmem:[#allocation7 + $0x8] sm:$0xf0]  ;;  %v699_v22 = vadd.f32 0.5, %v697_v56 }
  0xe7   :  { %6869 = vst [vmem:[#allocation43_spill] sm:$0xff] %v5082_v23  ;;  %v5112_v60 = vor.u32 %v4225_v14, %v3929_v40  ;;  %v4247_v6 = vld [vmem:[#allocation7 + $0x4] sm:$0xf] }
  0xe8   :  { %1146 = vmatpush.bf16.msra.mxu1 %v5076_v4  ;;  %6870 = vst [vmem:[#allocation44_spill] sm:$0xff] %v5085_v36 }
  0xe9   :  { %974 = vmatpush.bf16.msra.mxu0 %v5082_v23  ;;  %6871 = vst [vmem:[#allocation45_spill] sm:$0xff] %v5088_v37  ;;  %v4017_v37 = vld [vmem:[#allocation7] sm:$0xf]  ;;  %v4302_v23 = vpop.eup %4301 }
  0xea   :  { %6872 = vst [vmem:[#allocation46_spill] sm:$0xff] %v5091_v8  ;;  %1161 = vmatpush.bf16.msra.mxu2 %v5109_v49  ;;  %v698_v14 = vmul.f32 0.5, %v4302_v23  ;;  %v4270_v23 = vld [vmem:[#allocation7 + $0xb8] sm:$0xf0] }
  0xeb   :  { %6873 = vst [vmem:[#allocation47_spill] sm:$0xff] %v5094_v31 }
  0xec   :  { %1147 = vmatpush.bf16.msra.mxu1 %v5085_v36  ;;  %6874 = vst [vmem:[#allocation48_spill] sm:$0xff] %v5097_v28  ;;  %v5115_v36 = vor.u32 %v4248_v27, %v4017_v37  ;;  %v5126_v27 = vpop.f32.mrf.mxu0 }
  0xed   :  { %6876 = vst [vmem:[#allocation50_spill] sm:$0xff] %v5104_v18  ;;  %975 = vmatpush.bf16.msra.mxu0 %v5091_v8  ;;  %v4019_v8 = vld [vmem:[#allocation7 + $0xc] sm:$0xf0] }
  0xee   :  { %6877 = vst [vmem:[#allocation51_spill] sm:$0xff] %v5106_v52  ;;  %v402_v52 = vadd.f32 %v401_v32, %v5094_v31  ;;  %v5120_v33 = vor.u32 %v4247_v6, %v4019_v8  ;;  %v5128_v32 = vpop.f32.mrf.mxu1  ;;  %v4109_v6 = vld [vmem:[#allocation7 + $0xb0] sm:$0xf] }
  0xef   :  { %6878 = vst [vmem:[#allocation52_spill] sm:$0xff] %v5109_v49 }
  0xf0   :  { %1148 = vmatpush.bf16.msra.mxu1 %v5097_v28  ;;  %6879 = vst [vmem:[#allocation53_spill] sm:$0xff] %v5112_v60  ;;  %v5123_v28 = vpop.f32.mrf.mxu2  ;;  %1162 = vmatpush.bf16.msra.mxu2 %v5120_v33 }
  0xf1   :  { %6880 = vst [vmem:[#allocation54_spill] sm:$0xff] %v5115_v36  ;;  %976 = vmatpush.bf16.msra.mxu0 %v5112_v60 }
  0xf2   :  { %6881 = vst [vmem:[#allocation55_spill] sm:$0xff] %v5120_v33 }
  0xf3   :  { %6882 = vst [vmem:[#allocation56_spill] sm:$0xff] %v5123_v28 }
  0xf4   :  { %1149 = vmatpush.bf16.msra.mxu1 %v5115_v36  ;;  %6883 = vst [vmem:[#allocation57_spill] sm:$0xff] %v5126_v27  ;;  %v5132_v49 = vpop.f32.mrf.mxu0 }
  0xf5   :  { %6884 = vst [vmem:[#allocation58_spill] sm:$0xff] %v5128_v32  ;;  %v4249_v32 = vld [vmem:[#allocation7 + $0x10] sm:$0xf0] }
  0xf6   :  { %6886 = vst [vmem:[#allocation60_spill] sm:$0xff] %v5132_v49  ;;  %v4255_v49 = vld [vmem:[#allocation7 + $0x40] sm:$0xf0] }
  0xf8   :  { %v687_v55 = vpop.f32.mrf.mxu3 }
  0xf9   :  { %v705_v16 = vadd.f32 %v5104_v18, %v687_v55  ;;  %v700_v55 = vadd.f32 0.5, %v698_v14  ;;  %v5130_v18 = vpop.f32.mrf.mxu2  ;;  %v4097_v14 = vld [vmem:[#allocation7 + $0x98] sm:$0xf] }
  0xfa   :  { %6885 = vst [vmem:[#allocation59_spill] sm:$0xff] %v5130_v18  ;;  %v6894_v18 = vmov 0  }
  0xfb   :  { %v706_v40 = vmul.f32 %v705_v16, %v699_v22  ;;  %v709_v31 = vsub.f32 1.0, %v700_v55  ;;  %v711_v22 = vmul.f32 0.0, %v700_v55 }
  0xfd   :  { %v707_v37 = vadd.f32 %v706_v40, %v402_v52  ;;  %v5136_v52 = vpop.f32.mrf.mxu1 }
  0xfe   :  { %6887 = vst [vmem:[#allocation61_spill] sm:$0xff] %v5136_v52  ;;  %v4258_v52 = vld [vmem:[#allocation7 + $0x58] sm:$0xf0] }
  0xff   :  { %4303 = vtanh.f32 %v707_v37  ;;  %v5140_v37 = vor.u32 %v4270_v23, %v4109_v6 }
 0x100   :  { %v689_v56 = vpop.f32.mrf.mxu3 }
 0x101   :  { %v4267_v56 = vld [vmem:[#allocation7 + $0xa0] sm:$0xf0]  ;;  %v5145_v55 = vpop.f32.mrf.mxu2 }
 0x102   :  { %6888 = vst [vmem:[#allocation62_spill] sm:$0xff] %v5145_v55 }
 0x105   :  { %v4304_v8 = vpop.eup %4303  ;;  %v5155_v23 = vpop.f32.mrf.mxu1 }
 0x106   :  { %v710_v16 = vmul.f32 %v4304_v8, %v709_v31  ;;  %v5143_v31 = vor.u32 %v4267_v56, %v4097_v14  ;;  %v4085_v8 = vld [vmem:[#allocation7 + $0x80] sm:$0xf]  ;;  %6890 = vst [vmem:[#allocation64_spill] sm:$0xff] %v5155_v23  ;;  %v4073_v14 = vld [vmem:[#allocation7 + $0x68] sm:$0xf] }
 0x107   :  { %v4261_v56 = vld [vmem:[#allocation7 + $0x70] sm:$0xf0]  ;;  %v4049_v23 = vld [vmem:[#allocation7 + $0x38] sm:$0xf] }
 0x108   :  { %v5134_v28 = vadd.f32 %v711_v22, %v710_v16  ;;  %v4264_v22 = vld [vmem:[#allocation7 + $0x88] sm:$0xf0]  ;;  %v5150_v16 = vpop.f32.mrf.mxu0  ;;  %v5161_v55 = vor.u32 %v4261_v56, %v4073_v14 }
 0x109   :  { %6889 = vst [vmem:[#allocation63_spill] sm:$0xff] %v5150_v16  ;;  %v5153_v6 = vor.u32 %v4264_v22, %v4085_v8  ;;  %v4061_v16 = vld [vmem:[#allocation7 + $0x50] sm:$0xf]  ;;  %v5166_v8 = vpop.f32.mrf.mxu2 }
 0x10a   :  { %v717_v40 = vpack.c.bf16 %v5134_v28, %v5134_v28  ;;  %6891 = vst [vmem:[#allocation65_spill] sm:$0xff] %v5166_v8  ;;  %v5169_v22 = vor.u32 %v4258_v52, %v4061_v16  ;;  %v5181_v52 = vor.u32 %v4255_v49, %v4049_v23  ;;  %v4037_v16 = vld [vmem:[#allocation7 + $0x20] sm:$0xf]  ;;  %v4025_v8 = vld [vmem:[#allocation7 + $0x8] sm:$0xf] }
 0x10b   :  { %v5197_v23 = vor.u32 %v4249_v32, %v4025_v8 }
 0x10c   :  { %726 = vmatmul.bf16.vlgmr.msrb.gmra.mxu3 %v717_v40  ;;  %739 = vmatmul.bf16.vlgmr.msrb.gmra.mxu0 %v717_v40 }
 0x10d   :  { %752 = vmatmul.bf16.vlgmr.msrb.gmra.mxu1 %v717_v40  ;;  %951 = vmatmul.bf16.vlgmr.msrb.gmra.mxu2 %v717_v40  ;;  %v5176_v56 = vpop.f32.mrf.mxu1 }
 0x10e   :  { %1168 = vmatpush.bf16.msrb.mxu3 %v5140_v37  ;;  %1209 = vmatpush.bf16.msrb.mxu0 %v4680_v3  ;;  %6893 = vst [vmem:[#allocation67_spill] sm:$0xff] %v5176_v56 }
 0x10f   :  { %1222 = vmatpush.bf16.msrb.mxu1 %v4781_v63  ;;  %1235 = vmatpush.bf16.msrb.mxu2 %v4865_v58 }
 0x110   :  { %v5172_v14 = vpop.f32.mrf.mxu0 }
 0x111   :  { %6892 = vst [vmem:[#allocation66_spill] sm:$0xff] %v5172_v14  ;;  %v4252_v14 = vld [vmem:[#allocation7 + $0x28] sm:$0xf0]  ;;  %v5189_v56 = vpop.f32.mrf.mxu2 }
 0x112   :  { %1169 = vmatpush.bf16.msrb.mxu3 %v5143_v31  ;;  %1210 = vmatpush.bf16.msrb.mxu0 %v4683_v5  ;;  %6895 = vst [vmem:[#allocation68_spill] sm:$0xff] %v5189_v56  ;;  %v6911_v56 = vld [vmem:[#allocation35_spill] sm:$0xff] }
 0x113   :  { %1223 = vmatpush.bf16.msrb.mxu1 %v4803_v17  ;;  %1236 = vmatpush.bf16.msrb.mxu2 %v4878_v7 }
 0x115   :  { %v5199_v27 = vpop.f32.mrf.mxu1 }
 0x116   :  { %1170 = vmatpush.bf16.msrb.mxu3 %v5153_v6  ;;  %1211 = vmatpush.bf16.msrb.mxu0 %v4692_v10  ;;  %6897 = vst [vmem:[#allocation70_spill] sm:$0xff] %v5199_v27  ;;  %v6908_v27 = vld [vmem:[#allocation44_spill] sm:$0xff] }
 0x117   :  { %1224 = vmatpush.bf16.msrb.mxu1 %v4825_v30  ;;  %1237 = vmatpush.bf16.msrb.mxu2 %v4885_v15 }
 0x118   :  { %v5194_v49 = vpop.f32.mrf.mxu0 }
 0x119   :  { %6896 = vst [vmem:[#allocation69_spill] sm:$0xff] %v5194_v49  ;;  %v6910_v49 = vld [vmem:[#allocation20_spill] sm:$0xff] }
 0x11a   :  { %1171 = vmatpush.bf16.msrb.mxu3 %v5161_v55  ;;  %1212 = vmatpush.bf16.msrb.mxu0 %v4707_v19 }
 0x11b   :  { %1225 = vmatpush.bf16.msrb.mxu1 %v4841_v41  ;;  %1238 = vmatpush.bf16.msrb.mxu2 %v4892_v21 }
 0x11c   :  { %964 = vmatmul.bf16.vlgmr.msra.gmra.mxu3 %v717_v40  ;;  %977 = vmatmul.bf16.vlgmr.msra.gmra.mxu0 %v717_v40  ;;  %v5187_v40 = vor.u32 %v4252_v14, %v4037_v16  ;;  %v5208_v14 = vpop.f32.mrf.mxu2 }
 0x11d   :  { %1150 = vmatmul.bf16.vlgmr.msra.gmra.mxu1 %v6894_v18  ;;  %1163 = vmatmul.bf16.vlgmr.msra.gmra.mxu2 %v6894_v18  ;;  %6898 = vst [vmem:[#allocation71_spill] sm:$0xff] %v5208_v14  ;;  %v5219_v8 = vpop.f32.mrf.mxu1 }
 0x11e   :  { %1172 = vmatpush.bf16.msrb.mxu3 %v5169_v22  ;;  %1213 = vmatpush.bf16.msrb.mxu0 %v4719_v26  ;;  %6900 = vst [vmem:[#allocation73_spill] sm:$0xff] %v5219_v8 }
 0x11f   :  { %1226 = vmatpush.bf16.msrb.mxu1 %v4857_v53  ;;  %1239 = vmatpush.bf16.msrb.mxu2 %v4906_v34 }
 0x120   :  { %v5215_v32 = vpop.f32.mrf.mxu0 }
 0x121   :  { %6899 = vst [vmem:[#allocation72_spill] sm:$0xff] %v5215_v32  ;;  %v6905_v32 = vld [vmem:[#allocation30_spill] sm:$0xff] }
 0x122   :  { %1173 = vmatpush.bf16.msrb.mxu3 %v5181_v52  ;;  %1214 = vmatpush.bf16.msrb.mxu0 %v4734_v35 }
 0x123   :  { %1227 = vmatpush.bf16.msrb.mxu1 %v4870_v0  ;;  %1240 = vmatpush.bf16.msrb.mxu2 %v4915_v43 }
 0x125   :  { %v5234_v8 = vpop.f32.mrf.mxu1 }
 0x126   :  { %1174 = vmatpush.bf16.msrb.mxu3 %v5187_v40  ;;  %1215 = vmatpush.bf16.msrb.mxu0 %v4755_v47  ;;  %6903 = vst [vmem:[#allocation76_spill] sm:$0xff] %v5234_v8 }
 0x127   :  { %1228 = vmatpush.bf16.msrb.mxu1 %v4883_v12  ;;  %1241 = vmatpush.bf16.msrb.mxu2 %v4923_v48 }
 0x128   :  { %v5231_v16 = vpop.f32.mrf.mxu0 }
 0x129   :  { %6902 = vst [vmem:[#allocation75_spill] sm:$0xff] %v5231_v16  ;;  %v6907_v16 = vld [vmem:[#allocation43_spill] sm:$0xff] }
 0x12a   :  { %1175 = vmatpush.bf16.msrb.mxu3 %v5197_v23  ;;  %1216 = vmatpush.bf16.msrb.mxu0 %v4776_v61 }
 0x12b   :  { %1229 = vmatpush.bf16.msrb.mxu1 %v4890_v20  ;;  %1242 = vmatpush.bf16.msrb.mxu2 %v4936_v57 }
 0x12d   :  { %1176 = vmatmul.bf16.vlgmr.msrb.gmra.mxu3 %v6894_v18  ;;  %v5226_v18 = vpop.f32.mrf.mxu2 }
 0x12e   :  { %1266 = vmatpush.bf16.msra.mxu3 %v4901_v29  ;;  %1279 = vmatpush.bf16.msra.mxu0 %v4984_v38  ;;  %6901 = vst [vmem:[#allocation74_spill] sm:$0xff] %v5226_v18  ;;  %v6904_v18 = vld [vmem:[#allocation17_spill] sm:$0xff] }
 0x12f   :  { %1292 = vmatpush.bf16.msra.mxu1 %v5015_v11  ;;  %1306 = vmatpush.bf16.msra.mxu2 %v5017_v24 }
 0x130   :  { %v5247_v8 = vpop.f32.mrf.mxu0 }
 0x131   :  { %6909 = vst [vmem:[#allocation78_spill] sm:$0xff] %v5247_v8  ;;  %v6919_v8 = vld [vmem:[#allocation29_spill] sm:$0xff] }
 0x132   :  { %1267 = vmatpush.bf16.msra.mxu3 %v4911_v39  ;;  %1280 = vmatpush.bf16.msra.mxu0 %v4988_v42 }
 0x133   :  { %1293 = vmatpush.bf16.msra.mxu1 %v5030_v59  ;;  %1307 = vmatpush.bf16.msra.mxu2 %v5033_v1 }
 0x135   :  { %v5243_v14 = vpop.f32.mrf.mxu2 }
 0x136   :  { %1268 = vmatpush.bf16.msra.mxu3 %v4919_v46  ;;  %1281 = vmatpush.bf16.msra.mxu0 %v4996_v50  ;;  %6906 = vst [vmem:[#allocation77_spill] sm:$0xff] %v5243_v14  ;;  %v6917_v14 = vld [vmem:[#allocation25_spill] sm:$0xff] }
 0x137   :  { %1294 = vmatpush.bf16.msra.mxu1 %v5046_v45  ;;  %1308 = vmatpush.bf16.msra.mxu2 %v5049_v62  ;;  %v6949_v62 = vld [vmem:[#allocation47_spill] sm:$0xff] }
 0x13a   :  { %1269 = vmatpush.bf16.msra.mxu3 %v4926_v54  ;;  %1282 = vmatpush.bf16.msra.mxu0 %v5013_v9 }
 0x13b   :  { %1295 = vmatpush.bf16.msra.mxu1 %v5059_v51  ;;  %1309 = vmatpush.bf16.msra.mxu2 %v5062_v2 }
 0x13e   :  { %1270 = vmatpush.bf16.msra.mxu3 %v4968_v13  ;;  %1283 = vmatpush.bf16.msra.mxu0 %v5026_v44  ;;  %v5251_v44 = vpop.f32.mrf.mxu1 }
 0x13f   :  { %1296 = vmatpush.bf16.msra.mxu1 %v5073_v25  ;;  %1310 = vmatpush.bf16.msra.mxu2 %v5076_v4  ;;  %6912 = vst [vmem:[#allocation79_spill] sm:$0xff] %v5251_v44  ;;  %v6913_v25 = vld [vmem:[#allocation46_spill] sm:$0xff]  ;;  %v6914_v4 = vld [vmem:[#allocation48_spill] sm:$0xff] }
 0x142   :  { %1271 = vmatpush.bf16.msra.mxu3 %v6904_v18  ;;  %1284 = vmatpush.bf16.msra.mxu0 %v6905_v32  ;;  %v6915_v18 = vld [vmem:[#allocation24_spill] sm:$0xff]  ;;  %v6916_v32 = vld [vmem:[#allocation39_spill] sm:$0xff] }
 0x143   :  { %1297 = vmatpush.bf16.msra.mxu1 %v6907_v16  ;;  %1311 = vmatpush.bf16.msra.mxu2 %v6908_v27  ;;  %v5259_v27 = vpop.f32.mrf.mxu2  ;;  %v6946_v16 = vld [vmem:[#allocation49_spill] sm:$0xff] }
 0x144   :  { %6918 = vst [vmem:[#allocation80_spill] sm:$0xff] %v5259_v27  ;;  %v6928_v27 = vld [vmem:[#allocation45_spill] sm:$0xff] }
 0x146   :  { %1272 = vmatpush.bf16.msra.mxu3 %v6910_v49  ;;  %1285 = vmatpush.bf16.msra.mxu0 %v6911_v56  ;;  %v5263_v56 = vpop.f32.mrf.mxu0  ;;  %v5265_v44 = vpop.f32.mrf.mxu1 }
 0x147   :  { %1298 = vmatpush.bf16.msra.mxu1 %v6913_v25  ;;  %1312 = vmatpush.bf16.msra.mxu2 %v6914_v4  ;;  %6920 = vst [vmem:[#allocation81_spill] sm:$0xff] %v5263_v56  ;;  %v6922_v25 = vld [vmem:[#allocation34_spill] sm:$0xff] }
 0x148   :  { %6921 = vst [vmem:[#allocation82_spill] sm:$0xff] %v5265_v44 }
 0x14a   :  { %1273 = vmatpush.bf16.msra.mxu3 %v6915_v18  ;;  %1286 = vmatpush.bf16.msra.mxu0 %v6916_v32  ;;  %v6924_v18 = vld [vmem:[#allocation38_spill] sm:$0xff] }
 0x14b   :  { %1299 = vmatpush.bf16.msra.mxu1 %v5112_v60  ;;  %1313 = vmatpush.bf16.msra.mxu2 %v5115_v36  ;;  %v5268_v4 = vpop.f32.mrf.mxu2  ;;  %v6927_v60 = vld [vmem:[#allocation42_spill] sm:$0xff] }
 0x14c   :  { %6923 = vst [vmem:[#allocation83_spill] sm:$0xff] %v5268_v4 }
 0x14e   :  { %1319 = vmatpush.bf16.msrb.mxu3 %v6917_v14  ;;  %v5271_v32 = vpop.f32.mrf.mxu0  ;;  %v5273_v14 = vpop.f32.mrf.mxu1 }
 0x14f   :  { %6925 = vst [vmem:[#allocation84_spill] sm:$0xff] %v5271_v32 }
 0x150   :  { %6926 = vst [vmem:[#allocation85_spill] sm:$0xff] %v5273_v14 }
 0x152   :  { %1320 = vmatpush.bf16.msrb.mxu3 %v6919_v8  ;;  %v6930_v8 = vld [vmem:[#allocation52_spill] sm:$0xff] }
 0x153   :  { %v5277_v36 = vpop.f32.mrf.mxu2 }
 0x154   :  { %6929 = vst [vmem:[#allocation86_spill] sm:$0xff] %v5277_v36 }
 0x156   :  { %1321 = vmatpush.bf16.msrb.mxu3 %v6922_v25  ;;  %v5280_v56 = vpop.f32.mrf.mxu0  ;;  %v5282_v44 = vpop.f32.mrf.mxu1  ;;  %v6943_v25 = vld [vmem:[#allocation31_spill] sm:$0xff] }
 0x157   :  { %6931 = vst [vmem:[#allocation87_spill] sm:$0xff] %v5280_v56 }
 0x158   :  { %6932 = vst [vmem:[#allocation88_spill] sm:$0xff] %v5282_v44 }
 0x15a   :  { %1322 = vmatpush.bf16.msrb.mxu3 %v6924_v18 }
 0x15b   :  { %v5285_v4 = vpop.f32.mrf.mxu2 }
 0x15c   :  { %6933 = vst [vmem:[#allocation89_spill] sm:$0xff] %v5285_v4 }
 0x15e   :  { %1323 = vmatpush.bf16.msrb.mxu3 %v6927_v60  ;;  %v5287_v18 = vpop.f32.mrf.mxu0  ;;  %v5289_v32 = vpop.f32.mrf.mxu1 }
 0x15f   :  { %6934 = vst [vmem:[#allocation90_spill] sm:$0xff] %v5287_v18  ;;  %v6944_v18 = vld [vmem:[#allocation51_spill] sm:$0xff] }
 0x160   :  { %6935 = vst [vmem:[#allocation91_spill] sm:$0xff] %v5289_v32  ;;  %v355_v49 = vadd.f32 %v6944_v18, %v6943_v25  ;;  %v6945_v32 = vld [vmem:[#allocation21_spill] sm:$0xff] }
 0x162   :  { %1324 = vmatpush.bf16.msrb.mxu3 %v6928_v27 }
 0x163   :  { %v5291_v14 = vpop.f32.mrf.mxu2 }
 0x164   :  { %6936 = vst [vmem:[#allocation92_spill] sm:$0xff] %v5291_v14  ;;  %v306_v14 = vadd.f32 %v6946_v16, %v6945_v32 }
 0x166   :  { %1325 = vmatpush.bf16.msrb.mxu3 %v6930_v8  ;;  %v5293_v60 = vpop.f32.mrf.mxu0  ;;  %v5295_v27 = vpop.f32.mrf.mxu1 }
 0x167   :  { %6937 = vst [vmem:[#allocation93_spill] sm:$0xff] %v5293_v60 }
 0x168   :  { %6938 = vst [vmem:[#allocation94_spill] sm:$0xff] %v5295_v27 }
 0x16a   :  { %1326 = vmatpush.bf16.msrb.mxu3 %v5120_v33 }
 0x16b   :  { %v5297_v36 = vpop.f32.mrf.mxu2 }
 0x16c   :  { %6939 = vst [vmem:[#allocation95_spill] sm:$0xff] %v5297_v36 }
 0x16e   :  { %v5299_v8 = vpop.f32.mrf.mxu0  ;;  %v5301_v56 = vpop.f32.mrf.mxu1 }
 0x16f   :  { %6940 = vst [vmem:[#allocation96_spill] sm:$0xff] %v5299_v8 }
 0x170   :  { %6941 = vst [vmem:[#allocation97_spill] sm:$0xff] %v5301_v56 }
 0x173   :  { %v5303_v44 = vpop.f32.mrf.mxu2 }
 0x174   :  { %6942 = vst [vmem:[#allocation98_spill] sm:$0xff] %v5303_v44  ;;  %v807_v44 = vld [vmem:[%s6702_s7] sm:$0x7] }
 0x175   :  { %v5312_v56 = vperm.slane %v807_v44, 0 }
 0x177   :  { %6947 = vst [vmem:[#allocation51_spill] sm:$0xff] %v5312_v56 }
 0x189   :  { %v740_v33 = vpop.f32.mrf.mxu0 }
 0x18a   :  { %v753_v4 = vpop.f32.mrf.mxu1  ;;  %v758_v13 = vadd.f32 %v740_v33, %v355_v49 }
 0x18c   :  { %v760_v8 = vmul.f32 0.5, %v758_v13 }
 0x18f   :  { %v727_v60 = vpop.f32.mrf.mxu3 }
 0x190   :  { %v757_v2 = vadd.f32 %v727_v60, %v306_v14  ;;  %v952_v27 = vpop.f32.mrf.mxu2 }
 0x191   :  { %v742_v51 = vpop.f32.mrf.mxu0  ;;  %v953_v33 = vadd.f32 %v952_v27, %v5312_v56 }
 0x192   :  { %v759_v36 = vmul.f32 0.5, %v757_v2  ;;  %v755_v9 = vpop.f32.mrf.mxu1  ;;  %v5315_v2 = vperm.slane %v807_v44, 1 }
 0x193   :  { %v6948_v9 = vld [vmem:[#allocation50_spill] sm:$0xff] }
 0x194   :  { %4305 = vtanh.f32 %v759_v36  ;;  %v767_v14 = vadd.f32 %v6948_v9, %v753_v4  ;;  %v6950_v36 = vld [vmem:[#allocation56_spill] sm:$0xff] }
 0x195   :  { %4307 = vtanh.f32 %v760_v8  ;;  %v404_v45 = vadd.f32 %v6950_v36, %v6949_v62 }
 0x197   :  { %v729_v18 = vpop.f32.mrf.mxu3 }
 0x198   :  { %v954_v25 = vpop.f32.mrf.mxu2 }
 0x199   :  { %v978_v54 = vpop.f32.mrf.mxu0 }
 0x19a   :  { %v4306_v16 = vpop.eup %4305  ;;  %v1151_v60 = vpop.f32.mrf.mxu1 }
 0x19b   :  { %v763_v49 = vmul.f32 0.5, %v4306_v16  ;;  %v1181_v51 = vadd.f32 %v1151_v60, %v953_v33  ;;  %v4308_v13 = vpop.eup %4307 }
 0x19c   :  { %v764_v18 = vmul.f32 0.5, %v4308_v13 }
 0x19d   :  { %v765_v32 = vadd.f32 0.5, %v763_v49  ;;  %v1183_v25 = vmul.f32 0.5, %v1181_v51 }
 0x19e   :  { %v766_v60 = vadd.f32 0.5, %v764_v18 }
 0x19f   :  { %v768_v50 = vmul.f32 %v767_v14, %v765_v32  ;;  %v965_v8 = vpop.f32.mrf.mxu3 }
 0x1a0   :  { %v966_v46 = vadd.f32 %v965_v8, %v5315_v2  ;;  %v1164_v1 = vpop.f32.mrf.mxu2  ;;  %v771_v49 = vsub.f32 1.0, %v766_v60  ;;  %v773_v32 = vmul.f32 %v766_v60, %v5134_v28 }
 0x1a1   :  { %v769_v27 = vadd.f32 %v768_v50, %v404_v45  ;;  %v980_v56 = vpop.f32.mrf.mxu0  ;;  %v5327_v50 = vld [vmem:[%s6703_s8] ss:$0 sm:$0xff] }
 0x1a2   :  { %v1153_v16 = vpop.f32.mrf.mxu1  ;;  %v1182_v33 = vadd.f32 %v1164_v1, %v966_v46  ;;  %v5331_v1 = vperm.slane %v807_v44, 2 }
 0x1a3   :  { %4309 = vtanh.f32 %v769_v27 }
 0x1a4   :  { %4311 = vtanh.f32 %v1183_v25  ;;  %v1184_v59 = vmul.f32 0.5, %v1182_v33 }
 0x1a6   :  { %4313 = vtanh.f32 %v1184_v59  ;;  %v979_v59 = vadd.f32 %v978_v54, %v5331_v1 }
 0x1a7   :  { %v967_v4 = vpop.f32.mrf.mxu3 }
 0x1a8   :  { %v1166_v9 = vpop.f32.mrf.mxu2 }
 0x1a9   :  { %v4310_v42 = vpop.eup %4309 }
 0x1aa   :  { %v4312_v36 = vpop.eup %4311  ;;  %v772_v13 = vmul.f32 %v4310_v42, %v771_v49  ;;  %v6952_v49 = vld [vmem:[#allocation18_spill] sm:$0xff] }
 0x1ab   :  { %v1187_v14 = vmul.f32 0.5, %v4312_v36  ;;  %v6953_v36 = vld [vmem:[#allocation27_spill] sm:$0xff] }
 0x1ac   :  { %v5322_v51 = vadd.f32 %v773_v32, %v772_v13  ;;  %v4314_v56 = vpop.eup %4313  ;;  %v6954_v32 = vld [vmem:[#allocation28_spill] sm:$0xff]  ;;  %v6955_v13 = vld [vmem:[#allocation14_spill] sm:$0xff] }
 0x1ad   :  { %v1189_v28 = vadd.f32 0.5, %v1187_v14  ;;  %v1188_v44 = vmul.f32 0.5, %v4314_v56  ;;  %v6956_v14 = vld [vmem:[#allocation19_spill] sm:$0xff] }
 0x1ae   :  { %v1208_v46 = vpack.c.bf16 %v5322_v51, %v5322_v51  ;;  %v6959_v56 = vld [vmem:[#allocation15_spill] sm:$0xff] }
 0x1af   :  { %v1190_v18 = vadd.f32 0.5, %v1188_v44  ;;  %v6964_v44 = vld [vmem:[#allocation26_spill] sm:$0xff] }
 0x1b0   :  { %v1177_v45 = vpop.f32.mrf.mxu3  ;;  %1217 = vmatmul.bf16.vlgmr.msrb.gmra.mxu0 %v1208_v46  ;;  %1230 = vmatmul.bf16.vlgmr.msrb.gmra.mxu1 %v1208_v46 }
 0x1b1   :  { %v1195_v42 = vadd.f32 %v5327_v50, %v1177_v45  ;;  %1243 = vmatmul.bf16.vlgmr.msrb.gmra.mxu2 %v1208_v46  ;;  %1274 = vmatmul.bf16.vlgmr.msra.gmra.mxu3 %v1208_v46  ;;  %v1199_v54 = vsub.f32 1.0, %v1190_v18  ;;  %v1201_v16 = vmul.f32 0.0, %v1190_v18  ;;  %v6958_v45 = vld [vmem:[#allocation33_spill] sm:$0xff] }
 0x1b2   :  { %1332 = vmatpush.bf16.msrb.mxu0 %v5140_v37  ;;  %1370 = vmatpush.bf16.msrb.mxu1 %v4680_v3  ;;  %v6966_v18 = vld [vmem:[#allocation41_spill] sm:$0xff] }
 0x1b3   :  { %v1196_v9 = vmul.f32 %v1195_v42, %v1189_v28  ;;  %1383 = vmatpush.bf16.msrb.mxu2 %v4781_v63  ;;  %1396 = vmatpush.bf16.msra.mxu3 %v4865_v58  ;;  %v6960_v28 = vld [vmem:[#allocation22_spill] sm:$0xff]  ;;  %v6961_v42 = vld [vmem:[#allocation36_spill] sm:$0xff] }
 0x1b5   :  { %v1197_v8 = vadd.f32 %v1196_v9, %v979_v59  ;;  %v6962_v59 = vld [vmem:[#allocation37_spill] sm:$0xff]  ;;  %v6963_v9 = vld [vmem:[#allocation16_spill] sm:$0xff] }
 0x1b6   :  { %1333 = vmatpush.bf16.msrb.mxu0 %v5143_v31  ;;  %1371 = vmatpush.bf16.msrb.mxu1 %v4683_v5 }
 0x1b7   :  { %4315 = vtanh.f32 %v1197_v8  ;;  %1384 = vmatpush.bf16.msrb.mxu2 %v4803_v17  ;;  %1397 = vmatpush.bf16.msra.mxu3 %v4878_v7  ;;  %v6965_v8 = vld [vmem:[#allocation40_spill] sm:$0xff] }
 0x1b8   :  { %v1179_v25 = vpop.f32.mrf.mxu3 }
 0x1b9   :  { %v6967_v25 = vld [vmem:[#allocation17_spill] sm:$0xff] }
 0x1ba   :  { %1334 = vmatpush.bf16.msrb.mxu0 %v5153_v6  ;;  %1372 = vmatpush.bf16.msrb.mxu1 %v4692_v10 }
 0x1bb   :  { %1385 = vmatpush.bf16.msrb.mxu2 %v4825_v30  ;;  %1398 = vmatpush.bf16.msra.mxu3 %v4885_v15 }
 0x1bd   :  { %v4316_v27 = vpop.eup %4315 }
 0x1be   :  { %v1200_v33 = vmul.f32 %v4316_v27, %v1199_v54  ;;  %1335 = vmatpush.bf16.msrb.mxu0 %v5161_v55  ;;  %1373 = vmatpush.bf16.msrb.mxu1 %v4707_v19  ;;  %v6968_v54 = vld [vmem:[#allocation30_spill] sm:$0xff]  ;;  %v6969_v27 = vld [vmem:[#allocation43_spill] sm:$0xff] }
 0x1bf   :  { %1386 = vmatpush.bf16.msrb.mxu2 %v4841_v41  ;;  %1399 = vmatpush.bf16.msra.mxu3 %v4892_v21 }
 0x1c0   :  { %v5351_v60 = vadd.f32 %v1201_v16, %v1200_v33  ;;  %1287 = vmatmul.bf16.vlgmr.msra.gmra.mxu0 %v1208_v46  ;;  %1300 = vmatmul.bf16.vlgmr.msra.gmra.mxu1 %v1208_v46  ;;  %v6957_v46 = vld [vmem:[#allocation32_spill] sm:$0xff] }
 0x1c1   :  { %v6970_v16 = vld [vmem:[#allocation44_spill] sm:$0xff] }
 0x1c2   :  { %6951 = vst [vmem:[#allocation49_spill] sm:$0xff] %v5351_v60  ;;  %1336 = vmatpush.bf16.msrb.mxu0 %v5169_v22  ;;  %v1305_v4 = vpack.c.bf16 %v5351_v60, %v5351_v60  ;;  %1374 = vmatpush.bf16.msrb.mxu1 %v4719_v26  ;;  %v6971_v33 = vld [vmem:[#allocation20_spill] sm:$0xff] }
 0x1c3   :  { %1387 = vmatpush.bf16.msrb.mxu2 %v4857_v53  ;;  %1400 = vmatpush.bf16.msra.mxu3 %v4906_v34 }
 0x1c4   :  { %1314 = vmatmul.bf16.vlgmr.msra.gmra.mxu2 %v1305_v4  ;;  %1327 = vmatmul.bf16.vlgmr.msrb.gmra.mxu3 %v1305_v4 }
 0x1c6   :  { %1337 = vmatpush.bf16.msrb.mxu0 %v5181_v52  ;;  %1375 = vmatpush.bf16.msrb.mxu1 %v4734_v35 }
 0x1c7   :  { %1388 = vmatpush.bf16.msrb.mxu2 %v4870_v0  ;;  %1401 = vmatpush.bf16.msra.mxu3 %v4915_v43 }
 0x1ca   :  { %1338 = vmatpush.bf16.msrb.mxu0 %v5187_v40  ;;  %1376 = vmatpush.bf16.msrb.mxu1 %v4755_v47 }
 0x1cb   :  { %1389 = vmatpush.bf16.msrb.mxu2 %v4883_v12  ;;  %1402 = vmatpush.bf16.msra.mxu3 %v4923_v48 }
 0x1ce   :  { %1339 = vmatpush.bf16.msrb.mxu0 %v5197_v23  ;;  %1377 = vmatpush.bf16.msrb.mxu1 %v4776_v61 }
 0x1cf   :  { %1390 = vmatpush.bf16.msrb.mxu2 %v4890_v20  ;;  %1403 = vmatpush.bf16.msra.mxu3 %v4936_v57 }
 0x1d1   :  { %1340 = vmatmul.bf16.vlgmr.msrb.gmra.mxu0 %v1305_v4  ;;  %v6972_v4 = vld [vmem:[#allocation35_spill] sm:$0xff] }
 0x1d2   :  { %1427 = vmatpush.bf16.msra.mxu0 %v4901_v29  ;;  %1440 = vmatpush.bf16.msra.mxu1 %v4984_v38 }
 0x1d3   :  { %1453 = vmatpush.bf16.msra.mxu2 %v5015_v11  ;;  %1467 = vmatpush.bf16.msrb.mxu3 %v5017_v24 }
 0x1d6   :  { %1428 = vmatpush.bf16.msra.mxu0 %v4911_v39  ;;  %1441 = vmatpush.bf16.msra.mxu1 %v6952_v49 }
 0x1d7   :  { %1454 = vmatpush.bf16.msra.mxu2 %v6953_v36  ;;  %1468 = vmatpush.bf16.msrb.mxu3 %v6954_v32 }
 0x1da   :  { %1429 = vmatpush.bf16.msra.mxu0 %v6955_v13  ;;  %1442 = vmatpush.bf16.msra.mxu1 %v6956_v14 }
 0x1db   :  { %1455 = vmatpush.bf16.msra.mxu2 %v6957_v46  ;;  %1469 = vmatpush.bf16.msrb.mxu3 %v6958_v45 }
 0x1de   :  { %1430 = vmatpush.bf16.msra.mxu0 %v6959_v56  ;;  %1443 = vmatpush.bf16.msra.mxu1 %v6960_v28  ;;  %v6990_v28 = vld [vmem:[#allocation58_spill] sm:$0xff] }
 0x1df   :  { %1456 = vmatpush.bf16.msra.mxu2 %v6961_v42  ;;  %1470 = vmatpush.bf16.msrb.mxu3 %v6962_v59  ;;  %v6973_v59 = vld [vmem:[#allocation46_spill] sm:$0xff] }
 0x1e2   :  { %1431 = vmatpush.bf16.msra.mxu0 %v6963_v9  ;;  %1444 = vmatpush.bf16.msra.mxu1 %v6964_v44  ;;  %v6974_v9 = vld [vmem:[#allocation48_spill] sm:$0xff] }
 0x1e3   :  { %1457 = vmatpush.bf16.msra.mxu2 %v6965_v8  ;;  %1471 = vmatpush.bf16.msrb.mxu3 %v6966_v18  ;;  %v6975_v44 = vld [vmem:[#allocation24_spill] sm:$0xff]  ;;  %v6976_v8 = vld [vmem:[#allocation39_spill] sm:$0xff]  ;;  %v6977_v18 = vld [vmem:[#allocation25_spill] sm:$0xff] }
 0x1e6   :  { %1432 = vmatpush.bf16.msra.mxu0 %v6967_v25  ;;  %1445 = vmatpush.bf16.msra.mxu1 %v6968_v54  ;;  %v6978_v25 = vld [vmem:[#allocation53_spill] sm:$0xff]  ;;  %v6979_v54 = vld [vmem:[#allocation54_spill] sm:$0xff] }
 0x1e7   :  { %1458 = vmatpush.bf16.msra.mxu2 %v6969_v27  ;;  %1472 = vmatpush.bf16.msrb.mxu3 %v6970_v16  ;;  %v6980_v27 = vld [vmem:[#allocation29_spill] sm:$0xff]  ;;  %v6981_v16 = vld [vmem:[#allocation34_spill] sm:$0xff] }
 0x1ea   :  { %1433 = vmatpush.bf16.msra.mxu0 %v6971_v33  ;;  %1446 = vmatpush.bf16.msra.mxu1 %v6972_v4  ;;  %v6982_v33 = vld [vmem:[#allocation38_spill] sm:$0xff] }
 0x1eb   :  { %1459 = vmatpush.bf16.msra.mxu2 %v6973_v59  ;;  %1473 = vmatpush.bf16.msrb.mxu3 %v6974_v9  ;;  %v6983_v4 = vld [vmem:[#allocation42_spill] sm:$0xff]  ;;  %v6984_v59 = vld [vmem:[#allocation45_spill] sm:$0xff]  ;;  %v6985_v9 = vld [vmem:[#allocation52_spill] sm:$0xff] }
 0x1ee   :  { %1434 = vmatpush.bf16.msra.mxu0 %v6975_v44  ;;  %1447 = vmatpush.bf16.msra.mxu1 %v6976_v8  ;;  %v6986_v44 = vld [vmem:[#allocation55_spill] sm:$0xff]  ;;  %v6987_v8 = vld [vmem:[#allocation21_spill] sm:$0xff] }
 0x1ef   :  { %1460 = vmatpush.bf16.msra.mxu2 %v6978_v25  ;;  %1474 = vmatpush.bf16.msrb.mxu3 %v6979_v54  ;;  %v6989_v25 = vld [vmem:[#allocation31_spill] sm:$0xff] }
 0x1f0   :  { %v358_v54 = vadd.f32 %v6990_v28, %v6989_v25  ;;  %v6992_v25 = vld [vmem:[#allocation59_spill] sm:$0xff] }
 0x1f2   :  { %1480 = vmatpush.bf16.msrb.mxu0 %v6977_v18  ;;  %v6988_v18 = vld [vmem:[#allocation57_spill] sm:$0xff] }
 0x1f3   :  { %v309_v42 = vadd.f32 %v6988_v18, %v6987_v8  ;;  %v6991_v18 = vld [vmem:[#allocation50_spill] sm:$0xff] }
 0x1f6   :  { %1481 = vmatpush.bf16.msrb.mxu0 %v6980_v27 }
 0x1fa   :  { %1482 = vmatpush.bf16.msrb.mxu0 %v6981_v16 }
 0x1fe   :  { %1483 = vmatpush.bf16.msrb.mxu0 %v6982_v33 }
 0x202   :  { %1484 = vmatpush.bf16.msrb.mxu0 %v6983_v4 }
 0x206   :  { %1485 = vmatpush.bf16.msrb.mxu0 %v6984_v59 }
 0x20a   :  { %1486 = vmatpush.bf16.msrb.mxu0 %v6985_v9 }
 0x20e   :  { %1487 = vmatpush.bf16.msrb.mxu0 %v6986_v44 }
 0x22d   :  { %v1218_v56 = vpop.f32.mrf.mxu0  ;;  %v1231_v27 = vpop.f32.mrf.mxu1 }
 0x22e   :  { %v1248_v45 = vadd.f32 %v1218_v56, %v309_v42  ;;  %v1249_v16 = vadd.f32 %v1231_v27, %v358_v54  ;;  %v407_v56 = vadd.f32 %v6992_v25, %v6949_v62 }
 0x230   :  { %v1250_v46 = vmul.f32 0.5, %v1248_v45  ;;  %v1251_v33 = vmul.f32 0.5, %v1249_v16 }
 0x232   :  { %4317 = vtanh.f32 %v1250_v46 }
 0x233   :  { %4319 = vtanh.f32 %v1251_v33 }
 0x234   :  { %v1244_v4 = vpop.f32.mrf.mxu2  ;;  %v1275_v14 = vpop.f32.mrf.mxu3 }
 0x235   :  { %v1220_v59 = vpop.f32.mrf.mxu0  ;;  %v1233_v9 = vpop.f32.mrf.mxu1  ;;  %v1258_v8 = vadd.f32 %v6991_v18, %v1244_v4 }
 0x238   :  { %v4318_v13 = vpop.eup %4317 }
 0x239   :  { %v1254_v44 = vmul.f32 0.5, %v4318_v13  ;;  %v4320_v32 = vpop.eup %4319  ;;  %v6993_v13 = vld [vmem:[#allocation51_spill] sm:$0xff] }
 0x23a   :  { %v1255_v46 = vmul.f32 0.5, %v4320_v32  ;;  %v1276_v39 = vadd.f32 %v1275_v14, %v6993_v13 }
 0x23b   :  { %v1256_v36 = vadd.f32 0.5, %v1254_v44 }
 0x23c   :  { %v1246_v49 = vpop.f32.mrf.mxu2  ;;  %v1277_v28 = vpop.f32.mrf.mxu3  ;;  %v1257_v16 = vadd.f32 0.5, %v1255_v46 }
 0x23d   :  { %v1259_v42 = vmul.f32 %v1258_v8, %v1256_v36  ;;  %v1288_v45 = vpop.f32.mrf.mxu0  ;;  %v1301_v54 = vpop.f32.mrf.mxu1 }
 0x23e   :  { %v1262_v33 = vsub.f32 1.0, %v1257_v16  ;;  %v1289_v44 = vadd.f32 %v1288_v45, %v5315_v2  ;;  %v1264_v18 = vmul.f32 %v1257_v16, %v5322_v51 }
 0x23f   :  { %v1260_v27 = vadd.f32 %v1259_v42, %v407_v56 }
 0x241   :  { %4321 = vtanh.f32 %v1260_v27 }
 0x245   :  { %v1290_v59 = vpop.f32.mrf.mxu0  ;;  %v1303_v9 = vpop.f32.mrf.mxu1 }
 0x246   :  { %v1302_v9 = vadd.f32 %v1301_v54, %v5331_v1 }
 0x247   :  { %v4322_v4 = vpop.eup %4321  ;;  %v1315_v49 = vpop.f32.mrf.mxu2 }
 0x248   :  { %v1328_v28 = vpop.f32.mrf.mxu3  ;;  %v1263_v25 = vmul.f32 %v4322_v4, %v1262_v33  ;;  %v1345_v36 = vadd.f32 %v1315_v49, %v1276_v39 }
 0x249   :  { %v1346_v8 = vadd.f32 %v1328_v28, %v1289_v44 }
 0x24a   :  { %v5421_v62 = vadd.f32 %v1264_v18, %v1263_v25  ;;  %v1347_v32 = vmul.f32 0.5, %v1345_v36 }
 0x24b   :  { %v1348_v56 = vmul.f32 0.5, %v1346_v8 }
 0x24c   :  { %v1369_v42 = vpack.c.bf16 %v5421_v62, %v5421_v62  ;;  %4323 = vtanh.f32 %v1347_v32 }
 0x24d   :  { %4325 = vtanh.f32 %v1348_v56  ;;  %v6995_v56 = vld [vmem:[#allocation13_spill] sm:$0xff] }
 0x24e   :  { %v1341_v46 = vpop.f32.mrf.mxu0  ;;  %1378 = vmatmul.bf16.vlgmr.msrb.gmra.mxu1 %v1369_v42  ;;  %1391 = vmatmul.bf16.vlgmr.msrb.gmra.mxu2 %v1369_v42 }
 0x24f   :  { %v1317_v14 = vpop.f32.mrf.mxu2  ;;  %1404 = vmatmul.bf16.vlgmr.msra.gmra.mxu3 %v1369_v42  ;;  %1435 = vmatmul.bf16.vlgmr.msra.gmra.mxu0 %v1369_v42  ;;  %v1355_v16 = vadd.f32 %v5327_v50, %v1341_v46  ;;  %v6997_v46 = vld [vmem:[#allocation27_spill] sm:$0xff] }
 0x250   :  { %v1330_v45 = vpop.f32.mrf.mxu3  ;;  %1493 = vmatpush.bf16.msrb.mxu1 %v5140_v37  ;;  %1531 = vmatpush.bf16.msrb.mxu2 %v4680_v3  ;;  %v6998_v14 = vld [vmem:[#allocation28_spill] sm:$0xff] }
 0x251   :  { %1544 = vmatpush.bf16.msra.mxu3 %v4781_v63  ;;  %1557 = vmatpush.bf16.msra.mxu0 %v4865_v58  ;;  %v6999_v45 = vld [vmem:[#allocation14_spill] sm:$0xff] }
 0x252   :  { %v4324_v39 = vpop.eup %4323 }
 0x253   :  { %v1351_v51 = vmul.f32 0.5, %v4324_v39  ;;  %v4326_v18 = vpop.eup %4325  ;;  %v7000_v39 = vld [vmem:[#allocation19_spill] sm:$0xff] }
 0x254   :  { %1494 = vmatpush.bf16.msrb.mxu1 %v5143_v31  ;;  %1532 = vmatpush.bf16.msrb.mxu2 %v4683_v5  ;;  %v1352_v44 = vmul.f32 0.5, %v4326_v18  ;;  %v7002_v18 = vld [vmem:[#allocation33_spill] sm:$0xff] }
 0x255   :  { %v1353_v27 = vadd.f32 0.5, %v1351_v51  ;;  %1545 = vmatpush.bf16.msra.mxu3 %v4803_v17  ;;  %1558 = vmatpush.bf16.msra.mxu0 %v4878_v7  ;;  %v7001_v51 = vld [vmem:[#allocation32_spill] sm:$0xff] }
 0x256   :  { %v1343_v59 = vpop.f32.mrf.mxu0  ;;  %v1354_v49 = vadd.f32 0.5, %v1352_v44  ;;  %v7008_v44 = vld [vmem:[#allocation26_spill] sm:$0xff] }
 0x257   :  { %v1356_v33 = vmul.f32 %v1355_v16, %v1353_v27  ;;  %v7003_v27 = vld [vmem:[#allocation15_spill] sm:$0xff]  ;;  %v7004_v16 = vld [vmem:[#allocation22_spill] sm:$0xff]  ;;  %v7005_v59 = vld [vmem:[#allocation36_spill] sm:$0xff] }
 0x258   :  { %1495 = vmatpush.bf16.msrb.mxu1 %v5153_v6  ;;  %1533 = vmatpush.bf16.msrb.mxu2 %v4692_v10  ;;  %v1359_v54 = vsub.f32 1.0, %v1354_v49  ;;  %v1361_v25 = vmul.f32 %v1354_v49, %v5351_v60  ;;  %v7010_v49 = vld [vmem:[#allocation41_spill] sm:$0xff]  ;;  %v7016_v60 = vld [vmem:[#allocation35_spill] sm:$0xff] }
 0x259   :  { %v1357_v4 = vadd.f32 %v1356_v33, %v1302_v9  ;;  %1546 = vmatpush.bf16.msra.mxu3 %v4825_v30  ;;  %1559 = vmatpush.bf16.msra.mxu0 %v4885_v15  ;;  %v7006_v9 = vld [vmem:[#allocation37_spill] sm:$0xff]  ;;  %v7007_v33 = vld [vmem:[#allocation16_spill] sm:$0xff] }
 0x25b   :  { %4327 = vtanh.f32 %v1357_v4  ;;  %v7009_v4 = vld [vmem:[#allocation40_spill] sm:$0xff] }
 0x25c   :  { %1496 = vmatpush.bf16.msrb.mxu1 %v5161_v55  ;;  %1534 = vmatpush.bf16.msrb.mxu2 %v4707_v19 }
 0x25d   :  { %1547 = vmatpush.bf16.msra.mxu3 %v4841_v41  ;;  %1560 = vmatpush.bf16.msra.mxu0 %v4892_v21 }
 0x25e   :  { %1448 = vmatmul.bf16.vlgmr.msra.gmra.mxu1 %v1369_v42  ;;  %1461 = vmatmul.bf16.vlgmr.msra.gmra.mxu2 %v1369_v42  ;;  %v6996_v42 = vld [vmem:[#allocation18_spill] sm:$0xff] }
 0x260   :  { %1497 = vmatpush.bf16.msrb.mxu1 %v5169_v22  ;;  %1535 = vmatpush.bf16.msrb.mxu2 %v4719_v26 }
 0x261   :  { %v4328_v28 = vpop.eup %4327  ;;  %1548 = vmatpush.bf16.msra.mxu3 %v4857_v53  ;;  %1561 = vmatpush.bf16.msra.mxu0 %v4906_v34 }
 0x262   :  { %v1360_v36 = vmul.f32 %v4328_v28, %v1359_v54  ;;  %v7011_v54 = vld [vmem:[#allocation17_spill] sm:$0xff]  ;;  %v7012_v28 = vld [vmem:[#allocation30_spill] sm:$0xff] }
 0x264   :  { %v5448_v8 = vadd.f32 %v1361_v25, %v1360_v36  ;;  %1498 = vmatpush.bf16.msrb.mxu1 %v5181_v52  ;;  %1536 = vmatpush.bf16.msrb.mxu2 %v4734_v35  ;;  %v7013_v25 = vld [vmem:[#allocation43_spill] sm:$0xff]  ;;  %v7014_v36 = vld [vmem:[#allocation44_spill] sm:$0xff] }
 0x265   :  { %1549 = vmatpush.bf16.msra.mxu3 %v4870_v0  ;;  %1562 = vmatpush.bf16.msra.mxu0 %v4915_v43 }
 0x266   :  { %6994 = vst [vmem:[#allocation56_spill] sm:$0xff] %v5448_v8  ;;  %v1466_v32 = vpack.c.bf16 %v5448_v8, %v5448_v8 }
 0x268   :  { %1475 = vmatmul.bf16.vlgmr.msrb.gmra.mxu3 %v1466_v32  ;;  %1488 = vmatmul.bf16.vlgmr.msrb.gmra.mxu0 %v1466_v32 }
 0x269   :  { %1499 = vmatpush.bf16.msrb.mxu1 %v5187_v40  ;;  %1537 = vmatpush.bf16.msrb.mxu2 %v4755_v47 }
 0x26a   :  { %1550 = vmatpush.bf16.msra.mxu3 %v4883_v12  ;;  %1563 = vmatpush.bf16.msra.mxu0 %v4923_v48 }
 0x26d   :  { %1500 = vmatpush.bf16.msrb.mxu1 %v5197_v23  ;;  %1538 = vmatpush.bf16.msrb.mxu2 %v4776_v61 }
 0x26e   :  { %1551 = vmatpush.bf16.msra.mxu3 %v4890_v20  ;;  %1564 = vmatpush.bf16.msra.mxu0 %v4936_v57 }
 0x270   :  { %1501 = vmatmul.bf16.vlgmr.msrb.gmra.mxu1 %v1466_v32  ;;  %v7015_v32 = vld [vmem:[#allocation20_spill] sm:$0xff] }
 0x271   :  { %1588 = vmatpush.bf16.msra.mxu1 %v4901_v29  ;;  %1601 = vmatpush.bf16.msra.mxu2 %v4984_v38 }
 0x272   :  { %1614 = vmatpush.bf16.msrb.mxu3 %v5015_v11  ;;  %1628 = vmatpush.bf16.msrb.mxu0 %v5017_v24 }
 0x275   :  { %1589 = vmatpush.bf16.msra.mxu1 %v6995_v56  ;;  %1602 = vmatpush.bf16.msra.mxu2 %v6996_v42 }
 0x276   :  { %1615 = vmatpush.bf16.msrb.mxu3 %v6997_v46  ;;  %1629 = vmatpush.bf16.msrb.mxu0 %v6998_v14  ;;  %v7035_v46 = vld [vmem:[#allocation50_spill] sm:$0xff] }
 0x279   :  { %1590 = vmatpush.bf16.msra.mxu1 %v6999_v45  ;;  %1603 = vmatpush.bf16.msra.mxu2 %v7000_v39 }
 0x27a   :  { %1616 = vmatpush.bf16.msrb.mxu3 %v7001_v51  ;;  %1630 = vmatpush.bf16.msrb.mxu0 %v7002_v18 }
 0x27d   :  { %1591 = vmatpush.bf16.msra.mxu1 %v7003_v27  ;;  %1604 = vmatpush.bf16.msra.mxu2 %v7004_v16  ;;  %v7034_v27 = vld [vmem:[#allocation61_spill] sm:$0xff] }
 0x27e   :  { %1617 = vmatpush.bf16.msrb.mxu3 %v7005_v59  ;;  %1631 = vmatpush.bf16.msrb.mxu0 %v7006_v9  ;;  %v7017_v9 = vld [vmem:[#allocation46_spill] sm:$0xff] }
 0x281   :  { %1592 = vmatpush.bf16.msra.mxu1 %v7007_v33  ;;  %1605 = vmatpush.bf16.msra.mxu2 %v7008_v44  ;;  %v7018_v33 = vld [vmem:[#allocation48_spill] sm:$0xff] }
 0x282   :  { %1618 = vmatpush.bf16.msrb.mxu3 %v7009_v4  ;;  %1632 = vmatpush.bf16.msrb.mxu0 %v7010_v49  ;;  %v7019_v44 = vld [vmem:[#allocation24_spill] sm:$0xff]  ;;  %v7020_v4 = vld [vmem:[#allocation39_spill] sm:$0xff]  ;;  %v7021_v49 = vld [vmem:[#allocation25_spill] sm:$0xff] }
 0x285   :  { %1593 = vmatpush.bf16.msra.mxu1 %v7011_v54  ;;  %1606 = vmatpush.bf16.msra.mxu2 %v7012_v28  ;;  %v7022_v54 = vld [vmem:[#allocation53_spill] sm:$0xff]  ;;  %v7023_v28 = vld [vmem:[#allocation54_spill] sm:$0xff] }
 0x286   :  { %1619 = vmatpush.bf16.msrb.mxu3 %v7013_v25  ;;  %1633 = vmatpush.bf16.msrb.mxu0 %v7014_v36  ;;  %v7024_v25 = vld [vmem:[#allocation29_spill] sm:$0xff]  ;;  %v7025_v36 = vld [vmem:[#allocation34_spill] sm:$0xff] }
 0x289   :  { %1594 = vmatpush.bf16.msra.mxu1 %v7015_v32  ;;  %1607 = vmatpush.bf16.msra.mxu2 %v7016_v60  ;;  %v7026_v32 = vld [vmem:[#allocation38_spill] sm:$0xff] }
 0x28a   :  { %1620 = vmatpush.bf16.msrb.mxu3 %v7017_v9  ;;  %1634 = vmatpush.bf16.msrb.mxu0 %v7018_v33  ;;  %v7027_v60 = vld [vmem:[#allocation42_spill] sm:$0xff]  ;;  %v7028_v9 = vld [vmem:[#allocation45_spill] sm:$0xff]  ;;  %v7029_v33 = vld [vmem:[#allocation52_spill] sm:$0xff] }
 0x28d   :  { %1595 = vmatpush.bf16.msra.mxu1 %v7019_v44  ;;  %1608 = vmatpush.bf16.msra.mxu2 %v7020_v4  ;;  %v7030_v44 = vld [vmem:[#allocation55_spill] sm:$0xff]  ;;  %v7031_v4 = vld [vmem:[#allocation21_spill] sm:$0xff] }
 0x28e   :  { %1621 = vmatpush.bf16.msrb.mxu3 %v7022_v54  ;;  %1635 = vmatpush.bf16.msrb.mxu0 %v7023_v28 }
 0x291   :  { %1641 = vmatpush.bf16.msrb.mxu1 %v7021_v49  ;;  %v7032_v49 = vld [vmem:[#allocation60_spill] sm:$0xff] }
 0x292   :  { %v311_v59 = vadd.f32 %v7032_v49, %v7031_v4 }
 0x295   :  { %1642 = vmatpush.bf16.msrb.mxu1 %v7024_v25  ;;  %v7033_v25 = vld [vmem:[#allocation31_spill] sm:$0xff] }
 0x299   :  { %1643 = vmatpush.bf16.msrb.mxu1 %v7025_v36  ;;  %v360_v36 = vadd.f32 %v7034_v27, %v7033_v25 }
 0x29d   :  { %1644 = vmatpush.bf16.msrb.mxu1 %v7026_v32 }
 0x2a1   :  { %1645 = vmatpush.bf16.msrb.mxu1 %v7027_v60 }
 0x2a5   :  { %1646 = vmatpush.bf16.msrb.mxu1 %v7028_v9 }
 0x2a9   :  { %1647 = vmatpush.bf16.msrb.mxu1 %v7029_v33 }
 0x2ad   :  { %1648 = vmatpush.bf16.msrb.mxu1 %v7030_v44 }
 0x2cb   :  { %v1379_v54 = vpop.f32.mrf.mxu1 }
 0x2cc   :  { %v1409_v18 = vadd.f32 %v1379_v54, %v311_v59  ;;  %v1436_v28 = vpop.f32.mrf.mxu0  ;;  %v7036_v54 = vld [vmem:[#allocation47_spill] sm:$0xff] }
 0x2ce   :  { %v1411_v16 = vmul.f32 0.5, %v1409_v18  ;;  %v7037_v18 = vld [vmem:[#allocation62_spill] sm:$0xff] }
 0x2cf   :  { %v409_v24 = vadd.f32 %v7037_v18, %v7036_v54 }
 0x2d0   :  { %4329 = vtanh.f32 %v1411_v16 }
 0x2d1   :  { %v1392_v32 = vpop.f32.mrf.mxu2 }
 0x2d2   :  { %v1410_v51 = vadd.f32 %v1392_v32, %v360_v36  ;;  %v1405_v60 = vpop.f32.mrf.mxu3 }
 0x2d3   :  { %v1381_v14 = vpop.f32.mrf.mxu1  ;;  %v1419_v49 = vadd.f32 %v7035_v46, %v1405_v60 }
 0x2d4   :  { %v1412_v9 = vmul.f32 0.5, %v1410_v51  ;;  %v1438_v39 = vpop.f32.mrf.mxu0 }
 0x2d6   :  { %v4330_v33 = vpop.eup %4329  ;;  %4331 = vtanh.f32 %v1412_v9 }
 0x2d7   :  { %v1415_v44 = vmul.f32 0.5, %v4330_v33 }
 0x2d9   :  { %v1417_v45 = vadd.f32 0.5, %v1415_v44  ;;  %v1394_v4 = vpop.f32.mrf.mxu2 }
 0x2da   :  { %v1407_v59 = vpop.f32.mrf.mxu3 }
 0x2db   :  { %v1420_v42 = vmul.f32 %v1419_v49, %v1417_v45  ;;  %v1449_v27 = vpop.f32.mrf.mxu1  ;;  %v1437_v45 = vadd.f32 %v1436_v28, %v6993_v13 }
 0x2dc   :  { %v4332_v16 = vpop.eup %4331  ;;  %v1450_v4 = vadd.f32 %v1449_v27, %v5315_v2 }
 0x2dd   :  { %v1416_v25 = vmul.f32 0.5, %v4332_v16  ;;  %v1421_v36 = vadd.f32 %v1420_v42, %v409_v24 }
 0x2df   :  { %4333 = vtanh.f32 %v1421_v36  ;;  %v1418_v14 = vadd.f32 0.5, %v1416_v25 }
 0x2e1   :  { %v1462_v51 = vpop.f32.mrf.mxu2  ;;  %v1423_v32 = vsub.f32 1.0, %v1418_v14  ;;  %v1425_v44 = vmul.f32 %v1418_v14, %v5421_v62 }
 0x2e3   :  { %v1451_v39 = vpop.f32.mrf.mxu1 }
 0x2e5   :  { %v4334_v9 = vpop.eup %4333  ;;  %v1489_v33 = vpop.f32.mrf.mxu0 }
 0x2e6   :  { %v1424_v60 = vmul.f32 %v4334_v9, %v1423_v32  ;;  %v1507_v42 = vadd.f32 %v1489_v33, %v1450_v4 }
 0x2e8   :  { %v5512_v46 = vadd.f32 %v1425_v44, %v1424_v60  ;;  %v1509_v27 = vmul.f32 0.5, %v1507_v42  ;;  %v1463_v44 = vadd.f32 %v1462_v51, %v5331_v1 }
 0x2e9   :  { %v1464_v59 = vpop.f32.mrf.mxu2 }
 0x2ea   :  { %v1530_v24 = vpack.c.bf16 %v5512_v46, %v5512_v46 }
 0x2eb   :  { %v1476_v25 = vpop.f32.mrf.mxu3 }
 0x2ec   :  { %v1506_v49 = vadd.f32 %v1476_v25, %v1437_v45  ;;  %1539 = vmatmul.bf16.vlgmr.msrb.gmra.mxu2 %v1530_v24  ;;  %1552 = vmatmul.bf16.vlgmr.msra.gmra.mxu3 %v1530_v24 }
 0x2ed   :  { %v1502_v18 = vpop.f32.mrf.mxu1  ;;  %v1491_v16 = vpop.f32.mrf.mxu0  ;;  %1565 = vmatmul.bf16.vlgmr.msra.gmra.mxu0 %v1530_v24  ;;  %1596 = vmatmul.bf16.vlgmr.msra.gmra.mxu1 %v1530_v24 }
 0x2ee   :  { %v1508_v62 = vmul.f32 0.5, %v1506_v49  ;;  %1654 = vmatpush.bf16.msrb.mxu2 %v5140_v37  ;;  %1692 = vmatpush.bf16.msra.mxu3 %v4680_v3  ;;  %v1516_v33 = vadd.f32 %v5327_v50, %v1502_v18  ;;  %v7039_v16 = vld [vmem:[#allocation18_spill] sm:$0xff] }
 0x2ef   :  { %1705 = vmatpush.bf16.msra.mxu0 %v4781_v63  ;;  %1718 = vmatpush.bf16.msra.mxu1 %v4865_v58 }
 0x2f0   :  { %4335 = vtanh.f32 %v1508_v62  ;;  %v7040_v62 = vld [vmem:[#allocation23_spill] sm:$0xff] }
 0x2f1   :  { %4337 = vtanh.f32 %v1509_v27  ;;  %v7041_v27 = vld [vmem:[#allocation27_spill] sm:$0xff] }
 0x2f2   :  { %1655 = vmatpush.bf16.msrb.mxu2 %v5143_v31  ;;  %1693 = vmatpush.bf16.msra.mxu3 %v4683_v5 }
 0x2f3   :  { %v1478_v28 = vpop.f32.mrf.mxu3  ;;  %1706 = vmatpush.bf16.msra.mxu0 %v4803_v17  ;;  %1719 = vmatpush.bf16.msra.mxu1 %v4878_v7 }
 0x2f4   :  { %v7042_v28 = vld [vmem:[#allocation14_spill] sm:$0xff] }
 0x2f5   :  { %v1504_v36 = vpop.f32.mrf.mxu1 }
 0x2f6   :  { %v4336_v14 = vpop.eup %4335  ;;  %1656 = vmatpush.bf16.msrb.mxu2 %v5153_v6  ;;  %1694 = vmatpush.bf16.msra.mxu3 %v4692_v10  ;;  %v7043_v36 = vld [vmem:[#allocation19_spill] sm:$0xff] }
 0x2f7   :  { %v1512_v39 = vmul.f32 0.5, %v4336_v14  ;;  %1707 = vmatpush.bf16.msra.mxu0 %v4825_v30  ;;  %1720 = vmatpush.bf16.msra.mxu1 %v4885_v15  ;;  %v4338_v32 = vpop.eup %4337  ;;  %v7044_v14 = vld [vmem:[#allocation28_spill] sm:$0xff] }
 0x2f8   :  { %v1513_v4 = vmul.f32 0.5, %v4338_v32  ;;  %v7046_v32 = vld [vmem:[#allocation15_spill] sm:$0xff] }
 0x2f9   :  { %v1514_v9 = vadd.f32 0.5, %v1512_v39  ;;  %v7045_v39 = vld [vmem:[#allocation32_spill] sm:$0xff] }
 0x2fa   :  { %1657 = vmatpush.bf16.msrb.mxu2 %v5161_v55  ;;  %1695 = vmatpush.bf16.msra.mxu3 %v4707_v19  ;;  %v1515_v45 = vadd.f32 0.5, %v1513_v4  ;;  %v7051_v4 = vld [vmem:[#allocation26_spill] sm:$0xff] }
 0x2fb   :  { %v1517_v60 = vmul.f32 %v1516_v33, %v1514_v9  ;;  %1708 = vmatpush.bf16.msra.mxu0 %v4841_v41  ;;  %1721 = vmatpush.bf16.msra.mxu1 %v4892_v21  ;;  %v7047_v9 = vld [vmem:[#allocation22_spill] sm:$0xff]  ;;  %v7048_v33 = vld [vmem:[#allocation33_spill] sm:$0xff] }
 0x2fc   :  { %1609 = vmatmul.bf16.vlgmr.msra.gmra.mxu2 %v1530_v24  ;;  %1622 = vmatmul.bf16.vlgmr.msrb.gmra.mxu3 %v1530_v24  ;;  %v1520_v51 = vsub.f32 1.0, %v1515_v45  ;;  %v1522_v42 = vmul.f32 %v1515_v45, %v5448_v8  ;;  %v7053_v45 = vld [vmem:[#allocation40_spill] sm:$0xff]  ;;  %v7059_v8 = vld [vmem:[#allocation35_spill] sm:$0xff] }
 0x2fd   :  { %v1518_v59 = vadd.f32 %v1517_v60, %v1463_v44  ;;  %v7049_v44 = vld [vmem:[#allocation36_spill] sm:$0xff] }
 0x2fe   :  { %1658 = vmatpush.bf16.msrb.mxu2 %v5169_v22  ;;  %1696 = vmatpush.bf16.msra.mxu3 %v4719_v26  ;;  %v7050_v60 = vld [vmem:[#allocation16_spill] sm:$0xff] }
 0x2ff   :  { %4339 = vtanh.f32 %v1518_v59  ;;  %1709 = vmatpush.bf16.msra.mxu0 %v4857_v53  ;;  %1722 = vmatpush.bf16.msra.mxu1 %v4906_v34  ;;  %v7052_v59 = vld [vmem:[#allocation37_spill] sm:$0xff] }
 0x302   :  { %1659 = vmatpush.bf16.msrb.mxu2 %v5181_v52  ;;  %1697 = vmatpush.bf16.msra.mxu3 %v4734_v35 }
 0x303   :  { %1710 = vmatpush.bf16.msra.mxu0 %v4870_v0  ;;  %1723 = vmatpush.bf16.msra.mxu1 %v4915_v43 }
 0x305   :  { %v4340_v24 = vpop.eup %4339 }
 0x306   :  { %v1521_v25 = vmul.f32 %v4340_v24, %v1520_v51  ;;  %1660 = vmatpush.bf16.msrb.mxu2 %v5187_v40  ;;  %1698 = vmatpush.bf16.msra.mxu3 %v4755_v47  ;;  %v7054_v51 = vld [vmem:[#allocation17_spill] sm:$0xff]  ;;  %v7055_v24 = vld [vmem:[#allocation30_spill] sm:$0xff] }
 0x307   :  { %1711 = vmatpush.bf16.msra.mxu0 %v4883_v12  ;;  %1724 = vmatpush.bf16.msra.mxu1 %v4923_v48 }
 0x308   :  { %v5549_v49 = vadd.f32 %v1522_v42, %v1521_v25  ;;  %v7056_v42 = vld [vmem:[#allocation41_spill] sm:$0xff]  ;;  %v7057_v25 = vld [vmem:[#allocation43_spill] sm:$0xff] }
 0x30a   :  { %7038 = vst [vmem:[#allocation57_spill] sm:$0xff] %v5549_v49  ;;  %1661 = vmatpush.bf16.msrb.mxu2 %v5197_v23  ;;  %v1627_v18 = vpack.c.bf16 %v5549_v49, %v5549_v49  ;;  %1699 = vmatpush.bf16.msra.mxu3 %v4776_v61 }
 0x30b   :  { %1712 = vmatpush.bf16.msra.mxu0 %v4890_v20  ;;  %1725 = vmatpush.bf16.msra.mxu1 %v4936_v57 }
 0x30c   :  { %1636 = vmatmul.bf16.vlgmr.msrb.gmra.mxu0 %v1627_v18  ;;  %1649 = vmatmul.bf16.vlgmr.msrb.gmra.mxu1 %v1627_v18 }
 0x30d   :  { %1662 = vmatmul.bf16.vlgmr.msrb.gmra.mxu2 %v1627_v18  ;;  %v7058_v18 = vld [vmem:[#allocation20_spill] sm:$0xff] }
 0x30e   :  { %1749 = vmatpush.bf16.msra.mxu2 %v4901_v29  ;;  %1762 = vmatpush.bf16.msrb.mxu3 %v4984_v38 }
 0x30f   :  { %1775 = vmatpush.bf16.msrb.mxu0 %v5015_v11  ;;  %1789 = vmatpush.bf16.msrb.mxu1 %v7040_v62 }
 0x312   :  { %1750 = vmatpush.bf16.msra.mxu2 %v6995_v56  ;;  %1763 = vmatpush.bf16.msrb.mxu3 %v7039_v16 }
 0x313   :  { %1776 = vmatpush.bf16.msrb.mxu0 %v7041_v27  ;;  %1790 = vmatpush.bf16.msrb.mxu1 %v7044_v14 }
 0x316   :  { %1751 = vmatpush.bf16.msra.mxu2 %v7042_v28  ;;  %1764 = vmatpush.bf16.msrb.mxu3 %v7043_v36 }
 0x317   :  { %1777 = vmatpush.bf16.msrb.mxu0 %v7045_v39  ;;  %1791 = vmatpush.bf16.msrb.mxu1 %v7048_v33  ;;  %v7078_v33 = vld [vmem:[#allocation64_spill] sm:$0xff] }
 0x31a   :  { %1752 = vmatpush.bf16.msra.mxu2 %v7046_v32  ;;  %1765 = vmatpush.bf16.msrb.mxu3 %v7047_v9  ;;  %v7075_v9 = vld [vmem:[#allocation21_spill] sm:$0xff] }
 0x31b   :  { %1778 = vmatpush.bf16.msrb.mxu0 %v7049_v44  ;;  %1792 = vmatpush.bf16.msrb.mxu1 %v7052_v59  ;;  %v7060_v44 = vld [vmem:[#allocation44_spill] sm:$0xff]  ;;  %v7063_v59 = vld [vmem:[#allocation39_spill] sm:$0xff] }
 0x31e   :  { %1753 = vmatpush.bf16.msra.mxu2 %v7050_v60  ;;  %1766 = vmatpush.bf16.msrb.mxu3 %v7051_v4  ;;  %v7061_v60 = vld [vmem:[#allocation46_spill] sm:$0xff]  ;;  %v7062_v4 = vld [vmem:[#allocation24_spill] sm:$0xff] }
 0x31f   :  { %1779 = vmatpush.bf16.msrb.mxu0 %v7053_v45  ;;  %1793 = vmatpush.bf16.msrb.mxu1 %v7056_v42  ;;  %v7064_v45 = vld [vmem:[#allocation25_spill] sm:$0xff] }
 0x320   :  { %v7067_v42 = vld [vmem:[#allocation29_spill] sm:$0xff] }
 0x322   :  { %1754 = vmatpush.bf16.msra.mxu2 %v7054_v51  ;;  %1767 = vmatpush.bf16.msrb.mxu3 %v7055_v24  ;;  %v7065_v51 = vld [vmem:[#allocation48_spill] sm:$0xff]  ;;  %v7066_v24 = vld [vmem:[#allocation53_spill] sm:$0xff] }
 0x323   :  { %1780 = vmatpush.bf16.msrb.mxu0 %v7057_v25  ;;  %1794 = vmatpush.bf16.msrb.mxu1 %v7060_v44  ;;  %v7068_v25 = vld [vmem:[#allocation54_spill] sm:$0xff] }
 0x324   :  { %v7071_v44 = vld [vmem:[#allocation42_spill] sm:$0xff] }
 0x326   :  { %1755 = vmatpush.bf16.msra.mxu2 %v7058_v18  ;;  %1768 = vmatpush.bf16.msrb.mxu3 %v7059_v8  ;;  %v7069_v18 = vld [vmem:[#allocation34_spill] sm:$0xff] }
 0x327   :  { %1781 = vmatpush.bf16.msrb.mxu0 %v7061_v60  ;;  %1795 = vmatpush.bf16.msrb.mxu1 %v7065_v51  ;;  %v7070_v8 = vld [vmem:[#allocation38_spill] sm:$0xff]  ;;  %v7072_v60 = vld [vmem:[#allocation45_spill] sm:$0xff] }
 0x32a   :  { %1756 = vmatpush.bf16.msra.mxu2 %v7062_v4  ;;  %1769 = vmatpush.bf16.msrb.mxu3 %v7063_v59  ;;  %v7073_v4 = vld [vmem:[#allocation52_spill] sm:$0xff]  ;;  %v7074_v59 = vld [vmem:[#allocation55_spill] sm:$0xff] }
 0x32b   :  { %1782 = vmatpush.bf16.msrb.mxu0 %v7066_v24  ;;  %1796 = vmatpush.bf16.msrb.mxu1 %v7068_v25  ;;  %v7076_v24 = vld [vmem:[#allocation63_spill] sm:$0xff] }
 0x32c   :  { %v314_v32 = vadd.f32 %v7076_v24, %v7075_v9  ;;  %v5604_v24 = vld [vmem:[%s6699_s4] ss:$0 sm:$0xff] }
 0x32d   :  { %7079 = vst [vmem:[#allocation58_spill] sm:$0xff] %v5604_v24 }
 0x32e   :  { %1802 = vmatpush.bf16.msrb.mxu2 %v7064_v45 }
 0x332   :  { %1803 = vmatpush.bf16.msrb.mxu2 %v7067_v42  ;;  %v7077_v42 = vld [vmem:[#allocation31_spill] sm:$0xff] }
 0x333   :  { %v363_v25 = vadd.f32 %v7078_v33, %v7077_v42 }
 0x336   :  { %1804 = vmatpush.bf16.msrb.mxu2 %v7069_v18 }
 0x33a   :  { %1805 = vmatpush.bf16.msrb.mxu2 %v7070_v8 }
 0x33e   :  { %1806 = vmatpush.bf16.msrb.mxu2 %v7071_v44 }
 0x342   :  { %1807 = vmatpush.bf16.msrb.mxu2 %v7072_v60 }
 0x346   :  { %1808 = vmatpush.bf16.msrb.mxu2 %v7073_v4 }
 0x34a   :  { %1809 = vmatpush.bf16.msrb.mxu2 %v7074_v59 }
 0x36a   :  { %v1566_v45 = vpop.f32.mrf.mxu0  ;;  %v1597_v51 = vpop.f32.mrf.mxu1 }
 0x36b   :  { %v1580_v33 = vadd.f32 %v5604_v24, %v1566_v45 }
 0x36f   :  { %v1540_v39 = vpop.f32.mrf.mxu2  ;;  %v1553_v18 = vpop.f32.mrf.mxu3 }
 0x370   :  { %v1570_v36 = vadd.f32 %v1540_v39, %v314_v32  ;;  %v1571_v8 = vadd.f32 %v1553_v18, %v363_v25  ;;  %v1598_v25 = vadd.f32 %v1597_v51, %v6993_v13 }
 0x372   :  { %v1572_v28 = vmul.f32 0.5, %v1570_v36  ;;  %v1568_v44 = vpop.f32.mrf.mxu0  ;;  %v1599_v14 = vpop.f32.mrf.mxu1  ;;  %v1573_v60 = vmul.f32 0.5, %v1571_v8  ;;  %v7080_v36 = vld [vmem:[#allocation65_spill] sm:$0xff] }
 0x373   :  { %v412_v32 = vadd.f32 %v7080_v36, %v7036_v54 }
 0x374   :  { %4341 = vtanh.f32 %v1572_v28 }
 0x375   :  { %4343 = vtanh.f32 %v1573_v60 }
 0x377   :  { %v1542_v4 = vpop.f32.mrf.mxu2  ;;  %v1555_v59 = vpop.f32.mrf.mxu3 }
 0x37a   :  { %v4342_v27 = vpop.eup %4341 }
 0x37b   :  { %v1576_v16 = vmul.f32 0.5, %v4342_v27  ;;  %v4344_v56 = vpop.eup %4343 }
 0x37c   :  { %v1577_v44 = vmul.f32 0.5, %v4344_v56 }
 0x37d   :  { %v1578_v39 = vadd.f32 0.5, %v1576_v16 }
 0x37e   :  { %v1579_v4 = vadd.f32 0.5, %v1577_v44 }
 0x37f   :  { %v1581_v14 = vmul.f32 %v1580_v33, %v1578_v39  ;;  %v1610_v8 = vpop.f32.mrf.mxu2  ;;  %v1623_v28 = vpop.f32.mrf.mxu3 }
 0x380   :  { %v1584_v18 = vsub.f32 1.0, %v1579_v4  ;;  %v1611_v9 = vadd.f32 %v1610_v8, %v5315_v2  ;;  %v1586_v36 = vmul.f32 %v1579_v4, %v5512_v46 }
 0x381   :  { %v1582_v60 = vadd.f32 %v1581_v14, %v412_v32 }
 0x383   :  { %4345 = vtanh.f32 %v1582_v60 }
 0x387   :  { %v1612_v27 = vpop.f32.mrf.mxu2  ;;  %v1625_v59 = vpop.f32.mrf.mxu3 }
 0x388   :  { %v1624_v27 = vadd.f32 %v1623_v28, %v5331_v1 }
 0x389   :  { %v4346_v42 = vpop.eup %4345  ;;  %v1637_v45 = vpop.f32.mrf.mxu0 }
 0x38a   :  { %v1650_v16 = vpop.f32.mrf.mxu1  ;;  %v1585_v24 = vmul.f32 %v4346_v42, %v1584_v18  ;;  %v1667_v33 = vadd.f32 %v1637_v45, %v1598_v25 }
 0x38b   :  { %v1668_v39 = vadd.f32 %v1650_v16, %v1611_v9 }
 0x38c   :  { %v5612_v54 = vadd.f32 %v1586_v36, %v1585_v24  ;;  %v1669_v56 = vmul.f32 0.5, %v1667_v33 }
 0x38d   :  { %v1670_v32 = vmul.f32 0.5, %v1668_v39 }
 0x38e   :  { %v1691_v14 = vpack.c.bf16 %v5612_v54, %v5612_v54  ;;  %4347 = vtanh.f32 %v1669_v56  ;;  %v7082_v56 = vld [vmem:[#allocation13_spill] sm:$0xff] }
 0x38f   :  { %4349 = vtanh.f32 %v1670_v32  ;;  %v7083_v32 = vld [vmem:[#allocation18_spill] sm:$0xff] }
 0x390   :  { %v1663_v51 = vpop.f32.mrf.mxu2  ;;  %1700 = vmatmul.bf16.vlgmr.msra.gmra.mxu3 %v1691_v14  ;;  %1713 = vmatmul.bf16.vlgmr.msra.gmra.mxu0 %v1691_v14 }
 0x391   :  { %v1639_v8 = vpop.f32.mrf.mxu0  ;;  %1726 = vmatmul.bf16.vlgmr.msra.gmra.mxu1 %v1691_v14  ;;  %1757 = vmatmul.bf16.vlgmr.msra.gmra.mxu2 %v1691_v14  ;;  %v1677_v60 = vadd.f32 %v5327_v50, %v1663_v51  ;;  %v7085_v51 = vld [vmem:[#allocation28_spill] sm:$0xff] }
 0x392   :  { %v1652_v44 = vpop.f32.mrf.mxu1  ;;  %1815 = vmatpush.bf16.msra.mxu3 %v5140_v37  ;;  %1853 = vmatpush.bf16.msra.mxu0 %v4680_v3  ;;  %v7086_v8 = vld [vmem:[#allocation14_spill] sm:$0xff] }
 0x393   :  { %1866 = vmatpush.bf16.msra.mxu1 %v4781_v63  ;;  %1879 = vmatpush.bf16.msra.mxu2 %v4865_v58  ;;  %v7087_v44 = vld [vmem:[#allocation19_spill] sm:$0xff] }
 0x394   :  { %v4348_v46 = vpop.eup %4347 }
 0x395   :  { %v1673_v9 = vmul.f32 0.5, %v4348_v46  ;;  %v4350_v42 = vpop.eup %4349  ;;  %v7088_v46 = vld [vmem:[#allocation32_spill] sm:$0xff] }
 0x396   :  { %1816 = vmatpush.bf16.msra.mxu3 %v5143_v31  ;;  %1854 = vmatpush.bf16.msra.mxu0 %v4683_v5  ;;  %v1674_v25 = vmul.f32 0.5, %v4350_v42  ;;  %v7090_v42 = vld [vmem:[#allocation15_spill] sm:$0xff] }
 0x397   :  { %v1675_v24 = vadd.f32 0.5, %v1673_v9  ;;  %1867 = vmatpush.bf16.msra.mxu1 %v4803_v17  ;;  %1880 = vmatpush.bf16.msra.mxu2 %v4878_v7  ;;  %v7089_v9 = vld [vmem:[#allocation33_spill] sm:$0xff] }
 0x398   :  { %v1665_v4 = vpop.f32.mrf.mxu2  ;;  %v1676_v50 = vadd.f32 0.5, %v1674_v25  ;;  %v7096_v25 = vld [vmem:[#allocation40_spill] sm:$0xff] }
 0x399   :  { %v1678_v59 = vmul.f32 %v1677_v60, %v1675_v24  ;;  %v7091_v24 = vld [vmem:[#allocation22_spill] sm:$0xff]  ;;  %v7092_v60 = vld [vmem:[#allocation36_spill] sm:$0xff]  ;;  %v7093_v4 = vld [vmem:[#allocation37_spill] sm:$0xff] }
 0x39a   :  { %1817 = vmatpush.bf16.msra.mxu3 %v5153_v6  ;;  %1855 = vmatpush.bf16.msra.mxu0 %v4692_v10  ;;  %v1681_v28 = vsub.f32 1.0, %v1676_v50  ;;  %v1683_v16 = vmul.f32 %v1676_v50, %v5549_v49  ;;  %v7098_v50 = vld [vmem:[#allocation17_spill] sm:$0xff]  ;;  %v7104_v49 = vld [vmem:[#allocation46_spill] sm:$0xff] }
 0x39b   :  { %v1679_v18 = vadd.f32 %v1678_v59, %v1624_v27  ;;  %1868 = vmatpush.bf16.msra.mxu1 %v4825_v30  ;;  %1881 = vmatpush.bf16.msra.mxu2 %v4885_v15  ;;  %v7094_v27 = vld [vmem:[#allocation16_spill] sm:$0xff]  ;;  %v7095_v59 = vld [vmem:[#allocation26_spill] sm:$0xff] }
 0x39d   :  { %4351 = vtanh.f32 %v1679_v18  ;;  %v7097_v18 = vld [vmem:[#allocation41_spill] sm:$0xff] }
 0x39e   :  { %1818 = vmatpush.bf16.msra.mxu3 %v5161_v55  ;;  %1856 = vmatpush.bf16.msra.mxu0 %v4707_v19 }
 0x39f   :  { %1869 = vmatpush.bf16.msra.mxu1 %v4841_v41  ;;  %1882 = vmatpush.bf16.msra.mxu2 %v4892_v21 }
 0x3a0   :  { %1770 = vmatmul.bf16.vlgmr.msrb.gmra.mxu3 %v1691_v14  ;;  %1783 = vmatmul.bf16.vlgmr.msrb.gmra.mxu0 %v1691_v14  ;;  %v7084_v14 = vld [vmem:[#allocation27_spill] sm:$0xff] }
 0x3a2   :  { %1819 = vmatpush.bf16.msra.mxu3 %v5169_v22  ;;  %1857 = vmatpush.bf16.msra.mxu0 %v4719_v26 }
 0x3a3   :  { %v4352_v45 = vpop.eup %4351  ;;  %1870 = vmatpush.bf16.msra.mxu1 %v4857_v53  ;;  %1883 = vmatpush.bf16.msra.mxu2 %v4906_v34 }
 0x3a4   :  { %v1682_v36 = vmul.f32 %v4352_v45, %v1681_v28  ;;  %v7099_v28 = vld [vmem:[#allocation30_spill] sm:$0xff]  ;;  %v7100_v45 = vld [vmem:[#allocation43_spill] sm:$0xff] }
 0x3a6   :  { %v5639_v33 = vadd.f32 %v1683_v16, %v1682_v36  ;;  %1820 = vmatpush.bf16.msra.mxu3 %v5181_v52  ;;  %1858 = vmatpush.bf16.msra.mxu0 %v4734_v35  ;;  %v7101_v16 = vld [vmem:[#allocation44_spill] sm:$0xff] }
 0x3a7   :  { %1871 = vmatpush.bf16.msra.mxu1 %v4870_v0  ;;  %1884 = vmatpush.bf16.msra.mxu2 %v4915_v43  ;;  %v7102_v36 = vld [vmem:[#allocation20_spill] sm:$0xff] }
 0x3a8   :  { %7081 = vst [vmem:[#allocation59_spill] sm:$0xff] %v5639_v33  ;;  %v1788_v39 = vpack.c.bf16 %v5639_v33, %v5639_v33 }
 0x3aa   :  { %1797 = vmatmul.bf16.vlgmr.msrb.gmra.mxu1 %v1788_v39  ;;  %1810 = vmatmul.bf16.vlgmr.msrb.gmra.mxu2 %v1788_v39 }
 0x3ab   :  { %1821 = vmatpush.bf16.msra.mxu3 %v5187_v40  ;;  %1859 = vmatpush.bf16.msra.mxu0 %v4755_v47 }
 0x3ac   :  { %1872 = vmatpush.bf16.msra.mxu1 %v4883_v12  ;;  %1885 = vmatpush.bf16.msra.mxu2 %v4923_v48 }
 0x3af   :  { %1822 = vmatpush.bf16.msra.mxu3 %v5197_v23  ;;  %1860 = vmatpush.bf16.msra.mxu0 %v4776_v61 }
 0x3b0   :  { %1873 = vmatpush.bf16.msra.mxu1 %v4890_v20  ;;  %1886 = vmatpush.bf16.msra.mxu2 %v4936_v57 }
 0x3b2   :  { %1823 = vmatmul.bf16.vlgmr.msra.gmra.mxu3 %v1788_v39  ;;  %v7103_v39 = vld [vmem:[#allocation35_spill] sm:$0xff] }
 0x3b3   :  { %1910 = vmatpush.bf16.msrb.mxu3 %v4901_v29  ;;  %1923 = vmatpush.bf16.msrb.mxu0 %v4984_v38 }
 0x3b4   :  { %1936 = vmatpush.bf16.msrb.mxu1 %v5015_v11  ;;  %1950 = vmatpush.bf16.msrb.mxu2 %v7040_v62 }
 0x3b7   :  { %1911 = vmatpush.bf16.msrb.mxu3 %v7082_v56  ;;  %1924 = vmatpush.bf16.msrb.mxu0 %v7083_v32 }
 0x3b8   :  { %1937 = vmatpush.bf16.msrb.mxu1 %v7084_v14  ;;  %1951 = vmatpush.bf16.msrb.mxu2 %v7085_v51 }
 0x3bb   :  { %1912 = vmatpush.bf16.msrb.mxu3 %v7086_v8  ;;  %1925 = vmatpush.bf16.msrb.mxu0 %v7087_v44 }
 0x3bc   :  { %1938 = vmatpush.bf16.msrb.mxu1 %v7088_v46  ;;  %1952 = vmatpush.bf16.msrb.mxu2 %v7089_v9 }
 0x3bf   :  { %1913 = vmatpush.bf16.msrb.mxu3 %v7090_v42  ;;  %1926 = vmatpush.bf16.msrb.mxu0 %v7091_v24  ;;  %v7121_v24 = vld [vmem:[#allocation66_spill] sm:$0xff] }
 0x3c0   :  { %1939 = vmatpush.bf16.msrb.mxu1 %v7092_v60  ;;  %1953 = vmatpush.bf16.msrb.mxu2 %v7093_v4  ;;  %v7118_v4 = vld [vmem:[#allocation31_spill] sm:$0xff] }
 0x3c3   :  { %1914 = vmatpush.bf16.msrb.mxu3 %v7094_v27  ;;  %1927 = vmatpush.bf16.msrb.mxu0 %v7095_v59  ;;  %v7105_v27 = vld [vmem:[#allocation48_spill] sm:$0xff] }
 0x3c4   :  { %1940 = vmatpush.bf16.msrb.mxu1 %v7096_v25  ;;  %1954 = vmatpush.bf16.msrb.mxu2 %v7097_v18  ;;  %v7106_v59 = vld [vmem:[#allocation24_spill] sm:$0xff]  ;;  %v7107_v25 = vld [vmem:[#allocation39_spill] sm:$0xff]  ;;  %v7108_v18 = vld [vmem:[#allocation25_spill] sm:$0xff] }
 0x3c7   :  { %1915 = vmatpush.bf16.msrb.mxu3 %v7098_v50  ;;  %1928 = vmatpush.bf16.msrb.mxu0 %v7099_v28  ;;  %v7109_v50 = vld [vmem:[#allocation53_spill] sm:$0xff]  ;;  %v7110_v28 = vld [vmem:[#allocation54_spill] sm:$0xff] }
 0x3c8   :  { %1941 = vmatpush.bf16.msrb.mxu1 %v7100_v45  ;;  %1955 = vmatpush.bf16.msrb.mxu2 %v7101_v16  ;;  %v7111_v45 = vld [vmem:[#allocation29_spill] sm:$0xff]  ;;  %v7112_v16 = vld [vmem:[#allocation34_spill] sm:$0xff] }
 0x3cb   :  { %1916 = vmatpush.bf16.msrb.mxu3 %v7102_v36  ;;  %1929 = vmatpush.bf16.msrb.mxu0 %v7103_v39  ;;  %v7113_v36 = vld [vmem:[#allocation38_spill] sm:$0xff] }
 0x3cc   :  { %1942 = vmatpush.bf16.msrb.mxu1 %v7104_v49  ;;  %1956 = vmatpush.bf16.msrb.mxu2 %v7105_v27  ;;  %v7114_v39 = vld [vmem:[#allocation42_spill] sm:$0xff]  ;;  %v7115_v49 = vld [vmem:[#allocation45_spill] sm:$0xff]  ;;  %v7116_v27 = vld [vmem:[#allocation52_spill] sm:$0xff] }
 0x3cf   :  { %1917 = vmatpush.bf16.msrb.mxu3 %v7106_v59  ;;  %1930 = vmatpush.bf16.msrb.mxu0 %v7107_v25  ;;  %v7117_v59 = vld [vmem:[#allocation55_spill] sm:$0xff] }
 0x3d0   :  { %1943 = vmatpush.bf16.msrb.mxu1 %v7109_v50  ;;  %1957 = vmatpush.bf16.msrb.mxu2 %v7110_v28  ;;  %v7119_v50 = vld [vmem:[#allocation67_spill] sm:$0xff]  ;;  %v7120_v28 = vld [vmem:[#allocation21_spill] sm:$0xff] }
 0x3d1   :  { %v365_v60 = vadd.f32 %v7119_v50, %v7118_v4  ;;  %v7122_v50 = vld [vmem:[#allocation58_spill] sm:$0xff] }
 0x3d3   :  { %1963 = vmatpush.bf16.msra.mxu3 %v7108_v18 }
 0x3d7   :  { %1964 = vmatpush.bf16.msra.mxu3 %v7111_v45  ;;  %v316_v45 = vadd.f32 %v7121_v24, %v7120_v28  ;;  %v7123_v24 = vld [vmem:[#allocation47_spill] sm:$0xff] }
 0x3db   :  { %1965 = vmatpush.bf16.msra.mxu3 %v7112_v16 }
 0x3df   :  { %1966 = vmatpush.bf16.msra.mxu3 %v7113_v36 }
 0x3e3   :  { %1967 = vmatpush.bf16.msra.mxu3 %v7114_v39 }
 0x3e7   :  { %1968 = vmatpush.bf16.msra.mxu3 %v7115_v49 }
 0x3eb   :  { %1969 = vmatpush.bf16.msra.mxu3 %v7116_v27 }
 0x3ef   :  { %1970 = vmatpush.bf16.msra.mxu3 %v7117_v59 }
 0x40d   :  { %v1714_v25 = vpop.f32.mrf.mxu0 }
 0x40e   :  { %v1727_v18 = vpop.f32.mrf.mxu1  ;;  %v1732_v42 = vadd.f32 %v1714_v25, %v365_v60  ;;  %v7124_v60 = vld [vmem:[#allocation68_spill] sm:$0xff] }
 0x40f   :  { %v1741_v4 = vadd.f32 %v7122_v50, %v1727_v18  ;;  %v414_v25 = vadd.f32 %v7124_v60, %v7123_v24 }
 0x410   :  { %v1734_v49 = vmul.f32 0.5, %v1732_v42 }
 0x413   :  { %v1701_v16 = vpop.f32.mrf.mxu3 }
 0x414   :  { %v1731_v9 = vadd.f32 %v1701_v16, %v316_v45  ;;  %v1758_v36 = vpop.f32.mrf.mxu2 }
 0x415   :  { %v1716_v46 = vpop.f32.mrf.mxu0  ;;  %v1759_v42 = vadd.f32 %v1758_v36, %v6993_v13 }
 0x416   :  { %v1733_v39 = vmul.f32 0.5, %v1731_v9  ;;  %v1729_v44 = vpop.f32.mrf.mxu1 }
 0x418   :  { %4353 = vtanh.f32 %v1733_v39 }
 0x419   :  { %4355 = vtanh.f32 %v1734_v49 }
 0x41b   :  { %v1703_v27 = vpop.f32.mrf.mxu3 }
 0x41c   :  { %v1760_v59 = vpop.f32.mrf.mxu2 }
 0x41d   :  { %v1784_v8 = vpop.f32.mrf.mxu0 }
 0x41e   :  { %v4354_v51 = vpop.eup %4353 }
 0x41f   :  { %v1737_v14 = vmul.f32 0.5, %v4354_v51  ;;  %v4356_v32 = vpop.eup %4355 }
 0x420   :  { %v1738_v46 = vmul.f32 0.5, %v4356_v32 }
 0x421   :  { %v1739_v56 = vadd.f32 0.5, %v1737_v14 }
 0x422   :  { %v1740_v27 = vadd.f32 0.5, %v1738_v46 }
 0x423   :  { %v1742_v45 = vmul.f32 %v1741_v4, %v1739_v56  ;;  %v1771_v16 = vpop.f32.mrf.mxu3 }
 0x424   :  { %v1745_v28 = vsub.f32 1.0, %v1740_v27  ;;  %v1772_v18 = vadd.f32 %v1771_v16, %v5315_v2  ;;  %v1747_v56 = vmul.f32 %v1740_v27, %v5612_v54  ;;  %v5712_v54 = vld [vmem:[%s6703_s8] ss:$0 sm:$0xff] }
 0x425   :  { %v1743_v9 = vadd.f32 %v1742_v45, %v414_v25  ;;  %v1786_v44 = vpop.f32.mrf.mxu0 }
 0x427   :  { %4357 = vtanh.f32 %v1743_v9  ;;  %v1798_v49 = vpop.f32.mrf.mxu1 }
 0x428   :  { %v1828_v59 = vadd.f32 %v1798_v49, %v1759_v42  ;;  %v1785_v49 = vadd.f32 %v1784_v8, %v5331_v1 }
 0x42a   :  { %v1830_v39 = vmul.f32 0.5, %v1828_v59 }
 0x42b   :  { %v1773_v51 = vpop.f32.mrf.mxu3 }
 0x42c   :  { %4359 = vtanh.f32 %v1830_v39 }
 0x42d   :  { %v4358_v14 = vpop.eup %4357  ;;  %v1811_v50 = vpop.f32.mrf.mxu2 }
 0x42e   :  { %v1746_v4 = vmul.f32 %v4358_v14, %v1745_v28  ;;  %v1829_v32 = vadd.f32 %v1811_v50, %v1772_v18 }
 0x42f   :  { %v1800_v60 = vpop.f32.mrf.mxu1 }
 0x430   :  { %v5705_v25 = vadd.f32 %v1747_v56, %v1746_v4  ;;  %v1831_v36 = vmul.f32 0.5, %v1829_v32 }
 0x432   :  { %v4360_v45 = vpop.eup %4359  ;;  %4361 = vtanh.f32 %v1831_v36  ;;  %v1852_v46 = vpack.c.bf16 %v5705_v25, %v5705_v25  ;;  %v7126_v36 = vld [vmem:[#allocation13_spill] sm:$0xff] }
 0x433   :  { %v1834_v9 = vmul.f32 0.5, %v4360_v45  ;;  %v7127_v45 = vld [vmem:[#allocation18_spill] sm:$0xff] }
 0x434   :  { %1861 = vmatmul.bf16.vlgmr.msra.gmra.mxu0 %v1852_v46  ;;  %1874 = vmatmul.bf16.vlgmr.msra.gmra.mxu1 %v1852_v46 }
 0x435   :  { %v1836_v16 = vadd.f32 0.5, %v1834_v9  ;;  %v1824_v44 = vpop.f32.mrf.mxu3  ;;  %v1813_v42 = vpop.f32.mrf.mxu2  ;;  %1887 = vmatmul.bf16.vlgmr.msra.gmra.mxu2 %v1852_v46  ;;  %1918 = vmatmul.bf16.vlgmr.msrb.gmra.mxu3 %v1852_v46  ;;  %v7129_v9 = vld [vmem:[#allocation28_spill] sm:$0xff] }
 0x436   :  { %v1838_v28 = vadd.f32 %v5712_v54, %v1824_v44  ;;  %1976 = vmatpush.bf16.msra.mxu0 %v5140_v37  ;;  %2014 = vmatpush.bf16.msra.mxu1 %v4680_v3  ;;  %v7131_v44 = vld [vmem:[#allocation19_spill] sm:$0xff]  ;;  %v7132_v42 = vld [vmem:[#allocation32_spill] sm:$0xff] }
 0x437   :  { %2027 = vmatpush.bf16.msra.mxu2 %v4781_v63  ;;  %2040 = vmatpush.bf16.msrb.mxu3 %v4865_v58 }
 0x438   :  { %v4362_v50 = vpop.eup %4361  ;;  %v1839_v27 = vmul.f32 %v1838_v28, %v1836_v16  ;;  %v7130_v16 = vld [vmem:[#allocation14_spill] sm:$0xff]  ;;  %v7133_v28 = vld [vmem:[#allocation33_spill] sm:$0xff] }
 0x439   :  { %v1835_v59 = vmul.f32 0.5, %v4362_v50  ;;  %v7134_v50 = vld [vmem:[#allocation15_spill] sm:$0xff] }
 0x43a   :  { %v1840_v39 = vadd.f32 %v1839_v27, %v1785_v49  ;;  %1977 = vmatpush.bf16.msra.mxu0 %v5143_v31  ;;  %2015 = vmatpush.bf16.msra.mxu1 %v4683_v5  ;;  %v7135_v49 = vld [vmem:[#allocation22_spill] sm:$0xff]  ;;  %v7136_v27 = vld [vmem:[#allocation36_spill] sm:$0xff] }
 0x43b   :  { %2028 = vmatpush.bf16.msra.mxu2 %v4803_v17  ;;  %2041 = vmatpush.bf16.msrb.mxu3 %v4878_v7  ;;  %v1837_v51 = vadd.f32 0.5, %v1835_v59  ;;  %v7137_v59 = vld [vmem:[#allocation37_spill] sm:$0xff] }
 0x43c   :  { %4363 = vtanh.f32 %v1840_v39  ;;  %v7138_v39 = vld [vmem:[#allocation16_spill] sm:$0xff] }
 0x43d   :  { %v1826_v18 = vpop.f32.mrf.mxu3  ;;  %v1842_v8 = vsub.f32 1.0, %v1837_v51  ;;  %v1844_v56 = vmul.f32 %v1837_v51, %v5639_v33  ;;  %v7139_v51 = vld [vmem:[#allocation26_spill] sm:$0xff]  ;;  %v7146_v33 = vld [vmem:[#allocation20_spill] sm:$0xff] }
 0x43e   :  { %1978 = vmatpush.bf16.msra.mxu0 %v5153_v6  ;;  %2016 = vmatpush.bf16.msra.mxu1 %v4692_v10  ;;  %v7140_v18 = vld [vmem:[#allocation40_spill] sm:$0xff] }
 0x43f   :  { %2029 = vmatpush.bf16.msra.mxu2 %v4825_v30  ;;  %2042 = vmatpush.bf16.msrb.mxu3 %v4885_v15 }
 0x442   :  { %v4364_v14 = vpop.eup %4363  ;;  %1979 = vmatpush.bf16.msra.mxu0 %v5161_v55  ;;  %2017 = vmatpush.bf16.msra.mxu1 %v4707_v19 }
 0x443   :  { %v1843_v4 = vmul.f32 %v4364_v14, %v1842_v8  ;;  %2030 = vmatpush.bf16.msra.mxu2 %v4841_v41  ;;  %2043 = vmatpush.bf16.msrb.mxu3 %v4892_v21  ;;  %v7141_v8 = vld [vmem:[#allocation41_spill] sm:$0xff] }
 0x444   :  { %1931 = vmatmul.bf16.vlgmr.msrb.gmra.mxu0 %v1852_v46  ;;  %1944 = vmatmul.bf16.vlgmr.msrb.gmra.mxu1 %v1852_v46  ;;  %v7128_v46 = vld [vmem:[#allocation27_spill] sm:$0xff]  ;;  %v7142_v14 = vld [vmem:[#allocation17_spill] sm:$0xff] }
 0x445   :  { %v5733_v32 = vadd.f32 %v1844_v56, %v1843_v4  ;;  %v7143_v56 = vld [vmem:[#allocation30_spill] sm:$0xff]  ;;  %v7144_v4 = vld [vmem:[#allocation43_spill] sm:$0xff] }
 0x446   :  { %1980 = vmatpush.bf16.msra.mxu0 %v5169_v22  ;;  %2018 = vmatpush.bf16.msra.mxu1 %v4719_v26 }
 0x447   :  { %7125 = vst [vmem:[#allocation51_spill] sm:$0xff] %v5733_v32  ;;  %v1949_v60 = vpack.c.bf16 %v5733_v32, %v5733_v32  ;;  %2031 = vmatpush.bf16.msra.mxu2 %v4857_v53  ;;  %2044 = vmatpush.bf16.msrb.mxu3 %v4906_v34 }
 0x449   :  { %1958 = vmatmul.bf16.vlgmr.msrb.gmra.mxu2 %v1949_v60  ;;  %1971 = vmatmul.bf16.vlgmr.msra.gmra.mxu3 %v1949_v60 }
 0x44a   :  { %1981 = vmatpush.bf16.msra.mxu0 %v5181_v52  ;;  %2019 = vmatpush.bf16.msra.mxu1 %v4734_v35 }
 0x44b   :  { %2032 = vmatpush.bf16.msra.mxu2 %v4870_v0  ;;  %2045 = vmatpush.bf16.msrb.mxu3 %v4915_v43 }
 0x44e   :  { %1982 = vmatpush.bf16.msra.mxu0 %v5187_v40  ;;  %2020 = vmatpush.bf16.msra.mxu1 %v4755_v47 }
 0x44f   :  { %2033 = vmatpush.bf16.msra.mxu2 %v4883_v12  ;;  %2046 = vmatpush.bf16.msrb.mxu3 %v4923_v48 }
 0x452   :  { %1983 = vmatpush.bf16.msra.mxu0 %v5197_v23  ;;  %2021 = vmatpush.bf16.msra.mxu1 %v4776_v61 }
 0x453   :  { %2034 = vmatpush.bf16.msra.mxu2 %v4890_v20  ;;  %2047 = vmatpush.bf16.msrb.mxu3 %v4936_v57 }
 0x455   :  { %1984 = vmatmul.bf16.vlgmr.msra.gmra.mxu0 %v1949_v60  ;;  %v7145_v60 = vld [vmem:[#allocation44_spill] sm:$0xff] }
 0x456   :  { %2071 = vmatpush.bf16.msrb.mxu0 %v4901_v29  ;;  %2084 = vmatpush.bf16.msrb.mxu1 %v4984_v38 }
 0x457   :  { %2097 = vmatpush.bf16.msrb.mxu2 %v5015_v11  ;;  %2111 = vmatpush.bf16.msra.mxu3 %v7040_v62 }
 0x45a   :  { %2072 = vmatpush.bf16.msrb.mxu0 %v7126_v36  ;;  %2085 = vmatpush.bf16.msrb.mxu1 %v7127_v45 }
 0x45b   :  { %2098 = vmatpush.bf16.msrb.mxu2 %v7128_v46  ;;  %2112 = vmatpush.bf16.msra.mxu3 %v7129_v9 }
 0x45e   :  { %2073 = vmatpush.bf16.msrb.mxu0 %v7130_v16  ;;  %2086 = vmatpush.bf16.msrb.mxu1 %v7131_v44 }
 0x45f   :  { %2099 = vmatpush.bf16.msrb.mxu2 %v7132_v42  ;;  %2113 = vmatpush.bf16.msra.mxu3 %v7133_v28 }
 0x462   :  { %2074 = vmatpush.bf16.msrb.mxu0 %v7134_v50  ;;  %2087 = vmatpush.bf16.msrb.mxu1 %v7135_v49  ;;  %v7165_v50 = vld [vmem:[#allocation70_spill] sm:$0xff] }
 0x463   :  { %2100 = vmatpush.bf16.msrb.mxu2 %v7136_v27  ;;  %2114 = vmatpush.bf16.msra.mxu3 %v7137_v59  ;;  %v7147_v27 = vld [vmem:[#allocation35_spill] sm:$0xff]  ;;  %v7148_v59 = vld [vmem:[#allocation46_spill] sm:$0xff] }
 0x466   :  { %2075 = vmatpush.bf16.msrb.mxu0 %v7138_v39  ;;  %2088 = vmatpush.bf16.msrb.mxu1 %v7139_v51  ;;  %v7149_v39 = vld [vmem:[#allocation48_spill] sm:$0xff] }
 0x467   :  { %2101 = vmatpush.bf16.msrb.mxu2 %v7140_v18  ;;  %2115 = vmatpush.bf16.msra.mxu3 %v7141_v8  ;;  %v7150_v51 = vld [vmem:[#allocation24_spill] sm:$0xff]  ;;  %v7151_v18 = vld [vmem:[#allocation39_spill] sm:$0xff]  ;;  %v7152_v8 = vld [vmem:[#allocation25_spill] sm:$0xff] }
 0x46a   :  { %2076 = vmatpush.bf16.msrb.mxu0 %v7142_v14  ;;  %2089 = vmatpush.bf16.msrb.mxu1 %v7143_v56  ;;  %v7153_v14 = vld [vmem:[#allocation53_spill] sm:$0xff]  ;;  %v7154_v56 = vld [vmem:[#allocation54_spill] sm:$0xff] }
 0x46b   :  { %2102 = vmatpush.bf16.msrb.mxu2 %v7144_v4  ;;  %2116 = vmatpush.bf16.msra.mxu3 %v7145_v60  ;;  %v7155_v4 = vld [vmem:[#allocation29_spill] sm:$0xff]  ;;  %v7156_v60 = vld [vmem:[#allocation34_spill] sm:$0xff] }
 0x46e   :  { %2077 = vmatpush.bf16.msrb.mxu0 %v7146_v33  ;;  %2090 = vmatpush.bf16.msrb.mxu1 %v7147_v27  ;;  %v7157_v33 = vld [vmem:[#allocation38_spill] sm:$0xff] }
 0x46f   :  { %2103 = vmatpush.bf16.msrb.mxu2 %v7148_v59  ;;  %2117 = vmatpush.bf16.msra.mxu3 %v7149_v39  ;;  %v7158_v27 = vld [vmem:[#allocation42_spill] sm:$0xff]  ;;  %v7159_v59 = vld [vmem:[#allocation45_spill] sm:$0xff]  ;;  %v7160_v39 = vld [vmem:[#allocation52_spill] sm:$0xff] }
 0x472   :  { %2078 = vmatpush.bf16.msrb.mxu0 %v7150_v51  ;;  %2091 = vmatpush.bf16.msrb.mxu1 %v7151_v18  ;;  %v7161_v51 = vld [vmem:[#allocation55_spill] sm:$0xff]  ;;  %v7162_v18 = vld [vmem:[#allocation21_spill] sm:$0xff] }
 0x473   :  { %2104 = vmatpush.bf16.msrb.mxu2 %v7153_v14  ;;  %2118 = vmatpush.bf16.msra.mxu3 %v7154_v56  ;;  %v7164_v14 = vld [vmem:[#allocation31_spill] sm:$0xff] }
 0x474   :  { %v368_v56 = vadd.f32 %v7165_v50, %v7164_v14  ;;  %v7167_v14 = vld [vmem:[#allocation71_spill] sm:$0xff] }
 0x476   :  { %2124 = vmatpush.bf16.msra.mxu0 %v7152_v8  ;;  %v7163_v8 = vld [vmem:[#allocation69_spill] sm:$0xff] }
 0x477   :  { %v319_v49 = vadd.f32 %v7163_v8, %v7162_v18  ;;  %v7166_v8 = vld [vmem:[#allocation58_spill] sm:$0xff] }
 0x47a   :  { %2125 = vmatpush.bf16.msra.mxu0 %v7155_v4 }
 0x47e   :  { %2126 = vmatpush.bf16.msra.mxu0 %v7156_v60 }
 0x482   :  { %2127 = vmatpush.bf16.msra.mxu0 %v7157_v33 }
 0x486   :  { %2128 = vmatpush.bf16.msra.mxu0 %v7158_v27 }
 0x48a   :  { %2129 = vmatpush.bf16.msra.mxu0 %v7159_v59 }
 0x48e   :  { %2130 = vmatpush.bf16.msra.mxu0 %v7160_v39 }
 0x492   :  { %2131 = vmatpush.bf16.msra.mxu0 %v7161_v51 }
 0x4b1   :  { %v1862_v28 = vpop.f32.mrf.mxu0  ;;  %v1875_v4 = vpop.f32.mrf.mxu1 }
 0x4b2   :  { %v1892_v42 = vadd.f32 %v1862_v28, %v319_v49  ;;  %v1893_v60 = vadd.f32 %v1875_v4, %v368_v56  ;;  %v417_v28 = vadd.f32 %v7167_v14, %v7123_v24 }
 0x4b4   :  { %v1894_v44 = vmul.f32 0.5, %v1892_v42  ;;  %v1895_v33 = vmul.f32 0.5, %v1893_v60 }
 0x4b6   :  { %4365 = vtanh.f32 %v1894_v44 }
 0x4b7   :  { %4367 = vtanh.f32 %v1895_v33 }
 0x4b8   :  { %v1888_v27 = vpop.f32.mrf.mxu2  ;;  %v1919_v16 = vpop.f32.mrf.mxu3 }
 0x4b9   :  { %v1864_v59 = vpop.f32.mrf.mxu0  ;;  %v1877_v39 = vpop.f32.mrf.mxu1  ;;  %v1902_v18 = vadd.f32 %v7166_v8, %v1888_v27 }
 0x4bc   :  { %v4366_v9 = vpop.eup %4365 }
 0x4bd   :  { %v1898_v51 = vmul.f32 0.5, %v4366_v9  ;;  %v4368_v46 = vpop.eup %4367 }
 0x4be   :  { %v1899_v44 = vmul.f32 0.5, %v4368_v46 }
 0x4bf   :  { %v1900_v45 = vadd.f32 0.5, %v1898_v51  ;;  %v1920_v51 = vadd.f32 %v1919_v16, %v6993_v13 }
 0x4c0   :  { %v1890_v36 = vpop.f32.mrf.mxu2  ;;  %v1921_v50 = vpop.f32.mrf.mxu3  ;;  %v1901_v33 = vadd.f32 0.5, %v1899_v44 }
 0x4c1   :  { %v1903_v49 = vmul.f32 %v1902_v18, %v1900_v45  ;;  %v1932_v42 = vpop.f32.mrf.mxu0  ;;  %v1945_v56 = vpop.f32.mrf.mxu1 }
 0x4c2   :  { %v1906_v60 = vsub.f32 1.0, %v1901_v33  ;;  %v1933_v27 = vadd.f32 %v1932_v42, %v5315_v2  ;;  %v1908_v36 = vmul.f32 %v1901_v33, %v5705_v25 }
 0x4c3   :  { %v1904_v4 = vadd.f32 %v1903_v49, %v417_v28 }
 0x4c5   :  { %4369 = vtanh.f32 %v1904_v4 }
 0x4c9   :  { %v1934_v59 = vpop.f32.mrf.mxu0  ;;  %v1947_v39 = vpop.f32.mrf.mxu1 }
 0x4cb   :  { %v4370_v9 = vpop.eup %4369 }
 0x4cc   :  { %v1907_v50 = vmul.f32 %v4370_v9, %v1906_v60  ;;  %v1959_v8 = vpop.f32.mrf.mxu2  ;;  %v1972_v14 = vpop.f32.mrf.mxu3  ;;  %v1946_v60 = vadd.f32 %v1945_v56, %v5331_v1 }
 0x4cd   :  { %v1989_v45 = vadd.f32 %v1959_v8, %v1920_v51  ;;  %v1990_v18 = vadd.f32 %v1972_v14, %v1933_v27 }
 0x4ce   :  { %v5803_v24 = vadd.f32 %v1908_v36, %v1907_v50 }
 0x4cf   :  { %v1991_v46 = vmul.f32 0.5, %v1989_v45  ;;  %v1992_v49 = vmul.f32 0.5, %v1990_v18 }
 0x4d0   :  { %v2013_v28 = vpack.c.bf16 %v5803_v24, %v5803_v24 }
 0x4d1   :  { %4371 = vtanh.f32 %v1991_v46 }
 0x4d2   :  { %v1985_v44 = vpop.f32.mrf.mxu0  ;;  %2022 = vmatmul.bf16.vlgmr.msra.gmra.mxu1 %v2013_v28  ;;  %2035 = vmatmul.bf16.vlgmr.msra.gmra.mxu2 %v2013_v28  ;;  %4373 = vtanh.f32 %v1992_v49  ;;  %v7170_v49 = vld [vmem:[#allocation18_spill] sm:$0xff] }
 0x4d3   :  { %2048 = vmatmul.bf16.vlgmr.msrb.gmra.mxu3 %v2013_v28  ;;  %2079 = vmatmul.bf16.vlgmr.msrb.gmra.mxu0 %v2013_v28  ;;  %v1999_v59 = vadd.f32 %v5712_v54, %v1985_v44  ;;  %v7171_v44 = vld [vmem:[#allocation27_spill] sm:$0xff] }
 0x4d4   :  { %v1961_v25 = vpop.f32.mrf.mxu2  ;;  %v1974_v16 = vpop.f32.mrf.mxu3  ;;  %2137 = vmatpush.bf16.msra.mxu1 %v5140_v37  ;;  %2175 = vmatpush.bf16.msra.mxu2 %v4680_v3 }
 0x4d5   :  { %2188 = vmatpush.bf16.msrb.mxu3 %v4781_v63  ;;  %2201 = vmatpush.bf16.msrb.mxu0 %v4865_v58  ;;  %v7172_v25 = vld [vmem:[#allocation28_spill] sm:$0xff]  ;;  %v7173_v16 = vld [vmem:[#allocation14_spill] sm:$0xff] }
 0x4d7   :  { %v4372_v8 = vpop.eup %4371 }
 0x4d8   :  { %v1995_v42 = vmul.f32 0.5, %v4372_v8  ;;  %2138 = vmatpush.bf16.msra.mxu1 %v5143_v31  ;;  %2176 = vmatpush.bf16.msra.mxu2 %v4683_v5  ;;  %v4374_v4 = vpop.eup %4373  ;;  %v7174_v8 = vld [vmem:[#allocation19_spill] sm:$0xff] }
 0x4d9   :  { %2189 = vmatpush.bf16.msrb.mxu3 %v4803_v17  ;;  %2202 = vmatpush.bf16.msrb.mxu0 %v4878_v7  ;;  %v1996_v51 = vmul.f32 0.5, %v4374_v4  ;;  %v7176_v4 = vld [vmem:[#allocation33_spill] sm:$0xff] }
 0x4da   :  { %v1997_v33 = vadd.f32 0.5, %v1995_v42  ;;  %v1987_v39 = vpop.f32.mrf.mxu0  ;;  %v7175_v42 = vld [vmem:[#allocation32_spill] sm:$0xff] }
 0x4db   :  { %v1998_v36 = vadd.f32 0.5, %v1996_v51  ;;  %v7179_v39 = vld [vmem:[#allocation36_spill] sm:$0xff]  ;;  %v7182_v51 = vld [vmem:[#allocation26_spill] sm:$0xff] }
 0x4dc   :  { %v2000_v9 = vmul.f32 %v1999_v59, %v1997_v33  ;;  %2139 = vmatpush.bf16.msra.mxu1 %v5153_v6  ;;  %2177 = vmatpush.bf16.msra.mxu2 %v4692_v10  ;;  %v7177_v33 = vld [vmem:[#allocation15_spill] sm:$0xff]  ;;  %v7178_v59 = vld [vmem:[#allocation22_spill] sm:$0xff] }
 0x4dd   :  { %2190 = vmatpush.bf16.msrb.mxu3 %v4825_v30  ;;  %2203 = vmatpush.bf16.msrb.mxu0 %v4885_v15  ;;  %v2003_v56 = vsub.f32 1.0, %v1998_v36  ;;  %v2005_v14 = vmul.f32 %v1998_v36, %v5733_v32  ;;  %v7184_v36 = vld [vmem:[#allocation41_spill] sm:$0xff]  ;;  %v7190_v32 = vld [vmem:[#allocation35_spill] sm:$0xff] }
 0x4de   :  { %v2001_v27 = vadd.f32 %v2000_v9, %v1946_v60  ;;  %v7180_v60 = vld [vmem:[#allocation37_spill] sm:$0xff]  ;;  %v7181_v9 = vld [vmem:[#allocation16_spill] sm:$0xff] }
 0x4e0   :  { %4375 = vtanh.f32 %v2001_v27  ;;  %2140 = vmatpush.bf16.msra.mxu1 %v5161_v55  ;;  %2178 = vmatpush.bf16.msra.mxu2 %v4707_v19  ;;  %v7183_v27 = vld [vmem:[#allocation40_spill] sm:$0xff] }
 0x4e1   :  { %2191 = vmatpush.bf16.msrb.mxu3 %v4841_v41  ;;  %2204 = vmatpush.bf16.msrb.mxu0 %v4892_v21 }
 0x4e2   :  { %2092 = vmatmul.bf16.vlgmr.msrb.gmra.mxu1 %v2013_v28  ;;  %2105 = vmatmul.bf16.vlgmr.msrb.gmra.mxu2 %v2013_v28  ;;  %v7169_v28 = vld [vmem:[#allocation13_spill] sm:$0xff] }
 0x4e4   :  { %2141 = vmatpush.bf16.msra.mxu1 %v5169_v22  ;;  %2179 = vmatpush.bf16.msra.mxu2 %v4719_v26 }
 0x4e5   :  { %2192 = vmatpush.bf16.msrb.mxu3 %v4857_v53  ;;  %2205 = vmatpush.bf16.msrb.mxu0 %v4906_v34 }
 0x4e6   :  { %v4376_v50 = vpop.eup %4375 }
 0x4e7   :  { %v2004_v45 = vmul.f32 %v4376_v50, %v2003_v56  ;;  %v7185_v56 = vld [vmem:[#allocation17_spill] sm:$0xff]  ;;  %v7186_v50 = vld [vmem:[#allocation30_spill] sm:$0xff] }
 0x4e8   :  { %2142 = vmatpush.bf16.msra.mxu1 %v5181_v52  ;;  %2180 = vmatpush.bf16.msra.mxu2 %v4734_v35 }
 0x4e9   :  { %v5832_v18 = vadd.f32 %v2005_v14, %v2004_v45  ;;  %2193 = vmatpush.bf16.msrb.mxu3 %v4870_v0  ;;  %2206 = vmatpush.bf16.msrb.mxu0 %v4915_v43  ;;  %v7187_v14 = vld [vmem:[#allocation43_spill] sm:$0xff]  ;;  %v7188_v45 = vld [vmem:[#allocation44_spill] sm:$0xff] }
 0x4eb   :  { %7168 = vst [vmem:[#allocation60_spill] sm:$0xff] %v5832_v18  ;;  %v2110_v46 = vpack.c.bf16 %v5832_v18, %v5832_v18 }
 0x4ec   :  { %2143 = vmatpush.bf16.msra.mxu1 %v5187_v40  ;;  %2181 = vmatpush.bf16.msra.mxu2 %v4755_v47 }
 0x4ed   :  { %2119 = vmatmul.bf16.vlgmr.msra.gmra.mxu3 %v2110_v46  ;;  %2132 = vmatmul.bf16.vlgmr.msra.gmra.mxu0 %v2110_v46 }
 0x4ee   :  { %2194 = vmatpush.bf16.msrb.mxu3 %v4883_v12  ;;  %2207 = vmatpush.bf16.msrb.mxu0 %v4923_v48 }
 0x4f0   :  { %2144 = vmatpush.bf16.msra.mxu1 %v5197_v23  ;;  %2182 = vmatpush.bf16.msra.mxu2 %v4776_v61 }
 0x4f2   :  { %2195 = vmatpush.bf16.msrb.mxu3 %v4890_v20  ;;  %2208 = vmatpush.bf16.msrb.mxu0 %v4936_v57 }
 0x4f3   :  { %2145 = vmatmul.bf16.vlgmr.msra.gmra.mxu1 %v2110_v46  ;;  %v7189_v46 = vld [vmem:[#allocation20_spill] sm:$0xff] }
 0x4f4   :  { %2232 = vmatpush.bf16.msrb.mxu1 %v4901_v29  ;;  %2245 = vmatpush.bf16.msrb.mxu2 %v4984_v38 }
 0x4f6   :  { %2258 = vmatpush.bf16.msra.mxu3 %v5015_v11  ;;  %2272 = vmatpush.bf16.msra.mxu0 %v7040_v62 }
 0x4f8   :  { %2233 = vmatpush.bf16.msrb.mxu1 %v7169_v28  ;;  %2246 = vmatpush.bf16.msrb.mxu2 %v7170_v49 }
 0x4fa   :  { %2259 = vmatpush.bf16.msra.mxu3 %v7171_v44  ;;  %2273 = vmatpush.bf16.msra.mxu0 %v7172_v25  ;;  %v7209_v44 = vld [vmem:[#allocation58_spill] sm:$0xff] }
 0x4fc   :  { %2234 = vmatpush.bf16.msrb.mxu1 %v7173_v16  ;;  %2247 = vmatpush.bf16.msrb.mxu2 %v7174_v8 }
 0x4fe   :  { %2260 = vmatpush.bf16.msra.mxu3 %v7175_v42  ;;  %2274 = vmatpush.bf16.msra.mxu0 %v7176_v4 }
 0x500   :  { %2235 = vmatpush.bf16.msrb.mxu1 %v7177_v33  ;;  %2248 = vmatpush.bf16.msrb.mxu2 %v7178_v59  ;;  %v7208_v33 = vld [vmem:[#allocation73_spill] sm:$0xff] }
 0x502   :  { %2261 = vmatpush.bf16.msra.mxu3 %v7179_v39  ;;  %2275 = vmatpush.bf16.msra.mxu0 %v7180_v60  ;;  %v7191_v60 = vld [vmem:[#allocation46_spill] sm:$0xff] }
 0x504   :  { %2236 = vmatpush.bf16.msrb.mxu1 %v7181_v9  ;;  %2249 = vmatpush.bf16.msrb.mxu2 %v7182_v51  ;;  %v7192_v9 = vld [vmem:[#allocation48_spill] sm:$0xff] }
 0x505   :  { %v7193_v51 = vld [vmem:[#allocation24_spill] sm:$0xff] }
 0x506   :  { %2262 = vmatpush.bf16.msra.mxu3 %v7183_v27  ;;  %2276 = vmatpush.bf16.msra.mxu0 %v7184_v36  ;;  %v7194_v27 = vld [vmem:[#allocation39_spill] sm:$0xff]  ;;  %v7195_v36 = vld [vmem:[#allocation25_spill] sm:$0xff] }
 0x508   :  { %2237 = vmatpush.bf16.msrb.mxu1 %v7185_v56  ;;  %2250 = vmatpush.bf16.msrb.mxu2 %v7186_v50  ;;  %v7196_v56 = vld [vmem:[#allocation53_spill] sm:$0xff]  ;;  %v7197_v50 = vld [vmem:[#allocation54_spill] sm:$0xff] }
 0x50a   :  { %2263 = vmatpush.bf16.msra.mxu3 %v7187_v14  ;;  %2277 = vmatpush.bf16.msra.mxu0 %v7188_v45  ;;  %v7198_v14 = vld [vmem:[#allocation29_spill] sm:$0xff]  ;;  %v7199_v45 = vld [vmem:[#allocation34_spill] sm:$0xff] }
 0x50c   :  { %2238 = vmatpush.bf16.msrb.mxu1 %v7189_v46  ;;  %2251 = vmatpush.bf16.msrb.mxu2 %v7190_v32  ;;  %v7200_v46 = vld [vmem:[#allocation38_spill] sm:$0xff] }
 0x50d   :  { %v7201_v32 = vld [vmem:[#allocation42_spill] sm:$0xff] }
 0x50e   :  { %2264 = vmatpush.bf16.msra.mxu3 %v7191_v60  ;;  %2278 = vmatpush.bf16.msra.mxu0 %v7192_v9  ;;  %v7202_v60 = vld [vmem:[#allocation45_spill] sm:$0xff]  ;;  %v7203_v9 = vld [vmem:[#allocation52_spill] sm:$0xff] }
 0x510   :  { %2239 = vmatpush.bf16.msrb.mxu1 %v7193_v51  ;;  %2252 = vmatpush.bf16.msrb.mxu2 %v7194_v27  ;;  %v7204_v51 = vld [vmem:[#allocation55_spill] sm:$0xff]  ;;  %v7205_v27 = vld [vmem:[#allocation21_spill] sm:$0xff] }
 0x512   :  { %2265 = vmatpush.bf16.msra.mxu3 %v7196_v56  ;;  %2279 = vmatpush.bf16.msra.mxu0 %v7197_v50 }
 0x514   :  { %2285 = vmatpush.bf16.msra.mxu1 %v7195_v36  ;;  %v7206_v36 = vld [vmem:[#allocation72_spill] sm:$0xff] }
 0x515   :  { %v321_v39 = vadd.f32 %v7206_v36, %v7205_v27 }
 0x518   :  { %2286 = vmatpush.bf16.msra.mxu1 %v7198_v14  ;;  %v7207_v14 = vld [vmem:[#allocation31_spill] sm:$0xff] }
 0x51c   :  { %2287 = vmatpush.bf16.msra.mxu1 %v7199_v45  ;;  %v370_v45 = vadd.f32 %v7208_v33, %v7207_v14 }
 0x520   :  { %2288 = vmatpush.bf16.msra.mxu1 %v7200_v46 }
 0x524   :  { %2289 = vmatpush.bf16.msra.mxu1 %v7201_v32 }
 0x528   :  { %2290 = vmatpush.bf16.msra.mxu1 %v7202_v60 }
 0x52c   :  { %2291 = vmatpush.bf16.msra.mxu1 %v7203_v9 }
 0x530   :  { %2292 = vmatpush.bf16.msra.mxu1 %v7204_v51 }
 0x54f   :  { %v2023_v56 = vpop.f32.mrf.mxu1 }
 0x550   :  { %v2053_v4 = vadd.f32 %v2023_v56, %v321_v39  ;;  %v2080_v50 = vpop.f32.mrf.mxu0  ;;  %v7210_v56 = vld [vmem:[#allocation47_spill] sm:$0xff] }
 0x552   :  { %v2055_v59 = vmul.f32 0.5, %v2053_v4  ;;  %v7211_v4 = vld [vmem:[#allocation74_spill] sm:$0xff] }
 0x553   :  { %v419_v62 = vadd.f32 %v7211_v4, %v7210_v56 }
 0x554   :  { %4377 = vtanh.f32 %v2055_v59 }
 0x555   :  { %v2036_v46 = vpop.f32.mrf.mxu2 }
 0x556   :  { %v2054_v42 = vadd.f32 %v2036_v46, %v370_v45  ;;  %v2049_v32 = vpop.f32.mrf.mxu3 }
 0x557   :  { %v2025_v25 = vpop.f32.mrf.mxu1  ;;  %v2063_v36 = vadd.f32 %v7209_v44, %v2049_v32 }
 0x558   :  { %v2056_v60 = vmul.f32 0.5, %v2054_v42  ;;  %v2082_v8 = vpop.f32.mrf.mxu0 }
 0x55a   :  { %v4378_v9 = vpop.eup %4377  ;;  %4379 = vtanh.f32 %v2056_v60 }
 0x55b   :  { %v2059_v51 = vmul.f32 0.5, %v4378_v9 }
 0x55d   :  { %v2061_v16 = vadd.f32 0.5, %v2059_v51  ;;  %v2038_v27 = vpop.f32.mrf.mxu2 }
 0x55e   :  { %v2051_v39 = vpop.f32.mrf.mxu3 }
 0x55f   :  { %v2064_v49 = vmul.f32 %v2063_v36, %v2061_v16  ;;  %v2093_v33 = vpop.f32.mrf.mxu1 }
 0x560   :  { %v4380_v59 = vpop.eup %4379  ;;  %v2094_v36 = vadd.f32 %v2093_v33, %v5315_v2 }
 0x561   :  { %v2060_v14 = vmul.f32 0.5, %v4380_v59  ;;  %v2065_v45 = vadd.f32 %v2064_v49, %v419_v62  ;;  %v2081_v62 = vadd.f32 %v2080_v50, %v6993_v13 }
 0x563   :  { %4381 = vtanh.f32 %v2065_v45  ;;  %v2062_v25 = vadd.f32 0.5, %v2060_v14 }
 0x565   :  { %v2106_v42 = vpop.f32.mrf.mxu2  ;;  %v2067_v46 = vsub.f32 1.0, %v2062_v25  ;;  %v2069_v9 = vmul.f32 %v2062_v25, %v5803_v24 }
 0x567   :  { %v2095_v8 = vpop.f32.mrf.mxu1 }
 0x569   :  { %v4382_v60 = vpop.eup %4381 }
 0x56a   :  { %v2068_v51 = vmul.f32 %v4382_v60, %v2067_v46  ;;  %v2133_v32 = vpop.f32.mrf.mxu0 }
 0x56b   :  { %v2151_v49 = vadd.f32 %v2133_v32, %v2094_v36 }
 0x56c   :  { %v5894_v44 = vadd.f32 %v2069_v9, %v2068_v51  ;;  %v2107_v51 = vadd.f32 %v2106_v42, %v5331_v1 }
 0x56d   :  { %v2108_v27 = vpop.f32.mrf.mxu2  ;;  %v2153_v33 = vmul.f32 0.5, %v2151_v49 }
 0x56e   :  { %v2174_v16 = vpack.c.bf16 %v5894_v44, %v5894_v44 }
 0x570   :  { %v2120_v14 = vpop.f32.mrf.mxu3  ;;  %v2146_v39 = vpop.f32.mrf.mxu1  ;;  %2183 = vmatmul.bf16.vlgmr.msra.gmra.mxu2 %v2174_v16  ;;  %2196 = vmatmul.bf16.vlgmr.msrb.gmra.mxu3 %v2174_v16 }
 0x571   :  { %v2150_v4 = vadd.f32 %v2120_v14, %v2081_v62  ;;  %2209 = vmatmul.bf16.vlgmr.msrb.gmra.mxu0 %v2174_v16  ;;  %2240 = vmatmul.bf16.vlgmr.msrb.gmra.mxu1 %v2174_v16  ;;  %v2160_v9 = vadd.f32 %v5712_v54, %v2146_v39 }
 0x572   :  { %v2135_v24 = vpop.f32.mrf.mxu0  ;;  %2298 = vmatpush.bf16.msra.mxu2 %v5140_v37  ;;  %2336 = vmatpush.bf16.msrb.mxu3 %v4680_v3 }
 0x573   :  { %v2152_v59 = vmul.f32 0.5, %v2150_v4  ;;  %2349 = vmatpush.bf16.msrb.mxu0 %v4781_v63  ;;  %2362 = vmatpush.bf16.msrb.mxu1 %v4865_v58  ;;  %v7213_v24 = vld [vmem:[#allocation18_spill] sm:$0xff] }
 0x575   :  { %4383 = vtanh.f32 %v2152_v59  ;;  %v7214_v59 = vld [vmem:[#allocation23_spill] sm:$0xff] }
 0x576   :  { %2299 = vmatpush.bf16.msra.mxu2 %v5143_v31  ;;  %2337 = vmatpush.bf16.msrb.mxu3 %v4683_v5  ;;  %4385 = vtanh.f32 %v2153_v33  ;;  %v7215_v33 = vld [vmem:[#allocation27_spill] sm:$0xff] }
 0x577   :  { %2350 = vmatpush.bf16.msrb.mxu0 %v4803_v17  ;;  %2363 = vmatpush.bf16.msrb.mxu1 %v4878_v7 }
 0x578   :  { %v2122_v50 = vpop.f32.mrf.mxu3  ;;  %v2148_v45 = vpop.f32.mrf.mxu1 }
 0x579   :  { %v7216_v50 = vld [vmem:[#allocation14_spill] sm:$0xff]  ;;  %v7217_v45 = vld [vmem:[#allocation19_spill] sm:$0xff] }
 0x57a   :  { %2300 = vmatpush.bf16.msra.mxu2 %v5153_v6  ;;  %2338 = vmatpush.bf16.msrb.mxu3 %v4692_v10 }
 0x57b   :  { %v4384_v25 = vpop.eup %4383  ;;  %2351 = vmatpush.bf16.msrb.mxu0 %v4825_v30  ;;  %2364 = vmatpush.bf16.msrb.mxu1 %v4885_v15 }
 0x57c   :  { %v2156_v8 = vmul.f32 0.5, %v4384_v25  ;;  %v4386_v46 = vpop.eup %4385  ;;  %v7218_v25 = vld [vmem:[#allocation28_spill] sm:$0xff] }
 0x57d   :  { %v2157_v27 = vmul.f32 0.5, %v4386_v46  ;;  %v7220_v46 = vld [vmem:[#allocation15_spill] sm:$0xff] }
 0x57e   :  { %v2158_v60 = vadd.f32 0.5, %v2156_v8  ;;  %2301 = vmatpush.bf16.msra.mxu2 %v5161_v55  ;;  %2339 = vmatpush.bf16.msrb.mxu3 %v4707_v19  ;;  %v7219_v8 = vld [vmem:[#allocation32_spill] sm:$0xff] }
 0x57f   :  { %2352 = vmatpush.bf16.msrb.mxu0 %v4841_v41  ;;  %2365 = vmatpush.bf16.msrb.mxu1 %v4892_v21  ;;  %v2159_v62 = vadd.f32 0.5, %v2157_v27  ;;  %v7225_v27 = vld [vmem:[#allocation26_spill] sm:$0xff] }
 0x580   :  { %v2161_v32 = vmul.f32 %v2160_v9, %v2158_v60  ;;  %2253 = vmatmul.bf16.vlgmr.msrb.gmra.mxu2 %v2174_v16  ;;  %2266 = vmatmul.bf16.vlgmr.msra.gmra.mxu3 %v2174_v16  ;;  %v7221_v60 = vld [vmem:[#allocation22_spill] sm:$0xff]  ;;  %v7222_v9 = vld [vmem:[#allocation33_spill] sm:$0xff] }
 0x581   :  { %v2164_v42 = vsub.f32 1.0, %v2159_v62  ;;  %v2166_v49 = vmul.f32 %v2159_v62, %v5832_v18  ;;  %v7227_v62 = vld [vmem:[#allocation40_spill] sm:$0xff]  ;;  %v7233_v18 = vld [vmem:[#allocation35_spill] sm:$0xff] }
 0x582   :  { %v2162_v36 = vadd.f32 %v2161_v32, %v2107_v51  ;;  %2302 = vmatpush.bf16.msra.mxu2 %v5169_v22  ;;  %2340 = vmatpush.bf16.msrb.mxu3 %v4719_v26  ;;  %v7223_v51 = vld [vmem:[#allocation36_spill] sm:$0xff] }
 0x583   :  { %2353 = vmatpush.bf16.msrb.mxu0 %v4857_v53  ;;  %2366 = vmatpush.bf16.msrb.mxu1 %v4906_v34  ;;  %v7224_v32 = vld [vmem:[#allocation16_spill] sm:$0xff] }
 0x584   :  { %4387 = vtanh.f32 %v2162_v36  ;;  %v7226_v36 = vld [vmem:[#allocation37_spill] sm:$0xff] }
 0x586   :  { %2303 = vmatpush.bf16.msra.mxu2 %v5181_v52  ;;  %2341 = vmatpush.bf16.msrb.mxu3 %v4734_v35 }
 0x587   :  { %2354 = vmatpush.bf16.msrb.mxu0 %v4870_v0  ;;  %2367 = vmatpush.bf16.msrb.mxu1 %v4915_v43 }
 0x58a   :  { %v4388_v16 = vpop.eup %4387  ;;  %2304 = vmatpush.bf16.msra.mxu2 %v5187_v40  ;;  %2342 = vmatpush.bf16.msrb.mxu3 %v4755_v47 }
 0x58b   :  { %v2165_v14 = vmul.f32 %v4388_v16, %v2164_v42  ;;  %2355 = vmatpush.bf16.msrb.mxu0 %v4883_v12  ;;  %2368 = vmatpush.bf16.msrb.mxu1 %v4923_v48  ;;  %v7228_v42 = vld [vmem:[#allocation17_spill] sm:$0xff]  ;;  %v7229_v16 = vld [vmem:[#allocation30_spill] sm:$0xff] }
 0x58d   :  { %v5931_v39 = vadd.f32 %v2166_v49, %v2165_v14  ;;  %v7230_v49 = vld [vmem:[#allocation41_spill] sm:$0xff]  ;;  %v7231_v14 = vld [vmem:[#allocation43_spill] sm:$0xff] }
 0x58e   :  { %2305 = vmatpush.bf16.msra.mxu2 %v5197_v23  ;;  %2343 = vmatpush.bf16.msrb.mxu3 %v4776_v61 }
 0x58f   :  { %7212 = vst [vmem:[#allocation61_spill] sm:$0xff] %v5931_v39  ;;  %v2271_v4 = vpack.c.bf16 %v5931_v39, %v5931_v39  ;;  %2356 = vmatpush.bf16.msrb.mxu0 %v4890_v20  ;;  %2369 = vmatpush.bf16.msrb.mxu1 %v4936_v57 }
 0x591   :  { %2280 = vmatmul.bf16.vlgmr.msra.gmra.mxu0 %v2271_v4  ;;  %2293 = vmatmul.bf16.vlgmr.msra.gmra.mxu1 %v2271_v4 }
 0x592   :  { %2393 = vmatpush.bf16.msrb.mxu2 %v4901_v29  ;;  %2406 = vmatpush.bf16.msra.mxu3 %v4984_v38 }
 0x593   :  { %2306 = vmatmul.bf16.vlgmr.msra.gmra.mxu2 %v2271_v4  ;;  %2419 = vmatpush.bf16.msra.mxu0 %v5015_v11  ;;  %v7232_v4 = vld [vmem:[#allocation20_spill] sm:$0xff] }
 0x594   :  { %2433 = vmatpush.bf16.msra.mxu1 %v7214_v59 }
 0x596   :  { %2394 = vmatpush.bf16.msrb.mxu2 %v7169_v28  ;;  %2407 = vmatpush.bf16.msra.mxu3 %v7213_v24 }
 0x597   :  { %2420 = vmatpush.bf16.msra.mxu0 %v7215_v33 }
 0x598   :  { %2434 = vmatpush.bf16.msra.mxu1 %v7218_v25 }
 0x59a   :  { %2395 = vmatpush.bf16.msrb.mxu2 %v7216_v50  ;;  %2408 = vmatpush.bf16.msra.mxu3 %v7217_v45 }
 0x59b   :  { %2421 = vmatpush.bf16.msra.mxu0 %v7219_v8 }
 0x59c   :  { %2435 = vmatpush.bf16.msra.mxu1 %v7222_v9  ;;  %v7252_v9 = vld [vmem:[#allocation76_spill] sm:$0xff] }
 0x59e   :  { %2396 = vmatpush.bf16.msrb.mxu2 %v7220_v46  ;;  %2409 = vmatpush.bf16.msra.mxu3 %v7221_v60  ;;  %v7249_v60 = vld [vmem:[#allocation21_spill] sm:$0xff] }
 0x59f   :  { %2422 = vmatpush.bf16.msra.mxu0 %v7223_v51  ;;  %v7234_v51 = vld [vmem:[#allocation44_spill] sm:$0xff] }
 0x5a0   :  { %2436 = vmatpush.bf16.msra.mxu1 %v7226_v36  ;;  %v7237_v36 = vld [vmem:[#allocation39_spill] sm:$0xff] }
 0x5a2   :  { %2397 = vmatpush.bf16.msrb.mxu2 %v7224_v32  ;;  %2410 = vmatpush.bf16.msra.mxu3 %v7225_v27  ;;  %v7235_v32 = vld [vmem:[#allocation46_spill] sm:$0xff]  ;;  %v7236_v27 = vld [vmem:[#allocation24_spill] sm:$0xff] }
 0x5a3   :  { %2423 = vmatpush.bf16.msra.mxu0 %v7227_v62  ;;  %v7238_v62 = vld [vmem:[#allocation25_spill] sm:$0xff] }
 0x5a4   :  { %2437 = vmatpush.bf16.msra.mxu1 %v7230_v49  ;;  %v7241_v49 = vld [vmem:[#allocation29_spill] sm:$0xff] }
 0x5a6   :  { %2398 = vmatpush.bf16.msrb.mxu2 %v7228_v42  ;;  %2411 = vmatpush.bf16.msra.mxu3 %v7229_v16  ;;  %v7239_v42 = vld [vmem:[#allocation48_spill] sm:$0xff]  ;;  %v7240_v16 = vld [vmem:[#allocation53_spill] sm:$0xff] }
 0x5a7   :  { %2424 = vmatpush.bf16.msra.mxu0 %v7231_v14  ;;  %v7242_v14 = vld [vmem:[#allocation54_spill] sm:$0xff] }
 0x5a8   :  { %2438 = vmatpush.bf16.msra.mxu1 %v7234_v51  ;;  %v7245_v51 = vld [vmem:[#allocation42_spill] sm:$0xff] }
 0x5aa   :  { %2399 = vmatpush.bf16.msrb.mxu2 %v7232_v4  ;;  %2412 = vmatpush.bf16.msra.mxu3 %v7233_v18  ;;  %v7243_v4 = vld [vmem:[#allocation34_spill] sm:$0xff] }
 0x5ab   :  { %2425 = vmatpush.bf16.msra.mxu0 %v7235_v32  ;;  %v7244_v18 = vld [vmem:[#allocation38_spill] sm:$0xff]  ;;  %v7246_v32 = vld [vmem:[#allocation45_spill] sm:$0xff] }
 0x5ac   :  { %2439 = vmatpush.bf16.msra.mxu1 %v7239_v42 }
 0x5ae   :  { %2400 = vmatpush.bf16.msrb.mxu2 %v7236_v27  ;;  %2413 = vmatpush.bf16.msra.mxu3 %v7237_v36  ;;  %v7247_v27 = vld [vmem:[#allocation52_spill] sm:$0xff]  ;;  %v7248_v36 = vld [vmem:[#allocation55_spill] sm:$0xff] }
 0x5af   :  { %2426 = vmatpush.bf16.msra.mxu0 %v7240_v16  ;;  %v7250_v16 = vld [vmem:[#allocation75_spill] sm:$0xff] }
 0x5b0   :  { %2440 = vmatpush.bf16.msra.mxu1 %v7242_v14  ;;  %v324_v46 = vadd.f32 %v7250_v16, %v7249_v60  ;;  %v5986_v16 = vld [vmem:[%s6699_s4] ss:$0 sm:$0xff] }
 0x5b1   :  { %7253 = vst [vmem:[#allocation50_spill] sm:$0xff] %v5986_v16 }
 0x5b2   :  { %2446 = vmatpush.bf16.msra.mxu2 %v7238_v62 }
 0x5b6   :  { %2447 = vmatpush.bf16.msra.mxu2 %v7241_v49  ;;  %v7251_v49 = vld [vmem:[#allocation31_spill] sm:$0xff] }
 0x5b7   :  { %v373_v14 = vadd.f32 %v7252_v9, %v7251_v49 }
 0x5ba   :  { %2448 = vmatpush.bf16.msra.mxu2 %v7243_v4 }
 0x5be   :  { %2449 = vmatpush.bf16.msra.mxu2 %v7244_v18 }
 0x5c2   :  { %2450 = vmatpush.bf16.msra.mxu2 %v7245_v51 }
 0x5c6   :  { %2451 = vmatpush.bf16.msra.mxu2 %v7246_v32 }
 0x5ca   :  { %2452 = vmatpush.bf16.msra.mxu2 %v7247_v27 }
 0x5ce   :  { %2453 = vmatpush.bf16.msra.mxu2 %v7248_v36 }
 0x5ee   :  { %v2210_v62 = vpop.f32.mrf.mxu0  ;;  %v2241_v42 = vpop.f32.mrf.mxu1 }
 0x5ef   :  { %v2224_v9 = vadd.f32 %v5986_v16, %v2210_v62  ;;  %v2242_v60 = vadd.f32 %v2241_v42, %v6993_v13 }
 0x5f3   :  { %v2184_v8 = vpop.f32.mrf.mxu2  ;;  %v2197_v4 = vpop.f32.mrf.mxu3 }
 0x5f4   :  { %v2214_v45 = vadd.f32 %v2184_v8, %v324_v46  ;;  %v2215_v18 = vadd.f32 %v2197_v4, %v373_v14 }
 0x5f6   :  { %v2216_v50 = vmul.f32 0.5, %v2214_v45  ;;  %v2212_v51 = vpop.f32.mrf.mxu0  ;;  %v2243_v25 = vpop.f32.mrf.mxu1  ;;  %v2217_v32 = vmul.f32 0.5, %v2215_v18  ;;  %v7254_v45 = vld [vmem:[#allocation77_spill] sm:$0xff] }
 0x5f7   :  { %v422_v46 = vadd.f32 %v7254_v45, %v7210_v56 }
 0x5f8   :  { %4389 = vtanh.f32 %v2216_v50 }
 0x5f9   :  { %4391 = vtanh.f32 %v2217_v32 }
 0x5fb   :  { %v2186_v27 = vpop.f32.mrf.mxu2  ;;  %v2199_v36 = vpop.f32.mrf.mxu3 }
 0x5fe   :  { %v4390_v33 = vpop.eup %4389 }
 0x5ff   :  { %v2220_v24 = vmul.f32 0.5, %v4390_v33  ;;  %v4392_v28 = vpop.eup %4391 }
 0x600   :  { %v2221_v51 = vmul.f32 0.5, %v4392_v28 }
 0x601   :  { %v2222_v8 = vadd.f32 0.5, %v2220_v24 }
 0x602   :  { %v2223_v27 = vadd.f32 0.5, %v2221_v51 }
 0x603   :  { %v2225_v25 = vmul.f32 %v2224_v9, %v2222_v8  ;;  %v2254_v18 = vpop.f32.mrf.mxu2  ;;  %v2267_v50 = vpop.f32.mrf.mxu3 }
 0x604   :  { %v2228_v14 = vsub.f32 1.0, %v2223_v27  ;;  %v2255_v49 = vadd.f32 %v2254_v18, %v5315_v2  ;;  %v2230_v24 = vmul.f32 %v2223_v27, %v5894_v44 }
 0x605   :  { %v2226_v32 = vadd.f32 %v2225_v25, %v422_v46 }
 0x607   :  { %4393 = vtanh.f32 %v2226_v32 }
 0x60b   :  { %v2256_v33 = vpop.f32.mrf.mxu2  ;;  %v2269_v36 = vpop.f32.mrf.mxu3 }
 0x60c   :  { %v2268_v33 = vadd.f32 %v2267_v50, %v5331_v1 }
 0x60d   :  { %v4394_v4 = vpop.eup %4393 }
 0x60e   :  { %v2229_v62 = vmul.f32 %v4394_v4, %v2228_v14  ;;  %v2281_v16 = vpop.f32.mrf.mxu0  ;;  %v2294_v45 = vpop.f32.mrf.mxu1 }
 0x60f   :  { %v2311_v9 = vadd.f32 %v2281_v16, %v2242_v60  ;;  %v2312_v8 = vadd.f32 %v2294_v45, %v2255_v49 }
 0x610   :  { %v5994_v56 = vadd.f32 %v2230_v24, %v2229_v62 }
 0x611   :  { %v2313_v28 = vmul.f32 0.5, %v2311_v9  ;;  %v2314_v25 = vmul.f32 0.5, %v2312_v8 }
 0x612   :  { %v2335_v46 = vpack.c.bf16 %v5994_v56, %v5994_v56 }
 0x613   :  { %4395 = vtanh.f32 %v2313_v28  ;;  %v7256_v28 = vld [vmem:[#allocation13_spill] sm:$0xff] }
 0x614   :  { %2344 = vmatmul.bf16.vlgmr.msrb.gmra.mxu3 %v2335_v46  ;;  %2357 = vmatmul.bf16.vlgmr.msrb.gmra.mxu0 %v2335_v46  ;;  %4397 = vtanh.f32 %v2314_v25  ;;  %v7258_v25 = vld [vmem:[#allocation27_spill] sm:$0xff] }
 0x615   :  { %2370 = vmatmul.bf16.vlgmr.msrb.gmra.mxu1 %v2335_v46  ;;  %2401 = vmatmul.bf16.vlgmr.msrb.gmra.mxu2 %v2335_v46 }
 0x616   :  { %v2307_v42 = vpop.f32.mrf.mxu2  ;;  %v2283_v18 = vpop.f32.mrf.mxu0  ;;  %2459 = vmatpush.bf16.msrb.mxu3 %v5140_v37  ;;  %2497 = vmatpush.bf16.msrb.mxu0 %v4680_v3 }
 0x617   :  { %v2296_v44 = vpop.f32.mrf.mxu1  ;;  %2510 = vmatpush.bf16.msrb.mxu1 %v4781_v63  ;;  %2523 = vmatpush.bf16.msrb.mxu2 %v4865_v58  ;;  %v2321_v32 = vadd.f32 %v5712_v54, %v2307_v42  ;;  %v7259_v42 = vld [vmem:[#allocation28_spill] sm:$0xff]  ;;  %v7260_v18 = vld [vmem:[#allocation14_spill] sm:$0xff] }
 0x618   :  { %v7261_v44 = vld [vmem:[#allocation19_spill] sm:$0xff] }
 0x619   :  { %v4396_v60 = vpop.eup %4395 }
 0x61a   :  { %v2317_v49 = vmul.f32 0.5, %v4396_v60  ;;  %2460 = vmatpush.bf16.msrb.mxu3 %v5143_v31  ;;  %2498 = vmatpush.bf16.msrb.mxu0 %v4683_v5  ;;  %v4398_v16 = vpop.eup %4397  ;;  %v7262_v60 = vld [vmem:[#allocation32_spill] sm:$0xff] }
 0x61b   :  { %2511 = vmatpush.bf16.msrb.mxu1 %v4803_v17  ;;  %2524 = vmatpush.bf16.msrb.mxu2 %v4878_v7  ;;  %v2318_v14 = vmul.f32 0.5, %v4398_v16  ;;  %v7264_v16 = vld [vmem:[#allocation15_spill] sm:$0xff] }
 0x61c   :  { %v2319_v51 = vadd.f32 0.5, %v2317_v49  ;;  %v7263_v49 = vld [vmem:[#allocation33_spill] sm:$0xff] }
 0x61d   :  { %v2320_v54 = vadd.f32 0.5, %v2318_v14  ;;  %v7270_v14 = vld [vmem:[#allocation40_spill] sm:$0xff] }
 0x61e   :  { %v2309_v27 = vpop.f32.mrf.mxu2  ;;  %v2322_v36 = vmul.f32 %v2321_v32, %v2319_v51  ;;  %2461 = vmatpush.bf16.msrb.mxu3 %v5153_v6  ;;  %2499 = vmatpush.bf16.msrb.mxu0 %v4692_v10  ;;  %v7265_v51 = vld [vmem:[#allocation22_spill] sm:$0xff]  ;;  %v7266_v32 = vld [vmem:[#allocation36_spill] sm:$0xff] }
 0x61f   :  { %2512 = vmatpush.bf16.msrb.mxu1 %v4825_v30  ;;  %2525 = vmatpush.bf16.msrb.mxu2 %v4885_v15  ;;  %v2325_v50 = vsub.f32 1.0, %v2320_v54  ;;  %v2327_v24 = vmul.f32 %v2320_v54, %v5931_v39  ;;  %v7267_v27 = vld [vmem:[#allocation37_spill] sm:$0xff]  ;;  %v7278_v39 = vld [vmem:[#allocation46_spill] sm:$0xff] }
 0x620   :  { %v2323_v4 = vadd.f32 %v2322_v36, %v2268_v33  ;;  %v7268_v33 = vld [vmem:[#allocation16_spill] sm:$0xff]  ;;  %v7269_v36 = vld [vmem:[#allocation26_spill] sm:$0xff]  ;;  %v7272_v54 = vld [vmem:[#allocation17_spill] sm:$0xff] }
 0x622   :  { %4399 = vtanh.f32 %v2323_v4  ;;  %2462 = vmatpush.bf16.msrb.mxu3 %v5161_v55  ;;  %2500 = vmatpush.bf16.msrb.mxu0 %v4707_v19  ;;  %v7271_v4 = vld [vmem:[#allocation41_spill] sm:$0xff] }
 0x623   :  { %2513 = vmatpush.bf16.msrb.mxu1 %v4841_v41  ;;  %2526 = vmatpush.bf16.msrb.mxu2 %v4892_v21 }
 0x624   :  { %2414 = vmatmul.bf16.vlgmr.msra.gmra.mxu3 %v2335_v46  ;;  %2427 = vmatmul.bf16.vlgmr.msra.gmra.mxu0 %v2335_v46  ;;  %v7257_v46 = vld [vmem:[#allocation18_spill] sm:$0xff] }
 0x626   :  { %2463 = vmatpush.bf16.msrb.mxu3 %v5169_v22  ;;  %2501 = vmatpush.bf16.msrb.mxu0 %v4719_v26 }
 0x627   :  { %2514 = vmatpush.bf16.msrb.mxu1 %v4857_v53  ;;  %2527 = vmatpush.bf16.msrb.mxu2 %v4906_v34 }
 0x628   :  { %v4400_v62 = vpop.eup %4399 }
 0x629   :  { %v2326_v45 = vmul.f32 %v4400_v62, %v2325_v50  ;;  %v7273_v50 = vld [vmem:[#allocation30_spill] sm:$0xff]  ;;  %v7274_v62 = vld [vmem:[#allocation43_spill] sm:$0xff] }
 0x62a   :  { %2464 = vmatpush.bf16.msrb.mxu3 %v5181_v52  ;;  %2502 = vmatpush.bf16.msrb.mxu0 %v4734_v35 }
 0x62b   :  { %v6023_v9 = vadd.f32 %v2327_v24, %v2326_v45  ;;  %2515 = vmatpush.bf16.msrb.mxu1 %v4870_v0  ;;  %2528 = vmatpush.bf16.msrb.mxu2 %v4915_v43  ;;  %v7275_v24 = vld [vmem:[#allocation44_spill] sm:$0xff] }
 0x62c   :  { %v7276_v45 = vld [vmem:[#allocation20_spill] sm:$0xff] }
 0x62d   :  { %7255 = vst [vmem:[#allocation62_spill] sm:$0xff] %v6023_v9  ;;  %v2432_v8 = vpack.c.bf16 %v6023_v9, %v6023_v9 }
 0x62e   :  { %2465 = vmatpush.bf16.msrb.mxu3 %v5187_v40  ;;  %2503 = vmatpush.bf16.msrb.mxu0 %v4755_v47 }
 0x62f   :  { %2441 = vmatmul.bf16.vlgmr.msra.gmra.mxu1 %v2432_v8  ;;  %2454 = vmatmul.bf16.vlgmr.msra.gmra.mxu2 %v2432_v8 }
 0x630   :  { %2516 = vmatpush.bf16.msrb.mxu1 %v4883_v12  ;;  %2529 = vmatpush.bf16.msrb.mxu2 %v4923_v48 }
 0x632   :  { %2466 = vmatpush.bf16.msrb.mxu3 %v5197_v23  ;;  %2504 = vmatpush.bf16.msrb.mxu0 %v4776_v61 }
 0x634   :  { %2517 = vmatpush.bf16.msrb.mxu1 %v4890_v20  ;;  %2530 = vmatpush.bf16.msrb.mxu2 %v4936_v57 }
 0x635   :  { %2467 = vmatmul.bf16.vlgmr.msrb.gmra.mxu3 %v2432_v8  ;;  %v7277_v8 = vld [vmem:[#allocation35_spill] sm:$0xff] }
 0x636   :  { %2554 = vmatpush.bf16.msra.mxu3 %v4901_v29  ;;  %2567 = vmatpush.bf16.msra.mxu0 %v4984_v38 }
 0x638   :  { %2580 = vmatpush.bf16.msra.mxu1 %v5015_v11  ;;  %2594 = vmatpush.bf16.msra.mxu2 %v7214_v59 }
 0x63a   :  { %2555 = vmatpush.bf16.msra.mxu3 %v7256_v28  ;;  %2568 = vmatpush.bf16.msra.mxu0 %v7257_v46 }
 0x63c   :  { %2581 = vmatpush.bf16.msra.mxu1 %v7258_v25  ;;  %2595 = vmatpush.bf16.msra.mxu2 %v7259_v42 }
 0x63e   :  { %2556 = vmatpush.bf16.msra.mxu3 %v7260_v18  ;;  %2569 = vmatpush.bf16.msra.mxu0 %v7261_v44 }
 0x640   :  { %2582 = vmatpush.bf16.msra.mxu1 %v7262_v60  ;;  %2596 = vmatpush.bf16.msra.mxu2 %v7263_v49 }
 0x642   :  { %2557 = vmatpush.bf16.msra.mxu3 %v7264_v16  ;;  %2570 = vmatpush.bf16.msra.mxu0 %v7265_v51  ;;  %v7295_v51 = vld [vmem:[#allocation78_spill] sm:$0xff] }
 0x644   :  { %2583 = vmatpush.bf16.msra.mxu1 %v7266_v32  ;;  %2597 = vmatpush.bf16.msra.mxu2 %v7267_v27  ;;  %v7292_v27 = vld [vmem:[#allocation31_spill] sm:$0xff] }
 0x646   :  { %2558 = vmatpush.bf16.msra.mxu3 %v7268_v33  ;;  %2571 = vmatpush.bf16.msra.mxu0 %v7269_v36  ;;  %v7279_v33 = vld [vmem:[#allocation48_spill] sm:$0xff] }
 0x647   :  { %v7280_v36 = vld [vmem:[#allocation24_spill] sm:$0xff] }
 0x648   :  { %2584 = vmatpush.bf16.msra.mxu1 %v7270_v14  ;;  %2598 = vmatpush.bf16.msra.mxu2 %v7271_v4  ;;  %v7281_v14 = vld [vmem:[#allocation39_spill] sm:$0xff]  ;;  %v7282_v4 = vld [vmem:[#allocation25_spill] sm:$0xff] }
 0x64a   :  { %2559 = vmatpush.bf16.msra.mxu3 %v7272_v54  ;;  %2572 = vmatpush.bf16.msra.mxu0 %v7273_v50  ;;  %v7283_v54 = vld [vmem:[#allocation53_spill] sm:$0xff]  ;;  %v7284_v50 = vld [vmem:[#allocation54_spill] sm:$0xff] }
 0x64c   :  { %2585 = vmatpush.bf16.msra.mxu1 %v7274_v62  ;;  %2599 = vmatpush.bf16.msra.mxu2 %v7275_v24  ;;  %v7285_v62 = vld [vmem:[#allocation29_spill] sm:$0xff]  ;;  %v7286_v24 = vld [vmem:[#allocation34_spill] sm:$0xff] }
 0x64e   :  { %2560 = vmatpush.bf16.msra.mxu3 %v7276_v45  ;;  %2573 = vmatpush.bf16.msra.mxu0 %v7277_v8  ;;  %v7287_v45 = vld [vmem:[#allocation38_spill] sm:$0xff] }
 0x64f   :  { %v7288_v8 = vld [vmem:[#allocation42_spill] sm:$0xff] }
 0x650   :  { %2586 = vmatpush.bf16.msra.mxu1 %v7278_v39  ;;  %2600 = vmatpush.bf16.msra.mxu2 %v7279_v33  ;;  %v7289_v39 = vld [vmem:[#allocation45_spill] sm:$0xff]  ;;  %v7290_v33 = vld [vmem:[#allocation52_spill] sm:$0xff] }
 0x652   :  { %2561 = vmatpush.bf16.msra.mxu3 %v7280_v36  ;;  %2574 = vmatpush.bf16.msra.mxu0 %v7281_v14  ;;  %v7291_v36 = vld [vmem:[#allocation55_spill] sm:$0xff] }
 0x654   :  { %2587 = vmatpush.bf16.msra.mxu1 %v7283_v54  ;;  %2601 = vmatpush.bf16.msra.mxu2 %v7284_v50  ;;  %v7293_v54 = vld [vmem:[#allocation79_spill] sm:$0xff]  ;;  %v7294_v50 = vld [vmem:[#allocation21_spill] sm:$0xff] }
 0x655   :  { %v375_v32 = vadd.f32 %v7293_v54, %v7292_v27  ;;  %v7296_v54 = vld [vmem:[#allocation50_spill] sm:$0xff] }
 0x656   :  { %2607 = vmatpush.bf16.msrb.mxu3 %v7282_v4 }
 0x65a   :  { %2608 = vmatpush.bf16.msrb.mxu3 %v7285_v62  ;;  %v326_v62 = vadd.f32 %v7295_v51, %v7294_v50  ;;  %v7297_v51 = vld [vmem:[#allocation47_spill] sm:$0xff] }
 0x65e   :  { %2609 = vmatpush.bf16.msrb.mxu3 %v7286_v24 }
 0x662   :  { %2610 = vmatpush.bf16.msrb.mxu3 %v7287_v45 }
 0x666   :  { %2611 = vmatpush.bf16.msrb.mxu3 %v7288_v8 }
 0x66a   :  { %2612 = vmatpush.bf16.msrb.mxu3 %v7289_v39 }
 0x66e   :  { %2613 = vmatpush.bf16.msrb.mxu3 %v7290_v33 }
 0x672   :  { %2614 = vmatpush.bf16.msrb.mxu3 %v7291_v36 }
 0x691   :  { %v2358_v14 = vpop.f32.mrf.mxu0 }
 0x692   :  { %v2371_v4 = vpop.f32.mrf.mxu1  ;;  %v2376_v16 = vadd.f32 %v2358_v14, %v375_v32  ;;  %v7298_v32 = vld [vmem:[#allocation80_spill] sm:$0xff] }
 0x693   :  { %v2385_v27 = vadd.f32 %v7296_v54, %v2371_v4  ;;  %v424_v14 = vadd.f32 %v7298_v32, %v7297_v51 }
 0x694   :  { %v2378_v39 = vmul.f32 0.5, %v2376_v16 }
 0x697   :  { %v2345_v24 = vpop.f32.mrf.mxu3 }
 0x698   :  { %v2375_v49 = vadd.f32 %v2345_v24, %v326_v62  ;;  %v2402_v45 = vpop.f32.mrf.mxu2 }
 0x699   :  { %v2360_v60 = vpop.f32.mrf.mxu0 }
 0x69a   :  { %v2377_v8 = vmul.f32 0.5, %v2375_v49  ;;  %v2373_v44 = vpop.f32.mrf.mxu1 }
 0x69c   :  { %4401 = vtanh.f32 %v2377_v8 }
 0x69d   :  { %4403 = vtanh.f32 %v2378_v39  ;;  %v2403_v39 = vadd.f32 %v2402_v45, %v6993_v13 }
 0x69f   :  { %v2347_v33 = vpop.f32.mrf.mxu3 }
 0x6a0   :  { %v2404_v36 = vpop.f32.mrf.mxu2 }
 0x6a1   :  { %v2428_v18 = vpop.f32.mrf.mxu0 }
 0x6a2   :  { %v4402_v42 = vpop.eup %4401 }
 0x6a3   :  { %v2381_v25 = vmul.f32 0.5, %v4402_v42  ;;  %v4404_v46 = vpop.eup %4403 }
 0x6a4   :  { %v2382_v60 = vmul.f32 0.5, %v4404_v46 }
 0x6a5   :  { %v2383_v28 = vadd.f32 0.5, %v2381_v25 }
 0x6a6   :  { %v2384_v16 = vadd.f32 0.5, %v2382_v60 }
 0x6a7   :  { %v2386_v62 = vmul.f32 %v2385_v27, %v2383_v28  ;;  %v2415_v24 = vpop.f32.mrf.mxu3 }
 0x6a8   :  { %v2389_v50 = vsub.f32 1.0, %v2384_v16  ;;  %v2416_v25 = vadd.f32 %v2415_v24, %v5315_v2  ;;  %v2391_v4 = vmul.f32 %v2384_v16, %v5994_v56  ;;  %v6094_v56 = vld [vmem:[%s6703_s8] ss:$0 sm:$0xff] }
 0x6a9   :  { %v2387_v49 = vadd.f32 %v2386_v62, %v424_v14  ;;  %v2430_v44 = vpop.f32.mrf.mxu0 }
 0x6ab   :  { %4405 = vtanh.f32 %v2387_v49 }
 0x6ac   :  { %v2442_v33 = vpop.f32.mrf.mxu1 }
 0x6ad   :  { %v2472_v36 = vadd.f32 %v2442_v33, %v2403_v39  ;;  %v2429_v39 = vadd.f32 %v2428_v18, %v5331_v1 }
 0x6af   :  { %v2474_v8 = vmul.f32 0.5, %v2472_v36  ;;  %v2417_v42 = vpop.f32.mrf.mxu3 }
 0x6b1   :  { %v4406_v59 = vpop.eup %4405  ;;  %4407 = vtanh.f32 %v2474_v8 }
 0x6b2   :  { %v2390_v28 = vmul.f32 %v4406_v59, %v2389_v50  ;;  %v2455_v27 = vpop.f32.mrf.mxu2 }
 0x6b3   :  { %v2473_v46 = vadd.f32 %v2455_v27, %v2416_v25 }
 0x6b4   :  { %v6087_v32 = vadd.f32 %v2391_v4, %v2390_v28  ;;  %v2444_v14 = vpop.f32.mrf.mxu1 }
 0x6b5   :  { %v2475_v62 = vmul.f32 0.5, %v2473_v46 }
 0x6b6   :  { %v2496_v45 = vpack.c.bf16 %v6087_v32, %v6087_v32 }
 0x6b7   :  { %v4408_v60 = vpop.eup %4407  ;;  %4409 = vtanh.f32 %v2475_v62  ;;  %v7300_v62 = vld [vmem:[#allocation23_spill] sm:$0xff] }
 0x6b8   :  { %v2478_v49 = vmul.f32 0.5, %v4408_v60  ;;  %v2468_v44 = vpop.f32.mrf.mxu3  ;;  %2505 = vmatmul.bf16.vlgmr.msrb.gmra.mxu0 %v2496_v45  ;;  %2518 = vmatmul.bf16.vlgmr.msrb.gmra.mxu1 %v2496_v45  ;;  %v7302_v60 = vld [vmem:[#allocation18_spill] sm:$0xff] }
 0x6b9   :  { %v2482_v59 = vadd.f32 %v6094_v56, %v2468_v44  ;;  %2531 = vmatmul.bf16.vlgmr.msrb.gmra.mxu2 %v2496_v45  ;;  %2562 = vmatmul.bf16.vlgmr.msra.gmra.mxu3 %v2496_v45  ;;  %v7304_v44 = vld [vmem:[#allocation28_spill] sm:$0xff] }
 0x6ba   :  { %v2480_v50 = vadd.f32 0.5, %v2478_v49  ;;  %v2457_v24 = vpop.f32.mrf.mxu2  ;;  %2620 = vmatpush.bf16.msrb.mxu0 %v5140_v37  ;;  %2658 = vmatpush.bf16.msrb.mxu1 %v4680_v3  ;;  %v7303_v49 = vld [vmem:[#allocation27_spill] sm:$0xff] }
 0x6bb   :  { %2671 = vmatpush.bf16.msrb.mxu2 %v4781_v63  ;;  %2684 = vmatpush.bf16.msra.mxu3 %v4865_v58  ;;  %v7307_v24 = vld [vmem:[#allocation32_spill] sm:$0xff] }
 0x6bc   :  { %v2483_v16 = vmul.f32 %v2482_v59, %v2480_v50  ;;  %v7305_v59 = vld [vmem:[#allocation14_spill] sm:$0xff]  ;;  %v7306_v50 = vld [vmem:[#allocation19_spill] sm:$0xff] }
 0x6bd   :  { %v4410_v33 = vpop.eup %4409 }
 0x6be   :  { %v2479_v36 = vmul.f32 0.5, %v4410_v33  ;;  %v2484_v8 = vadd.f32 %v2483_v16, %v2429_v39  ;;  %2621 = vmatpush.bf16.msrb.mxu0 %v5143_v31  ;;  %2659 = vmatpush.bf16.msrb.mxu1 %v4683_v5  ;;  %v7308_v39 = vld [vmem:[#allocation33_spill] sm:$0xff]  ;;  %v7309_v16 = vld [vmem:[#allocation15_spill] sm:$0xff]  ;;  %v7310_v33 = vld [vmem:[#allocation22_spill] sm:$0xff] }
 0x6bf   :  { %2672 = vmatpush.bf16.msrb.mxu2 %v4803_v17  ;;  %2685 = vmatpush.bf16.msra.mxu3 %v4878_v7 }
 0x6c0   :  { %4411 = vtanh.f32 %v2484_v8  ;;  %v2470_v42 = vpop.f32.mrf.mxu3  ;;  %v2481_v25 = vadd.f32 0.5, %v2479_v36  ;;  %v7311_v36 = vld [vmem:[#allocation36_spill] sm:$0xff]  ;;  %v7312_v8 = vld [vmem:[#allocation37_spill] sm:$0xff] }
 0x6c1   :  { %v7313_v42 = vld [vmem:[#allocation16_spill] sm:$0xff] }
 0x6c2   :  { %2622 = vmatpush.bf16.msrb.mxu0 %v5153_v6  ;;  %2660 = vmatpush.bf16.msrb.mxu1 %v4692_v10  ;;  %v2486_v18 = vsub.f32 1.0, %v2481_v25  ;;  %v2488_v28 = vmul.f32 %v2481_v25, %v6023_v9  ;;  %v7314_v25 = vld [vmem:[#allocation26_spill] sm:$0xff]  ;;  %v7320_v9 = vld [vmem:[#allocation44_spill] sm:$0xff] }
 0x6c3   :  { %2673 = vmatpush.bf16.msrb.mxu2 %v4825_v30  ;;  %2686 = vmatpush.bf16.msra.mxu3 %v4885_v15 }
 0x6c6   :  { %v4412_v4 = vpop.eup %4411  ;;  %2623 = vmatpush.bf16.msrb.mxu0 %v5161_v55  ;;  %2661 = vmatpush.bf16.msrb.mxu1 %v4707_v19 }
 0x6c7   :  { %v2487_v27 = vmul.f32 %v4412_v4, %v2486_v18  ;;  %2674 = vmatpush.bf16.msrb.mxu2 %v4841_v41  ;;  %2687 = vmatpush.bf16.msra.mxu3 %v4892_v21  ;;  %v7315_v18 = vld [vmem:[#allocation40_spill] sm:$0xff]  ;;  %v7316_v4 = vld [vmem:[#allocation41_spill] sm:$0xff] }
 0x6c8   :  { %2575 = vmatmul.bf16.vlgmr.msra.gmra.mxu0 %v2496_v45  ;;  %2588 = vmatmul.bf16.vlgmr.msra.gmra.mxu1 %v2496_v45  ;;  %v7301_v45 = vld [vmem:[#allocation13_spill] sm:$0xff] }
 0x6c9   :  { %v6115_v46 = vadd.f32 %v2488_v28, %v2487_v27  ;;  %v7317_v28 = vld [vmem:[#allocation17_spill] sm:$0xff]  ;;  %v7318_v27 = vld [vmem:[#allocation30_spill] sm:$0xff] }
 0x6ca   :  { %2624 = vmatpush.bf16.msrb.mxu0 %v5169_v22  ;;  %2662 = vmatpush.bf16.msrb.mxu1 %v4719_v26 }
 0x6cb   :  { %7299 = vst [vmem:[#allocation63_spill] sm:$0xff] %v6115_v46  ;;  %v2593_v14 = vpack.c.bf16 %v6115_v46, %v6115_v46  ;;  %2675 = vmatpush.bf16.msrb.mxu2 %v4857_v53  ;;  %2688 = vmatpush.bf16.msra.mxu3 %v4906_v34 }
 0x6cd   :  { %2602 = vmatmul.bf16.vlgmr.msra.gmra.mxu2 %v2593_v14  ;;  %2615 = vmatmul.bf16.vlgmr.msrb.gmra.mxu3 %v2593_v14 }
 0x6ce   :  { %2625 = vmatpush.bf16.msrb.mxu0 %v5181_v52  ;;  %2663 = vmatpush.bf16.msrb.mxu1 %v4734_v35 }
 0x6cf   :  { %2676 = vmatpush.bf16.msrb.mxu2 %v4870_v0  ;;  %2689 = vmatpush.bf16.msra.mxu3 %v4915_v43 }
 0x6d2   :  { %2626 = vmatpush.bf16.msrb.mxu0 %v5187_v40  ;;  %2664 = vmatpush.bf16.msrb.mxu1 %v4755_v47 }
 0x6d3   :  { %2677 = vmatpush.bf16.msrb.mxu2 %v4883_v12  ;;  %2690 = vmatpush.bf16.msra.mxu3 %v4923_v48 }
 0x6d6   :  { %2627 = vmatpush.bf16.msrb.mxu0 %v5197_v23  ;;  %2665 = vmatpush.bf16.msrb.mxu1 %v4776_v61 }
 0x6d7   :  { %2678 = vmatpush.bf16.msrb.mxu2 %v4890_v20  ;;  %2691 = vmatpush.bf16.msra.mxu3 %v4936_v57 }
 0x6d9   :  { %2628 = vmatmul.bf16.vlgmr.msrb.gmra.mxu0 %v2593_v14  ;;  %v7319_v14 = vld [vmem:[#allocation43_spill] sm:$0xff] }
 0x6da   :  { %2715 = vmatpush.bf16.msra.mxu0 %v4901_v29  ;;  %2728 = vmatpush.bf16.msra.mxu1 %v4984_v38 }
 0x6db   :  { %2741 = vmatpush.bf16.msra.mxu2 %v5015_v11  ;;  %2755 = vmatpush.bf16.msrb.mxu3 %v7300_v62 }
 0x6de   :  { %2716 = vmatpush.bf16.msra.mxu0 %v7301_v45  ;;  %2729 = vmatpush.bf16.msra.mxu1 %v7302_v60 }
 0x6df   :  { %2742 = vmatpush.bf16.msra.mxu2 %v7303_v49  ;;  %2756 = vmatpush.bf16.msrb.mxu3 %v7304_v44 }
 0x6e2   :  { %2717 = vmatpush.bf16.msra.mxu0 %v7305_v59  ;;  %2730 = vmatpush.bf16.msra.mxu1 %v7306_v50 }
 0x6e3   :  { %2743 = vmatpush.bf16.msra.mxu2 %v7307_v24  ;;  %2757 = vmatpush.bf16.msrb.mxu3 %v7308_v39  ;;  %v7340_v39 = vld [vmem:[#allocation82_spill] sm:$0xff] }
 0x6e6   :  { %2718 = vmatpush.bf16.msra.mxu0 %v7309_v16  ;;  %2731 = vmatpush.bf16.msra.mxu1 %v7310_v33  ;;  %v7321_v33 = vld [vmem:[#allocation20_spill] sm:$0xff] }
 0x6e7   :  { %2744 = vmatpush.bf16.msra.mxu2 %v7311_v36  ;;  %2758 = vmatpush.bf16.msrb.mxu3 %v7312_v8  ;;  %v7322_v36 = vld [vmem:[#allocation35_spill] sm:$0xff]  ;;  %v7323_v8 = vld [vmem:[#allocation46_spill] sm:$0xff] }
 0x6ea   :  { %2719 = vmatpush.bf16.msra.mxu0 %v7313_v42  ;;  %2732 = vmatpush.bf16.msra.mxu1 %v7314_v25  ;;  %v7324_v42 = vld [vmem:[#allocation48_spill] sm:$0xff] }
 0x6eb   :  { %2745 = vmatpush.bf16.msra.mxu2 %v7315_v18  ;;  %2759 = vmatpush.bf16.msrb.mxu3 %v7316_v4  ;;  %v7325_v25 = vld [vmem:[#allocation24_spill] sm:$0xff]  ;;  %v7326_v18 = vld [vmem:[#allocation39_spill] sm:$0xff]  ;;  %v7327_v4 = vld [vmem:[#allocation25_spill] sm:$0xff] }
 0x6ee   :  { %2720 = vmatpush.bf16.msra.mxu0 %v7317_v28  ;;  %2733 = vmatpush.bf16.msra.mxu1 %v7318_v27  ;;  %v7328_v28 = vld [vmem:[#allocation53_spill] sm:$0xff]  ;;  %v7329_v27 = vld [vmem:[#allocation54_spill] sm:$0xff] }
 0x6ef   :  { %2746 = vmatpush.bf16.msra.mxu2 %v7319_v14  ;;  %2760 = vmatpush.bf16.msrb.mxu3 %v7320_v9  ;;  %v7330_v14 = vld [vmem:[#allocation29_spill] sm:$0xff]  ;;  %v7331_v9 = vld [vmem:[#allocation34_spill] sm:$0xff] }
 0x6f2   :  { %2721 = vmatpush.bf16.msra.mxu0 %v7321_v33  ;;  %2734 = vmatpush.bf16.msra.mxu1 %v7322_v36  ;;  %v7332_v33 = vld [vmem:[#allocation38_spill] sm:$0xff] }
 0x6f3   :  { %2747 = vmatpush.bf16.msra.mxu2 %v7323_v8  ;;  %2761 = vmatpush.bf16.msrb.mxu3 %v7324_v42  ;;  %v7333_v36 = vld [vmem:[#allocation42_spill] sm:$0xff]  ;;  %v7334_v8 = vld [vmem:[#allocation45_spill] sm:$0xff]  ;;  %v7335_v42 = vld [vmem:[#allocation52_spill] sm:$0xff] }
 0x6f6   :  { %2722 = vmatpush.bf16.msra.mxu0 %v7325_v25  ;;  %2735 = vmatpush.bf16.msra.mxu1 %v7326_v18  ;;  %v7336_v25 = vld [vmem:[#allocation55_spill] sm:$0xff]  ;;  %v7337_v18 = vld [vmem:[#allocation21_spill] sm:$0xff] }
 0x6f7   :  { %2748 = vmatpush.bf16.msra.mxu2 %v7328_v28  ;;  %2762 = vmatpush.bf16.msrb.mxu3 %v7329_v27  ;;  %v7339_v28 = vld [vmem:[#allocation31_spill] sm:$0xff] }
 0x6f8   :  { %v378_v27 = vadd.f32 %v7340_v39, %v7339_v28  ;;  %v7341_v28 = vld [vmem:[#allocation83_spill] sm:$0xff] }
 0x6fa   :  { %2768 = vmatpush.bf16.msrb.mxu0 %v7327_v4  ;;  %v7338_v4 = vld [vmem:[#allocation81_spill] sm:$0xff] }
 0x6fb   :  { %v329_v16 = vadd.f32 %v7338_v4, %v7337_v18 }
 0x6fe   :  { %2769 = vmatpush.bf16.msrb.mxu0 %v7330_v14 }
 0x702   :  { %2770 = vmatpush.bf16.msrb.mxu0 %v7331_v9 }
 0x706   :  { %2771 = vmatpush.bf16.msrb.mxu0 %v7332_v33 }
 0x70a   :  { %2772 = vmatpush.bf16.msrb.mxu0 %v7333_v36 }
 0x70e   :  { %2773 = vmatpush.bf16.msrb.mxu0 %v7334_v8 }
 0x712   :  { %2774 = vmatpush.bf16.msrb.mxu0 %v7335_v42 }
 0x716   :  { %2775 = vmatpush.bf16.msrb.mxu0 %v7336_v25 }
 0x735   :  { %v2506_v24 = vpop.f32.mrf.mxu0  ;;  %v2519_v14 = vpop.f32.mrf.mxu1 }
 0x736   :  { %v2536_v50 = vadd.f32 %v2506_v24, %v329_v16  ;;  %v2537_v9 = vadd.f32 %v2519_v14, %v378_v27  ;;  %v427_v24 = vadd.f32 %v7341_v28, %v7297_v51 }
 0x738   :  { %v2538_v59 = vmul.f32 0.5, %v2536_v50  ;;  %v2539_v33 = vmul.f32 0.5, %v2537_v9 }
 0x73a   :  { %4413 = vtanh.f32 %v2538_v59 }
 0x73b   :  { %4415 = vtanh.f32 %v2539_v33 }
 0x73c   :  { %v2532_v36 = vpop.f32.mrf.mxu2  ;;  %v2563_v44 = vpop.f32.mrf.mxu3 }
 0x73d   :  { %v2508_v8 = vpop.f32.mrf.mxu0  ;;  %v2521_v42 = vpop.f32.mrf.mxu1  ;;  %v2546_v4 = vadd.f32 %v7296_v54, %v2532_v36 }
 0x740   :  { %v4414_v49 = vpop.eup %4413 }
 0x741   :  { %v2542_v25 = vmul.f32 0.5, %v4414_v49  ;;  %v4416_v60 = vpop.eup %4415 }
 0x742   :  { %v2543_v59 = vmul.f32 0.5, %v4416_v60 }
 0x743   :  { %v2544_v45 = vadd.f32 0.5, %v2542_v25  ;;  %v2564_v25 = vadd.f32 %v2563_v44, %v6993_v13 }
 0x744   :  { %v2534_v18 = vpop.f32.mrf.mxu2  ;;  %v2565_v39 = vpop.f32.mrf.mxu3  ;;  %v2545_v33 = vadd.f32 0.5, %v2543_v59 }
 0x745   :  { %v2547_v16 = vmul.f32 %v2546_v4, %v2544_v45  ;;  %v2576_v50 = vpop.f32.mrf.mxu0  ;;  %v2589_v9 = vpop.f32.mrf.mxu1 }
 0x746   :  { %v2550_v14 = vsub.f32 1.0, %v2545_v33  ;;  %v2577_v36 = vadd.f32 %v2576_v50, %v5315_v2  ;;  %v2552_v18 = vmul.f32 %v2545_v33, %v6087_v32 }
 0x747   :  { %v2548_v27 = vadd.f32 %v2547_v16, %v427_v24 }
 0x749   :  { %4417 = vtanh.f32 %v2548_v27 }
 0x74d   :  { %v2578_v8 = vpop.f32.mrf.mxu0  ;;  %v2591_v42 = vpop.f32.mrf.mxu1 }
 0x74f   :  { %v4418_v49 = vpop.eup %4417 }
 0x750   :  { %v2551_v39 = vmul.f32 %v4418_v49, %v2550_v14  ;;  %v2603_v54 = vpop.f32.mrf.mxu2  ;;  %v2616_v28 = vpop.f32.mrf.mxu3  ;;  %v2590_v14 = vadd.f32 %v2589_v9, %v5331_v1 }
 0x751   :  { %v2633_v45 = vadd.f32 %v2603_v54, %v2564_v25  ;;  %v2634_v4 = vadd.f32 %v2616_v28, %v2577_v36 }
 0x752   :  { %v6185_v51 = vadd.f32 %v2552_v18, %v2551_v39 }
 0x753   :  { %v2635_v60 = vmul.f32 0.5, %v2633_v45  ;;  %v2636_v16 = vmul.f32 0.5, %v2634_v4 }
 0x754   :  { %v2657_v24 = vpack.c.bf16 %v6185_v51, %v6185_v51 }
 0x755   :  { %4419 = vtanh.f32 %v2635_v60 }
 0x756   :  { %v2629_v59 = vpop.f32.mrf.mxu0  ;;  %2666 = vmatmul.bf16.vlgmr.msrb.gmra.mxu1 %v2657_v24  ;;  %2679 = vmatmul.bf16.vlgmr.msrb.gmra.mxu2 %v2657_v24  ;;  %4421 = vtanh.f32 %v2636_v16  ;;  %v7344_v16 = vld [vmem:[#allocation18_spill] sm:$0xff] }
 0x757   :  { %2692 = vmatmul.bf16.vlgmr.msra.gmra.mxu3 %v2657_v24  ;;  %2723 = vmatmul.bf16.vlgmr.msra.gmra.mxu0 %v2657_v24  ;;  %v2643_v8 = vadd.f32 %v6094_v56, %v2629_v59  ;;  %v7345_v59 = vld [vmem:[#allocation27_spill] sm:$0xff] }
 0x758   :  { %v2605_v32 = vpop.f32.mrf.mxu2  ;;  %v2618_v44 = vpop.f32.mrf.mxu3  ;;  %2781 = vmatpush.bf16.msrb.mxu1 %v5140_v37  ;;  %2819 = vmatpush.bf16.msrb.mxu2 %v4680_v3 }
 0x759   :  { %2832 = vmatpush.bf16.msra.mxu3 %v4781_v63  ;;  %2845 = vmatpush.bf16.msra.mxu0 %v4865_v58  ;;  %v7346_v32 = vld [vmem:[#allocation28_spill] sm:$0xff]  ;;  %v7347_v44 = vld [vmem:[#allocation14_spill] sm:$0xff] }
 0x75b   :  { %v4420_v54 = vpop.eup %4419 }
 0x75c   :  { %v2639_v50 = vmul.f32 0.5, %v4420_v54  ;;  %2782 = vmatpush.bf16.msrb.mxu1 %v5143_v31  ;;  %2820 = vmatpush.bf16.msrb.mxu2 %v4683_v5  ;;  %v4422_v27 = vpop.eup %4421  ;;  %v7348_v54 = vld [vmem:[#allocation19_spill] sm:$0xff] }
 0x75d   :  { %2833 = vmatpush.bf16.msra.mxu3 %v4803_v17  ;;  %2846 = vmatpush.bf16.msra.mxu0 %v4878_v7  ;;  %v2640_v25 = vmul.f32 0.5, %v4422_v27  ;;  %v7350_v27 = vld [vmem:[#allocation33_spill] sm:$0xff] }
 0x75e   :  { %v2641_v33 = vadd.f32 0.5, %v2639_v50  ;;  %v2631_v42 = vpop.f32.mrf.mxu0  ;;  %v7349_v50 = vld [vmem:[#allocation32_spill] sm:$0xff] }
 0x75f   :  { %v2642_v18 = vadd.f32 0.5, %v2640_v25  ;;  %v7353_v42 = vld [vmem:[#allocation36_spill] sm:$0xff]  ;;  %v7356_v25 = vld [vmem:[#allocation26_spill] sm:$0xff] }
 0x760   :  { %v2644_v49 = vmul.f32 %v2643_v8, %v2641_v33  ;;  %2783 = vmatpush.bf16.msrb.mxu1 %v5153_v6  ;;  %2821 = vmatpush.bf16.msrb.mxu2 %v4692_v10  ;;  %v7351_v33 = vld [vmem:[#allocation15_spill] sm:$0xff]  ;;  %v7352_v8 = vld [vmem:[#allocation22_spill] sm:$0xff] }
 0x761   :  { %2834 = vmatpush.bf16.msra.mxu3 %v4825_v30  ;;  %2847 = vmatpush.bf16.msra.mxu0 %v4885_v15  ;;  %v2647_v9 = vsub.f32 1.0, %v2642_v18  ;;  %v2649_v28 = vmul.f32 %v2642_v18, %v6115_v46  ;;  %v7358_v18 = vld [vmem:[#allocation41_spill] sm:$0xff]  ;;  %v7364_v46 = vld [vmem:[#allocation35_spill] sm:$0xff] }
 0x762   :  { %v2645_v36 = vadd.f32 %v2644_v49, %v2590_v14  ;;  %v7354_v14 = vld [vmem:[#allocation37_spill] sm:$0xff]  ;;  %v7355_v49 = vld [vmem:[#allocation16_spill] sm:$0xff] }
 0x764   :  { %4423 = vtanh.f32 %v2645_v36  ;;  %2784 = vmatpush.bf16.msrb.mxu1 %v5161_v55  ;;  %2822 = vmatpush.bf16.msrb.mxu2 %v4707_v19  ;;  %v7357_v36 = vld [vmem:[#allocation40_spill] sm:$0xff] }
 0x765   :  { %2835 = vmatpush.bf16.msra.mxu3 %v4841_v41  ;;  %2848 = vmatpush.bf16.msra.mxu0 %v4892_v21 }
 0x766   :  { %2736 = vmatmul.bf16.vlgmr.msra.gmra.mxu1 %v2657_v24  ;;  %2749 = vmatmul.bf16.vlgmr.msra.gmra.mxu2 %v2657_v24  ;;  %v7343_v24 = vld [vmem:[#allocation13_spill] sm:$0xff] }
 0x768   :  { %2785 = vmatpush.bf16.msrb.mxu1 %v5169_v22  ;;  %2823 = vmatpush.bf16.msrb.mxu2 %v4719_v26 }
 0x769   :  { %2836 = vmatpush.bf16.msra.mxu3 %v4857_v53  ;;  %2849 = vmatpush.bf16.msra.mxu0 %v4906_v34 }
 0x76a   :  { %v4424_v39 = vpop.eup %4423 }
 0x76b   :  { %v2648_v45 = vmul.f32 %v4424_v39, %v2647_v9  ;;  %v7359_v9 = vld [vmem:[#allocation17_spill] sm:$0xff]  ;;  %v7360_v39 = vld [vmem:[#allocation30_spill] sm:$0xff] }
 0x76c   :  { %2786 = vmatpush.bf16.msrb.mxu1 %v5181_v52  ;;  %2824 = vmatpush.bf16.msrb.mxu2 %v4734_v35 }
 0x76d   :  { %v6214_v4 = vadd.f32 %v2649_v28, %v2648_v45  ;;  %2837 = vmatpush.bf16.msra.mxu3 %v4870_v0  ;;  %2850 = vmatpush.bf16.msra.mxu0 %v4915_v43  ;;  %v7361_v28 = vld [vmem:[#allocation43_spill] sm:$0xff]  ;;  %v7362_v45 = vld [vmem:[#allocation44_spill] sm:$0xff] }
 0x76f   :  { %7342 = vst [vmem:[#allocation64_spill] sm:$0xff] %v6214_v4  ;;  %v2754_v60 = vpack.c.bf16 %v6214_v4, %v6214_v4 }
 0x770   :  { %2787 = vmatpush.bf16.msrb.mxu1 %v5187_v40  ;;  %2825 = vmatpush.bf16.msrb.mxu2 %v4755_v47 }
 0x771   :  { %2763 = vmatmul.bf16.vlgmr.msrb.gmra.mxu3 %v2754_v60  ;;  %2776 = vmatmul.bf16.vlgmr.msrb.gmra.mxu0 %v2754_v60 }
 0x772   :  { %2838 = vmatpush.bf16.msra.mxu3 %v4883_v12  ;;  %2851 = vmatpush.bf16.msra.mxu0 %v4923_v48 }
 0x774   :  { %2788 = vmatpush.bf16.msrb.mxu1 %v5197_v23  ;;  %2826 = vmatpush.bf16.msrb.mxu2 %v4776_v61 }
 0x776   :  { %2839 = vmatpush.bf16.msra.mxu3 %v4890_v20  ;;  %2852 = vmatpush.bf16.msra.mxu0 %v4936_v57 }
 0x777   :  { %2789 = vmatmul.bf16.vlgmr.msrb.gmra.mxu1 %v2754_v60  ;;  %v7363_v60 = vld [vmem:[#allocation20_spill] sm:$0xff] }
 0x778   :  { %2876 = vmatpush.bf16.msra.mxu1 %v4901_v29  ;;  %2889 = vmatpush.bf16.msra.mxu2 %v4984_v38 }
 0x77a   :  { %2902 = vmatpush.bf16.msrb.mxu3 %v5015_v11  ;;  %2916 = vmatpush.bf16.msrb.mxu0 %v7300_v62 }
 0x77c   :  { %2877 = vmatpush.bf16.msra.mxu1 %v7343_v24  ;;  %2890 = vmatpush.bf16.msra.mxu2 %v7344_v16 }
 0x77e   :  { %2903 = vmatpush.bf16.msrb.mxu3 %v7345_v59  ;;  %2917 = vmatpush.bf16.msrb.mxu0 %v7346_v32  ;;  %v7383_v59 = vld [vmem:[#allocation50_spill] sm:$0xff] }
 0x780   :  { %2878 = vmatpush.bf16.msra.mxu1 %v7347_v44  ;;  %2891 = vmatpush.bf16.msra.mxu2 %v7348_v54 }
 0x782   :  { %2904 = vmatpush.bf16.msrb.mxu3 %v7349_v50  ;;  %2918 = vmatpush.bf16.msrb.mxu0 %v7350_v27 }
 0x784   :  { %2879 = vmatpush.bf16.msra.mxu1 %v7351_v33  ;;  %2892 = vmatpush.bf16.msra.mxu2 %v7352_v8  ;;  %v7382_v33 = vld [vmem:[#allocation85_spill] sm:$0xff] }
 0x786   :  { %2905 = vmatpush.bf16.msrb.mxu3 %v7353_v42  ;;  %2919 = vmatpush.bf16.msrb.mxu0 %v7354_v14  ;;  %v7365_v14 = vld [vmem:[#allocation46_spill] sm:$0xff] }
 0x788   :  { %2880 = vmatpush.bf16.msra.mxu1 %v7355_v49  ;;  %2893 = vmatpush.bf16.msra.mxu2 %v7356_v25  ;;  %v7366_v49 = vld [vmem:[#allocation48_spill] sm:$0xff] }
 0x789   :  { %v7367_v25 = vld [vmem:[#allocation24_spill] sm:$0xff] }
 0x78a   :  { %2906 = vmatpush.bf16.msrb.mxu3 %v7357_v36  ;;  %2920 = vmatpush.bf16.msrb.mxu0 %v7358_v18  ;;  %v7368_v36 = vld [vmem:[#allocation39_spill] sm:$0xff]  ;;  %v7369_v18 = vld [vmem:[#allocation25_spill] sm:$0xff] }
 0x78c   :  { %2881 = vmatpush.bf16.msra.mxu1 %v7359_v9  ;;  %2894 = vmatpush.bf16.msra.mxu2 %v7360_v39  ;;  %v7370_v9 = vld [vmem:[#allocation53_spill] sm:$0xff]  ;;  %v7371_v39 = vld [vmem:[#allocation54_spill] sm:$0xff] }
 0x78e   :  { %2907 = vmatpush.bf16.msrb.mxu3 %v7361_v28  ;;  %2921 = vmatpush.bf16.msrb.mxu0 %v7362_v45  ;;  %v7372_v28 = vld [vmem:[#allocation29_spill] sm:$0xff]  ;;  %v7373_v45 = vld [vmem:[#allocation34_spill] sm:$0xff] }
 0x790   :  { %2882 = vmatpush.bf16.msra.mxu1 %v7363_v60  ;;  %2895 = vmatpush.bf16.msra.mxu2 %v7364_v46  ;;  %v7374_v60 = vld [vmem:[#allocation38_spill] sm:$0xff] }
 0x791   :  { %v7375_v46 = vld [vmem:[#allocation42_spill] sm:$0xff] }
 0x792   :  { %2908 = vmatpush.bf16.msrb.mxu3 %v7365_v14  ;;  %2922 = vmatpush.bf16.msrb.mxu0 %v7366_v49  ;;  %v7376_v14 = vld [vmem:[#allocation45_spill] sm:$0xff]  ;;  %v7377_v49 = vld [vmem:[#allocation52_spill] sm:$0xff] }
 0x794   :  { %2883 = vmatpush.bf16.msra.mxu1 %v7367_v25  ;;  %2896 = vmatpush.bf16.msra.mxu2 %v7368_v36  ;;  %v7378_v25 = vld [vmem:[#allocation55_spill] sm:$0xff]  ;;  %v7379_v36 = vld [vmem:[#allocation21_spill] sm:$0xff] }
 0x796   :  { %2909 = vmatpush.bf16.msrb.mxu3 %v7370_v9  ;;  %2923 = vmatpush.bf16.msrb.mxu0 %v7371_v39 }
 0x798   :  { %2929 = vmatpush.bf16.msrb.mxu1 %v7369_v18  ;;  %v7380_v18 = vld [vmem:[#allocation84_spill] sm:$0xff] }
 0x799   :  { %v331_v42 = vadd.f32 %v7380_v18, %v7379_v36 }
 0x79c   :  { %2930 = vmatpush.bf16.msrb.mxu1 %v7372_v28  ;;  %v7381_v28 = vld [vmem:[#allocation31_spill] sm:$0xff] }
 0x7a0   :  { %2931 = vmatpush.bf16.msrb.mxu1 %v7373_v45  ;;  %v380_v45 = vadd.f32 %v7382_v33, %v7381_v28 }
 0x7a4   :  { %2932 = vmatpush.bf16.msrb.mxu1 %v7374_v60 }
 0x7a8   :  { %2933 = vmatpush.bf16.msrb.mxu1 %v7375_v46 }
 0x7ac   :  { %2934 = vmatpush.bf16.msrb.mxu1 %v7376_v14 }
 0x7b0   :  { %2935 = vmatpush.bf16.msrb.mxu1 %v7377_v49 }
 0x7b4   :  { %2936 = vmatpush.bf16.msrb.mxu1 %v7378_v25 }
 0x7d3   :  { %v2667_v9 = vpop.f32.mrf.mxu1 }
 0x7d4   :  { %v2697_v27 = vadd.f32 %v2667_v9, %v331_v42  ;;  %v2724_v39 = vpop.f32.mrf.mxu0  ;;  %v7384_v9 = vld [vmem:[#allocation47_spill] sm:$0xff] }
 0x7d6   :  { %v2699_v8 = vmul.f32 0.5, %v2697_v27  ;;  %v7385_v27 = vld [vmem:[#allocation86_spill] sm:$0xff] }
 0x7d7   :  { %v429_v62 = vadd.f32 %v7385_v27, %v7384_v9 }
 0x7d8   :  { %4425 = vtanh.f32 %v2699_v8 }
 0x7d9   :  { %v2680_v60 = vpop.f32.mrf.mxu2 }
 0x7da   :  { %v2698_v50 = vadd.f32 %v2680_v60, %v380_v45  ;;  %v2693_v46 = vpop.f32.mrf.mxu3 }
 0x7db   :  { %v2669_v32 = vpop.f32.mrf.mxu1  ;;  %v2707_v18 = vadd.f32 %v7383_v59, %v2693_v46 }
 0x7dc   :  { %v2700_v14 = vmul.f32 0.5, %v2698_v50  ;;  %v2726_v54 = vpop.f32.mrf.mxu0 }
 0x7de   :  { %v4426_v49 = vpop.eup %4425  ;;  %4427 = vtanh.f32 %v2700_v14 }
 0x7df   :  { %v2703_v25 = vmul.f32 0.5, %v4426_v49 }
 0x7e1   :  { %v2705_v44 = vadd.f32 0.5, %v2703_v25  ;;  %v2682_v36 = vpop.f32.mrf.mxu2 }
 0x7e2   :  { %v2695_v42 = vpop.f32.mrf.mxu3 }
 0x7e3   :  { %v2708_v16 = vmul.f32 %v2707_v18, %v2705_v44  ;;  %v2737_v33 = vpop.f32.mrf.mxu1 }
 0x7e4   :  { %v4428_v8 = vpop.eup %4427  ;;  %v2738_v18 = vadd.f32 %v2737_v33, %v5315_v2 }
 0x7e5   :  { %v2704_v28 = vmul.f32 0.5, %v4428_v8  ;;  %v2709_v45 = vadd.f32 %v2708_v16, %v429_v62  ;;  %v2725_v62 = vadd.f32 %v2724_v39, %v6993_v13 }
 0x7e7   :  { %4429 = vtanh.f32 %v2709_v45  ;;  %v2706_v32 = vadd.f32 0.5, %v2704_v28 }
 0x7e9   :  { %v2750_v50 = vpop.f32.mrf.mxu2  ;;  %v2711_v60 = vsub.f32 1.0, %v2706_v32  ;;  %v2713_v49 = vmul.f32 %v2706_v32, %v6185_v51 }
 0x7eb   :  { %v2739_v54 = vpop.f32.mrf.mxu1 }
 0x7ed   :  { %v4430_v14 = vpop.eup %4429 }
 0x7ee   :  { %v2712_v25 = vmul.f32 %v4430_v14, %v2711_v60  ;;  %v2777_v46 = vpop.f32.mrf.mxu0 }
 0x7ef   :  { %v2795_v16 = vadd.f32 %v2777_v46, %v2738_v18 }
 0x7f0   :  { %v6276_v59 = vadd.f32 %v2713_v49, %v2712_v25  ;;  %v2751_v25 = vadd.f32 %v2750_v50, %v5331_v1 }
 0x7f1   :  { %v2752_v36 = vpop.f32.mrf.mxu2  ;;  %v2797_v33 = vmul.f32 0.5, %v2795_v16 }
 0x7f2   :  { %v2818_v44 = vpack.c.bf16 %v6276_v59, %v6276_v59 }
 0x7f4   :  { %v2764_v28 = vpop.f32.mrf.mxu3  ;;  %v2790_v42 = vpop.f32.mrf.mxu1  ;;  %2827 = vmatmul.bf16.vlgmr.msrb.gmra.mxu2 %v2818_v44  ;;  %2840 = vmatmul.bf16.vlgmr.msra.gmra.mxu3 %v2818_v44 }
 0x7f5   :  { %v2794_v27 = vadd.f32 %v2764_v28, %v2725_v62  ;;  %2853 = vmatmul.bf16.vlgmr.msra.gmra.mxu0 %v2818_v44  ;;  %2884 = vmatmul.bf16.vlgmr.msra.gmra.mxu1 %v2818_v44  ;;  %v2804_v49 = vadd.f32 %v6094_v56, %v2790_v42 }
 0x7f6   :  { %v2779_v51 = vpop.f32.mrf.mxu0  ;;  %2942 = vmatpush.bf16.msrb.mxu2 %v5140_v37  ;;  %2980 = vmatpush.bf16.msra.mxu3 %v4680_v3 }
 0x7f7   :  { %v2796_v8 = vmul.f32 0.5, %v2794_v27  ;;  %2993 = vmatpush.bf16.msra.mxu0 %v4781_v63  ;;  %3006 = vmatpush.bf16.msra.mxu1 %v4865_v58  ;;  %v7387_v51 = vld [vmem:[#allocation18_spill] sm:$0xff] }
 0x7f9   :  { %4431 = vtanh.f32 %v2796_v8  ;;  %v7388_v8 = vld [vmem:[#allocation23_spill] sm:$0xff] }
 0x7fa   :  { %2943 = vmatpush.bf16.msrb.mxu2 %v5143_v31  ;;  %2981 = vmatpush.bf16.msra.mxu3 %v4683_v5  ;;  %4433 = vtanh.f32 %v2797_v33  ;;  %v7389_v33 = vld [vmem:[#allocation27_spill] sm:$0xff] }
 0x7fb   :  { %2994 = vmatpush.bf16.msra.mxu0 %v4803_v17  ;;  %3007 = vmatpush.bf16.msra.mxu1 %v4878_v7 }
 0x7fc   :  { %v2766_v39 = vpop.f32.mrf.mxu3  ;;  %v2792_v45 = vpop.f32.mrf.mxu1 }
 0x7fd   :  { %v7390_v39 = vld [vmem:[#allocation14_spill] sm:$0xff]  ;;  %v7391_v45 = vld [vmem:[#allocation19_spill] sm:$0xff] }
 0x7fe   :  { %2944 = vmatpush.bf16.msrb.mxu2 %v5153_v6  ;;  %2982 = vmatpush.bf16.msra.mxu3 %v4692_v10 }
 0x7ff   :  { %v4432_v32 = vpop.eup %4431  ;;  %2995 = vmatpush.bf16.msra.mxu0 %v4825_v30  ;;  %3008 = vmatpush.bf16.msra.mxu1 %v4885_v15 }
 0x800   :  { %v2800_v54 = vmul.f32 0.5, %v4432_v32  ;;  %v4434_v60 = vpop.eup %4433  ;;  %v7392_v32 = vld [vmem:[#allocation28_spill] sm:$0xff] }
 0x801   :  { %v2801_v36 = vmul.f32 0.5, %v4434_v60  ;;  %v7394_v60 = vld [vmem:[#allocation15_spill] sm:$0xff] }
 0x802   :  { %v2802_v14 = vadd.f32 0.5, %v2800_v54  ;;  %2945 = vmatpush.bf16.msrb.mxu2 %v5161_v55  ;;  %2983 = vmatpush.bf16.msra.mxu3 %v4707_v19  ;;  %v7393_v54 = vld [vmem:[#allocation32_spill] sm:$0xff] }
 0x803   :  { %2996 = vmatpush.bf16.msra.mxu0 %v4841_v41  ;;  %3009 = vmatpush.bf16.msra.mxu1 %v4892_v21  ;;  %v2803_v62 = vadd.f32 0.5, %v2801_v36  ;;  %v7399_v36 = vld [vmem:[#allocation26_spill] sm:$0xff] }
 0x804   :  { %v2805_v46 = vmul.f32 %v2804_v49, %v2802_v14  ;;  %2897 = vmatmul.bf16.vlgmr.msra.gmra.mxu2 %v2818_v44  ;;  %2910 = vmatmul.bf16.vlgmr.msrb.gmra.mxu3 %v2818_v44  ;;  %v7395_v14 = vld [vmem:[#allocation22_spill] sm:$0xff]  ;;  %v7396_v49 = vld [vmem:[#allocation33_spill] sm:$0xff] }
 0x805   :  { %v2808_v50 = vsub.f32 1.0, %v2803_v62  ;;  %v2810_v16 = vmul.f32 %v2803_v62, %v6214_v4  ;;  %v7401_v62 = vld [vmem:[#allocation40_spill] sm:$0xff]  ;;  %v7407_v4 = vld [vmem:[#allocation35_spill] sm:$0xff] }
 0x806   :  { %v2806_v18 = vadd.f32 %v2805_v46, %v2751_v25  ;;  %2946 = vmatpush.bf16.msrb.mxu2 %v5169_v22  ;;  %2984 = vmatpush.bf16.msra.mxu3 %v4719_v26  ;;  %v7397_v25 = vld [vmem:[#allocation36_spill] sm:$0xff] }
 0x807   :  { %2997 = vmatpush.bf16.msra.mxu0 %v4857_v53  ;;  %3010 = vmatpush.bf16.msra.mxu1 %v4906_v34  ;;  %v7398_v46 = vld [vmem:[#allocation16_spill] sm:$0xff] }
 0x808   :  { %4435 = vtanh.f32 %v2806_v18  ;;  %v7400_v18 = vld [vmem:[#allocation37_spill] sm:$0xff] }
 0x80a   :  { %2947 = vmatpush.bf16.msrb.mxu2 %v5181_v52  ;;  %2985 = vmatpush.bf16.msra.mxu3 %v4734_v35 }
 0x80b   :  { %2998 = vmatpush.bf16.msra.mxu0 %v4870_v0  ;;  %3011 = vmatpush.bf16.msra.mxu1 %v4915_v43 }
 0x80e   :  { %v4436_v44 = vpop.eup %4435  ;;  %2948 = vmatpush.bf16.msrb.mxu2 %v5187_v40  ;;  %2986 = vmatpush.bf16.msra.mxu3 %v4755_v47 }
 0x80f   :  { %v2809_v28 = vmul.f32 %v4436_v44, %v2808_v50  ;;  %2999 = vmatpush.bf16.msra.mxu0 %v4883_v12  ;;  %3012 = vmatpush.bf16.msra.mxu1 %v4923_v48  ;;  %v7402_v50 = vld [vmem:[#allocation17_spill] sm:$0xff]  ;;  %v7403_v44 = vld [vmem:[#allocation30_spill] sm:$0xff] }
 0x811   :  { %v6313_v42 = vadd.f32 %v2810_v16, %v2809_v28  ;;  %v7404_v16 = vld [vmem:[#allocation41_spill] sm:$0xff]  ;;  %v7405_v28 = vld [vmem:[#allocation43_spill] sm:$0xff] }
 0x812   :  { %2949 = vmatpush.bf16.msrb.mxu2 %v5197_v23  ;;  %2987 = vmatpush.bf16.msra.mxu3 %v4776_v61 }
 0x813   :  { %7386 = vst [vmem:[#allocation65_spill] sm:$0xff] %v6313_v42  ;;  %v2915_v27 = vpack.c.bf16 %v6313_v42, %v6313_v42  ;;  %3000 = vmatpush.bf16.msra.mxu0 %v4890_v20  ;;  %3013 = vmatpush.bf16.msra.mxu1 %v4936_v57 }
 0x815   :  { %2924 = vmatmul.bf16.vlgmr.msrb.gmra.mxu0 %v2915_v27  ;;  %2937 = vmatmul.bf16.vlgmr.msrb.gmra.mxu1 %v2915_v27 }
 0x816   :  { %3037 = vmatpush.bf16.msra.mxu2 %v4901_v29  ;;  %3050 = vmatpush.bf16.msrb.mxu3 %v4984_v38 }
 0x817   :  { %2950 = vmatmul.bf16.vlgmr.msrb.gmra.mxu2 %v2915_v27  ;;  %3063 = vmatpush.bf16.msrb.mxu0 %v5015_v11  ;;  %v7406_v27 = vld [vmem:[#allocation20_spill] sm:$0xff] }
 0x818   :  { %3077 = vmatpush.bf16.msrb.mxu1 %v7388_v8 }
 0x81a   :  { %3038 = vmatpush.bf16.msra.mxu2 %v7343_v24  ;;  %3051 = vmatpush.bf16.msrb.mxu3 %v7387_v51 }
 0x81b   :  { %3064 = vmatpush.bf16.msrb.mxu0 %v7389_v33 }
 0x81c   :  { %3078 = vmatpush.bf16.msrb.mxu1 %v7392_v32 }
 0x81e   :  { %3039 = vmatpush.bf16.msra.mxu2 %v7390_v39  ;;  %3052 = vmatpush.bf16.msrb.mxu3 %v7391_v45 }
 0x81f   :  { %3065 = vmatpush.bf16.msrb.mxu0 %v7393_v54 }
 0x820   :  { %3079 = vmatpush.bf16.msrb.mxu1 %v7396_v49  ;;  %v7426_v49 = vld [vmem:[#allocation88_spill] sm:$0xff] }
 0x822   :  { %3040 = vmatpush.bf16.msra.mxu2 %v7394_v60  ;;  %3053 = vmatpush.bf16.msrb.mxu3 %v7395_v14  ;;  %v7423_v14 = vld [vmem:[#allocation21_spill] sm:$0xff] }
 0x823   :  { %3066 = vmatpush.bf16.msrb.mxu0 %v7397_v25  ;;  %v7408_v25 = vld [vmem:[#allocation44_spill] sm:$0xff] }
 0x824   :  { %3080 = vmatpush.bf16.msrb.mxu1 %v7400_v18  ;;  %v7411_v18 = vld [vmem:[#allocation39_spill] sm:$0xff] }
 0x826   :  { %3041 = vmatpush.bf16.msra.mxu2 %v7398_v46  ;;  %3054 = vmatpush.bf16.msrb.mxu3 %v7399_v36  ;;  %v7409_v46 = vld [vmem:[#allocation46_spill] sm:$0xff]  ;;  %v7410_v36 = vld [vmem:[#allocation24_spill] sm:$0xff] }
 0x827   :  { %3067 = vmatpush.bf16.msrb.mxu0 %v7401_v62  ;;  %v7412_v62 = vld [vmem:[#allocation25_spill] sm:$0xff] }
 0x828   :  { %3081 = vmatpush.bf16.msrb.mxu1 %v7404_v16  ;;  %v7415_v16 = vld [vmem:[#allocation29_spill] sm:$0xff] }
 0x82a   :  { %3042 = vmatpush.bf16.msra.mxu2 %v7402_v50  ;;  %3055 = vmatpush.bf16.msrb.mxu3 %v7403_v44  ;;  %v7413_v50 = vld [vmem:[#allocation48_spill] sm:$0xff]  ;;  %v7414_v44 = vld [vmem:[#allocation53_spill] sm:$0xff] }
 0x82b   :  { %3068 = vmatpush.bf16.msrb.mxu0 %v7405_v28  ;;  %v7416_v28 = vld [vmem:[#allocation54_spill] sm:$0xff] }
 0x82c   :  { %3082 = vmatpush.bf16.msrb.mxu1 %v7408_v25  ;;  %v7419_v25 = vld [vmem:[#allocation42_spill] sm:$0xff] }
 0x82e   :  { %3043 = vmatpush.bf16.msra.mxu2 %v7406_v27  ;;  %3056 = vmatpush.bf16.msrb.mxu3 %v7407_v4  ;;  %v7417_v27 = vld [vmem:[#allocation34_spill] sm:$0xff] }
 0x82f   :  { %3069 = vmatpush.bf16.msrb.mxu0 %v7409_v46  ;;  %v7418_v4 = vld [vmem:[#allocation38_spill] sm:$0xff]  ;;  %v7420_v46 = vld [vmem:[#allocation45_spill] sm:$0xff] }
 0x830   :  { %3083 = vmatpush.bf16.msrb.mxu1 %v7413_v50 }
 0x832   :  { %3044 = vmatpush.bf16.msra.mxu2 %v7410_v36  ;;  %3057 = vmatpush.bf16.msrb.mxu3 %v7411_v18  ;;  %v7421_v36 = vld [vmem:[#allocation52_spill] sm:$0xff]  ;;  %v7422_v18 = vld [vmem:[#allocation55_spill] sm:$0xff] }
 0x833   :  { %3070 = vmatpush.bf16.msrb.mxu0 %v7414_v44  ;;  %v7424_v44 = vld [vmem:[#allocation87_spill] sm:$0xff] }
 0x834   :  { %3084 = vmatpush.bf16.msrb.mxu1 %v7416_v28  ;;  %v334_v60 = vadd.f32 %v7424_v44, %v7423_v14  ;;  %v6368_v44 = vld [vmem:[%s6699_s4] ss:$0 sm:$0xff] }
 0x835   :  { %7427 = vst [vmem:[#allocation67_spill] sm:$0xff] %v6368_v44 }
 0x836   :  { %3090 = vmatpush.bf16.msrb.mxu2 %v7412_v62 }
 0x83a   :  { %3091 = vmatpush.bf16.msrb.mxu2 %v7415_v16  ;;  %v7425_v16 = vld [vmem:[#allocation31_spill] sm:$0xff] }
 0x83b   :  { %v383_v28 = vadd.f32 %v7426_v49, %v7425_v16 }
 0x83e   :  { %3092 = vmatpush.bf16.msrb.mxu2 %v7417_v27 }
 0x842   :  { %3093 = vmatpush.bf16.msrb.mxu2 %v7418_v4 }
 0x846   :  { %3094 = vmatpush.bf16.msrb.mxu2 %v7419_v25 }
 0x84a   :  { %3095 = vmatpush.bf16.msrb.mxu2 %v7420_v46 }
 0x84e   :  { %3096 = vmatpush.bf16.msrb.mxu2 %v7421_v36 }
 0x852   :  { %3097 = vmatpush.bf16.msrb.mxu2 %v7422_v18 }
 0x872   :  { %v2854_v62 = vpop.f32.mrf.mxu0  ;;  %v2885_v50 = vpop.f32.mrf.mxu1 }
 0x873   :  { %v2868_v49 = vadd.f32 %v6368_v44, %v2854_v62  ;;  %v2886_v14 = vadd.f32 %v2885_v50, %v6993_v13 }
 0x877   :  { %v2828_v54 = vpop.f32.mrf.mxu2  ;;  %v2841_v27 = vpop.f32.mrf.mxu3 }
 0x878   :  { %v2858_v45 = vadd.f32 %v2828_v54, %v334_v60  ;;  %v2859_v4 = vadd.f32 %v2841_v27, %v383_v28 }
 0x87a   :  { %v2860_v39 = vmul.f32 0.5, %v2858_v45  ;;  %v2856_v25 = vpop.f32.mrf.mxu0  ;;  %v2887_v32 = vpop.f32.mrf.mxu1  ;;  %v2861_v46 = vmul.f32 0.5, %v2859_v4  ;;  %v7428_v45 = vld [vmem:[#allocation89_spill] sm:$0xff] }
 0x87b   :  { %v432_v60 = vadd.f32 %v7428_v45, %v7384_v9 }
 0x87c   :  { %4437 = vtanh.f32 %v2860_v39 }
 0x87d   :  { %4439 = vtanh.f32 %v2861_v46 }
 0x87f   :  { %v2830_v36 = vpop.f32.mrf.mxu2  ;;  %v2843_v18 = vpop.f32.mrf.mxu3 }
 0x882   :  { %v4438_v33 = vpop.eup %4437 }
 0x883   :  { %v2864_v51 = vmul.f32 0.5, %v4438_v33  ;;  %v4440_v24 = vpop.eup %4439 }
 0x884   :  { %v2865_v25 = vmul.f32 0.5, %v4440_v24 }
 0x885   :  { %v2866_v54 = vadd.f32 0.5, %v2864_v51 }
 0x886   :  { %v2867_v36 = vadd.f32 0.5, %v2865_v25 }
 0x887   :  { %v2869_v32 = vmul.f32 %v2868_v49, %v2866_v54  ;;  %v2898_v4 = vpop.f32.mrf.mxu2  ;;  %v2911_v39 = vpop.f32.mrf.mxu3 }
 0x888   :  { %v2872_v28 = vsub.f32 1.0, %v2867_v36  ;;  %v2899_v16 = vadd.f32 %v2898_v4, %v5315_v2  ;;  %v2874_v51 = vmul.f32 %v2867_v36, %v6276_v59 }
 0x889   :  { %v2870_v46 = vadd.f32 %v2869_v32, %v432_v60 }
 0x88b   :  { %4441 = vtanh.f32 %v2870_v46 }
 0x88f   :  { %v2900_v33 = vpop.f32.mrf.mxu2  ;;  %v2913_v18 = vpop.f32.mrf.mxu3 }
 0x890   :  { %v2912_v33 = vadd.f32 %v2911_v39, %v5331_v1 }
 0x891   :  { %v4442_v27 = vpop.eup %4441 }
 0x892   :  { %v2873_v62 = vmul.f32 %v4442_v27, %v2872_v28  ;;  %v2925_v44 = vpop.f32.mrf.mxu0  ;;  %v2938_v45 = vpop.f32.mrf.mxu1 }
 0x893   :  { %v2955_v49 = vadd.f32 %v2925_v44, %v2886_v14  ;;  %v2956_v54 = vadd.f32 %v2938_v45, %v2899_v16 }
 0x894   :  { %v6376_v9 = vadd.f32 %v2874_v51, %v2873_v62 }
 0x895   :  { %v2957_v24 = vmul.f32 0.5, %v2955_v49  ;;  %v2958_v32 = vmul.f32 0.5, %v2956_v54 }
 0x896   :  { %v2979_v60 = vpack.c.bf16 %v6376_v9, %v6376_v9 }
 0x897   :  { %4443 = vtanh.f32 %v2957_v24  ;;  %v7430_v24 = vld [vmem:[#allocation13_spill] sm:$0xff] }
 0x898   :  { %2988 = vmatmul.bf16.vlgmr.msra.gmra.mxu3 %v2979_v60  ;;  %3001 = vmatmul.bf16.vlgmr.msra.gmra.mxu0 %v2979_v60  ;;  %4445 = vtanh.f32 %v2958_v32  ;;  %v7432_v32 = vld [vmem:[#allocation27_spill] sm:$0xff] }
 0x899   :  { %3014 = vmatmul.bf16.vlgmr.msra.gmra.mxu1 %v2979_v60  ;;  %3045 = vmatmul.bf16.vlgmr.msra.gmra.mxu2 %v2979_v60 }
 0x89a   :  { %v2951_v50 = vpop.f32.mrf.mxu2  ;;  %v2927_v4 = vpop.f32.mrf.mxu0  ;;  %3103 = vmatpush.bf16.msra.mxu3 %v5140_v37  ;;  %3141 = vmatpush.bf16.msra.mxu0 %v4680_v3 }
 0x89b   :  { %v2940_v59 = vpop.f32.mrf.mxu1  ;;  %3154 = vmatpush.bf16.msra.mxu1 %v4781_v63  ;;  %3167 = vmatpush.bf16.msra.mxu2 %v4865_v58  ;;  %v2965_v46 = vadd.f32 %v6094_v56, %v2951_v50  ;;  %v7433_v50 = vld [vmem:[#allocation28_spill] sm:$0xff]  ;;  %v7434_v4 = vld [vmem:[#allocation14_spill] sm:$0xff] }
 0x89c   :  { %v7435_v59 = vld [vmem:[#allocation19_spill] sm:$0xff] }
 0x89d   :  { %v4444_v14 = vpop.eup %4443 }
 0x89e   :  { %v2961_v16 = vmul.f32 0.5, %v4444_v14  ;;  %3104 = vmatpush.bf16.msra.mxu3 %v5143_v31  ;;  %3142 = vmatpush.bf16.msra.mxu0 %v4683_v5  ;;  %v4446_v44 = vpop.eup %4445  ;;  %v7436_v14 = vld [vmem:[#allocation32_spill] sm:$0xff] }
 0x89f   :  { %3155 = vmatpush.bf16.msra.mxu1 %v4803_v17  ;;  %3168 = vmatpush.bf16.msra.mxu2 %v4878_v7  ;;  %v2962_v28 = vmul.f32 0.5, %v4446_v44  ;;  %v7438_v44 = vld [vmem:[#allocation15_spill] sm:$0xff] }
 0x8a0   :  { %v2963_v25 = vadd.f32 0.5, %v2961_v16  ;;  %v7437_v16 = vld [vmem:[#allocation33_spill] sm:$0xff] }
 0x8a1   :  { %v2964_v56 = vadd.f32 0.5, %v2962_v28  ;;  %v7444_v28 = vld [vmem:[#allocation40_spill] sm:$0xff] }
 0x8a2   :  { %v2953_v36 = vpop.f32.mrf.mxu2  ;;  %v2966_v18 = vmul.f32 %v2965_v46, %v2963_v25  ;;  %3105 = vmatpush.bf16.msra.mxu3 %v5153_v6  ;;  %3143 = vmatpush.bf16.msra.mxu0 %v4692_v10  ;;  %v7439_v25 = vld [vmem:[#allocation22_spill] sm:$0xff]  ;;  %v7440_v46 = vld [vmem:[#allocation36_spill] sm:$0xff] }
 0x8a3   :  { %3156 = vmatpush.bf16.msra.mxu1 %v4825_v30  ;;  %3169 = vmatpush.bf16.msra.mxu2 %v4885_v15  ;;  %v2969_v39 = vsub.f32 1.0, %v2964_v56  ;;  %v2971_v51 = vmul.f32 %v2964_v56, %v6313_v42  ;;  %v7441_v36 = vld [vmem:[#allocation37_spill] sm:$0xff]  ;;  %v7452_v42 = vld [vmem:[#allocation46_spill] sm:$0xff] }
 0x8a4   :  { %v2967_v27 = vadd.f32 %v2966_v18, %v2912_v33  ;;  %v7442_v33 = vld [vmem:[#allocation16_spill] sm:$0xff]  ;;  %v7443_v18 = vld [vmem:[#allocation26_spill] sm:$0xff]  ;;  %v7446_v56 = vld [vmem:[#allocation17_spill] sm:$0xff] }
 0x8a6   :  { %4447 = vtanh.f32 %v2967_v27  ;;  %3106 = vmatpush.bf16.msra.mxu3 %v5161_v55  ;;  %3144 = vmatpush.bf16.msra.mxu0 %v4707_v19  ;;  %v7445_v27 = vld [vmem:[#allocation41_spill] sm:$0xff] }
 0x8a7   :  { %3157 = vmatpush.bf16.msra.mxu1 %v4841_v41  ;;  %3170 = vmatpush.bf16.msra.mxu2 %v4892_v21 }
 0x8a8   :  { %3058 = vmatmul.bf16.vlgmr.msrb.gmra.mxu3 %v2979_v60  ;;  %3071 = vmatmul.bf16.vlgmr.msrb.gmra.mxu0 %v2979_v60  ;;  %v7431_v60 = vld [vmem:[#allocation18_spill] sm:$0xff] }
 0x8aa   :  { %3107 = vmatpush.bf16.msra.mxu3 %v5169_v22  ;;  %3145 = vmatpush.bf16.msra.mxu0 %v4719_v26 }
 0x8ab   :  { %3158 = vmatpush.bf16.msra.mxu1 %v4857_v53  ;;  %3171 = vmatpush.bf16.msra.mxu2 %v4906_v34 }
 0x8ac   :  { %v4448_v62 = vpop.eup %4447 }
 0x8ad   :  { %v2970_v45 = vmul.f32 %v4448_v62, %v2969_v39  ;;  %v7447_v39 = vld [vmem:[#allocation30_spill] sm:$0xff]  ;;  %v7448_v62 = vld [vmem:[#allocation43_spill] sm:$0xff] }
 0x8ae   :  { %3108 = vmatpush.bf16.msra.mxu3 %v5181_v52  ;;  %3146 = vmatpush.bf16.msra.mxu0 %v4734_v35 }
 0x8af   :  { %v6405_v49 = vadd.f32 %v2971_v51, %v2970_v45  ;;  %3159 = vmatpush.bf16.msra.mxu1 %v4870_v0  ;;  %3172 = vmatpush.bf16.msra.mxu2 %v4915_v43  ;;  %v7449_v51 = vld [vmem:[#allocation44_spill] sm:$0xff] }
 0x8b0   :  { %v7450_v45 = vld [vmem:[#allocation20_spill] sm:$0xff] }
 0x8b1   :  { %7429 = vst [vmem:[#allocation66_spill] sm:$0xff] %v6405_v49  ;;  %v3076_v54 = vpack.c.bf16 %v6405_v49, %v6405_v49 }
 0x8b2   :  { %3109 = vmatpush.bf16.msra.mxu3 %v5187_v40  ;;  %3147 = vmatpush.bf16.msra.mxu0 %v4755_v47 }
 0x8b3   :  { %3085 = vmatmul.bf16.vlgmr.msrb.gmra.mxu1 %v3076_v54  ;;  %3098 = vmatmul.bf16.vlgmr.msrb.gmra.mxu2 %v3076_v54 }
 0x8b4   :  { %3160 = vmatpush.bf16.msra.mxu1 %v4883_v12  ;;  %3173 = vmatpush.bf16.msra.mxu2 %v4923_v48 }
 0x8b6   :  { %3110 = vmatpush.bf16.msra.mxu3 %v5197_v23  ;;  %3148 = vmatpush.bf16.msra.mxu0 %v4776_v61 }
 0x8b8   :  { %3161 = vmatpush.bf16.msra.mxu1 %v4890_v20  ;;  %3174 = vmatpush.bf16.msra.mxu2 %v4936_v57 }
 0x8b9   :  { %3111 = vmatmul.bf16.vlgmr.msra.gmra.mxu3 %v3076_v54  ;;  %v7451_v54 = vld [vmem:[#allocation35_spill] sm:$0xff] }
 0x8ba   :  { %3198 = vmatpush.bf16.msrb.mxu3 %v4901_v29  ;;  %3211 = vmatpush.bf16.msrb.mxu0 %v4984_v38 }
 0x8bc   :  { %3224 = vmatpush.bf16.msrb.mxu1 %v5015_v11  ;;  %3238 = vmatpush.bf16.msrb.mxu2 %v7388_v8 }
 0x8be   :  { %3199 = vmatpush.bf16.msrb.mxu3 %v7430_v24  ;;  %3212 = vmatpush.bf16.msrb.mxu0 %v7431_v60 }
 0x8c0   :  { %3225 = vmatpush.bf16.msrb.mxu1 %v7432_v32  ;;  %3239 = vmatpush.bf16.msrb.mxu2 %v7433_v50 }
 0x8c2   :  { %3200 = vmatpush.bf16.msrb.mxu3 %v7434_v4  ;;  %3213 = vmatpush.bf16.msrb.mxu0 %v7435_v59 }
 0x8c4   :  { %3226 = vmatpush.bf16.msrb.mxu1 %v7436_v14  ;;  %3240 = vmatpush.bf16.msrb.mxu2 %v7437_v16 }
 0x8c6   :  { %3201 = vmatpush.bf16.msrb.mxu3 %v7438_v44  ;;  %3214 = vmatpush.bf16.msrb.mxu0 %v7439_v25  ;;  %v7469_v25 = vld [vmem:[#allocation90_spill] sm:$0xff] }
 0x8c8   :  { %3227 = vmatpush.bf16.msrb.mxu1 %v7440_v46  ;;  %3241 = vmatpush.bf16.msrb.mxu2 %v7441_v36  ;;  %v7466_v36 = vld [vmem:[#allocation31_spill] sm:$0xff] }
 0x8ca   :  { %3202 = vmatpush.bf16.msrb.mxu3 %v7442_v33  ;;  %3215 = vmatpush.bf16.msrb.mxu0 %v7443_v18  ;;  %v7453_v33 = vld [vmem:[#allocation48_spill] sm:$0xff] }
 0x8cb   :  { %v7454_v18 = vld [vmem:[#allocation24_spill] sm:$0xff] }
 0x8cc   :  { %3228 = vmatpush.bf16.msrb.mxu1 %v7444_v28  ;;  %3242 = vmatpush.bf16.msrb.mxu2 %v7445_v27  ;;  %v7455_v28 = vld [vmem:[#allocation39_spill] sm:$0xff]  ;;  %v7456_v27 = vld [vmem:[#allocation25_spill] sm:$0xff] }
 0x8ce   :  { %3203 = vmatpush.bf16.msrb.mxu3 %v7446_v56  ;;  %3216 = vmatpush.bf16.msrb.mxu0 %v7447_v39  ;;  %v7457_v56 = vld [vmem:[#allocation53_spill] sm:$0xff]  ;;  %v7458_v39 = vld [vmem:[#allocation54_spill] sm:$0xff] }
 0x8d0   :  { %3229 = vmatpush.bf16.msrb.mxu1 %v7448_v62  ;;  %3243 = vmatpush.bf16.msrb.mxu2 %v7449_v51  ;;  %v7459_v62 = vld [vmem:[#allocation29_spill] sm:$0xff]  ;;  %v7460_v51 = vld [vmem:[#allocation34_spill] sm:$0xff] }
 0x8d2   :  { %3204 = vmatpush.bf16.msrb.mxu3 %v7450_v45  ;;  %3217 = vmatpush.bf16.msrb.mxu0 %v7451_v54  ;;  %v7461_v45 = vld [vmem:[#allocation38_spill] sm:$0xff] }
 0x8d3   :  { %v7462_v54 = vld [vmem:[#allocation42_spill] sm:$0xff] }
 0x8d4   :  { %3230 = vmatpush.bf16.msrb.mxu1 %v7452_v42  ;;  %3244 = vmatpush.bf16.msrb.mxu2 %v7453_v33  ;;  %v7463_v42 = vld [vmem:[#allocation45_spill] sm:$0xff]  ;;  %v7464_v33 = vld [vmem:[#allocation52_spill] sm:$0xff] }
 0x8d6   :  { %3205 = vmatpush.bf16.msrb.mxu3 %v7454_v18  ;;  %3218 = vmatpush.bf16.msrb.mxu0 %v7455_v28  ;;  %v7465_v18 = vld [vmem:[#allocation55_spill] sm:$0xff] }
 0x8d8   :  { %3231 = vmatpush.bf16.msrb.mxu1 %v7457_v56  ;;  %3245 = vmatpush.bf16.msrb.mxu2 %v7458_v39  ;;  %v7467_v56 = vld [vmem:[#allocation91_spill] sm:$0xff]  ;;  %v7468_v39 = vld [vmem:[#allocation21_spill] sm:$0xff] }
 0x8d9   :  { %v385_v46 = vadd.f32 %v7467_v56, %v7466_v36  ;;  %v7470_v56 = vld [vmem:[#allocation67_spill] sm:$0xff] }
 0x8da   :  { %3251 = vmatpush.bf16.msra.mxu3 %v7456_v27 }
 0x8de   :  { %3252 = vmatpush.bf16.msra.mxu3 %v7459_v62  ;;  %v336_v62 = vadd.f32 %v7469_v25, %v7468_v39  ;;  %v7471_v25 = vld [vmem:[#allocation47_spill] sm:$0xff] }
 0x8e2   :  { %3253 = vmatpush.bf16.msra.mxu3 %v7460_v51 }
 0x8e6   :  { %3254 = vmatpush.bf16.msra.mxu3 %v7461_v45 }
 0x8ea   :  { %3255 = vmatpush.bf16.msra.mxu3 %v7462_v54 }
 0x8ee   :  { %3256 = vmatpush.bf16.msra.mxu3 %v7463_v42 }
 0x8f2   :  { %3257 = vmatpush.bf16.msra.mxu3 %v7464_v33 }
 0x8f6   :  { %3258 = vmatpush.bf16.msra.mxu3 %v7465_v18 }
 0x915   :  { %v3002_v28 = vpop.f32.mrf.mxu0 }
 0x916   :  { %v3015_v27 = vpop.f32.mrf.mxu1  ;;  %v3020_v44 = vadd.f32 %v3002_v28, %v385_v46  ;;  %v7472_v46 = vld [vmem:[#allocation92_spill] sm:$0xff] }
 0x917   :  { %v3029_v36 = vadd.f32 %v7470_v56, %v3015_v27  ;;  %v434_v28 = vadd.f32 %v7472_v46, %v7471_v25 }
 0x918   :  { %v3022_v42 = vmul.f32 0.5, %v3020_v44 }
 0x91b   :  { %v2989_v51 = vpop.f32.mrf.mxu3 }
 0x91c   :  { %v3019_v16 = vadd.f32 %v2989_v51, %v336_v62  ;;  %v3046_v45 = vpop.f32.mrf.mxu2 }
 0x91d   :  { %v3004_v14 = vpop.f32.mrf.mxu0 }
 0x91e   :  { %v3021_v54 = vmul.f32 0.5, %v3019_v16  ;;  %v3017_v59 = vpop.f32.mrf.mxu1 }
 0x920   :  { %4449 = vtanh.f32 %v3021_v54 }
 0x921   :  { %4451 = vtanh.f32 %v3022_v42  ;;  %v3047_v42 = vadd.f32 %v3046_v45, %v6993_v13 }
 0x923   :  { %v2991_v33 = vpop.f32.mrf.mxu3 }
 0x924   :  { %v3048_v18 = vpop.f32.mrf.mxu2 }
 0x925   :  { %v3072_v4 = vpop.f32.mrf.mxu0 }
 0x926   :  { %v4450_v50 = vpop.eup %4449 }
 0x927   :  { %v3025_v32 = vmul.f32 0.5, %v4450_v50  ;;  %v4452_v60 = vpop.eup %4451 }
 0x928   :  { %v3026_v14 = vmul.f32 0.5, %v4452_v60 }
 0x929   :  { %v3027_v24 = vadd.f32 0.5, %v3025_v32 }
 0x92a   :  { %v3028_v44 = vadd.f32 0.5, %v3026_v14 }
 0x92b   :  { %v3030_v62 = vmul.f32 %v3029_v36, %v3027_v24  ;;  %v3059_v51 = vpop.f32.mrf.mxu3 }
 0x92c   :  { %v3033_v39 = vsub.f32 1.0, %v3028_v44  ;;  %v3060_v32 = vadd.f32 %v3059_v51, %v5315_v2  ;;  %v3035_v27 = vmul.f32 %v3028_v44, %v6376_v9  ;;  %v6476_v9 = vld [vmem:[%s6703_s8] ss:$0 sm:$0xff] }
 0x92d   :  { %v3031_v16 = vadd.f32 %v3030_v62, %v434_v28  ;;  %v3074_v59 = vpop.f32.mrf.mxu0 }
 0x92f   :  { %4453 = vtanh.f32 %v3031_v16 }
 0x930   :  { %v3086_v33 = vpop.f32.mrf.mxu1 }
 0x931   :  { %v3116_v18 = vadd.f32 %v3086_v33, %v3047_v42  ;;  %v3073_v42 = vadd.f32 %v3072_v4, %v5331_v1  ;;  %v7490_v4 = vld [vmem:[#allocation17_spill] sm:$0xff] }
 0x933   :  { %v3118_v54 = vmul.f32 0.5, %v3116_v18  ;;  %v3061_v50 = vpop.f32.mrf.mxu3 }
 0x935   :  { %v4454_v8 = vpop.eup %4453  ;;  %4455 = vtanh.f32 %v3118_v54 }
 0x936   :  { %v3034_v24 = vmul.f32 %v4454_v8, %v3033_v39  ;;  %v3099_v36 = vpop.f32.mrf.mxu2 }
 0x937   :  { %v3117_v60 = vadd.f32 %v3099_v36, %v3060_v32  ;;  %v7491_v32 = vld [vmem:[#allocation30_spill] sm:$0xff]  ;;  %v7494_v36 = vld [vmem:[#allocation20_spill] sm:$0xff] }
 0x938   :  { %v6469_v46 = vadd.f32 %v3035_v27, %v3034_v24  ;;  %v3088_v28 = vpop.f32.mrf.mxu1  ;;  %v7492_v27 = vld [vmem:[#allocation43_spill] sm:$0xff]  ;;  %v7493_v24 = vld [vmem:[#allocation44_spill] sm:$0xff] }
 0x939   :  { %v3119_v62 = vmul.f32 0.5, %v3117_v60  ;;  %v7495_v60 = vld [vmem:[#allocation35_spill] sm:$0xff]  ;;  %v7496_v28 = vld [vmem:[#allocation46_spill] sm:$0xff] }
 0x93a   :  { %v3140_v45 = vpack.c.bf16 %v6469_v46, %v6469_v46 }
 0x93b   :  { %v4456_v14 = vpop.eup %4455  ;;  %4457 = vtanh.f32 %v3119_v62  ;;  %v7497_v62 = vld [vmem:[#allocation48_spill] sm:$0xff] }
 0x93c   :  { %v3122_v16 = vmul.f32 0.5, %v4456_v14  ;;  %v3112_v59 = vpop.f32.mrf.mxu3  ;;  %3149 = vmatmul.bf16.vlgmr.msra.gmra.mxu0 %v3140_v45  ;;  %3162 = vmatmul.bf16.vlgmr.msra.gmra.mxu1 %v3140_v45  ;;  %v7499_v14 = vld [vmem:[#allocation39_spill] sm:$0xff] }
 0x93d   :  { %v3126_v8 = vadd.f32 %v6476_v9, %v3112_v59  ;;  %3175 = vmatmul.bf16.vlgmr.msra.gmra.mxu2 %v3140_v45  ;;  %3206 = vmatmul.bf16.vlgmr.msrb.gmra.mxu3 %v3140_v45  ;;  %v7501_v59 = vld [vmem:[#allocation53_spill] sm:$0xff] }
 0x93e   :  { %v3124_v39 = vadd.f32 0.5, %v3122_v16  ;;  %v3101_v51 = vpop.f32.mrf.mxu2  ;;  %3264 = vmatpush.bf16.msra.mxu0 %v5140_v37  ;;  %3302 = vmatpush.bf16.msra.mxu1 %v4680_v3  ;;  %v7500_v16 = vld [vmem:[#allocation25_spill] sm:$0xff] }
 0x93f   :  { %3315 = vmatpush.bf16.msra.mxu2 %v4781_v63  ;;  %3328 = vmatpush.bf16.msrb.mxu3 %v4865_v58  ;;  %v7504_v51 = vld [vmem:[#allocation34_spill] sm:$0xff] }
 0x940   :  { %v3127_v44 = vmul.f32 %v3126_v8, %v3124_v39  ;;  %v7502_v8 = vld [vmem:[#allocation54_spill] sm:$0xff]  ;;  %v7503_v39 = vld [vmem:[#allocation29_spill] sm:$0xff] }
 0x941   :  { %v4458_v33 = vpop.eup %4457 }
 0x942   :  { %v3123_v18 = vmul.f32 0.5, %v4458_v33  ;;  %v3128_v54 = vadd.f32 %v3127_v44, %v3073_v42  ;;  %3265 = vmatpush.bf16.msra.mxu0 %v5143_v31  ;;  %3303 = vmatpush.bf16.msra.mxu1 %v4683_v5  ;;  %v7505_v42 = vld [vmem:[#allocation38_spill] sm:$0xff]  ;;  %v7507_v33 = vld [vmem:[#allocation45_spill] sm:$0xff] }
 0x943   :  { %3316 = vmatpush.bf16.msra.mxu2 %v4803_v17  ;;  %3329 = vmatpush.bf16.msrb.mxu3 %v4878_v7  ;;  %v7481_v7 = vld [vmem:[#allocation33_spill] sm:$0xff]  ;;  %v7506_v44 = vld [vmem:[#allocation42_spill] sm:$0xff] }
 0x944   :  { %4459 = vtanh.f32 %v3128_v54  ;;  %v3114_v3 = vpop.f32.mrf.mxu3  ;;  %v3125_v50 = vadd.f32 0.5, %v3123_v18  ;;  %v7508_v18 = vld [vmem:[#allocation52_spill] sm:$0xff]  ;;  %v7509_v54 = vld [vmem:[#allocation55_spill] sm:$0xff] }
 0x945   :  { %v7510_v3 = vld [vmem:[#allocation21_spill] sm:$0xff] }
 0x946   :  { %3266 = vmatpush.bf16.msra.mxu0 %v5153_v6  ;;  %3304 = vmatpush.bf16.msra.mxu1 %v4692_v10  ;;  %v3130_v63 = vsub.f32 1.0, %v3125_v50  ;;  %v3132_v5 = vmul.f32 %v3125_v50, %v6405_v49  ;;  %v7511_v50 = vld [vmem:[#allocation93_spill] sm:$0xff] }
 0x947   :  { %3317 = vmatpush.bf16.msra.mxu2 %v4825_v30  ;;  %3330 = vmatpush.bf16.msrb.mxu3 %v4885_v15  ;;  %v7483_v15 = vld [vmem:[#allocation22_spill] sm:$0xff] }
 0x94a   :  { %v4460_v58 = vpop.eup %4459  ;;  %3267 = vmatpush.bf16.msra.mxu0 %v5161_v55  ;;  %3305 = vmatpush.bf16.msra.mxu1 %v4707_v19  ;;  %v7473_v19 = vld [vmem:[#allocation23_spill] sm:$0xff] }
 0x94b   :  { %v3131_v17 = vmul.f32 %v4460_v58, %v3130_v63  ;;  %3318 = vmatpush.bf16.msra.mxu2 %v4841_v41  ;;  %3331 = vmatpush.bf16.msrb.mxu3 %v4892_v21  ;;  %v7478_v41 = vld [vmem:[#allocation14_spill] sm:$0xff]  ;;  %v7485_v21 = vld [vmem:[#allocation37_spill] sm:$0xff]  ;;  %v339_v63 = vadd.f32 %v7511_v50, %v7510_v3  ;;  %v7512_v58 = vld [vmem:[#allocation31_spill] sm:$0xff] }
 0x94c   :  { %3219 = vmatmul.bf16.vlgmr.msrb.gmra.mxu0 %v3140_v45  ;;  %3232 = vmatmul.bf16.vlgmr.msrb.gmra.mxu1 %v3140_v45  ;;  %v7498_v45 = vld [vmem:[#allocation24_spill] sm:$0xff] }
 0x94d   :  { %v6497_v10 = vadd.f32 %v3132_v5, %v3131_v17  ;;  %v7513_v5 = vld [vmem:[#allocation94_spill] sm:$0xff] }
 0x94e   :  { %3268 = vmatpush.bf16.msra.mxu0 %v5169_v22  ;;  %3306 = vmatpush.bf16.msra.mxu1 %v4719_v26  ;;  %v7474_v26 = vld [vmem:[#allocation13_spill] sm:$0xff]  ;;  %v388_v17 = vadd.f32 %v7513_v5, %v7512_v58  ;;  %v7514_v58 = vld [vmem:[#allocation95_spill] sm:$0xff] }
 0x94f   :  { %v3237_v30 = vpack.c.bf16 %v6497_v10, %v6497_v10  ;;  %3319 = vmatpush.bf16.msra.mxu2 %v4857_v53  ;;  %3332 = vmatpush.bf16.msrb.mxu3 %v4906_v34  ;;  %v7479_v53 = vld [vmem:[#allocation19_spill] sm:$0xff]  ;;  %v7486_v34 = vld [vmem:[#allocation16_spill] sm:$0xff] }
 0x951   :  { %3246 = vmatmul.bf16.vlgmr.msrb.gmra.mxu2 %v3237_v30  ;;  %3259 = vmatmul.bf16.vlgmr.msra.gmra.mxu3 %v3237_v30 }
 0x952   :  { %3269 = vmatpush.bf16.msra.mxu0 %v5181_v52  ;;  %3307 = vmatpush.bf16.msra.mxu1 %v4734_v35  ;;  %v7475_v35 = vld [vmem:[#allocation18_spill] sm:$0xff] }
 0x953   :  { %3320 = vmatpush.bf16.msra.mxu2 %v4870_v0  ;;  %3333 = vmatpush.bf16.msrb.mxu3 %v4915_v43  ;;  %v7480_v0 = vld [vmem:[#allocation32_spill] sm:$0xff]  ;;  %v7487_v43 = vld [vmem:[#allocation26_spill] sm:$0xff] }
 0x956   :  { %3270 = vmatpush.bf16.msra.mxu0 %v5187_v40  ;;  %3308 = vmatpush.bf16.msra.mxu1 %v4755_v47  ;;  %v7476_v47 = vld [vmem:[#allocation27_spill] sm:$0xff] }
 0x957   :  { %3321 = vmatpush.bf16.msra.mxu2 %v4883_v12  ;;  %3334 = vmatpush.bf16.msrb.mxu3 %v4923_v48  ;;  %v7482_v12 = vld [vmem:[#allocation15_spill] sm:$0xff]  ;;  %v7488_v48 = vld [vmem:[#allocation40_spill] sm:$0xff] }
 0x95a   :  { %3271 = vmatpush.bf16.msra.mxu0 %v5197_v23  ;;  %3309 = vmatpush.bf16.msra.mxu1 %v4776_v61  ;;  %v7477_v61 = vld [vmem:[#allocation28_spill] sm:$0xff] }
 0x95b   :  { %3322 = vmatpush.bf16.msra.mxu2 %v4890_v20  ;;  %3335 = vmatpush.bf16.msrb.mxu3 %v4936_v57  ;;  %v7484_v20 = vld [vmem:[#allocation36_spill] sm:$0xff]  ;;  %v7489_v57 = vld [vmem:[#allocation41_spill] sm:$0xff] }
 0x95d   :  { %3272 = vmatmul.bf16.vlgmr.msra.gmra.mxu0 %v3237_v30 }
 0x95e   :  { %3359 = vmatpush.bf16.msrb.mxu0 %v4901_v29  ;;  %3372 = vmatpush.bf16.msrb.mxu1 %v4984_v38 }
 0x95f   :  { %3385 = vmatpush.bf16.msrb.mxu2 %v5015_v11  ;;  %3399 = vmatpush.bf16.msra.mxu3 %v7473_v19 }
 0x962   :  { %3360 = vmatpush.bf16.msrb.mxu0 %v7474_v26  ;;  %3373 = vmatpush.bf16.msrb.mxu1 %v7475_v35 }
 0x963   :  { %3386 = vmatpush.bf16.msrb.mxu2 %v7476_v47  ;;  %3400 = vmatpush.bf16.msra.mxu3 %v7477_v61 }
 0x966   :  { %3361 = vmatpush.bf16.msrb.mxu0 %v7478_v41  ;;  %3374 = vmatpush.bf16.msrb.mxu1 %v7479_v53 }
 0x967   :  { %3387 = vmatpush.bf16.msrb.mxu2 %v7480_v0  ;;  %3401 = vmatpush.bf16.msra.mxu3 %v7481_v7 }
 0x96a   :  { %3362 = vmatpush.bf16.msrb.mxu0 %v7482_v12  ;;  %3375 = vmatpush.bf16.msrb.mxu1 %v7483_v15 }
 0x96b   :  { %3388 = vmatpush.bf16.msrb.mxu2 %v7484_v20  ;;  %3402 = vmatpush.bf16.msra.mxu3 %v7485_v21 }
 0x96e   :  { %3363 = vmatpush.bf16.msrb.mxu0 %v7486_v34  ;;  %3376 = vmatpush.bf16.msrb.mxu1 %v7487_v43 }
 0x96f   :  { %3389 = vmatpush.bf16.msrb.mxu2 %v7488_v48  ;;  %3403 = vmatpush.bf16.msra.mxu3 %v7489_v57 }
 0x972   :  { %3364 = vmatpush.bf16.msrb.mxu0 %v7490_v4  ;;  %3377 = vmatpush.bf16.msrb.mxu1 %v7491_v32 }
 0x973   :  { %3390 = vmatpush.bf16.msrb.mxu2 %v7492_v27  ;;  %3404 = vmatpush.bf16.msra.mxu3 %v7493_v24 }
 0x976   :  { %3365 = vmatpush.bf16.msrb.mxu0 %v7494_v36  ;;  %3378 = vmatpush.bf16.msrb.mxu1 %v7495_v60 }
 0x977   :  { %3391 = vmatpush.bf16.msrb.mxu2 %v7496_v28  ;;  %3405 = vmatpush.bf16.msra.mxu3 %v7497_v62 }
 0x97a   :  { %3366 = vmatpush.bf16.msrb.mxu0 %v7498_v45  ;;  %3379 = vmatpush.bf16.msrb.mxu1 %v7499_v14 }
 0x97b   :  { %3392 = vmatpush.bf16.msrb.mxu2 %v7501_v59  ;;  %3406 = vmatpush.bf16.msra.mxu3 %v7502_v8 }
 0x97e   :  { %3412 = vmatpush.bf16.msra.mxu0 %v7500_v16 }
 0x982   :  { %3413 = vmatpush.bf16.msra.mxu0 %v7503_v39 }
 0x986   :  { %3414 = vmatpush.bf16.msra.mxu0 %v7504_v51 }
 0x98a   :  { %3415 = vmatpush.bf16.msra.mxu0 %v7505_v42 }
 0x98e   :  { %3416 = vmatpush.bf16.msra.mxu0 %v7506_v44 }
 0x992   :  { %3417 = vmatpush.bf16.msra.mxu0 %v7507_v33 }
 0x996   :  { %3418 = vmatpush.bf16.msra.mxu0 %v7508_v18 }
 0x99a   :  { %3419 = vmatpush.bf16.msra.mxu0 %v7509_v54 }
 0x9b9   :  { %v3150_v30 = vpop.f32.mrf.mxu0  ;;  %v3163_v49 = vpop.f32.mrf.mxu1 }
 0x9ba   :  { %v3180_v8 = vadd.f32 %v3150_v30, %v339_v63  ;;  %v3181_v62 = vadd.f32 %v3163_v49, %v388_v17  ;;  %v437_v63 = vadd.f32 %v7514_v58, %v7471_v25 }
 0x9bc   :  { %v3182_v24 = vmul.f32 0.5, %v3180_v8  ;;  %v3183_v57 = vmul.f32 0.5, %v3181_v62 }
 0x9be   :  { %4461 = vtanh.f32 %v3182_v24 }
 0x9bf   :  { %4463 = vtanh.f32 %v3183_v57 }
 0x9c0   :  { %v3176_v44 = vpop.f32.mrf.mxu2  ;;  %v3207_v42 = vpop.f32.mrf.mxu3 }
 0x9c1   :  { %v3152_v33 = vpop.f32.mrf.mxu0  ;;  %v3165_v18 = vpop.f32.mrf.mxu1  ;;  %v3190_v50 = vadd.f32 %v7470_v56, %v3176_v44 }
 0x9c4   :  { %v4462_v21 = vpop.eup %4461 }
 0x9c5   :  { %v3186_v54 = vmul.f32 0.5, %v4462_v21  ;;  %v4464_v51 = vpop.eup %4463 }
 0x9c6   :  { %v3187_v24 = vmul.f32 0.5, %v4464_v51 }
 0x9c7   :  { %v3188_v7 = vadd.f32 0.5, %v3186_v54  ;;  %v3208_v54 = vadd.f32 %v3207_v42, %v6993_v13 }
 0x9c8   :  { %v3178_v3 = vpop.f32.mrf.mxu2  ;;  %v3209_v5 = vpop.f32.mrf.mxu3  ;;  %v3189_v57 = vadd.f32 0.5, %v3187_v24 }
 0x9c9   :  { %v3191_v49 = vmul.f32 %v3190_v50, %v3188_v7  ;;  %v3220_v8 = vpop.f32.mrf.mxu0  ;;  %v3233_v62 = vpop.f32.mrf.mxu1 }
 0x9ca   :  { %v3194_v30 = vsub.f32 1.0, %v3189_v57  ;;  %v3221_v44 = vadd.f32 %v3220_v8, %v5315_v2  ;;  %v3196_v3 = vmul.f32 %v3189_v57, %v6469_v46 }
 0x9cb   :  { %v3192_v17 = vadd.f32 %v3191_v49, %v437_v63 }
 0x9cd   :  { %4465 = vtanh.f32 %v3192_v17 }
 0x9d1   :  { %v3222_v33 = vpop.f32.mrf.mxu0  ;;  %v3235_v18 = vpop.f32.mrf.mxu1 }
 0x9d3   :  { %v4466_v21 = vpop.eup %4465 }
 0x9d4   :  { %v3195_v5 = vmul.f32 %v4466_v21, %v3194_v30  ;;  %v3247_v56 = vpop.f32.mrf.mxu2  ;;  %v3260_v58 = vpop.f32.mrf.mxu3 }
 0x9d5   :  { %v3277_v7 = vadd.f32 %v3247_v56, %v3208_v54  ;;  %v3278_v50 = vadd.f32 %v3260_v58, %v3221_v44 }
 0x9d6   :  { %v6567_v25 = vadd.f32 %v3196_v3, %v3195_v5  ;;  %v7531_v5 = vld [vmem:[#allocation67_spill] sm:$0xff] }
 0x9d7   :  { %v3279_v51 = vmul.f32 0.5, %v3277_v7  ;;  %v3280_v49 = vmul.f32 0.5, %v3278_v50 }
 0x9d8   :  { %v3301_v63 = vpack.c.bf16 %v6567_v25, %v6567_v25 }
 0x9d9   :  { %4467 = vtanh.f32 %v3279_v51  ;;  %v7532_v51 = vld [vmem:[#allocation47_spill] sm:$0xff] }
 0x9da   :  { %v3273_v24 = vpop.f32.mrf.mxu0  ;;  %3310 = vmatmul.bf16.vlgmr.msra.gmra.mxu1 %v3301_v63  ;;  %3323 = vmatmul.bf16.vlgmr.msra.gmra.mxu2 %v3301_v63  ;;  %4469 = vtanh.f32 %v3280_v49 }
 0x9db   :  { %3336 = vmatmul.bf16.vlgmr.msrb.gmra.mxu3 %v3301_v63  ;;  %3367 = vmatmul.bf16.vlgmr.msrb.gmra.mxu0 %v3301_v63  ;;  %v3287_v33 = vadd.f32 %v6476_v9, %v3273_v24 }
 0x9dc   :  { %v3249_v46 = vpop.f32.mrf.mxu2  ;;  %v3262_v42 = vpop.f32.mrf.mxu3  ;;  %3425 = vmatpush.bf16.msra.mxu1 %v5140_v37  ;;  %3459 = vmatpush.bf16.msra.mxu2 %v4901_v29  ;;  %v3234_v29 = vadd.f32 %v3233_v62, %v5331_v1 }
 0x9dd   :  { %3472 = vmatpush.bf16.msrb.mxu3 %v4984_v38  ;;  %3485 = vmatpush.bf16.msrb.mxu0 %v5015_v11 }
 0x9df   :  { %v4468_v56 = vpop.eup %4467 }
 0x9e0   :  { %v3283_v8 = vmul.f32 0.5, %v4468_v56  ;;  %3426 = vmatpush.bf16.msra.mxu1 %v5143_v31  ;;  %3460 = vmatpush.bf16.msra.mxu2 %v7474_v26  ;;  %v4470_v17 = vpop.eup %4469 }
 0x9e1   :  { %3473 = vmatpush.bf16.msrb.mxu3 %v7475_v35  ;;  %3486 = vmatpush.bf16.msrb.mxu0 %v7476_v47  ;;  %v3284_v11 = vmul.f32 0.5, %v4470_v17 }
 0x9e2   :  { %v3285_v57 = vadd.f32 0.5, %v3283_v8  ;;  %v3275_v18 = vpop.f32.mrf.mxu0 }
 0x9e3   :  { %v3286_v35 = vadd.f32 0.5, %v3284_v11 }
 0x9e4   :  { %v3288_v38 = vmul.f32 %v3287_v33, %v3285_v57  ;;  %3427 = vmatpush.bf16.msra.mxu1 %v5153_v6  ;;  %3461 = vmatpush.bf16.msra.mxu2 %v7478_v41 }
 0x9e5   :  { %3474 = vmatpush.bf16.msrb.mxu3 %v7479_v53  ;;  %3487 = vmatpush.bf16.msrb.mxu0 %v7480_v0  ;;  %v3291_v47 = vsub.f32 1.0, %v3286_v35  ;;  %v3293_v53 = vmul.f32 %v3286_v35, %v6497_v10 }
 0x9e6   :  { %v3289_v26 = vadd.f32 %v3288_v38, %v3234_v29 }
 0x9e8   :  { %4471 = vtanh.f32 %v3289_v26  ;;  %3428 = vmatpush.bf16.msra.mxu1 %v5161_v55  ;;  %3462 = vmatpush.bf16.msra.mxu2 %v7482_v12 }
 0x9e9   :  { %3475 = vmatpush.bf16.msrb.mxu3 %v7483_v15  ;;  %3488 = vmatpush.bf16.msrb.mxu0 %v7484_v20  ;;  %v7515_v20 = vld [vmem:[#allocation33_spill] sm:$0xff] }
 0x9ea   :  { %3380 = vmatmul.bf16.vlgmr.msrb.gmra.mxu1 %v3301_v63  ;;  %3393 = vmatmul.bf16.vlgmr.msrb.gmra.mxu2 %v3301_v63  ;;  %v7533_v63 = vld [vmem:[#allocation98_spill] sm:$0xff] }
 0x9eb   :  { %v439_v49 = vadd.f32 %v7533_v63, %v7532_v51  ;;  %v4283_v51 = vld [vmem:[#allocation8 + $0x60] sm:$0xff] }
 0x9ec   :  { %3429 = vmatpush.bf16.msra.mxu1 %v5169_v22  ;;  %3463 = vmatpush.bf16.msra.mxu2 %v7486_v34  ;;  %v7516_v34 = vld [vmem:[#allocation34_spill] sm:$0xff]  ;;  %v4275_v63 = vld [vmem:[#allocation8 + $0x20] sm:$0xff] }
 0x9ed   :  { %3476 = vmatpush.bf16.msrb.mxu3 %v7487_v43  ;;  %3489 = vmatpush.bf16.msrb.mxu0 %v7488_v48  ;;  %v7518_v43 = vld [vmem:[#allocation38_spill] sm:$0xff]  ;;  %v7519_v48 = vld [vmem:[#allocation41_spill] sm:$0xff] }
 0x9ee   :  { %v4472_v41 = vpop.eup %4471 }
 0x9ef   :  { %v3292_v0 = vmul.f32 %v4472_v41, %v3291_v47 }
 0x9f0   :  { %3430 = vmatpush.bf16.msra.mxu1 %v5181_v52  ;;  %3464 = vmatpush.bf16.msra.mxu2 %v7490_v4  ;;  %v7523_v4 = vld [vmem:[#allocation48_spill] sm:$0xff] }
 0x9f1   :  { %v6596_v12 = vadd.f32 %v3293_v53, %v3292_v0  ;;  %3477 = vmatpush.bf16.msrb.mxu3 %v7491_v32  ;;  %3490 = vmatpush.bf16.msrb.mxu0 %v7492_v27  ;;  %v7525_v32 = vld [vmem:[#allocation54_spill] sm:$0xff]  ;;  %v7527_v27 = vld [vmem:[#allocation21_spill] sm:$0xff] }
 0x9f3   :  { %v3398_v15 = vpack.c.bf16 %v6596_v12, %v6596_v12 }
 0x9f4   :  { %3431 = vmatpush.bf16.msra.mxu1 %v5187_v40  ;;  %3465 = vmatpush.bf16.msra.mxu2 %v7494_v36 }
 0x9f5   :  { %3407 = vmatmul.bf16.vlgmr.msra.gmra.mxu3 %v3398_v15  ;;  %3420 = vmatmul.bf16.vlgmr.msra.gmra.mxu0 %v3398_v15 }
 0x9f6   :  { %3478 = vmatpush.bf16.msrb.mxu3 %v7495_v60  ;;  %3491 = vmatpush.bf16.msrb.mxu0 %v7496_v28 }
 0x9f8   :  { %3432 = vmatpush.bf16.msra.mxu1 %v5197_v23  ;;  %3466 = vmatpush.bf16.msra.mxu2 %v7498_v45 }
 0x9fa   :  { %3479 = vmatpush.bf16.msrb.mxu3 %v7499_v14  ;;  %3492 = vmatpush.bf16.msrb.mxu0 %v7501_v59 }
 0x9fb   :  { %3433 = vmatmul.bf16.vlgmr.msra.gmra.mxu1 %v3398_v15 }
 0x9fc   :  { %3499 = vmatpush.bf16.msrb.mxu1 %v7473_v19  ;;  %3512 = vmatpush.bf16.msrb.mxu2 %v7500_v16  ;;  %v7517_v19 = vld [vmem:[#allocation37_spill] sm:$0xff] }
 0x9fd   :  { %v7530_v16 = vld [vmem:[#allocation97_spill] sm:$0xff] }
 0x9fe   :  { %3525 = vmatpush.bf16.msra.mxu3 %v5140_v37  ;;  %v7520_v37 = vld [vmem:[#allocation42_spill] sm:$0xff] }
 0xa00   :  { %3500 = vmatpush.bf16.msrb.mxu1 %v7477_v61  ;;  %3513 = vmatpush.bf16.msrb.mxu2 %v7503_v39  ;;  %v7521_v61 = vld [vmem:[#allocation44_spill] sm:$0xff] }
 0xa02   :  { %3526 = vmatpush.bf16.msra.mxu3 %v5143_v31  ;;  %v7522_v31 = vld [vmem:[#allocation45_spill] sm:$0xff] }
 0xa04   :  { %3501 = vmatpush.bf16.msrb.mxu1 %v7515_v20  ;;  %3514 = vmatpush.bf16.msrb.mxu2 %v7516_v34 }
 0xa06   :  { %3527 = vmatpush.bf16.msra.mxu3 %v5153_v6  ;;  %v7524_v6 = vld [vmem:[#allocation52_spill] sm:$0xff] }
 0xa08   :  { %3502 = vmatpush.bf16.msrb.mxu1 %v7517_v19  ;;  %3515 = vmatpush.bf16.msrb.mxu2 %v7518_v43 }
 0xa0a   :  { %3528 = vmatpush.bf16.msra.mxu3 %v5161_v55  ;;  %v7526_v55 = vld [vmem:[#allocation55_spill] sm:$0xff] }
 0xa0c   :  { %3503 = vmatpush.bf16.msrb.mxu1 %v7519_v48  ;;  %3516 = vmatpush.bf16.msrb.mxu2 %v7520_v37 }
 0xa0e   :  { %3529 = vmatpush.bf16.msra.mxu3 %v5169_v22  ;;  %v7528_v22 = vld [vmem:[#allocation96_spill] sm:$0xff] }
 0xa0f   :  { %v341_v36 = vadd.f32 %v7528_v22, %v7527_v27 }
 0xa10   :  { %3504 = vmatpush.bf16.msrb.mxu1 %v7521_v61  ;;  %3517 = vmatpush.bf16.msrb.mxu2 %v7522_v31 }
 0xa12   :  { %3530 = vmatpush.bf16.msra.mxu3 %v5181_v52  ;;  %v7529_v52 = vld [vmem:[#allocation31_spill] sm:$0xff] }
 0xa13   :  { %v390_v59 = vadd.f32 %v7530_v16, %v7529_v52 }
 0xa14   :  { %3505 = vmatpush.bf16.msrb.mxu1 %v7523_v4  ;;  %3518 = vmatpush.bf16.msrb.mxu2 %v7524_v6 }
 0xa16   :  { %3531 = vmatpush.bf16.msra.mxu3 %v5187_v40 }
 0xa18   :  { %3506 = vmatpush.bf16.msrb.mxu1 %v7525_v32  ;;  %3519 = vmatpush.bf16.msrb.mxu2 %v7526_v55 }
 0xa1a   :  { %3532 = vmatpush.bf16.msra.mxu3 %v5197_v23 }
 0xa57   :  { %v3311_v60 = vpop.f32.mrf.mxu1 }
 0xa58   :  { %v3341_v28 = vadd.f32 %v3311_v60, %v341_v36  ;;  %v3368_v45 = vpop.f32.mrf.mxu0 }
 0xa59   :  { %v3369_v0 = vadd.f32 %v3368_v45, %v6993_v13 }
 0xa5a   :  { %v3343_v14 = vmul.f32 0.5, %v3341_v28 }
 0xa5c   :  { %4473 = vtanh.f32 %v3343_v14 }
 0xa5d   :  { %v3324_v39 = vpop.f32.mrf.mxu2 }
 0xa5e   :  { %v3342_v62 = vadd.f32 %v3324_v39, %v390_v59  ;;  %v3337_v40 = vpop.f32.mrf.mxu3 }
 0xa5f   :  { %v3313_v30 = vpop.f32.mrf.mxu1  ;;  %v3351_v58 = vadd.f32 %v7531_v5, %v3337_v40  ;;  %v4286_v40 = vld [vmem:[#allocation8 + $0x78] sm:$0xff]  ;;  %v4284_v5 = vld [vmem:[#allocation8 + $0x68] sm:$0xff] }
 0xa60   :  { %v3344_v21 = vmul.f32 0.5, %v3342_v62  ;;  %v3370_v54 = vpop.f32.mrf.mxu0  ;;  %3706 = vmatpush.bf16.msra.mxu1 %v4286_v40 }
 0xa61   :  { %v4278_v54 = vld [vmem:[#allocation8 + $0x38] sm:$0xff] }
 0xa62   :  { %v4474_v44 = vpop.eup %4473  ;;  %4475 = vtanh.f32 %v3344_v21  ;;  %3693 = vmatpush.bf16.msra.mxu0 %v4278_v54 }
 0xa63   :  { %v3347_v23 = vmul.f32 0.5, %v4474_v44  ;;  %v4285_v44 = vld [vmem:[#allocation8 + $0x70] sm:$0xff] }
 0xa64   :  { %3707 = vmatpush.bf16.msra.mxu1 %v4285_v44  ;;  %v7542_v44 = vld [vmem:[#allocation63_spill] sm:$0xff] }
 0xa65   :  { %v3349_v3 = vadd.f32 0.5, %v3347_v23  ;;  %v3326_v7 = vpop.f32.mrf.mxu2 }
 0xa66   :  { %v3339_v50 = vpop.f32.mrf.mxu3 }
 0xa67   :  { %v3352_v24 = vmul.f32 %v3351_v58, %v3349_v3  ;;  %v3381_v46 = vpop.f32.mrf.mxu1  ;;  %v4277_v3 = vld [vmem:[#allocation8 + $0x30] sm:$0xff]  ;;  %v4276_v50 = vld [vmem:[#allocation8 + $0x28] sm:$0xff] }
 0xa68   :  { %v4476_v42 = vpop.eup %4475  ;;  %v3382_v41 = vadd.f32 %v3381_v46, %v5315_v2  ;;  %3694 = vmatpush.bf16.msra.mxu0 %v4277_v3  ;;  %3708 = vmatpush.bf16.msra.mxu1 %v4284_v5  ;;  %v4281_v46 = vld [vmem:[#allocation8 + $0x50] sm:$0xff] }
 0xa69   :  { %v3348_v56 = vmul.f32 0.5, %v4476_v42  ;;  %v3353_v8 = vadd.f32 %v3352_v24, %v439_v49  ;;  %v4282_v49 = vld [vmem:[#allocation8 + $0x58] sm:$0xff]  ;;  %v4273_v42 = vld [vmem:[#allocation8 + $0x10] sm:$0xff] }
 0xa6a   :  { %v4274_v24 = vld [vmem:[#allocation8 + $0x18] sm:$0xff] }
 0xa6b   :  { %4477 = vtanh.f32 %v3353_v8  ;;  %v3350_v17 = vadd.f32 0.5, %v3348_v56  ;;  %v4280_v56 = vld [vmem:[#allocation8 + $0x48] sm:$0xff] }
 0xa6c   :  { %3695 = vmatpush.bf16.msra.mxu0 %v4276_v50  ;;  %3709 = vmatpush.bf16.msra.mxu1 %v4283_v51  ;;  %v4272_v8 = vld [vmem:[#allocation8 + $0x8] sm:$0xff]  ;;  %v7544_v51 = vld [vmem:[#allocation65_spill] sm:$0xff] }
 0xa6d   :  { %v3394_v57 = vpop.f32.mrf.mxu2  ;;  %v3355_v18 = vsub.f32 1.0, %v3350_v17  ;;  %v3357_v38 = vmul.f32 %v3350_v17, %v6567_v25 }
 0xa6e   :  { %v3395_v27 = vadd.f32 %v3394_v57, %v5331_v1  ;;  %v4279_v57 = vld [vmem:[#allocation8 + $0x40] sm:$0xff] }
 0xa6f   :  { %v3383_v33 = vpop.f32.mrf.mxu1 }
 0xa70   :  { %3696 = vmatpush.bf16.msra.mxu0 %v4275_v63  ;;  %3710 = vmatpush.bf16.msra.mxu1 %v4282_v49  ;;  %v4271_v33 = vld [vmem:[#allocation8] sm:$0xff] }
 0xa71   :  { %v4478_v29 = vpop.eup %4477 }
 0xa72   :  { %v3356_v11 = vmul.f32 %v4478_v29, %v3355_v18  ;;  %v3421_v26 = vpop.f32.mrf.mxu0 }
 0xa73   :  { %v3439_v15 = vadd.f32 %v3421_v26, %v3382_v41  ;;  %v7536_v41 = vld [vmem:[#allocation57_spill] sm:$0xff] }
 0xa74   :  { %v3358_v35 = vadd.f32 %v3357_v38, %v3356_v11  ;;  %3697 = vmatpush.bf16.msra.mxu0 %v4274_v24  ;;  %3711 = vmatpush.bf16.msra.mxu1 %v4281_v46  ;;  %v7534_v38 = vld [vmem:[#allocation56_spill] sm:$0xff]  ;;  %v7535_v11 = vld [vmem:[#allocation49_spill] sm:$0xff]  ;;  %v7545_v46 = vld [vmem:[#allocation66_spill] sm:$0xff] }
 0xa75   :  { %v3396_v47 = vpop.f32.mrf.mxu2  ;;  %v3441_v37 = vmul.f32 0.5, %v3439_v15  ;;  %v1364_v26 = vmax.f32 %v7535_v11, %v7534_v38 }
 0xa76   :  { %v3458_v53 = vpack.c.bf16 %v3358_v35, %v3358_v35  ;;  %v1363_v35 = vadd.f32 %v7534_v38, %v7535_v11 }
 0xa78   :  { %v3408_v20 = vpop.f32.mrf.mxu3  ;;  %v3434_v34 = vpop.f32.mrf.mxu1  ;;  %3467 = vmatmul.bf16.vlgmr.msra.gmra.mxu2 %v3458_v53  ;;  %3480 = vmatmul.bf16.vlgmr.msrb.gmra.mxu3 %v3458_v53 }
 0xa79   :  { %v3438_v19 = vadd.f32 %v3408_v20, %v3369_v0  ;;  %3493 = vmatmul.bf16.vlgmr.msrb.gmra.mxu0 %v3458_v53  ;;  %v3448_v55 = vadd.f32 %v6476_v9, %v3434_v34  ;;  %3712 = vmatpush.bf16.msra.mxu1 %v4280_v56  ;;  %v1525_v53 = vmax.f32 %v1364_v26, %v7536_v41  ;;  %v7537_v20 = vld [vmem:[#allocation59_spill] sm:$0xff] }
 0xa7a   :  { %v3423_v43 = vpop.f32.mrf.mxu0  ;;  %3698 = vmatpush.bf16.msra.mxu0 %v4273_v42  ;;  %v1524_v0 = vadd.f32 %v7536_v41, %v1363_v35 }
 0xa7b   :  { %v3440_v48 = vmul.f32 0.5, %v3438_v19  ;;  %v1686_v34 = vmax.f32 %v1525_v53, %v7537_v20 }
 0xa7c   :  { %v1685_v19 = vadd.f32 %v7537_v20, %v1524_v0 }
 0xa7d   :  { %4479 = vtanh.f32 %v3440_v48  ;;  %3713 = vmatpush.bf16.msra.mxu1 %v4279_v57 }
 0xa7e   :  { %4481 = vtanh.f32 %v3441_v37  ;;  %3699 = vmatpush.bf16.msra.mxu0 %v4272_v8 }
 0xa80   :  { %v3410_v25 = vpop.f32.mrf.mxu3  ;;  %v3436_v61 = vpop.f32.mrf.mxu1 }
 0xa81   :  { %v7538_v25 = vld [vmem:[#allocation51_spill] sm:$0xff] }
 0xa82   :  { %3700 = vmatpush.bf16.msra.mxu0 %v4271_v33  ;;  %v1847_v61 = vmax.f32 %v1686_v34, %v7538_v25 }
 0xa83   :  { %v4480_v31 = vpop.eup %4479 }
 0xa84   :  { %v3444_v4 = vmul.f32 0.5, %v4480_v31  ;;  %v4482_v6 = vpop.eup %4481  ;;  %v1846_v31 = vadd.f32 %v7538_v25, %v1685_v19 }
 0xa85   :  { %v3445_v36 = vmul.f32 0.5, %v4482_v6 }
 0xa86   :  { %v3446_v32 = vadd.f32 0.5, %v3444_v4 }
 0xa87   :  { %v3447_v28 = vadd.f32 0.5, %v3445_v36 }
 0xa88   :  { %v3449_v22 = vmul.f32 %v3448_v55, %v3446_v32  ;;  %v7539_v32 = vld [vmem:[#allocation60_spill] sm:$0xff] }
 0xa89   :  { %v3452_v45 = vsub.f32 1.0, %v3447_v28  ;;  %v3454_v52 = vmul.f32 %v3447_v28, %v6596_v12  ;;  %v2008_v55 = vmax.f32 %v1847_v61, %v7539_v32 }
 0xa8a   :  { %v3450_v60 = vadd.f32 %v3449_v22, %v3395_v27  ;;  %v2007_v27 = vadd.f32 %v7539_v32, %v1846_v31  ;;  %v7540_v22 = vld [vmem:[#allocation61_spill] sm:$0xff] }
 0xa8b   :  { %v2169_v36 = vmax.f32 %v2008_v55, %v7540_v22 }
 0xa8c   :  { %4483 = vtanh.f32 %v3450_v60  ;;  %v2168_v60 = vadd.f32 %v7540_v22, %v2007_v27 }
 0xa92   :  { %v4484_v14 = vpop.eup %4483 }
 0xa93   :  { %v3453_v16 = vmul.f32 %v4484_v14, %v3452_v45 }
 0xa95   :  { %v6647_v59 = vadd.f32 %v3454_v52, %v3453_v16  ;;  %v7541_v52 = vld [vmem:[#allocation62_spill] sm:$0xff] }
 0xa96   :  { %v2330_v16 = vmax.f32 %v2169_v36, %v7541_v52 }
 0xa97   :  { %v3498_v39 = vpack.c.bf16 %v6647_v59, %v6647_v59 }
 0xa99   :  { %3507 = vmatmul.bf16.vlgmr.msrb.gmra.mxu1 %v3498_v39  ;;  %3520 = vmatmul.bf16.vlgmr.msrb.gmra.mxu2 %v3498_v39 }
 0xa9a   :  { %3533 = vmatmul.bf16.vlgmr.msra.gmra.mxu3 %v3498_v39  ;;  %v2329_v39 = vadd.f32 %v7541_v52, %v2168_v60 }
 0xa9c   :  { %v2490_v3 = vadd.f32 %v7542_v44, %v2329_v39 }
 0xaf6   :  { %v6651_v62 = vpop.f32.mrf.mxu0 }
 0xafb   :  { %v3468_v30 = vpop.f32.mrf.mxu2  ;;  %v3481_v21 = vpop.f32.mrf.mxu3 }
 0xafc   :  { %v3469_v17 = vadd.f32 %v3468_v30, %v6993_v13  ;;  %v3482_v13 = vadd.f32 %v3481_v21, %v5315_v2  ;;  %v3495_v30 = vadd.f32 %v6651_v62, %v5331_v1 }
 0xafe   :  { %v3496_v23 = vpop.f32.mrf.mxu0 }
 0xaff   :  { %v2491_v23 = vmax.f32 %v2330_v16, %v7542_v44 }
 0xb03   :  { %v3470_v58 = vpop.f32.mrf.mxu2  ;;  %v3483_v7 = vpop.f32.mrf.mxu3 }
 0xb04   :  { %v7543_v7 = vld [vmem:[#allocation64_spill] sm:$0xff] }
 0xb05   :  { %v2652_v50 = vmax.f32 %v2491_v23, %v7543_v7 }
 0xb07   :  { %v2813_v63 = vmax.f32 %v2652_v50, %v7544_v51 }
 0xb09   :  { %v2974_v1 = vmax.f32 %v2813_v63, %v7545_v46 }
 0xb0b   :  { %v3135_v42 = vmax.f32 %v2974_v1, %v6497_v10 }
 0xb0d   :  { %v3296_v57 = vmax.f32 %v3135_v42, %v6596_v12 }
 0xb0f   :  { %v3457_v38 = vmax.f32 %v3296_v57, %v6647_v59 }
 0xb16   :  { %v3508_v18 = vpop.f32.mrf.mxu1 }
 0xb17   :  { %v3538_v29 = vadd.f32 %v3508_v18, %v3469_v17 }
 0xb19   :  { %v3540_v47 = vmul.f32 0.5, %v3538_v29 }
 0xb1b   :  { %4485 = vtanh.f32 %v3540_v47 }
 0xb1c   :  { %v3521_v15 = vpop.f32.mrf.mxu2 }
 0xb1d   :  { %v3539_v43 = vadd.f32 %v3521_v15, %v3482_v13  ;;  %v3534_v48 = vpop.f32.mrf.mxu3 }
 0xb1e   :  { %v3510_v37 = vpop.f32.mrf.mxu1  ;;  %v3548_v45 = vadd.f32 %v6476_v9, %v3534_v48  ;;  %v2651_v9 = vadd.f32 %v7543_v7, %v2490_v3 }
 0xb1f   :  { %v3541_v4 = vmul.f32 0.5, %v3539_v43 }
 0xb20   :  { %v2812_v49 = vadd.f32 %v7544_v51, %v2651_v9 }
 0xb21   :  { %v4486_v6 = vpop.eup %4485  ;;  %4487 = vtanh.f32 %v3541_v4 }
 0xb22   :  { %v3544_v2 = vmul.f32 0.5, %v4486_v6  ;;  %v2973_v62 = vadd.f32 %v7545_v46, %v2812_v49 }
 0xb24   :  { %v3546_v28 = vadd.f32 0.5, %v3544_v2  ;;  %v3523_v14 = vpop.f32.mrf.mxu2  ;;  %v3134_v8 = vadd.f32 %v6497_v10, %v2973_v62  ;;  %v4298_v10 = vld [vmem:[%s6705_s10] ss:$0 sm:$0xff] }
 0xb25   :  { %v3536_v40 = vpop.f32.mrf.mxu3 }
 0xb26   :  { %v3549_v21 = vmul.f32 %v3548_v45, %v3546_v28  ;;  %v3295_v29 = vadd.f32 %v6596_v12, %v3134_v8 }
 0xb27   :  { %v4488_v54 = vpop.eup %4487 }
 0xb28   :  { %v3545_v5 = vmul.f32 0.5, %v4488_v54  ;;  %v3550_v58 = vadd.f32 %v3549_v21, %v3495_v30  ;;  %v3456_v26 = vadd.f32 %v6647_v59, %v3295_v29 }
 0xb2a   :  { %4489 = vtanh.f32 %v3550_v58  ;;  %v3547_v24 = vadd.f32 0.5, %v3545_v5 }
 0xb2c   :  { %v3552_v56 = vsub.f32 1.0, %v3547_v24  ;;  %v3554_v33 = vmul.f32 %v3547_v24, %v6647_v59 }
 0xb30   :  { %v4490_v17 = vpop.eup %4489 }
 0xb31   :  { %v3553_v18 = vmul.f32 %v4490_v17, %v3552_v56 }
 0xb33   :  { %v3555_v11 = vadd.f32 %v3554_v33, %v3553_v18 }
 0xb35   :  { %v3557_v35 = vmax.f32 %v3457_v38, %v3555_v11  ;;  %v3556_v47 = vadd.f32 %v3555_v11, %v3456_v26 }
 0xb37   :  { %v3560_v41 = vpack.c.bf16 %v3557_v35, %v3557_v35  ;;  %v3558_v53 = vmul.f32 0.0625, %v3556_v47 }
 0xb39   :  { %3714 = vmatmul.bf16.vlgmr.msra.gmra.mxu1 %v3560_v41  ;;  %v3559_v0 = vpack.c.bf16 %v3558_v53, %v3558_v53 }
 0xb3b   :  { %3701 = vmatmul.bf16.vlgmr.msra.gmra.mxu0 %v3559_v0 }
 0xbb6   :  { %v3715_v13 = vpop.f32.mrf.mxu1 }
 0xbb8   :  { %v3702_v15 = vpop.f32.mrf.mxu0 }
 0xbb9   :  { %v3703_v20 = vadd.f32 %v4298_v10, %v3702_v15 }
 0xbbb   :  { %v3716_v12 = vadd.f32 %v3715_v13, %v3703_v20 }
 0xbbd   :  { %3719 = vst [vmem:[%s6706_s11] sm:$0xff] %v3716_v12 }
 0xbbe   :  { %v3717_v59 = vpop.f32.mrf.mxu1 }
 0xbc0   :  { %v3704_v34 = vpop.f32.mrf.mxu0 }
 0xbc1   :  { %3724 = vsyncpa [#allocation4], 1 }
 0xbc2   :  { %3725 = vsyncpa [#allocation6], 1 }
 0xbc3   :  { %3726 = vsyncpa [#allocation9], 1 }

</bundles_post_ra>
